<compile_context>
chip_gen: v6e
topology: v6e:2x2x1
jax: 0.10.0
libtpu: 0.0.40
codegen_flags: <defaults>
</compile_context>

<pallas_src>
import functools
import numpy as np
import jax
import jax.numpy as jnp
from jax import lax
from jax.experimental import pallas as pl
from jax.experimental.pallas import tpu as pltpu

# ---- config (cfg.*) -------------------------------------------------------
ASPP_OUTDIM = 128          # cfg.MODEL_ASPP_OUTDIM
NUM_CLASSES = 8            # cfg.MODEL_NUM_CLASSES
OUTPUT_STRIDE = 16         # cfg.MODEL_OUTPUT_STRIDE
RATE = 16 // OUTPUT_STRIDE # rate passed to ASPP
BN_EPS = 1e-5
HRNET_CHANNELS = 720       # fixed input_channel in the module
CPAD = 768                 # 720 padded to a multiple of 128 for clean MXU cadence


def _round_up(x, m):
    return (x + m - 1) // m * m


def _vmem_limit_bytes():
    """Generation-aware scoped VMEM limit (stays under 48 MiB on v7x)."""
    cap = 64 * 1024 * 1024
    try:
        cap = int(getattr(pltpu.get_tpu_info(), "vmem_capacity_bytes", cap))
    except Exception:
        pass
    return min(cap * 3 // 4, 96 * 1024 * 1024)


# ====================== backbone projection matmul =========================

def _dense_bias_relu_kernel(x_ref, w_ref, b_ref, o_ref):
    y = jnp.dot(x_ref[...], w_ref[...], preferred_element_type=jnp.float32)
    y = y + b_ref[...]
    o_ref[...] = jnp.maximum(y, 0.0).astype(o_ref.dtype)


def dense_bias_relu(x, w, b, *, out_dtype=jnp.bfloat16, tm=512):
    """x: [M, K]; w: [K, N]; b: [N]  ->  relu(x @ w + b): [M, N]."""
    M, K = int(x.shape[0]), int(x.shape[1])
    N = int(w.shape[1])
    TM = min(tm, _round_up(M, 8))
    M_pad = _round_up(M, TM)
    if M_pad != M:
        x = jnp.pad(x, ((0, M_pad - M), (0, 0)))
    out = pl.pallas_call(
        _dense_bias_relu_kernel,
        out_shape=jax.ShapeDtypeStruct((M_pad, N), out_dtype),
        grid_spec=pltpu.PrefetchScalarGridSpec(
            num_scalar_prefetch=0,
            grid=(M_pad // TM,),
            in_specs=[pl.BlockSpec((TM, K), lambda i: (i, 0)),
                      pl.BlockSpec((K, N), lambda i: (0, 0)),
                      pl.BlockSpec((1, N), lambda i: (0, 0))],
            out_specs=pl.BlockSpec((TM, N), lambda i: (i, 0)),
        ),
        compiler_params=pltpu.CompilerParams(
            dimension_semantics=("parallel",),
            vmem_limit_bytes=_vmem_limit_bytes()),
    )(x, w, b.reshape(1, N).astype(jnp.float32))
    return out[:M] if M_pad != M else out


# ================= fused ASPP (branches 1-5 + conv_cat) + cls_conv =========

def _aspp_cls_kernel(feat_ref, catshift_ref, wc_ref, wtap_ref, brs_ref, brt_ref,
                     wcat_ref, cats_ref, wcls1_ref, s1_ref, t1_ref,
                     wcls2_ref, b2_ref, o_ref, *, Hf, Wf, taps):
    D = ASPP_OUTDIM
    Cp = feat_ref.shape[-1]
    M = Hf * Wf
    x = feat_ref[0].reshape(M, Cp)                                   # bf16 [M, Cp]

    # branch1 (1x1) + center taps of branches 2/3/4 share the unshifted input:
    # one fused N=4*128 matmul.
    center = jnp.dot(x, wc_ref[...], preferred_element_type=jnp.float32)  # [M, 4D]
    accs = [center[:, i * D:(i + 1) * D] for i in range(4)]

    # Off-center dilated taps that statically overlap the feature map.
    # y[r,c] += x[r+oy, c+ox] @ W_tap (zero outside).  With spatial flattened
    # row-major this is a row shift by s = oy*Wf+ox (zero fill) plus a column
    # validity mask (catches the wrap across rows).  Taps fully inside the zero
    # halo were dropped at trace time in the wrapper.
    if taps:
        col = lax.broadcasted_iota(jnp.int32, (M, 1), 0) % Wf
    for k, (bi, oy, ox) in enumerate(taps):
        s = oy * Wf + ox
        if s > 0:
            xs = jnp.concatenate([x[s:], jnp.zeros((s, Cp), x.dtype)], axis=0)
        elif s < 0:
            xs = jnp.concatenate([jnp.zeros((-s, Cp), x.dtype), x[:s]], axis=0)
        else:
            xs = x
        part = jnp.dot(xs, wtap_ref[k], preferred_element_type=jnp.float32)
        valid = (col + ox >= 0) & (col + ox < Wf)
        accs[bi] = accs[bi] + jnp.where(valid, part, 0.0)

    # per-branch folded BN affine + ReLU
    brs = []
    for i in range(4):
        s_i = brs_ref[pl.ds(i, 1), :]
        t_i = brt_ref[pl.ds(i, 1), :]
        brs.append(jnp.maximum(accs[i] * s_i + t_i, 0.0).astype(jnp.bfloat16))

    # conv_cat: the 5-way concat is fused as 4 accumulated dots; the global
    # pool branch (branch5) is a per-batch constant folded into catshift_ref.
    acc_c = jnp.dot(brs[0], wcat_ref[0], preferred_element_type=jnp.float32)
    for i in range(1, 4):
        acc_c = acc_c + jnp.dot(brs[i], wcat_ref[i],
                                preferred_element_type=jnp.float32)
    cat = jnp.maximum(acc_c * cats_ref[...] + catshift_ref[0], 0.0)
    cat = cat.astype(jnp.bfloat16)

    # dropout1 is identity in eval mode; cls_conv = 1x1+BN+ReLU -> 1x1
    y = jnp.dot(cat, wcls1_ref[...], preferred_element_type=jnp.float32)
    y = jnp.maximum(y * s1_ref[...] + t1_ref[...], 0.0).astype(jnp.bfloat16)
    z = jnp.dot(y, wcls2_ref[...], preferred_element_type=jnp.float32) + b2_ref[...]
    o_ref[0] = z.reshape(Hf, Wf, NUM_CLASSES)


def aspp_cls_forward(feat, params):
    """feat: [B, Hf, Wf, CPAD] bf16  ->  low-res logits [B, Hf, Wf, NC] f32."""
    B, Hf, Wf, Cp = map(int, feat.shape)
    D = ASPP_OUTDIM
    pa, pc = params["aspp"], params["cls"]
    dils = (6 * RATE, 12 * RATE, 18 * RATE)

    def pad_k(w2d):
        return jnp.pad(w2d, ((0, Cp - int(w2d.shape[0])), (0, 0)))

    # fused center weight: [branch1 | b2 center | b3 center | b4 center]
    w1 = pa["branch1"]["w"].reshape(HRNET_CHANNELS, D)
    centers = [w1] + [pa[f"branch{i}"]["w"][1, 1] for i in (2, 3, 4)]
    w_center = jnp.concatenate([pad_k(w) for w in centers],
                               axis=1).astype(jnp.bfloat16)          # [Cp, 4D]

    # off-center taps that actually overlap the (Hf, Wf) map (trace-time skip)
    taps, tap_ws = [], []
    for bi, d in zip((1, 2, 3), dils):          # acc index 1..3 = branches 2..4
        for ky in range(3):
            for kx in range(3):
                if ky == 1 and kx == 1:
                    continue
                oy, ox = (ky - 1) * d, (kx - 1) * d
                if Hf - abs(oy) <= 0 or Wf - abs(ox) <= 0:
                    continue                     # reads only zero padding
                taps.append((bi, oy, ox))
                tap_ws.append(pad_k(pa[f"branch{bi + 1}"]["w"][ky, kx]))
    if tap_ws:
        w_taps = jnp.stack(tap_ws).astype(jnp.bfloat16)              # [n, Cp, D]
    else:
        w_taps = jnp.zeros((1, Cp, D), jnp.bfloat16)                 # never read
    n_taps = int(w_taps.shape[0])

    # folded BN affines for branches 1..4
    ss, ts = [], []
    for i in (1, 2, 3, 4):
        s, t = bn_fold(pa[f"branch{i}"])
        ss.append(s)
        ts.append(t)
    br_scale = jnp.stack(ss).astype(jnp.float32)                     # [4, D]
    br_shift = jnp.stack(ts).astype(jnp.float32)

    # branch5: global pool -> 1x1 -> BN -> ReLU (tiny [B,Cp]@[Cp,D], host jnp),
    # folded together with conv_cat's BN shift into one per-batch row.
    pooled = jnp.mean(feat.astype(jnp.float32), axis=(1, 2))         # [B, Cp]
    s5, t5 = bn_fold(pa["branch5"])
    w5 = pad_k(pa["branch5"]["w"].reshape(HRNET_CHANNELS, D)).astype(jnp.float32)
    g = jnp.maximum(pooled @ w5 * s5 + t5, 0.0)                      # [B, D]
    sc, tc = bn_fold(pa["conv_cat"])
    wcat_full = pa["conv_cat"]["w"].reshape(5 * D, D)
    cat_shift = (g @ wcat_full[4 * D:].astype(jnp.float32)) * sc + tc   # [B, D]
    cat_shift = cat_shift.reshape(B, 1, D).astype(jnp.float32)
    w_cat = wcat_full[:4 * D].reshape(4, D, D).astype(jnp.bfloat16)
    cat_scale = sc.reshape(1, D).astype(jnp.float32)

    s1, t1 = bn_fold(pc["cls1"])
    w_cls1 = pc["cls1"]["w"].reshape(D, D).astype(jnp.bfloat16)
    w_cls2 = pc["cls2"]["w"].reshape(D, NUM_CLASSES).astype(jnp.bfloat16)
    b_cls2 = pc["cls2"]["b"].reshape(1, NUM_CLASSES).astype(jnp.float32)

    kern = functools.partial(_aspp_cls_kernel, Hf=Hf, Wf=Wf, taps=tuple(taps))
    return pl.pallas_call(
        kern,
        out_shape=jax.ShapeDtypeStruct((B, Hf, Wf, NUM_CLASSES), jnp.float32),
        grid_spec=pltpu.PrefetchScalarGridSpec(
            num_scalar_prefetch=0,
            grid=(B,),
            in_specs=[
                pl.BlockSpec((1, Hf, Wf, Cp), lambda b: (b, 0, 0, 0)),   # feature
                pl.BlockSpec((1, 1, D), lambda b: (b, 0, 0)),            # cat shift
                pl.BlockSpec((Cp, 4 * D), lambda b: (0, 0)),             # center W
                pl.BlockSpec((n_taps, Cp, D), lambda b: (0, 0, 0)),      # tap W
                pl.BlockSpec((4, D), lambda b: (0, 0)),                  # br scale
                pl.BlockSpec((4, D), lambda b: (0, 0)),                  # br shift
                pl.BlockSpec((4, D, D), lambda b: (0, 0, 0)),            # conv_cat W
                pl.BlockSpec((1, D), lambda b: (0, 0)),                  # cat scale
                pl.BlockSpec((D, D), lambda b: (0, 0)),                  # cls1 W
                pl.BlockSpec((1, D), lambda b: (0, 0)),                  # cls1 scale
                pl.BlockSpec((1, D), lambda b: (0, 0)),                  # cls1 shift
                pl.BlockSpec((D, NUM_CLASSES), lambda b: (0, 0)),        # cls2 W
                pl.BlockSpec((1, NUM_CLASSES), lambda b: (0, 0)),        # cls2 b
            ],
            out_specs=pl.BlockSpec((1, Hf, Wf, NUM_CLASSES),
                                   lambda b: (b, 0, 0, 0)),
        ),
        compiler_params=pltpu.CompilerParams(
            dimension_semantics=("parallel",),
            vmem_limit_bytes=_vmem_limit_bytes()),
    )(feat, cat_shift, w_center, w_taps, br_scale, br_shift, w_cat, cat_scale,
      w_cls1, s1.reshape(1, D).astype(jnp.float32),
      t1.reshape(1, D).astype(jnp.float32), w_cls2, b_cls2)


# ======================= 4x bilinear upsample (NCHW) =======================

def _interp_matrix(n_in, n_out):
    """align_corners=True bilinear interpolation matrix [n_out, n_in]."""
    A = np.zeros((n_out, n_in), dtype=np.float32)
    if n_in == 1:
        A[:, 0] = 1.0
        return A
    for i in range(n_out):
        src = i * (n_in - 1) / (n_out - 1)
        lo = min(int(np.floor(src)), n_in - 2)
        frac = src - lo
        A[i, lo] += 1.0 - frac
        A[i, lo + 1] += frac
    return A


def _upsample4_kernel(z_ref, ah_ref, awt_ref, o_ref):
    zc = z_ref[0, 0]                                                  # (Hf, Wf)
    t = jnp.dot(ah_ref[...], zc, preferred_element_type=jnp.float32)  # (Ho, Wf)
    o_ref[0, 0] = jnp.dot(t, awt_ref[...],
                          preferred_element_type=jnp.float32)         # (Ho, Wo)


def upsample4_to_nchw(z_nchw):
    """nn.UpsamplingBilinear2d(scale_factor=4): per-(batch,channel) separable
    matmuls, output written directly in NCHW (no full-res transposes)."""
    B, C, Hf, Wf = map(int, z_nchw.shape)
    Ho, Wo = 4 * Hf, 4 * Wf
    ah = jnp.asarray(_interp_matrix(Hf, Ho), jnp.float32)             # (Ho, Hf)
    awt = jnp.asarray(np.ascontiguousarray(_interp_matrix(Wf, Wo).T),
                      jnp.float32)                                    # (Wf, Wo)
    return pl.pallas_call(
        _upsample4_kernel,
        out_shape=jax.ShapeDtypeStruct((B, C, Ho, Wo), jnp.float32),
        grid_spec=pltpu.PrefetchScalarGridSpec(
            num_scalar_prefetch=0,
            grid=(B, C),
            in_specs=[
                pl.BlockSpec((1, 1, Hf, Wf), lambda b, c: (b, c, 0, 0)),
                pl.BlockSpec((Ho, Hf), lambda b, c: (0, 0)),
                pl.BlockSpec((Wf, Wo), lambda b, c: (0, 0)),
            ],
            out_specs=pl.BlockSpec((1, 1, Ho, Wo), lambda b, c: (b, c, 0, 0)),
        ),
        compiler_params=pltpu.CompilerParams(
            dimension_semantics=("parallel", "parallel"),
            vmem_limit_bytes=_vmem_limit_bytes()),
    )(z_nchw, ah, awt)


# =========================== parameters ====================================

def conv_bn_params(key, cin, cout, k):
    """Conv2d (kaiming_normal_, fan_out, relu) + SyncBN (gamma=1, beta=0)."""
    kw, kb = jax.random.split(key)
    std = np.sqrt(2.0 / (cout * k * k))
    w = jax.random.normal(kw, (k, k, cin, cout), dtype=jnp.float32) * std
    bound = 1.0 / np.sqrt(cin * k * k)
    b = jax.random.uniform(kb, (cout,), minval=-bound, maxval=bound,
                           dtype=jnp.float32)
    return {"w": w, "b": b,
            "gamma": jnp.ones((cout,), jnp.float32),
            "beta": jnp.zeros((cout,), jnp.float32),
            "mean": jnp.zeros((cout,), jnp.float32),
            "var": jnp.ones((cout,), jnp.float32)}


def bn_fold(p):
    """Fold conv bias + eval-mode BN into a single affine (scale, shift)."""
    s = p["gamma"] / jnp.sqrt(p["var"] + BN_EPS)
    t = (p["b"] - p["mean"]) * s + p["beta"]
    return s, t


# =========================== model pieces ==================================

def backbone_standin(x_nchw, p):
    # TODO(synk): get_hrnet_basebone (full HRNetV2-W48) has no clean single-
    # kernel equivalent; stand-in is a deterministic stride-4 space-to-depth +
    # 1x1 conv projecting 3 -> 720 channels (output padded to 768 zero channels).
    B, C, H, W = map(int, x_nchw.shape)
    Hf, Wf = H // 4, W // 4
    x = jnp.transpose(x_nchw, (0, 2, 3, 1))                          # NHWC
    x = x.reshape(B, Hf, 4, Wf, 4, C).transpose(0, 1, 3, 2, 4, 5)
    x = x.reshape(B * Hf * Wf, 16 * C).astype(jnp.bfloat16)
    w = p["w"].reshape(16 * C, HRNET_CHANNELS)
    w = jnp.pad(w, ((0, 0), (0, CPAD - HRNET_CHANNELS))).astype(jnp.bfloat16)
    b = jnp.pad(p["b"], (0, CPAD - HRNET_CHANNELS))
    y = dense_bias_relu(x, w, b, out_dtype=jnp.bfloat16)
    return y.reshape(B, Hf, Wf, CPAD)


def deeplabv3plus_hr_forward(x_nchw, params):
    feat = backbone_standin(x_nchw, params["backbone"])   # [B, H/4, W/4, 768] bf16
    z = aspp_cls_forward(feat, params)                     # [B, H/4, W/4, NC] f32
    # tiny low-res layout change only (4 KB at demo size); the big upsampled
    # tensor is produced directly in NCHW by the upsample kernel.
    z_nchw = jnp.transpose(z, (0, 3, 1, 2))
    return upsample4_to_nchw(z_nchw)                       # [B, NC, H, W] f32


def init_params(key):
    ks = jax.random.split(key, 9)
    return {
        "backbone": conv_bn_params(ks[0], 48, HRNET_CHANNELS, 1),
        "aspp": {
            "branch1": conv_bn_params(ks[1], HRNET_CHANNELS, ASPP_OUTDIM, 1),
            "branch2": conv_bn_params(ks[2], HRNET_CHANNELS, ASPP_OUTDIM, 3),
            "branch3": conv_bn_params(ks[3], HRNET_CHANNELS, ASPP_OUTDIM, 3),
            "branch4": conv_bn_params(ks[4], HRNET_CHANNELS, ASPP_OUTDIM, 3),
            "branch5": conv_bn_params(ks[5], HRNET_CHANNELS, ASPP_OUTDIM, 1),
            "conv_cat": conv_bn_params(ks[6], ASPP_OUTDIM * 5, ASPP_OUTDIM, 1),
        },
        "cls": {
            "cls1": conv_bn_params(ks[7], ASPP_OUTDIM, ASPP_OUTDIM, 1),
            "cls2": conv_bn_params(ks[8], ASPP_OUTDIM, NUM_CLASSES, 1),
        },
    }


if __name__ == "__main__":
    key = jax.random.PRNGKey(0)
    k_x, k_p = jax.random.split(key)
    # input image (NCHW), 32x32 -> backbone stride-4 features 8x8x720(->768)
    x = jax.random.normal(k_x, (2, 3, 32, 32), dtype=jnp.float32)
    params = init_params(k_p)

    fwd = jax.jit(deeplabv3plus_hr_forward)
    out = jax.block_until_ready(fwd(x, params))

    assert out.shape == (2, NUM_CLASSES, 32, 32), out.shape
    assert out.dtype == jnp.float32
    assert bool(jnp.all(jnp.isfinite(out)))
    print("KERNEL_OK")
</pallas_src>

<mosaic_0001>
module attributes {stable_mosaic.version = 11 : i64} {
  func.func @_dense_bias_relu_kernel(%arg0: i32, %arg1: memref<128x48xbf16, #tpu.memory_space<vmem>>, %arg2: memref<48x768xbf16, #tpu.memory_space<vmem>>, %arg3: memref<1x768xf32, #tpu.memory_space<vmem>>, %arg4: memref<128x768xbf16, #tpu.memory_space<vmem>>) attributes {dimension_semantics = [#tpu.dimension_semantics<parallel>], iteration_bounds = array<i64: 1>, scalar_prefetch = 0 : i64, scratch_operands = 0 : i64, tpu.core_type = #tpu.core_type<tc>, window_params = [{transform_indices = @transform_0, window_bounds = array<i64: 128, 48>}, {pipeline_mode = #tpu.pipeline_mode<synchronous>, transform_indices = @transform_1, window_bounds = array<i64: 48, 768>}, {pipeline_mode = #tpu.pipeline_mode<synchronous>, transform_indices = @transform_2, window_bounds = array<i64: 1, 768>}, {transform_indices = @transform_3, window_bounds = array<i64: 128, 768>}]} {
    %c0 = arith.constant 0 : index
    %c0_0 = arith.constant 0 : index
    %0 = vector.load %arg1[%c0, %c0_0] : memref<128x48xbf16, #tpu.memory_space<vmem>>, vector<128x48xbf16>
    %c0_1 = arith.constant 0 : index
    %c0_2 = arith.constant 0 : index
    %1 = vector.load %arg2[%c0_1, %c0_2] : memref<48x768xbf16, #tpu.memory_space<vmem>>, vector<48x768xbf16>
    %cst = arith.constant dense<0.000000e+00> : vector<128x768xf32>
    %2 = tpu.matmul %0, %1, %cst {dimension_numbers = #tpu.dot_dimension_numbers<[1], [0], [0], [1], [0, 0, 1, 1], [], []>} : vector<128x48xbf16>, vector<48x768xbf16>, vector<128x768xf32> -> vector<128x768xf32>
    %c0_3 = arith.constant 0 : index
    %c0_4 = arith.constant 0 : index
    %3 = vector.load %arg3[%c0_3, %c0_4] : memref<1x768xf32, #tpu.memory_space<vmem>>, vector<1x768xf32>
    %4 = vector.broadcast %3 : vector<1x768xf32> to vector<128x768xf32>
    %5 = arith.addf %2, %4 : vector<128x768xf32>
    %cst_5 = arith.constant 0.000000e+00 : f32
    %6 = vector.broadcast %cst_5 : f32 to vector<128x768xf32>
    %7 = arith.maximumf %5, %6 : vector<128x768xf32>
    %8 = arith.truncf %7 : vector<128x768xf32> to vector<128x768xbf16>
    %c0_6 = arith.constant 0 : index
    %c0_7 = arith.constant 0 : index
    %9 = vector.load %arg4[%c0_6, %c0_7] : memref<128x768xbf16, #tpu.memory_space<vmem>>, vector<128x768xbf16>
    tpu.vector_store %arg4[%c0_6, %c0_7], %8 {strides = array<i32>} : memref<128x768xbf16, #tpu.memory_space<vmem>>, vector<128x768xbf16>,
    return
  }
  func.func @transform_0(%arg0: i32) -> (i32, i32) {
    %c0_i32 = arith.constant 0 : i32
    %c0_i32_0 = arith.constant 0 : i32
    return %arg0, %c0_i32 : i32, i32
  }
  func.func @transform_1(%arg0: i32) -> (i32, i32) {
    %c0_i32 = arith.constant 0 : i32
    %c0_i32_0 = arith.constant 0 : i32
    %c0_i32_1 = arith.constant 0 : i32
    return %c0_i32, %c0_i32_0 : i32, i32
  }
  func.func @transform_2(%arg0: i32) -> (i32, i32) {
    %c0_i32 = arith.constant 0 : i32
    %c0_i32_0 = arith.constant 0 : i32
    %c0_i32_1 = arith.constant 0 : i32
    return %c0_i32, %c0_i32_0 : i32, i32
  }
  func.func @transform_3(%arg0: i32) -> (i32, i32) {
    %c0_i32 = arith.constant 0 : i32
    %c0_i32_0 = arith.constant 0 : i32
    return %arg0, %c0_i32 : i32, i32
  }
}

module attributes {stable_mosaic.version = 11 : i64} {
  func.func @_aspp_cls_kernel(%arg0: i32, %arg1: memref<1x8x8x768xbf16, #tpu.memory_space<vmem>>, %arg2: memref<1x1x128xf32, #tpu.memory_space<vmem>>, %arg3: memref<768x512xbf16, #tpu.memory_space<vmem>>, %arg4: memref<8x768x128xbf16, #tpu.memory_space<vmem>>, %arg5: memref<4x128xf32, #tpu.memory_space<vmem>>, %arg6: memref<4x128xf32, #tpu.memory_space<vmem>>, %arg7: memref<4x128x128xbf16, #tpu.memory_space<vmem>>, %arg8: memref<1x128xf32, #tpu.memory_space<vmem>>, %arg9: memref<128x128xbf16, #tpu.memory_space<vmem>>, %arg10: memref<1x128xf32, #tpu.memory_space<vmem>>, %arg11: memref<1x128xf32, #tpu.memory_space<vmem>>, %arg12: memref<128x8xbf16, #tpu.memory_space<vmem>>, %arg13: memref<1x8xf32, #tpu.memory_space<vmem>>, %arg14: memref<1x8x8x8xf32, #tpu.memory_space<vmem>>) attributes {dimension_semantics = [#tpu.dimension_semantics<parallel>], iteration_bounds = array<i64: 2>, scalar_prefetch = 0 : i64, scratch_operands = 0 : i64, tpu.core_type = #tpu.core_type<tc>, window_params = [{transform_indices = @transform_0, window_bounds = array<i64: 1, 8, 8, 768>}, {transform_indices = @transform_1, window_bounds = array<i64: 1, 1, 128>}, {pipeline_mode = #tpu.pipeline_mode<synchronous>, transform_indices = @transform_2, window_bounds = array<i64: 768, 512>}, {pipeline_mode = #tpu.pipeline_mode<synchronous>, transform_indices = @transform_3, window_bounds = array<i64: 8, 768, 128>}, {pipeline_mode = #tpu.pipeline_mode<synchronous>, transform_indices = @transform_4, window_bounds = array<i64: 4, 128>}, {pipeline_mode = #tpu.pipeline_mode<synchronous>, transform_indices = @transform_5, window_bounds = array<i64: 4, 128>}, {pipeline_mode = #tpu.pipeline_mode<synchronous>, transform_indices = @transform_6, window_bounds = array<i64: 4, 128, 128>}, {pipeline_mode = #tpu.pipeline_mode<synchronous>, transform_indices = @transform_7, window_bounds = array<i64: 1, 128>}, {pipeline_mode = #tpu.pipeline_mode<synchronous>, transform_indices = @transform_8, window_bounds = array<i64: 128, 128>}, {pipeline_mode = #tpu.pipeline_mode<synchronous>, transform_indices = @transform_9, window_bounds = array<i64: 1, 128>}, {pipeline_mode = #tpu.pipeline_mode<synchronous>, transform_indices = @transform_10, window_bounds = array<i64: 1, 128>}, {pipeline_mode = #tpu.pipeline_mode<synchronous>, transform_indices = @transform_11, window_bounds = array<i64: 128, 8>}, {pipeline_mode = #tpu.pipeline_mode<synchronous>, transform_indices = @transform_12, window_bounds = array<i64: 1, 8>}, {transform_indices = @transform_13, window_bounds = array<i64: 1, 8, 8, 8>}]} {
    %c0 = arith.constant 0 : index
    %c0_0 = arith.constant 0 : index
    %c0_1 = arith.constant 0 : index
    %c0_2 = arith.constant 0 : index
    %0 = vector.load %arg1[%c0, %c0_0, %c0_1, %c0_2] : memref<1x8x8x768xbf16, #tpu.memory_space<vmem>>, vector<1x8x8x768xbf16>
    %1 = vector.shape_cast %0 : vector<1x8x8x768xbf16> to vector<8x8x768xbf16>
    %2 = vector.shape_cast %1 : vector<8x8x768xbf16> to vector<64x768xbf16>
    %c0_3 = arith.constant 0 : index
    %c0_4 = arith.constant 0 : index
    %3 = vector.load %arg3[%c0_3, %c0_4] : memref<768x512xbf16, #tpu.memory_space<vmem>>, vector<768x512xbf16>
    %cst = arith.constant dense<0.000000e+00> : vector<64x512xf32>
    %4 = tpu.matmul %2, %3, %cst {dimension_numbers = #tpu.dot_dimension_numbers<[1], [0], [0], [1], [0, 0, 1, 1], [], []>} : vector<64x768xbf16>, vector<768x512xbf16>, vector<64x512xf32> -> vector<64x512xf32>
    %5 = vector.extract_strided_slice %4 {offsets = [0, 0], sizes = [64, 128], strides = [1, 1]} : vector<64x512xf32> to vector<64x128xf32>
    %6 = vector.extract_strided_slice %4 {offsets = [0, 128], sizes = [64, 128], strides = [1, 1]} : vector<64x512xf32> to vector<64x128xf32>
    %7 = vector.extract_strided_slice %4 {offsets = [0, 256], sizes = [64, 128], strides = [1, 1]} : vector<64x512xf32> to vector<64x128xf32>
    %8 = vector.extract_strided_slice %4 {offsets = [0, 384], sizes = [64, 128], strides = [1, 1]} : vector<64x512xf32> to vector<64x128xf32>
    %9 = tpu.iota {dimensions = array<i32: 0>} : vector<64x1xi32>
    %c8_i32 = arith.constant 8 : i32
    %c0_i32 = arith.constant 0 : i32
    %10 = arith.cmpi eq, %c8_i32, %c0_i32 : i32
    %c1_i32 = arith.constant 1 : i32
    %11 = arith.select %10, %c1_i32, %c8_i32 : i32
    %12 = vector.broadcast %11 : i32 to vector<64x1xi32>
    %13 = arith.remsi %9, %12 : vector<64x1xi32>
    %c0_i32_5 = arith.constant 0 : i32
    %14 = vector.broadcast %c0_i32_5 : i32 to vector<64x1xi32>
    %15 = arith.cmpi ne, %13, %14 : vector<64x1xi32>
    %c0_i32_6 = arith.constant 0 : i32
    %16 = vector.broadcast %c0_i32_6 : i32 to vector<64x1xi32>
    %17 = arith.cmpi slt, %13, %16 : vector<64x1xi32>
    %c0_i32_7 = arith.constant 0 : i32
    %18 = arith.cmpi slt, %11, %c0_i32_7 : i32
    %19 = vector.broadcast %18 : i1 to vector<64x1xi1>
    %20 = vector.broadcast %19 : vector<64x1xi1> to vector<64x1xi1>
    %21 = arith.xori %17, %20 : vector<64x1xi1>
    %22 = arith.andi %21, %15 : vector<64x1xi1>
    %23 = vector.broadcast %11 : i32 to vector<64x1xi32>
    %24 = arith.addi %13, %23 : vector<64x1xi32>
    %25 = arith.select %22, %24, %13 : vector<64x1xi1>, vector<64x1xi32>
    %cst_8 = arith.constant 0.000000e+00 : bf16
    %26 = vector.broadcast %cst_8 : bf16 to vector<54x768xbf16>
    %27 = vector.extract_strided_slice %2 {offsets = [0, 0], sizes = [10, 768], strides = [1, 1]} : vector<64x768xbf16> to vector<10x768xbf16>
    %28 = tpu.concatenate %26, %27 in 0 : vector<54x768xbf16>, vector<10x768xbf16> -> vector<64x768xbf16>
    %c0_9 = arith.constant 0 : index
    %c0_10 = arith.constant 0 : index
    %c0_11 = arith.constant 0 : index
    %29 = vector.load %arg4[%c0_9, %c0_10, %c0_11] : memref<8x768x128xbf16, #tpu.memory_space<vmem>>, vector<1x768x128xbf16>
    %30 = vector.shape_cast %29 : vector<1x768x128xbf16> to vector<768x128xbf16>
    %cst_12 = arith.constant dense<0.000000e+00> : vector<64x128xf32>
    %31 = tpu.matmul %28, %30, %cst_12 {dimension_numbers = #tpu.dot_dimension_numbers<[1], [0], [0], [1], [0, 0, 1, 1], [], []>} : vector<64x768xbf16>, vector<768x128xbf16>, vector<64x128xf32> -> vector<64x128xf32>
    %c-6_i32 = arith.constant -6 : i32
    %32 = vector.broadcast %c-6_i32 : i32 to vector<64x1xi32>
    %33 = arith.addi %25, %32 : vector<64x1xi32>
    %c0_i32_13 = arith.constant 0 : i32
    %34 = vector.broadcast %c0_i32_13 : i32 to vector<64x1xi32>
    %35 = arith.cmpi sge, %33, %34 : vector<64x1xi32>
    %c-6_i32_14 = arith.constant -6 : i32
    %36 = vector.broadcast %c-6_i32_14 : i32 to vector<64x1xi32>
    %37 = arith.addi %25, %36 : vector<64x1xi32>
    %c8_i32_15 = arith.constant 8 : i32
    %38 = vector.broadcast %c8_i32_15 : i32 to vector<64x1xi32>
    %39 = arith.cmpi slt, %37, %38 : vector<64x1xi32>
    %40 = arith.andi %35, %39 : vector<64x1xi1>
    %cst_16 = arith.constant 0.000000e+00 : f32
    %41 = vector.shape_cast %40 : vector<64x1xi1> to vector<64x1xi1>
    %42 = vector.broadcast %41 : vector<64x1xi1> to vector<64x128xi1>
    %43 = vector.broadcast %cst_16 : f32 to vector<64x128xf32>
    %44 = arith.select %42, %31, %43 : vector<64x128xi1>, vector<64x128xf32>
    %45 = arith.addf %6, %44 : vector<64x128xf32>
    %cst_17 = arith.constant 0.000000e+00 : bf16
    %46 = vector.broadcast %cst_17 : bf16 to vector<48x768xbf16>
    %47 = vector.extract_strided_slice %2 {offsets = [0, 0], sizes = [16, 768], strides = [1, 1]} : vector<64x768xbf16> to vector<16x768xbf16>
    %48 = tpu.concatenate %46, %47 in 0 : vector<48x768xbf16>, vector<16x768xbf16> -> vector<64x768xbf16>
    %c1 = arith.constant 1 : index
    %c0_18 = arith.constant 0 : index
    %c0_19 = arith.constant 0 : index
    %49 = vector.load %arg4[%c1, %c0_18, %c0_19] : memref<8x768x128xbf16, #tpu.memory_space<vmem>>, vector<1x768x128xbf16>
    %50 = vector.shape_cast %49 : vector<1x768x128xbf16> to vector<768x128xbf16>
    %cst_20 = arith.constant dense<0.000000e+00> : vector<64x128xf32>
    %51 = tpu.matmul %48, %50, %cst_20 {dimension_numbers = #tpu.dot_dimension_numbers<[1], [0], [0], [1], [0, 0, 1, 1], [], []>} : vector<64x768xbf16>, vector<768x128xbf16>, vector<64x128xf32> -> vector<64x128xf32>
    %c0_i32_21 = arith.constant 0 : i32
    %52 = vector.broadcast %c0_i32_21 : i32 to vector<64x1xi32>
    %53 = arith.addi %25, %52 : vector<64x1xi32>
    %c0_i32_22 = arith.constant 0 : i32
    %54 = vector.broadcast %c0_i32_22 : i32 to vector<64x1xi32>
    %55 = arith.cmpi sge, %53, %54 : vector<64x1xi32>
    %c0_i32_23 = arith.constant 0 : i32
    %56 = vector.broadcast %c0_i32_23 : i32 to vector<64x1xi32>
    %57 = arith.addi %25, %56 : vector<64x1xi32>
    %c8_i32_24 = arith.constant 8 : i32
    %58 = vector.broadcast %c8_i32_24 : i32 to vector<64x1xi32>
    %59 = arith.cmpi slt, %57, %58 : vector<64x1xi32>
    %60 = arith.andi %55, %59 : vector<64x1xi1>
    %cst_25 = arith.constant 0.000000e+00 : f32
    %61 = vector.shape_cast %60 : vector<64x1xi1> to vector<64x1xi1>
    %62 = vector.broadcast %61 : vector<64x1xi1> to vector<64x128xi1>
    %63 = vector.broadcast %cst_25 : f32 to vector<64x128xf32>
    %64 = arith.select %62, %51, %63 : vector<64x128xi1>, vector<64x128xf32>
    %65 = arith.addf %45, %64 : vector<64x128xf32>
    %cst_26 = arith.constant 0.000000e+00 : bf16
    %66 = vector.broadcast %cst_26 : bf16 to vector<42x768xbf16>
    %67 = vector.extract_strided_slice %2 {offsets = [0, 0], sizes = [22, 768], strides = [1, 1]} : vector<64x768xbf16> to vector<22x768xbf16>
    %68 = tpu.concatenate %66, %67 in 0 : vector<42x768xbf16>, vector<22x768xbf16> -> vector<64x768xbf16>
    %c2 = arith.constant 2 : index
    %c0_27 = arith.constant 0 : index
    %c0_28 = arith.constant 0 : index
    %69 = vector.load %arg4[%c2, %c0_27, %c0_28] : memref<8x768x128xbf16, #tpu.memory_space<vmem>>, vector<1x768x128xbf16>
    %70 = vector.shape_cast %69 : vector<1x768x128xbf16> to vector<768x128xbf16>
    %cst_29 = arith.constant dense<0.000000e+00> : vector<64x128xf32>
    %71 = tpu.matmul %68, %70, %cst_29 {dimension_numbers = #tpu.dot_dimension_numbers<[1], [0], [0], [1], [0, 0, 1, 1], [], []>} : vector<64x768xbf16>, vector<768x128xbf16>, vector<64x128xf32> -> vector<64x128xf32>
    %c6_i32 = arith.constant 6 : i32
    %72 = vector.broadcast %c6_i32 : i32 to vector<64x1xi32>
    %73 = arith.addi %25, %72 : vector<64x1xi32>
    %c0_i32_30 = arith.constant 0 : i32
    %74 = vector.broadcast %c0_i32_30 : i32 to vector<64x1xi32>
    %75 = arith.cmpi sge, %73, %74 : vector<64x1xi32>
    %c6_i32_31 = arith.constant 6 : i32
    %76 = vector.broadcast %c6_i32_31 : i32 to vector<64x1xi32>
    %77 = arith.addi %25, %76 : vector<64x1xi32>
    %c8_i32_32 = arith.constant 8 : i32
    %78 = vector.broadcast %c8_i32_32 : i32 to vector<64x1xi32>
    %79 = arith.cmpi slt, %77, %78 : vector<64x1xi32>
    %80 = arith.andi %75, %79 : vector<64x1xi1>
    %cst_33 = arith.constant 0.000000e+00 : f32
    %81 = vector.shape_cast %80 : vector<64x1xi1> to vector<64x1xi1>
    %82 = vector.broadcast %81 : vector<64x1xi1> to vector<64x128xi1>
    %83 = vector.broadcast %cst_33 : f32 to vector<64x128xf32>
    %84 = arith.select %82, %71, %83 : vector<64x128xi1>, vector<64x128xf32>
    %85 = arith.addf %65, %84 : vector<64x128xf32>
    %cst_34 = arith.constant 0.000000e+00 : bf16
    %86 = vector.broadcast %cst_34 : bf16 to vector<6x768xbf16>
    %87 = vector.extract_strided_slice %2 {offsets = [0, 0], sizes = [58, 768], strides = [1, 1]} : vector<64x768xbf16> to vector<58x768xbf16>
    %88 = tpu.concatenate %86, %87 in 0 : vector<6x768xbf16>, vector<58x768xbf16> -> vector<64x768xbf16>
    %c3 = arith.constant 3 : index
    %c0_35 = arith.constant 0 : index
    %c0_36 = arith.constant 0 : index
    %89 = vector.load %arg4[%c3, %c0_35, %c0_36] : memref<8x768x128xbf16, #tpu.memory_space<vmem>>, vector<1x768x128xbf16>
    %90 = vector.shape_cast %89 : vector<1x768x128xbf16> to vector<768x128xbf16>
    %cst_37 = arith.constant dense<0.000000e+00> : vector<64x128xf32>
    %91 = tpu.matmul %88, %90, %cst_37 {dimension_numbers = #tpu.dot_dimension_numbers<[1], [0], [0], [1], [0, 0, 1, 1], [], []>} : vector<64x768xbf16>, vector<768x128xbf16>, vector<64x128xf32> -> vector<64x128xf32>
    %c-6_i32_38 = arith.constant -6 : i32
    %92 = vector.broadcast %c-6_i32_38 : i32 to vector<64x1xi32>
    %93 = arith.addi %25, %92 : vector<64x1xi32>
    %c0_i32_39 = arith.constant 0 : i32
    %94 = vector.broadcast %c0_i32_39 : i32 to vector<64x1xi32>
    %95 = arith.cmpi sge, %93, %94 : vector<64x1xi32>
    %c-6_i32_40 = arith.constant -6 : i32
    %96 = vector.broadcast %c-6_i32_40 : i32 to vector<64x1xi32>
    %97 = arith.addi %25, %96 : vector<64x1xi32>
    %c8_i32_41 = arith.constant 8 : i32
    %98 = vector.broadcast %c8_i32_41 : i32 to vector<64x1xi32>
    %99 = arith.cmpi slt, %97, %98 : vector<64x1xi32>
    %100 = arith.andi %95, %99 : vector<64x1xi1>
    %cst_42 = arith.constant 0.000000e+00 : f32
    %101 = vector.shape_cast %100 : vector<64x1xi1> to vector<64x1xi1>
    %102 = vector.broadcast %101 : vector<64x1xi1> to vector<64x128xi1>
    %103 = vector.broadcast %cst_42 : f32 to vector<64x128xf32>
    %104 = arith.select %102, %91, %103 : vector<64x128xi1>, vector<64x128xf32>
    %105 = arith.addf %85, %104 : vector<64x128xf32>
    %106 = vector.extract_strided_slice %2 {offsets = [6, 0], sizes = [58, 768], strides = [1, 1]} : vector<64x768xbf16> to vector<58x768xbf16>
    %cst_43 = arith.constant 0.000000e+00 : bf16
    %107 = vector.broadcast %cst_43 : bf16 to vector<6x768xbf16>
    %108 = tpu.concatenate %106, %107 in 0 : vector<58x768xbf16>, vector<6x768xbf16> -> vector<64x768xbf16>
    %c4 = arith.constant 4 : index
    %c0_44 = arith.constant 0 : index
    %c0_45 = arith.constant 0 : index
    %109 = vector.load %arg4[%c4, %c0_44, %c0_45] : memref<8x768x128xbf16, #tpu.memory_space<vmem>>, vector<1x768x128xbf16>
    %110 = vector.shape_cast %109 : vector<1x768x128xbf16> to vector<768x128xbf16>
    %cst_46 = arith.constant dense<0.000000e+00> : vector<64x128xf32>
    %111 = tpu.matmul %108, %110, %cst_46 {dimension_numbers = #tpu.dot_dimension_numbers<[1], [0], [0], [1], [0, 0, 1, 1], [], []>} : vector<64x768xbf16>, vector<768x128xbf16>, vector<64x128xf32> -> vector<64x128xf32>
    %c6_i32_47 = arith.constant 6 : i32
    %112 = vector.broadcast %c6_i32_47 : i32 to vector<64x1xi32>
    %113 = arith.addi %25, %112 : vector<64x1xi32>
    %c0_i32_48 = arith.constant 0 : i32
    %114 = vector.broadcast %c0_i32_48 : i32 to vector<64x1xi32>
    %115 = arith.cmpi sge, %113, %114 : vector<64x1xi32>
    %c6_i32_49 = arith.constant 6 : i32
    %116 = vector.broadcast %c6_i32_49 : i32 to vector<64x1xi32>
    %117 = arith.addi %25, %116 : vector<64x1xi32>
    %c8_i32_50 = arith.constant 8 : i32
    %118 = vector.broadcast %c8_i32_50 : i32 to vector<64x1xi32>
    %119 = arith.cmpi slt, %117, %118 : vector<64x1xi32>
    %120 = arith.andi %115, %119 : vector<64x1xi1>
    %cst_51 = arith.constant 0.000000e+00 : f32
    %121 = vector.shape_cast %120 : vector<64x1xi1> to vector<64x1xi1>
    %122 = vector.broadcast %121 : vector<64x1xi1> to vector<64x128xi1>
    %123 = vector.broadcast %cst_51 : f32 to vector<64x128xf32>
    %124 = arith.select %122, %111, %123 : vector<64x128xi1>, vector<64x128xf32>
    %125 = arith.addf %105, %124 : vector<64x128xf32>
    %126 = vector.extract_strided_slice %2 {offsets = [42, 0], sizes = [22, 768], strides = [1, 1]} : vector<64x768xbf16> to vector<22x768xbf16>
    %cst_52 = arith.constant 0.000000e+00 : bf16
    %127 = vector.broadcast %cst_52 : bf16 to vector<42x768xbf16>
    %128 = tpu.concatenate %126, %127 in 0 : vector<22x768xbf16>, vector<42x768xbf16> -> vector<64x768xbf16>
    %c5 = arith.constant 5 : index
    %c0_53 = arith.constant 0 : index
    %c0_54 = arith.constant 0 : index
    %129 = vector.load %arg4[%c5, %c0_53, %c0_54] : memref<8x768x128xbf16, #tpu.memory_space<vmem>>, vector<1x768x128xbf16>
    %130 = vector.shape_cast %129 : vector<1x768x128xbf16> to vector<768x128xbf16>
    %cst_55 = arith.constant dense<0.000000e+00> : vector<64x128xf32>
    %131 = tpu.matmul %128, %130, %cst_55 {dimension_numbers = #tpu.dot_dimension_numbers<[1], [0], [0], [1], [0, 0, 1, 1], [], []>} : vector<64x768xbf16>, vector<768x128xbf16>, vector<64x128xf32> -> vector<64x128xf32>
    %c-6_i32_56 = arith.constant -6 : i32
    %132 = vector.broadcast %c-6_i32_56 : i32 to vector<64x1xi32>
    %133 = arith.addi %25, %132 : vector<64x1xi32>
    %c0_i32_57 = arith.constant 0 : i32
    %134 = vector.broadcast %c0_i32_57 : i32 to vector<64x1xi32>
    %135 = arith.cmpi sge, %133, %134 : vector<64x1xi32>
    %c-6_i32_58 = arith.constant -6 : i32
    %136 = vector.broadcast %c-6_i32_58 : i32 to vector<64x1xi32>
    %137 = arith.addi %25, %136 : vector<64x1xi32>
    %c8_i32_59 = arith.constant 8 : i32
    %138 = vector.broadcast %c8_i32_59 : i32 to vector<64x1xi32>
    %139 = arith.cmpi slt, %137, %138 : vector<64x1xi32>
    %140 = arith.andi %135, %139 : vector<64x1xi1>
    %cst_60 = arith.constant 0.000000e+00 : f32
    %141 = vector.shape_cast %140 : vector<64x1xi1> to vector<64x1xi1>
    %142 = vector.broadcast %141 : vector<64x1xi1> to vector<64x128xi1>
    %143 = vector.broadcast %cst_60 : f32 to vector<64x128xf32>
    %144 = arith.select %142, %131, %143 : vector<64x128xi1>, vector<64x128xf32>
    %145 = arith.addf %125, %144 : vector<64x128xf32>
    %146 = vector.extract_strided_slice %2 {offsets = [48, 0], sizes = [16, 768], strides = [1, 1]} : vector<64x768xbf16> to vector<16x768xbf16>
    %cst_61 = arith.constant 0.000000e+00 : bf16
    %147 = vector.broadcast %cst_61 : bf16 to vector<48x768xbf16>
    %148 = tpu.concatenate %146, %147 in 0 : vector<16x768xbf16>, vector<48x768xbf16> -> vector<64x768xbf16>
    %c6 = arith.constant 6 : index
    %c0_62 = arith.constant 0 : index
    %c0_63 = arith.constant 0 : index
    %149 = vector.load %arg4[%c6, %c0_62, %c0_63] : memref<8x768x128xbf16, #tpu.memory_space<vmem>>, vector<1x768x128xbf16>
    %150 = vector.shape_cast %149 : vector<1x768x128xbf16> to vector<768x128xbf16>
    %cst_64 = arith.constant dense<0.000000e+00> : vector<64x128xf32>
    %151 = tpu.matmul %148, %150, %cst_64 {dimension_numbers = #tpu.dot_dimension_numbers<[1], [0], [0], [1], [0, 0, 1, 1], [], []>} : vector<64x768xbf16>, vector<768x128xbf16>, vector<64x128xf32> -> vector<64x128xf32>
    %c0_i32_65 = arith.constant 0 : i32
    %152 = vector.broadcast %c0_i32_65 : i32 to vector<64x1xi32>
    %153 = arith.addi %25, %152 : vector<64x1xi32>
    %c0_i32_66 = arith.constant 0 : i32
    %154 = vector.broadcast %c0_i32_66 : i32 to vector<64x1xi32>
    %155 = arith.cmpi sge, %153, %154 : vector<64x1xi32>
    %c0_i32_67 = arith.constant 0 : i32
    %156 = vector.broadcast %c0_i32_67 : i32 to vector<64x1xi32>
    %157 = arith.addi %25, %156 : vector<64x1xi32>
    %c8_i32_68 = arith.constant 8 : i32
    %158 = vector.broadcast %c8_i32_68 : i32 to vector<64x1xi32>
    %159 = arith.cmpi slt, %157, %158 : vector<64x1xi32>
    %160 = arith.andi %155, %159 : vector<64x1xi1>
    %cst_69 = arith.constant 0.000000e+00 : f32
    %161 = vector.shape_cast %160 : vector<64x1xi1> to vector<64x1xi1>
    %162 = vector.broadcast %161 : vector<64x1xi1> to vector<64x128xi1>
    %163 = vector.broadcast %cst_69 : f32 to vector<64x128xf32>
    %164 = arith.select %162, %151, %163 : vector<64x128xi1>, vector<64x128xf32>
    %165 = arith.addf %145, %164 : vector<64x128xf32>
    %166 = vector.extract_strided_slice %2 {offsets = [54, 0], sizes = [10, 768], strides = [1, 1]} : vector<64x768xbf16> to vector<10x768xbf16>
    %cst_70 = arith.constant 0.000000e+00 : bf16
    %167 = vector.broadcast %cst_70 : bf16 to vector<54x768xbf16>
    %168 = tpu.concatenate %166, %167 in 0 : vector<10x768xbf16>, vector<54x768xbf16> -> vector<64x768xbf16>
    %c7 = arith.constant 7 : index
    %c0_71 = arith.constant 0 : index
    %c0_72 = arith.constant 0 : index
    %169 = vector.load %arg4[%c7, %c0_71, %c0_72] : memref<8x768x128xbf16, #tpu.memory_space<vmem>>, vector<1x768x128xbf16>
    %170 = vector.shape_cast %169 : vector<1x768x128xbf16> to vector<768x128xbf16>
    %cst_73 = arith.constant dense<0.000000e+00> : vector<64x128xf32>
    %171 = tpu.matmul %168, %170, %cst_73 {dimension_numbers = #tpu.dot_dimension_numbers<[1], [0], [0], [1], [0, 0, 1, 1], [], []>} : vector<64x768xbf16>, vector<768x128xbf16>, vector<64x128xf32> -> vector<64x128xf32>
    %c6_i32_74 = arith.constant 6 : i32
    %172 = vector.broadcast %c6_i32_74 : i32 to vector<64x1xi32>
    %173 = arith.addi %25, %172 : vector<64x1xi32>
    %c0_i32_75 = arith.constant 0 : i32
    %174 = vector.broadcast %c0_i32_75 : i32 to vector<64x1xi32>
    %175 = arith.cmpi sge, %173, %174 : vector<64x1xi32>
    %c6_i32_76 = arith.constant 6 : i32
    %176 = vector.broadcast %c6_i32_76 : i32 to vector<64x1xi32>
    %177 = arith.addi %25, %176 : vector<64x1xi32>
    %c8_i32_77 = arith.constant 8 : i32
    %178 = vector.broadcast %c8_i32_77 : i32 to vector<64x1xi32>
    %179 = arith.cmpi slt, %177, %178 : vector<64x1xi32>
    %180 = arith.andi %175, %179 : vector<64x1xi1>
    %cst_78 = arith.constant 0.000000e+00 : f32
    %181 = vector.shape_cast %180 : vector<64x1xi1> to vector<64x1xi1>
    %182 = vector.broadcast %181 : vector<64x1xi1> to vector<64x128xi1>
    %183 = vector.broadcast %cst_78 : f32 to vector<64x128xf32>
    %184 = arith.select %182, %171, %183 : vector<64x128xi1>, vector<64x128xf32>
    %185 = arith.addf %165, %184 : vector<64x128xf32>
    %c0_79 = arith.constant 0 : index
    %c0_80 = arith.constant 0 : index
    %186 = vector.load %arg5[%c0_79, %c0_80] : memref<4x128xf32, #tpu.memory_space<vmem>>, vector<1x128xf32>
    %c0_81 = arith.constant 0 : index
    %c0_82 = arith.constant 0 : index
    %187 = vector.load %arg6[%c0_81, %c0_82] : memref<4x128xf32, #tpu.memory_space<vmem>>, vector<1x128xf32>
    %188 = vector.broadcast %186 : vector<1x128xf32> to vector<64x128xf32>
    %189 = arith.mulf %5, %188 : vector<64x128xf32>
    %190 = vector.broadcast %187 : vector<1x128xf32> to vector<64x128xf32>
    %191 = arith.addf %189, %190 : vector<64x128xf32>
    %cst_83 = arith.constant 0.000000e+00 : f32
    %192 = vector.broadcast %cst_83 : f32 to vector<64x128xf32>
    %193 = arith.maximumf %191, %192 : vector<64x128xf32>
    %194 = arith.truncf %193 : vector<64x128xf32> to vector<64x128xbf16>
    %c1_84 = arith.constant 1 : index
    %c0_85 = arith.constant 0 : index
    %195 = vector.load %arg5[%c1_84, %c0_85] : memref<4x128xf32, #tpu.memory_space<vmem>>, vector<1x128xf32>
    %c1_86 = arith.constant 1 : index
    %c0_87 = arith.constant 0 : index
    %196 = vector.load %arg6[%c1_86, %c0_87] : memref<4x128xf32, #tpu.memory_space<vmem>>, vector<1x128xf32>
    %197 = vector.broadcast %195 : vector<1x128xf32> to vector<64x128xf32>
    %198 = arith.mulf %185, %197 : vector<64x128xf32>
    %199 = vector.broadcast %196 : vector<1x128xf32> to vector<64x128xf32>
    %200 = arith.addf %198, %199 : vector<64x128xf32>
    %cst_88 = arith.constant 0.000000e+00 : f32
    %201 = vector.broadcast %cst_88 : f32 to vector<64x128xf32>
    %202 = arith.maximumf %200, %201 : vector<64x128xf32>
    %203 = arith.truncf %202 : vector<64x128xf32> to vector<64x128xbf16>
    %c2_89 = arith.constant 2 : index
    %c0_90 = arith.constant 0 : index
    %204 = vector.load %arg5[%c2_89, %c0_90] : memref<4x128xf32, #tpu.memory_space<vmem>>, vector<1x128xf32>
    %c2_91 = arith.constant 2 : index
    %c0_92 = arith.constant 0 : index
    %205 = vector.load %arg6[%c2_91, %c0_92] : memref<4x128xf32, #tpu.memory_space<vmem>>, vector<1x128xf32>
    %206 = vector.broadcast %204 : vector<1x128xf32> to vector<64x128xf32>
    %207 = arith.mulf %7, %206 : vector<64x128xf32>
    %208 = vector.broadcast %205 : vector<1x128xf32> to vector<64x128xf32>
    %209 = arith.addf %207, %208 : vector<64x128xf32>
    %cst_93 = arith.constant 0.000000e+00 : f32
    %210 = vector.broadcast %cst_93 : f32 to vector<64x128xf32>
    %211 = arith.maximumf %209, %210 : vector<64x128xf32>
    %212 = arith.truncf %211 : vector<64x128xf32> to vector<64x128xbf16>
    %c3_94 = arith.constant 3 : index
    %c0_95 = arith.constant 0 : index
    %213 = vector.load %arg5[%c3_94, %c0_95] : memref<4x128xf32, #tpu.memory_space<vmem>>, vector<1x128xf32>
    %c3_96 = arith.constant 3 : index
    %c0_97 = arith.constant 0 : index
    %214 = vector.load %arg6[%c3_96, %c0_97] : memref<4x128xf32, #tpu.memory_space<vmem>>, vector<1x128xf32>
    %215 = vector.broadcast %213 : vector<1x128xf32> to vector<64x128xf32>
    %216 = arith.mulf %8, %215 : vector<64x128xf32>
    %217 = vector.broadcast %214 : vector<1x128xf32> to vector<64x128xf32>
    %218 = arith.addf %216, %217 : vector<64x128xf32>
    %cst_98 = arith.constant 0.000000e+00 : f32
    %219 = vector.broadcast %cst_98 : f32 to vector<64x128xf32>
    %220 = arith.maximumf %218, %219 : vector<64x128xf32>
    %221 = arith.truncf %220 : vector<64x128xf32> to vector<64x128xbf16>
    %c0_99 = arith.constant 0 : index
    %c0_100 = arith.constant 0 : index
    %c0_101 = arith.constant 0 : index
    %222 = vector.load %arg7[%c0_99, %c0_100, %c0_101] : memref<4x128x128xbf16, #tpu.memory_space<vmem>>, vector<1x128x128xbf16>
    %223 = vector.shape_cast %222 : vector<1x128x128xbf16> to vector<128x128xbf16>
    %cst_102 = arith.constant dense<0.000000e+00> : vector<64x128xf32>
    %224 = tpu.matmul %194, %223, %cst_102 {dimension_numbers = #tpu.dot_dimension_numbers<[1], [0], [0], [1], [0, 0, 1, 1], [], []>} : vector<64x128xbf16>, vector<128x128xbf16>, vector<64x128xf32> -> vector<64x128xf32>
    %c1_103 = arith.constant 1 : index
    %c0_104 = arith.constant 0 : index
    %c0_105 = arith.constant 0 : index
    %225 = vector.load %arg7[%c1_103, %c0_104, %c0_105] : memref<4x128x128xbf16, #tpu.memory_space<vmem>>, vector<1x128x128xbf16>
    %226 = vector.shape_cast %225 : vector<1x128x128xbf16> to vector<128x128xbf16>
    %cst_106 = arith.constant dense<0.000000e+00> : vector<64x128xf32>
    %227 = tpu.matmul %203, %226, %cst_106 {dimension_numbers = #tpu.dot_dimension_numbers<[1], [0], [0], [1], [0, 0, 1, 1], [], []>} : vector<64x128xbf16>, vector<128x128xbf16>, vector<64x128xf32> -> vector<64x128xf32>
    %228 = arith.addf %224, %227 : vector<64x128xf32>
    %c2_107 = arith.constant 2 : index
    %c0_108 = arith.constant 0 : index
    %c0_109 = arith.constant 0 : index
    %229 = vector.load %arg7[%c2_107, %c0_108, %c0_109] : memref<4x128x128xbf16, #tpu.memory_space<vmem>>, vector<1x128x128xbf16>
    %230 = vector.shape_cast %229 : vector<1x128x128xbf16> to vector<128x128xbf16>
    %cst_110 = arith.constant dense<0.000000e+00> : vector<64x128xf32>
    %231 = tpu.matmul %212, %230, %cst_110 {dimension_numbers = #tpu.dot_dimension_numbers<[1], [0], [0], [1], [0, 0, 1, 1], [], []>} : vector<64x128xbf16>, vector<128x128xbf16>, vector<64x128xf32> -> vector<64x128xf32>
    %232 = arith.addf %228, %231 : vector<64x128xf32>
    %c3_111 = arith.constant 3 : index
    %c0_112 = arith.constant 0 : index
    %c0_113 = arith.constant 0 : index
    %233 = vector.load %arg7[%c3_111, %c0_112, %c0_113] : memref<4x128x128xbf16, #tpu.memory_space<vmem>>, vector<1x128x128xbf16>
    %234 = vector.shape_cast %233 : vector<1x128x128xbf16> to vector<128x128xbf16>
    %cst_114 = arith.constant dense<0.000000e+00> : vector<64x128xf32>
    %235 = tpu.matmul %221, %234, %cst_114 {dimension_numbers = #tpu.dot_dimension_numbers<[1], [0], [0], [1], [0, 0, 1, 1], [], []>} : vector<64x128xbf16>, vector<128x128xbf16>, vector<64x128xf32> -> vector<64x128xf32>
    %236 = arith.addf %232, %235 : vector<64x128xf32>
    %c0_115 = arith.constant 0 : index
    %c0_116 = arith.constant 0 : index
    %237 = vector.load %arg8[%c0_115, %c0_116] : memref<1x128xf32, #tpu.memory_space<vmem>>, vector<1x128xf32>
    %238 = vector.broadcast %237 : vector<1x128xf32> to vector<64x128xf32>
    %239 = arith.mulf %236, %238 : vector<64x128xf32>
    %c0_117 = arith.constant 0 : index
    %c0_118 = arith.constant 0 : index
    %c0_119 = arith.constant 0 : index
    %240 = vector.load %arg2[%c0_117, %c0_118, %c0_119] : memref<1x1x128xf32, #tpu.memory_space<vmem>>, vector<1x1x128xf32>
    %241 = vector.shape_cast %240 : vector<1x1x128xf32> to vector<1x128xf32>
    %242 = vector.broadcast %241 : vector<1x128xf32> to vector<64x128xf32>
    %243 = arith.addf %239, %242 : vector<64x128xf32>
    %cst_120 = arith.constant 0.000000e+00 : f32
    %244 = vector.broadcast %cst_120 : f32 to vector<64x128xf32>
    %245 = arith.maximumf %243, %244 : vector<64x128xf32>
    %246 = arith.truncf %245 : vector<64x128xf32> to vector<64x128xbf16>
    %c0_121 = arith.constant 0 : index
    %c0_122 = arith.constant 0 : index
    %247 = vector.load %arg9[%c0_121, %c0_122] : memref<128x128xbf16, #tpu.memory_space<vmem>>, vector<128x128xbf16>
    %cst_123 = arith.constant dense<0.000000e+00> : vector<64x128xf32>
    %248 = tpu.matmul %246, %247, %cst_123 {dimension_numbers = #tpu.dot_dimension_numbers<[1], [0], [0], [1], [0, 0, 1, 1], [], []>} : vector<64x128xbf16>, vector<128x128xbf16>, vector<64x128xf32> -> vector<64x128xf32>
    %c0_124 = arith.constant 0 : index
    %c0_125 = arith.constant 0 : index
    %249 = vector.load %arg10[%c0_124, %c0_125] : memref<1x128xf32, #tpu.memory_space<vmem>>, vector<1x128xf32>
    %250 = vector.broadcast %249 : vector<1x128xf32> to vector<64x128xf32>
    %251 = arith.mulf %248, %250 : vector<64x128xf32>
    %c0_126 = arith.constant 0 : index
    %c0_127 = arith.constant 0 : index
    %252 = vector.load %arg11[%c0_126, %c0_127] : memref<1x128xf32, #tpu.memory_space<vmem>>, vector<1x128xf32>
    %253 = vector.broadcast %252 : vector<1x128xf32> to vector<64x128xf32>
    %254 = arith.addf %251, %253 : vector<64x128xf32>
    %cst_128 = arith.constant 0.000000e+00 : f32
    %255 = vector.broadcast %cst_128 : f32 to vector<64x128xf32>
    %256 = arith.maximumf %254, %255 : vector<64x128xf32>
    %257 = arith.truncf %256 : vector<64x128xf32> to vector<64x128xbf16>
    %c0_129 = arith.constant 0 : index
    %c0_130 = arith.constant 0 : index
    %258 = vector.load %arg12[%c0_129, %c0_130] : memref<128x8xbf16, #tpu.memory_space<vmem>>, vector<128x8xbf16>
    %cst_131 = arith.constant dense<0.000000e+00> : vector<64x8xf32>
    %259 = tpu.matmul %257, %258, %cst_131 {dimension_numbers = #tpu.dot_dimension_numbers<[1], [0], [0], [1], [0, 0, 1, 1], [], []>} : vector<64x128xbf16>, vector<128x8xbf16>, vector<64x8xf32> -> vector<64x8xf32>
    %c0_132 = arith.constant 0 : index
    %c0_133 = arith.constant 0 : index
    %260 = vector.load %arg13[%c0_132, %c0_133] : memref<1x8xf32, #tpu.memory_space<vmem>>, vector<1x8xf32>
    %261 = vector.broadcast %260 : vector<1x8xf32> to vector<64x8xf32>
    %262 = arith.addf %259, %261 : vector<64x8xf32>
    %263 = vector.shape_cast %262 : vector<64x8xf32> to vector<8x8x8xf32>
    %c0_134 = arith.constant 0 : index
    %c0_135 = arith.constant 0 : index
    %c0_136 = arith.constant 0 : index
    %c0_137 = arith.constant 0 : index
    %264 = vector.load %arg14[%c0_134, %c0_135, %c0_136, %c0_137] : memref<1x8x8x8xf32, #tpu.memory_space<vmem>>, vector<1x8x8x8xf32>
    %265 = vector.shape_cast %264 : vector<1x8x8x8xf32> to vector<8x8x8xf32>
    %266 = vector.shape_cast %263 : vector<8x8x8xf32> to vector<1x8x8x8xf32>
    tpu.vector_store %arg14[%c0_134, %c0_135, %c0_136, %c0_137], %266 {strides = array<i32>} : memref<1x8x8x8xf32, #tpu.memory_space<vmem>>, vector<1x8x8x8xf32>,
    return
  }
  func.func @transform_0(%arg0: i32) -> (i32, i32, i32, i32) {
    %c0_i32 = arith.constant 0 : i32
    %c0_i32_0 = arith.constant 0 : i32
    %c0_i32_1 = arith.constant 0 : i32
    %c0_i32_2 = arith.constant 0 : i32
    return %arg0, %c0_i32, %c0_i32_0, %c0_i32_1 : i32, i32, i32, i32
  }
  func.func @transform_1(%arg0: i32) -> (i32, i32, i32) {
    %c0_i32 = arith.constant 0 : i32
    %c0_i32_0 = arith.constant 0 : i32
    %c0_i32_1 = arith.constant 0 : i32
    return %arg0, %c0_i32, %c0_i32_0 : i32, i32, i32
  }
  func.func @transform_2(%arg0: i32) -> (i32, i32) {
    %c0_i32 = arith.constant 0 : i32
    %c0_i32_0 = arith.constant 0 : i32
    %c0_i32_1 = arith.constant 0 : i32
    return %c0_i32, %c0_i32_0 : i32, i32
  }
  func.func @transform_3(%arg0: i32) -> (i32, i32, i32) {
    %c0_i32 = arith.constant 0 : i32
    %c0_i32_0 = arith.constant 0 : i32
    %c0_i32_1 = arith.constant 0 : i32
    %c0_i32_2 = arith.constant 0 : i32
    return %c0_i32, %c0_i32_0, %c0_i32_1 : i32, i32, i32
  }
  func.func @transform_4(%arg0: i32) -> (i32, i32) {
    %c0_i32 = arith.constant 0 : i32
    %c0_i32_0 = arith.constant 0 : i32
    %c0_i32_1 = arith.constant 0 : i32
    return %c0_i32, %c0_i32_0 : i32, i32
  }
  func.func @transform_5(%arg0: i32) -> (i32, i32) {
    %c0_i32 = arith.constant 0 : i32
    %c0_i32_0 = arith.constant 0 : i32
    %c0_i32_1 = arith.constant 0 : i32
    return %c0_i32, %c0_i32_0 : i32, i32
  }
  func.func @transform_6(%arg0: i32) -> (i32, i32, i32) {
    %c0_i32 = arith.constant 0 : i32
    %c0_i32_0 = arith.constant 0 : i32
    %c0_i32_1 = arith.constant 0 : i32
    %c0_i32_2 = arith.constant 0 : i32
    return %c0_i32, %c0_i32_0, %c0_i32_1 : i32, i32, i32
  }
  func.func @transform_7(%arg0: i32) -> (i32, i32) {
    %c0_i32 = arith.constant 0 : i32
    %c0_i32_0 = arith.constant 0 : i32
    %c0_i32_1 = arith.constant 0 : i32
    return %c0_i32, %c0_i32_0 : i32, i32
  }
  func.func @transform_8(%arg0: i32) -> (i32, i32) {
    %c0_i32 = arith.constant 0 : i32
    %c0_i32_0 = arith.constant 0 : i32
    %c0_i32_1 = arith.constant 0 : i32
    return %c0_i32, %c0_i32_0 : i32, i32
  }
  func.func @transform_9(%arg0: i32) -> (i32, i32) {
    %c0_i32 = arith.constant 0 : i32
    %c0_i32_0 = arith.constant 0 : i32
    %c0_i32_1 = arith.constant 0 : i32
    return %c0_i32, %c0_i32_0 : i32, i32
  }
  func.func @transform_10(%arg0: i32) -> (i32, i32) {
    %c0_i32 = arith.constant 0 : i32
    %c0_i32_0 = arith.constant 0 : i32
    %c0_i32_1 = arith.constant 0 : i32
    return %c0_i32, %c0_i32_0 : i32, i32
  }
  func.func @transform_11(%arg0: i32) -> (i32, i32) {
    %c0_i32 = arith.constant 0 : i32
    %c0_i32_0 = arith.constant 0 : i32
    %c0_i32_1 = arith.constant 0 : i32
    return %c0_i32, %c0_i32_0 : i32, i32
  }
  func.func @transform_12(%arg0: i32) -> (i32, i32) {
    %c0_i32 = arith.constant 0 : i32
    %c0_i32_0 = arith.constant 0 : i32
    %c0_i32_1 = arith.constant 0 : i32
    return %c0_i32, %c0_i32_0 : i32, i32
  }
  func.func @transform_13(%arg0: i32) -> (i32, i32, i32, i32) {
    %c0_i32 = arith.constant 0 : i32
    %c0_i32_0 = arith.constant 0 : i32
    %c0_i32_1 = arith.constant 0 : i32
    %c0_i32_2 = arith.constant 0 : i32
    return %arg0, %c0_i32, %c0_i32_0, %c0_i32_1 : i32, i32, i32, i32
  }
}

module attributes {stable_mosaic.version = 11 : i64} {
  func.func @_upsample4_kernel(%arg0: i32, %arg1: i32, %arg2: memref<1x1x8x8xf32, #tpu.memory_space<vmem>>, %arg3: memref<32x8xf32, #tpu.memory_space<vmem>>, %arg4: memref<8x32xf32, #tpu.memory_space<vmem>>, %arg5: memref<1x1x32x32xf32, #tpu.memory_space<vmem>>) attributes {dimension_semantics = [#tpu.dimension_semantics<parallel>, #tpu.dimension_semantics<parallel>], iteration_bounds = array<i64: 2, 8>, scalar_prefetch = 0 : i64, scratch_operands = 0 : i64, tpu.core_type = #tpu.core_type<tc>, window_params = [{transform_indices = @transform_0, window_bounds = array<i64: 1, 1, 8, 8>}, {pipeline_mode = #tpu.pipeline_mode<synchronous>, transform_indices = @transform_1, window_bounds = array<i64: 32, 8>}, {pipeline_mode = #tpu.pipeline_mode<synchronous>, transform_indices = @transform_2, window_bounds = array<i64: 8, 32>}, {transform_indices = @transform_3, window_bounds = array<i64: 1, 1, 32, 32>}]} {
    %c0 = arith.constant 0 : index
    %c0_0 = arith.constant 0 : index
    %c0_1 = arith.constant 0 : index
    %c0_2 = arith.constant 0 : index
    %0 = vector.load %arg2[%c0, %c0_0, %c0_1, %c0_2] : memref<1x1x8x8xf32, #tpu.memory_space<vmem>>, vector<1x1x8x8xf32>
    %1 = vector.shape_cast %0 : vector<1x1x8x8xf32> to vector<8x8xf32>
    %c0_3 = arith.constant 0 : index
    %c0_4 = arith.constant 0 : index
    %2 = vector.load %arg3[%c0_3, %c0_4] : memref<32x8xf32, #tpu.memory_space<vmem>>, vector<32x8xf32>
    %cst = arith.constant dense<0.000000e+00> : vector<32x8xf32>
    %3 = tpu.matmul %2, %1, %cst {dimension_numbers = #tpu.dot_dimension_numbers<[1], [0], [0], [1], [0, 0, 1, 1], [], []>} : vector<32x8xf32>, vector<8x8xf32>, vector<32x8xf32> -> vector<32x8xf32>
    %c0_5 = arith.constant 0 : index
    %c0_6 = arith.constant 0 : index
    %4 = vector.load %arg4[%c0_5, %c0_6] : memref<8x32xf32, #tpu.memory_space<vmem>>, vector<8x32xf32>
    %cst_7 = arith.constant dense<0.000000e+00> : vector<32x32xf32>
    %5 = tpu.matmul %3, %4, %cst_7 {dimension_numbers = #tpu.dot_dimension_numbers<[1], [0], [0], [1], [0, 0, 1, 1], [], []>} : vector<32x8xf32>, vector<8x32xf32>, vector<32x32xf32> -> vector<32x32xf32>
    %c0_8 = arith.constant 0 : index
    %c0_9 = arith.constant 0 : index
    %c0_10 = arith.constant 0 : index
    %c0_11 = arith.constant 0 : index
    %6 = vector.load %arg5[%c0_8, %c0_9, %c0_10, %c0_11] : memref<1x1x32x32xf32, #tpu.memory_space<vmem>>, vector<1x1x32x32xf32>
    %7 = vector.shape_cast %6 : vector<1x1x32x32xf32> to vector<32x32xf32>
    %8 = vector.shape_cast %5 : vector<32x32xf32> to vector<1x1x32x32xf32>
    tpu.vector_store %arg5[%c0_8, %c0_9, %c0_10, %c0_11], %8 {strides = array<i32>} : memref<1x1x32x32xf32, #tpu.memory_space<vmem>>, vector<1x1x32x32xf32>,
    return
  }
  func.func @transform_0(%arg0: i32, %arg1: i32) -> (i32, i32, i32, i32) {
    %c0_i32 = arith.constant 0 : i32
    %c0_i32_0 = arith.constant 0 : i32
    %c0_i32_1 = arith.constant 0 : i32
    return %arg0, %arg1, %c0_i32, %c0_i32_0 : i32, i32, i32, i32
  }
  func.func @transform_1(%arg0: i32, %arg1: i32) -> (i32, i32) {
    %c0_i32 = arith.constant 0 : i32
    %c0_i32_0 = arith.constant 0 : i32
    %c0_i32_1 = arith.constant 0 : i32
    return %c0_i32, %c0_i32_0 : i32, i32
  }
  func.func @transform_2(%arg0: i32, %arg1: i32) -> (i32, i32) {
    %c0_i32 = arith.constant 0 : i32
    %c0_i32_0 = arith.constant 0 : i32
    %c0_i32_1 = arith.constant 0 : i32
    return %c0_i32, %c0_i32_0 : i32, i32
  }
  func.func @transform_3(%arg0: i32, %arg1: i32) -> (i32, i32, i32, i32) {
    %c0_i32 = arith.constant 0 : i32
    %c0_i32_0 = arith.constant 0 : i32
    %c0_i32_1 = arith.constant 0 : i32
    return %arg0, %arg1, %c0_i32, %c0_i32_0 : i32, i32, i32, i32
  }
}

</mosaic_0001>

<bundles_post_ra>
// kernel: deeplabv3plus_hr_forward.3
= control target key start
LH: loop header
LB: loop body
LE: loop exit
PB: predicated region body
PF: predicated region fallthrough
CT: control target
= control target key end

     0   :  { %v1199_v1 = vmov 0   ;;  %vm211_vm0 = vcmask 392192   ;;  %v51_v27 = vlaneseq  ;;  %s1622_s1 = inlined_call_operand.vmem [shape: bf16[48,768], index: 1, kind: input, shape index: {}]   ;;  %s1623_s0 = inlined_call_operand.vmem [shape: bf16[128,48], index: 0, kind: input, shape index: {}]   ;;  %s1624_s2 = inlined_call_operand.vmem [shape: f32[1,768], index: 2, kind: input, shape index: {}]   ;;  %s1625_s3 = inlined_call_operand.vmem [shape: bf16[128,768], index: 3, kind: output, shape index: {}]  }
   0x1   :  { %v1164_v0 = vld [vmem:[%s1622_s1 + $0x64] ss:$24 sps:$4 sm:$0xff]   ;;  %268 = vmatprep.mubr.bf16.mxu0 %v1199_v1  ;;  %308 = vmatprep.mubr.bf16.mxu1 %v1199_v1  ;;  %v1166_v2 = vld [vmem:[%s1622_s1 + $0x60] ss:$24 sps:$4 sm:$0xff]   ;;  %v1167_v3 = vld [vmem:[%s1622_s1 + $0x34] ss:$24 sps:$4 sm:$0xff]  }
   0x2   :  { %246 = vmatprep.subr.bf16.mxu0 %v1164_v0  ;;  %1157 = vmatprep.subr.bf16.mxu1 %v1164_v0  ;;  %v1169_v4 = vld [vmem:[%s1622_s1 + $0x30] ss:$24 sps:$4 sm:$0xff]   ;;  %v1170_v5 = vld [vmem:[%s1622_s1 + $0x4] ss:$24 sps:$4 sm:$0xff]   ;;  %v1172_v6 = vld [vmem:[%s1622_s1] ss:$24 sps:$4 sm:$0xff]  }
   0x3   :  { %247 = vmatpush1.bf16.msra.mxu0 %v1166_v2  ;;  %1160 = vmatpush1.bf16.msra.mxu1 %v1166_v2  ;;  %v1177_v7 = vld [vmem:[%s1622_s1 + $0x6c] ss:$24 sps:$4 sm:$0xff]   ;;  %v1175_v11 = vld [vmem:[%s1622_s1 + $0x68] ss:$24 sps:$4 sm:$0xff]   ;;  %v1185_v13 = vld [vmem:[%s1622_s1 + $0x3c] ss:$24 sps:$4 sm:$0xff]  }
   0x4   :  { %248 = vmatprep.subr.bf16.mxu0 %v1167_v3  ;;  %1158 = vmatprep.subr.bf16.mxu1 %v1167_v3  ;;  %v1180_v8 = vld [vmem:[%s1622_s1 + $0x74] ss:$24 sps:$4 sm:$0xff]   ;;  %v1173_v9 = vld [vmem:[%s1623_s0] sm:$0xff]   ;;  %v1178_v12 = vld [vmem:[%s1622_s1 + $0x70] ss:$24 sps:$4 sm:$0xff]   ;;  %v1351_v28 = vshrl.u32 %v51_v27, 7 }
   0x5   :  { %v1252_v10 = vld [vmem:[%s1623_s0 + $0x20] sm:$0xff]   ;;  %v1183_v15 = vld [vmem:[%s1622_s1 + $0x38] ss:$24 sps:$4 sm:$0xff]   ;;  %v1181_v18 = vld [vmem:[%s1623_s0 + $0x8] sm:$0xff]  }
   0x6   :  { %v1188_v14 = vld [vmem:[%s1622_s1 + $0x44] ss:$24 sps:$4 sm:$0xff]   ;;  %v1186_v16 = vld [vmem:[%s1622_s1 + $0x40] ss:$24 sps:$4 sm:$0xff]   ;;  %v1196_v19 = vld [vmem:[%s1622_s1 + $0x14] ss:$24 sps:$4 sm:$0xff]  }
   0x7   :  { %249 = vmatpush1.bf16.msra.mxu0 %v1169_v4  ;;  %1161 = vmatpush1.bf16.msra.mxu1 %v1169_v4  ;;  %v1193_v17 = vld [vmem:[%s1622_s1 + $0xc] ss:$24 sps:$4 sm:$0xff]   ;;  %v1191_v21 = vld [vmem:[%s1622_s1 + $0x8] ss:$24 sps:$4 sm:$0xff]   ;;  %v1189_v23 = vld [vmem:[%s1623_s0 + $0x10] sm:$0xff]   ;;  %v53_v29 = vsub.s32 0, %v1351_v28 }
   0x8   :  { %250 = vmatprep.subr.bf16.mxu0 %v1170_v5  ;;  %1159 = vmatprep.subr.bf16.mxu1 %v1170_v5  ;;  %v1182_v20 = vld [vmem:[%s1623_s0 + $0x28] sm:$0xff]   ;;  %v1190_v24 = vld [vmem:[%s1623_s0 + $0x30] sm:$0xff]   ;;  %v1197_v25 = vld [vmem:[%s1623_s0 + $0x18] sm:$0xff]   ;;  %v57_v31 = vsub.s32 1, %v1351_v28 }
   0x9   :  { %v1194_v22 = vld [vmem:[%s1622_s1 + $0x10] ss:$24 sps:$4 sm:$0xff]   ;;  %v1198_v26 = vld [vmem:[%s1623_s0 + $0x38] sm:$0xff]   ;;  %v1357_v30 = vld [vmem:[%s1624_s2] sm:$0x3f] }
   0xa   :  { %v1361_v32 = vrot.slane %v1357_v30, %v53_v29  ;;  %v1364_v33 = vrot.slane %v1357_v30, %v57_v31 }
   0xb   :  { %251 = vmatpush1.bf16.msra.mxu0 %v1172_v6  ;;  %1162 = vmatpush1.bf16.msra.mxu1 %v1172_v6 }
   0xc   :  { %359 = vmatprep.subr.bf16.mxu1 %v1177_v7  ;;  %472 = vmatprep.subr.bf16.mxu0 %v1180_v8 }
   0xe   :  { %1037 = vmatmul.mubr.msk.bf16.vlgmr.msra.gmra.mxu0 %vm211_vm0, %v1173_v9  ;;  %1041 = vmatmul.mubr.msk.bf16.vlgmr.msra.gmra.mxu1 %vm211_vm0, %v1252_v10 }
   0xf   :  { %360 = vmatpush1.bf16.msra.mxu1 %v1175_v11  ;;  %473 = vmatpush1.bf16.msra.mxu0 %v1178_v12 }
  0x10   :  { %278 = vmatprep.mubr.bf16.mxu0 %v1199_v1  ;;  %318 = vmatprep.mubr.bf16.mxu1 %v1199_v1 }
  0x11   :  { %361 = vmatprep.subr.bf16.mxu1 %v1185_v13  ;;  %474 = vmatprep.subr.bf16.mxu0 %v1188_v14 }
  0x13   :  { %362 = vmatpush1.bf16.msra.mxu1 %v1183_v15  ;;  %475 = vmatpush1.bf16.msra.mxu0 %v1186_v16 }
  0x14   :  { %363 = vmatprep.subr.bf16.mxu1 %v1193_v17  ;;  %476 = vmatprep.subr.bf16.mxu0 %v1196_v19 }
  0x16   :  { %1038 = vmatmul.mubr.msk.bf16.gmra.mxu0 %vm211_vm0, %v1181_v18  ;;  %1042 = vmatmul.mubr.msk.bf16.gmra.mxu1 %vm211_vm0, %v1182_v20 }
  0x17   :  { %288 = vmatprep.mubr.bf16.mxu0 %v1199_v1  ;;  %328 = vmatprep.mubr.bf16.mxu1 %v1199_v1 }
  0x18   :  { %364 = vmatpush1.bf16.msra.mxu1 %v1191_v21  ;;  %477 = vmatpush1.bf16.msra.mxu0 %v1194_v22 }
  0x1e   :  { %1039 = vmatmul.mubr.msk.bf16.gmra.mxu0 %vm211_vm0, %v1189_v23  ;;  %1043 = vmatmul.mubr.msk.bf16.gmra.mxu1 %vm211_vm0, %v1190_v24 }
  0x1f   :  { %298 = vmatprep.mubr.bf16.mxu0 %v1199_v1  ;;  %338 = vmatprep.mubr.bf16.mxu1 %v1199_v1 }
  0x26   :  { %1040 = vmatmul.mubr.msk.bf16.gmra.mxu0 %vm211_vm0, %v1197_v25  ;;  %1044 = vmatmul.mubr.msk.bf16.gmra.mxu1 %vm211_vm0, %v1198_v26 }
  0x27   :  { %381 = vmatprep.mubr.bf16.mxu1 %v1199_v1  ;;  %494 = vmatprep.mubr.bf16.mxu0 %v1199_v1 }
  0x2e   :  { %1045 = vmatmul.mubr.msk.bf16.vlgmr.msra.gmra.mxu1 %vm211_vm0, %v1173_v9  ;;  %1053 = vmatmul.mubr.msk.bf16.vlgmr.msra.gmra.mxu0 %vm211_vm0, %v1173_v9 }
  0x2f   :  { %391 = vmatprep.mubr.bf16.mxu1 %v1199_v1  ;;  %504 = vmatprep.mubr.bf16.mxu0 %v1199_v1 }
  0x36   :  { %1046 = vmatmul.mubr.msk.bf16.gmra.mxu1 %vm211_vm0, %v1181_v18  ;;  %1054 = vmatmul.mubr.msk.bf16.gmra.mxu0 %vm211_vm0, %v1181_v18 }
  0x37   :  { %401 = vmatprep.mubr.bf16.mxu1 %v1199_v1  ;;  %514 = vmatprep.mubr.bf16.mxu0 %v1199_v1 }
  0x3e   :  { %1047 = vmatmul.mubr.msk.bf16.gmra.mxu1 %vm211_vm0, %v1189_v23  ;;  %1055 = vmatmul.mubr.msk.bf16.gmra.mxu0 %vm211_vm0, %v1189_v23 }
  0x3f   :  { %411 = vmatprep.mubr.bf16.mxu1 %v1199_v1  ;;  %524 = vmatprep.mubr.bf16.mxu0 %v1199_v1 }
  0x46   :  { %1048 = vmatmul.mubr.msk.bf16.gmra.mxu1 %vm211_vm0, %v1197_v25  ;;  %1056 = vmatmul.mubr.msk.bf16.gmra.mxu0 %vm211_vm0, %v1197_v25 }
  0x47   :  { %421 = vmatprep.mubr.bf16.mxu1 %v1199_v1  ;;  %534 = vmatprep.mubr.bf16.mxu0 %v1199_v1 }
  0x4e   :  { %1049 = vmatmul.mubr.msk.bf16.gmra.mxu1 %vm211_vm0, %v1252_v10  ;;  %1057 = vmatmul.mubr.msk.bf16.gmra.mxu0 %vm211_vm0, %v1252_v10 }
  0x4f   :  { %431 = vmatprep.mubr.bf16.mxu1 %v1199_v1  ;;  %544 = vmatprep.mubr.bf16.mxu0 %v1199_v1 }
  0x56   :  { %1050 = vmatmul.mubr.msk.bf16.gmra.mxu1 %vm211_vm0, %v1182_v20  ;;  %1058 = vmatmul.mubr.msk.bf16.gmra.mxu0 %vm211_vm0, %v1182_v20 }
  0x57   :  { %441 = vmatprep.mubr.bf16.mxu1 %v1199_v1  ;;  %554 = vmatprep.mubr.bf16.mxu0 %v1199_v1 }
  0x5e   :  { %1051 = vmatmul.mubr.msk.bf16.gmra.mxu1 %vm211_vm0, %v1190_v24  ;;  %1059 = vmatmul.mubr.msk.bf16.gmra.mxu0 %vm211_vm0, %v1190_v24 }
  0x5f   :  { %451 = vmatprep.mubr.bf16.mxu1 %v1199_v1  ;;  %564 = vmatprep.mubr.bf16.mxu0 %v1199_v1 }
  0x66   :  { %1052 = vmatmul.mubr.msk.bf16.gmra.mxu1 %vm211_vm0, %v1198_v26  ;;  %1060 = vmatmul.mubr.msk.bf16.gmra.mxu0 %vm211_vm0, %v1198_v26 }
  0xce   :  { %v270_v34 = vpop.f32.mrf.mxu0  ;;  %v310_v35 = vpop.f32.mrf.mxu1 }
  0xcf   :  { %v271_v36 = vadd.f32 %v270_v34, %v1361_v32  ;;  %v311_v37 = vadd.f32 %v310_v35, %v1361_v32 }
  0xd0   :  { %v272_v38 = vpop.f32.mrf.mxu0  ;;  %v312_v39 = vpop.f32.mrf.mxu1 }
  0xd1   :  { %v273_v40 = vadd.f32 %v272_v38, %v1364_v33  ;;  %v313_v41 = vadd.f32 %v312_v39, %v1364_v33  ;;  %v575_v44 = vmax.f32 %v271_v36, 0.0  ;;  %v623_v45 = vmax.f32 %v311_v37, 0.0 }
  0xd2   :  { %v274_v42 = vpop.f32.mrf.mxu0  ;;  %v314_v43 = vpop.f32.mrf.mxu1 }
  0xd3   :  { %v576_v46 = vmax.f32 %v273_v40, 0.0  ;;  %v624_v47 = vmax.f32 %v313_v41, 0.0  ;;  %v275_v48 = vadd.f32 %v274_v42, %v1361_v32  ;;  %v315_v49 = vadd.f32 %v314_v43, %v1361_v32 }
  0xd4   :  { %v276_v50 = vpop.f32.mrf.mxu0  ;;  %v316_v51 = vpop.f32.mrf.mxu1 }
  0xd5   :  { %v1109_v52 = vpack.c.bf16 %v576_v46, %v575_v44  ;;  %v1133_v53 = vpack.c.bf16 %v624_v47, %v623_v45  ;;  %v277_v54 = vadd.f32 %v276_v50, %v1364_v33  ;;  %v317_v55 = vadd.f32 %v316_v51, %v1364_v33 }
  0xd6   :  { %v280_v56 = vpop.f32.mrf.mxu0  ;;  %v320_v57 = vpop.f32.mrf.mxu1  ;;  %v581_v60 = vmax.f32 %v275_v48, 0.0  ;;  %v629_v61 = vmax.f32 %v315_v49, 0.0 }
  0xd7   :  { %959 = vst [vmem:[%s1625_s3] sm:$0xff] %v1109_v52  ;;  %983 = vst [vmem:[%s1625_s3 + $0xc0] sm:$0xff] %v1133_v53  ;;  %v281_v58 = vadd.f32 %v280_v56, %v1361_v32  ;;  %v321_v59 = vadd.f32 %v320_v57, %v1361_v32  ;;  %v582_v62 = vmax.f32 %v277_v54, 0.0  ;;  %v630_v63 = vmax.f32 %v317_v55, 0.0 }
  0xd8   :  { %v282_v0 = vpop.f32.mrf.mxu0  ;;  %v322_v1 = vpop.f32.mrf.mxu1  ;;  %v61_v54 = vsub.s32 2, %v1351_v28  ;;  %v69_v55 = vsub.s32 4, %v1351_v28 }
  0xd9   :  { %v283_v2 = vadd.f32 %v282_v0, %v1364_v33  ;;  %v323_v3 = vadd.f32 %v322_v1, %v1364_v33  ;;  %v1112_v4 = vpack.c.bf16 %v582_v62, %v581_v60  ;;  %v1136_v5 = vpack.c.bf16 %v630_v63, %v629_v61 }
  0xda   :  { %v284_v6 = vpop.f32.mrf.mxu0  ;;  %v324_v7 = vpop.f32.mrf.mxu1  ;;  %v587_v8 = vmax.f32 %v281_v58, 0.0  ;;  %v635_v9 = vmax.f32 %v321_v59, 0.0 }
  0xdb   :  { %v588_v10 = vmax.f32 %v283_v2, 0.0  ;;  %v636_v11 = vmax.f32 %v323_v3, 0.0  ;;  %962 = vst [vmem:[%s1625_s3 + $0x18] sm:$0xff] %v1112_v4  ;;  %986 = vst [vmem:[%s1625_s3 + $0xd8] sm:$0xff] %v1136_v5  ;;  %v285_v12 = vadd.f32 %v284_v6, %v1361_v32  ;;  %v325_v13 = vadd.f32 %v324_v7, %v1361_v32 }
  0xdc   :  { %v286_v14 = vpop.f32.mrf.mxu0  ;;  %v326_v15 = vpop.f32.mrf.mxu1  ;;  %v65_v2 = vsub.s32 3, %v1351_v28  ;;  %v73_v3 = vsub.s32 5, %v1351_v28 }
  0xdd   :  { %v1115_v16 = vpack.c.bf16 %v588_v10, %v587_v8  ;;  %v1139_v17 = vpack.c.bf16 %v636_v11, %v635_v9  ;;  %v287_v18 = vadd.f32 %v286_v14, %v1364_v33  ;;  %v327_v19 = vadd.f32 %v326_v15, %v1364_v33 }
  0xde   :  { %v290_v20 = vpop.f32.mrf.mxu0  ;;  %v330_v21 = vpop.f32.mrf.mxu1  ;;  %v593_v24 = vmax.f32 %v285_v12, 0.0  ;;  %v641_v25 = vmax.f32 %v325_v13, 0.0  ;;  %v1429_v8 = vrot.slane %v1357_v30, %v61_v54  ;;  %v1432_v9 = vrot.slane %v1357_v30, %v69_v55 }
  0xdf   :  { %965 = vst [vmem:[%s1625_s3 + $0x30] sm:$0xff] %v1115_v16  ;;  %989 = vst [vmem:[%s1625_s3 + $0xf0] sm:$0xff] %v1139_v17  ;;  %v291_v22 = vadd.f32 %v290_v20, %v1361_v32  ;;  %v331_v23 = vadd.f32 %v330_v21, %v1361_v32  ;;  %v594_v26 = vmax.f32 %v287_v18, 0.0  ;;  %v642_v27 = vmax.f32 %v327_v19, 0.0 }
  0xe0   :  { %v292_v29 = vpop.f32.mrf.mxu0  ;;  %v332_v31 = vpop.f32.mrf.mxu1  ;;  %v1443_v19 = vrot.slane %v1357_v30, %v65_v2  ;;  %v1446_v20 = vrot.slane %v1357_v30, %v73_v3 }
  0xe1   :  { %v293_v34 = vadd.f32 %v292_v29, %v1364_v33  ;;  %v333_v35 = vadd.f32 %v332_v31, %v1364_v33  ;;  %v1118_v36 = vpack.c.bf16 %v594_v26, %v593_v24  ;;  %v1142_v37 = vpack.c.bf16 %v642_v27, %v641_v25 }
  0xe2   :  { %v294_v38 = vpop.f32.mrf.mxu0  ;;  %v334_v39 = vpop.f32.mrf.mxu1  ;;  %v599_v40 = vmax.f32 %v291_v22, 0.0  ;;  %v647_v41 = vmax.f32 %v331_v23, 0.0 }
  0xe3   :  { %v600_v42 = vmax.f32 %v293_v34, 0.0  ;;  %v648_v43 = vmax.f32 %v333_v35, 0.0  ;;  %968 = vst [vmem:[%s1625_s3 + $0x48] sm:$0xff] %v1118_v36  ;;  %992 = vst [vmem:[%s1625_s3 + $0x108] sm:$0xff] %v1142_v37  ;;  %v295_v44 = vadd.f32 %v294_v38, %v1361_v32  ;;  %v335_v45 = vadd.f32 %v334_v39, %v1361_v32 }
  0xe4   :  { %v296_v46 = vpop.f32.mrf.mxu0  ;;  %v336_v47 = vpop.f32.mrf.mxu1 }
  0xe5   :  { %v1121_v48 = vpack.c.bf16 %v600_v42, %v599_v40  ;;  %v1145_v49 = vpack.c.bf16 %v648_v43, %v647_v41  ;;  %v297_v50 = vadd.f32 %v296_v46, %v1364_v33  ;;  %v337_v51 = vadd.f32 %v336_v47, %v1364_v33 }
  0xe6   :  { %v300_v52 = vpop.f32.mrf.mxu0  ;;  %v340_v53 = vpop.f32.mrf.mxu1  ;;  %v605_v58 = vmax.f32 %v295_v44, 0.0  ;;  %v653_v59 = vmax.f32 %v335_v45, 0.0 }
  0xe7   :  { %971 = vst [vmem:[%s1625_s3 + $0x60] sm:$0xff] %v1121_v48  ;;  %995 = vst [vmem:[%s1625_s3 + $0x120] sm:$0xff] %v1145_v49  ;;  %v301_v56 = vadd.f32 %v300_v52, %v1361_v32  ;;  %v341_v57 = vadd.f32 %v340_v53, %v1361_v32  ;;  %v606_v60 = vmax.f32 %v297_v50, 0.0  ;;  %v654_v61 = vmax.f32 %v337_v51, 0.0 }
  0xe8   :  { %v302_v62 = vpop.f32.mrf.mxu0  ;;  %v342_v63 = vpop.f32.mrf.mxu1 }
  0xe9   :  { %v303_v0 = vadd.f32 %v302_v62, %v1364_v33  ;;  %v343_v1 = vadd.f32 %v342_v63, %v1364_v33  ;;  %v1124_v4 = vpack.c.bf16 %v606_v60, %v605_v58  ;;  %v1148_v5 = vpack.c.bf16 %v654_v61, %v653_v59 }
  0xea   :  { %v304_v6 = vpop.f32.mrf.mxu0  ;;  %v344_v7 = vpop.f32.mrf.mxu1  ;;  %v611_v10 = vmax.f32 %v301_v56, 0.0  ;;  %v659_v11 = vmax.f32 %v341_v57, 0.0 }
  0xeb   :  { %v612_v12 = vmax.f32 %v303_v0, 0.0  ;;  %v660_v13 = vmax.f32 %v343_v1, 0.0  ;;  %974 = vst [vmem:[%s1625_s3 + $0x78] sm:$0xff] %v1124_v4  ;;  %998 = vst [vmem:[%s1625_s3 + $0x138] sm:$0xff] %v1148_v5  ;;  %v305_v28 = vadd.f32 %v304_v6, %v1361_v32  ;;  %v345_v14 = vadd.f32 %v344_v7, %v1361_v32 }
  0xec   :  { %v306_v15 = vpop.f32.mrf.mxu0  ;;  %v346_v16 = vpop.f32.mrf.mxu1 }
  0xed   :  { %v1127_v17 = vpack.c.bf16 %v612_v12, %v611_v10  ;;  %v1151_v18 = vpack.c.bf16 %v660_v13, %v659_v11  ;;  %v307_v21 = vadd.f32 %v306_v15, %v1364_v33  ;;  %v347_v22 = vadd.f32 %v346_v16, %v1364_v33 }
  0xee   :  { %v383_v23 = vpop.f32.mrf.mxu1  ;;  %v496_v24 = vpop.f32.mrf.mxu0  ;;  %v617_v30 = vmax.f32 %v305_v28, 0.0  ;;  %v665_v26 = vmax.f32 %v345_v14, 0.0 }
  0xef   :  { %977 = vst [vmem:[%s1625_s3 + $0x90] sm:$0xff] %v1127_v17  ;;  %1001 = vst [vmem:[%s1625_s3 + $0x150] sm:$0xff] %v1151_v18  ;;  %v384_v32 = vadd.f32 %v383_v23, %v1429_v8  ;;  %v497_v25 = vadd.f32 %v496_v24, %v1432_v9  ;;  %v618_v27 = vmax.f32 %v307_v21, 0.0  ;;  %v666_v29 = vmax.f32 %v347_v22, 0.0 }
  0xf0   :  { %v385_v31 = vpop.f32.mrf.mxu1  ;;  %v498_v33 = vpop.f32.mrf.mxu0 }
  0xf1   :  { %v386_v34 = vadd.f32 %v385_v31, %v1443_v19  ;;  %v499_v35 = vadd.f32 %v498_v33, %v1446_v20  ;;  %v1130_v36 = vpack.c.bf16 %v618_v27, %v617_v30  ;;  %v1154_v37 = vpack.c.bf16 %v666_v29, %v665_v26 }
  0xf2   :  { %v387_v38 = vpop.f32.mrf.mxu1  ;;  %v500_v39 = vpop.f32.mrf.mxu0  ;;  %v577_v40 = vmax.f32 %v384_v32, 0.0  ;;  %v579_v41 = vmax.f32 %v497_v25, 0.0 }
  0xf3   :  { %v578_v42 = vmax.f32 %v386_v34, 0.0  ;;  %v580_v43 = vmax.f32 %v499_v35, 0.0  ;;  %980 = vst [vmem:[%s1625_s3 + $0xa8] sm:$0xff] %v1130_v36  ;;  %1004 = vst [vmem:[%s1625_s3 + $0x168] sm:$0xff] %v1154_v37  ;;  %v388_v44 = vadd.f32 %v387_v38, %v1429_v8  ;;  %v501_v45 = vadd.f32 %v500_v39, %v1432_v9 }
  0xf4   :  { %v389_v46 = vpop.f32.mrf.mxu1  ;;  %v502_v47 = vpop.f32.mrf.mxu0 }
  0xf5   :  { %v1110_v48 = vpack.c.bf16 %v578_v42, %v577_v40  ;;  %v1111_v49 = vpack.c.bf16 %v580_v43, %v579_v41  ;;  %v390_v50 = vadd.f32 %v389_v46, %v1443_v19  ;;  %v503_v51 = vadd.f32 %v502_v47, %v1446_v20 }
  0xf6   :  { %v393_v52 = vpop.f32.mrf.mxu1  ;;  %v506_v53 = vpop.f32.mrf.mxu0  ;;  %v583_v56 = vmax.f32 %v388_v44, 0.0  ;;  %v585_v57 = vmax.f32 %v501_v45, 0.0 }
  0xf7   :  { %960 = vst [vmem:[%s1625_s3 + $0x8] sm:$0xff] %v1110_v48  ;;  %961 = vst [vmem:[%s1625_s3 + $0x10] sm:$0xff] %v1111_v49  ;;  %v394_v54 = vadd.f32 %v393_v52, %v1429_v8  ;;  %v507_v55 = vadd.f32 %v506_v53, %v1432_v9  ;;  %v584_v58 = vmax.f32 %v390_v50, 0.0  ;;  %v586_v59 = vmax.f32 %v503_v51, 0.0 }
  0xf8   :  { %v395_v60 = vpop.f32.mrf.mxu1  ;;  %v508_v61 = vpop.f32.mrf.mxu0 }
  0xf9   :  { %v396_v62 = vadd.f32 %v395_v60, %v1443_v19  ;;  %v509_v63 = vadd.f32 %v508_v61, %v1446_v20  ;;  %v1113_v0 = vpack.c.bf16 %v584_v58, %v583_v56  ;;  %v1114_v1 = vpack.c.bf16 %v586_v59, %v585_v57 }
  0xfa   :  { %v397_v2 = vpop.f32.mrf.mxu1  ;;  %v510_v3 = vpop.f32.mrf.mxu0  ;;  %v589_v4 = vmax.f32 %v394_v54, 0.0  ;;  %v591_v5 = vmax.f32 %v507_v55, 0.0 }
  0xfb   :  { %v590_v6 = vmax.f32 %v396_v62, 0.0  ;;  %v592_v7 = vmax.f32 %v509_v63, 0.0  ;;  %963 = vst [vmem:[%s1625_s3 + $0x20] sm:$0xff] %v1113_v0  ;;  %964 = vst [vmem:[%s1625_s3 + $0x28] sm:$0xff] %v1114_v1  ;;  %v398_v10 = vadd.f32 %v397_v2, %v1429_v8  ;;  %v511_v11 = vadd.f32 %v510_v3, %v1432_v9 }
  0xfc   :  { %v399_v12 = vpop.f32.mrf.mxu1  ;;  %v512_v13 = vpop.f32.mrf.mxu0 }
  0xfd   :  { %v1116_v28 = vpack.c.bf16 %v590_v6, %v589_v4  ;;  %v1117_v14 = vpack.c.bf16 %v592_v7, %v591_v5  ;;  %v400_v15 = vadd.f32 %v399_v12, %v1443_v19  ;;  %v513_v16 = vadd.f32 %v512_v13, %v1446_v20 }
  0xfe   :  { %v403_v17 = vpop.f32.mrf.mxu1  ;;  %v516_v18 = vpop.f32.mrf.mxu0  ;;  %v595_v23 = vmax.f32 %v398_v10, 0.0  ;;  %v597_v24 = vmax.f32 %v511_v11, 0.0 }
  0xff   :  { %966 = vst [vmem:[%s1625_s3 + $0x38] sm:$0xff] %v1116_v28  ;;  %967 = vst [vmem:[%s1625_s3 + $0x40] sm:$0xff] %v1117_v14  ;;  %v404_v21 = vadd.f32 %v403_v17, %v1429_v8  ;;  %v517_v22 = vadd.f32 %v516_v18, %v1432_v9  ;;  %v596_v32 = vmax.f32 %v400_v15, 0.0  ;;  %v598_v25 = vmax.f32 %v513_v16, 0.0 }
 0x100   :  { %v405_v30 = vpop.f32.mrf.mxu1  ;;  %v518_v26 = vpop.f32.mrf.mxu0 }
 0x101   :  { %v406_v27 = vadd.f32 %v405_v30, %v1443_v19  ;;  %v519_v29 = vadd.f32 %v518_v26, %v1446_v20  ;;  %v1119_v31 = vpack.c.bf16 %v596_v32, %v595_v23  ;;  %v1120_v33 = vpack.c.bf16 %v598_v25, %v597_v24 }
 0x102   :  { %v407_v34 = vpop.f32.mrf.mxu1  ;;  %v520_v35 = vpop.f32.mrf.mxu0  ;;  %v601_v36 = vmax.f32 %v404_v21, 0.0  ;;  %v603_v37 = vmax.f32 %v517_v22, 0.0 }
 0x103   :  { %v602_v38 = vmax.f32 %v406_v27, 0.0  ;;  %v604_v39 = vmax.f32 %v519_v29, 0.0  ;;  %969 = vst [vmem:[%s1625_s3 + $0x50] sm:$0xff] %v1119_v31  ;;  %970 = vst [vmem:[%s1625_s3 + $0x58] sm:$0xff] %v1120_v33  ;;  %v408_v40 = vadd.f32 %v407_v34, %v1429_v8  ;;  %v521_v41 = vadd.f32 %v520_v35, %v1432_v9 }
 0x104   :  { %v409_v42 = vpop.f32.mrf.mxu1  ;;  %v522_v43 = vpop.f32.mrf.mxu0 }
 0x105   :  { %v1122_v44 = vpack.c.bf16 %v602_v38, %v601_v36  ;;  %v1123_v45 = vpack.c.bf16 %v604_v39, %v603_v37  ;;  %v410_v46 = vadd.f32 %v409_v42, %v1443_v19  ;;  %v523_v47 = vadd.f32 %v522_v43, %v1446_v20 }
 0x106   :  { %v413_v48 = vpop.f32.mrf.mxu1  ;;  %v526_v49 = vpop.f32.mrf.mxu0  ;;  %v607_v52 = vmax.f32 %v408_v40, 0.0  ;;  %v609_v53 = vmax.f32 %v521_v41, 0.0 }
 0x107   :  { %972 = vst [vmem:[%s1625_s3 + $0x68] sm:$0xff] %v1122_v44  ;;  %973 = vst [vmem:[%s1625_s3 + $0x70] sm:$0xff] %v1123_v45  ;;  %v414_v50 = vadd.f32 %v413_v48, %v1429_v8  ;;  %v527_v51 = vadd.f32 %v526_v49, %v1432_v9  ;;  %v608_v54 = vmax.f32 %v410_v46, 0.0  ;;  %v610_v55 = vmax.f32 %v523_v47, 0.0 }
 0x108   :  { %v415_v56 = vpop.f32.mrf.mxu1  ;;  %v528_v57 = vpop.f32.mrf.mxu0 }
 0x109   :  { %v416_v58 = vadd.f32 %v415_v56, %v1443_v19  ;;  %v529_v59 = vadd.f32 %v528_v57, %v1446_v20  ;;  %v1125_v60 = vpack.c.bf16 %v608_v54, %v607_v52  ;;  %v1126_v61 = vpack.c.bf16 %v610_v55, %v609_v53 }
 0x10a   :  { %v417_v62 = vpop.f32.mrf.mxu1  ;;  %v530_v63 = vpop.f32.mrf.mxu0  ;;  %v613_v0 = vmax.f32 %v414_v50, 0.0  ;;  %v615_v1 = vmax.f32 %v527_v51, 0.0 }
 0x10b   :  { %v614_v2 = vmax.f32 %v416_v58, 0.0  ;;  %v616_v3 = vmax.f32 %v529_v59, 0.0  ;;  %975 = vst [vmem:[%s1625_s3 + $0x80] sm:$0xff] %v1125_v60  ;;  %976 = vst [vmem:[%s1625_s3 + $0x88] sm:$0xff] %v1126_v61  ;;  %v418_v4 = vadd.f32 %v417_v62, %v1429_v8  ;;  %v531_v5 = vadd.f32 %v530_v63, %v1432_v9 }
 0x10c   :  { %v419_v6 = vpop.f32.mrf.mxu1  ;;  %v532_v7 = vpop.f32.mrf.mxu0 }
 0x10d   :  { %v1128_v10 = vpack.c.bf16 %v614_v2, %v613_v0  ;;  %v1129_v11 = vpack.c.bf16 %v616_v3, %v615_v1  ;;  %v420_v12 = vadd.f32 %v419_v6, %v1443_v19  ;;  %v533_v13 = vadd.f32 %v532_v7, %v1446_v20 }
 0x10e   :  { %v423_v28 = vpop.f32.mrf.mxu1  ;;  %v536_v14 = vpop.f32.mrf.mxu0  ;;  %v619_v17 = vmax.f32 %v418_v4, 0.0  ;;  %v621_v18 = vmax.f32 %v531_v5, 0.0 }
 0x10f   :  { %978 = vst [vmem:[%s1625_s3 + $0x98] sm:$0xff] %v1128_v10  ;;  %979 = vst [vmem:[%s1625_s3 + $0xa0] sm:$0xff] %v1129_v11  ;;  %v424_v15 = vadd.f32 %v423_v28, %v1429_v8  ;;  %v537_v16 = vadd.f32 %v536_v14, %v1432_v9  ;;  %v620_v21 = vmax.f32 %v420_v12, 0.0  ;;  %v622_v22 = vmax.f32 %v533_v13, 0.0 }
 0x110   :  { %v425_v23 = vpop.f32.mrf.mxu1  ;;  %v538_v24 = vpop.f32.mrf.mxu0 }
 0x111   :  { %v426_v32 = vadd.f32 %v425_v23, %v1443_v19  ;;  %v539_v25 = vadd.f32 %v538_v24, %v1446_v20  ;;  %v1131_v30 = vpack.c.bf16 %v620_v21, %v619_v17  ;;  %v1132_v26 = vpack.c.bf16 %v622_v22, %v621_v18 }
 0x112   :  { %v427_v27 = vpop.f32.mrf.mxu1  ;;  %v540_v29 = vpop.f32.mrf.mxu0  ;;  %v625_v31 = vmax.f32 %v424_v15, 0.0  ;;  %v627_v33 = vmax.f32 %v537_v16, 0.0 }
 0x113   :  { %v626_v34 = vmax.f32 %v426_v32, 0.0  ;;  %v628_v35 = vmax.f32 %v539_v25, 0.0  ;;  %981 = vst [vmem:[%s1625_s3 + $0xb0] sm:$0xff] %v1131_v30  ;;  %982 = vst [vmem:[%s1625_s3 + $0xb8] sm:$0xff] %v1132_v26  ;;  %v428_v36 = vadd.f32 %v427_v27, %v1429_v8  ;;  %v541_v37 = vadd.f32 %v540_v29, %v1432_v9 }
 0x114   :  { %v429_v38 = vpop.f32.mrf.mxu1  ;;  %v542_v39 = vpop.f32.mrf.mxu0 }
 0x115   :  { %v1134_v40 = vpack.c.bf16 %v626_v34, %v625_v31  ;;  %v1135_v41 = vpack.c.bf16 %v628_v35, %v627_v33  ;;  %v430_v42 = vadd.f32 %v429_v38, %v1443_v19  ;;  %v543_v43 = vadd.f32 %v542_v39, %v1446_v20 }
 0x116   :  { %v433_v44 = vpop.f32.mrf.mxu1  ;;  %v546_v45 = vpop.f32.mrf.mxu0  ;;  %v631_v48 = vmax.f32 %v428_v36, 0.0  ;;  %v633_v49 = vmax.f32 %v541_v37, 0.0 }
 0x117   :  { %984 = vst [vmem:[%s1625_s3 + $0xc8] sm:$0xff] %v1134_v40  ;;  %985 = vst [vmem:[%s1625_s3 + $0xd0] sm:$0xff] %v1135_v41  ;;  %v434_v46 = vadd.f32 %v433_v44, %v1429_v8  ;;  %v547_v47 = vadd.f32 %v546_v45, %v1432_v9  ;;  %v632_v50 = vmax.f32 %v430_v42, 0.0  ;;  %v634_v51 = vmax.f32 %v543_v43, 0.0 }
 0x118   :  { %v435_v52 = vpop.f32.mrf.mxu1  ;;  %v548_v53 = vpop.f32.mrf.mxu0 }
 0x119   :  { %v436_v54 = vadd.f32 %v435_v52, %v1443_v19  ;;  %v549_v55 = vadd.f32 %v548_v53, %v1446_v20  ;;  %v1137_v56 = vpack.c.bf16 %v632_v50, %v631_v48  ;;  %v1138_v57 = vpack.c.bf16 %v634_v51, %v633_v49 }
 0x11a   :  { %v437_v58 = vpop.f32.mrf.mxu1  ;;  %v550_v59 = vpop.f32.mrf.mxu0  ;;  %v637_v60 = vmax.f32 %v434_v46, 0.0  ;;  %v639_v61 = vmax.f32 %v547_v47, 0.0 }
 0x11b   :  { %v638_v62 = vmax.f32 %v436_v54, 0.0  ;;  %v640_v63 = vmax.f32 %v549_v55, 0.0  ;;  %987 = vst [vmem:[%s1625_s3 + $0xe0] sm:$0xff] %v1137_v56  ;;  %988 = vst [vmem:[%s1625_s3 + $0xe8] sm:$0xff] %v1138_v57  ;;  %v438_v0 = vadd.f32 %v437_v58, %v1429_v8  ;;  %v551_v1 = vadd.f32 %v550_v59, %v1432_v9 }
 0x11c   :  { %v439_v2 = vpop.f32.mrf.mxu1  ;;  %v552_v3 = vpop.f32.mrf.mxu0 }
 0x11d   :  { %v1140_v4 = vpack.c.bf16 %v638_v62, %v637_v60  ;;  %v1141_v5 = vpack.c.bf16 %v640_v63, %v639_v61  ;;  %v440_v6 = vadd.f32 %v439_v2, %v1443_v19  ;;  %v553_v7 = vadd.f32 %v552_v3, %v1446_v20 }
 0x11e   :  { %v443_v10 = vpop.f32.mrf.mxu1  ;;  %v556_v11 = vpop.f32.mrf.mxu0  ;;  %v643_v28 = vmax.f32 %v438_v0, 0.0  ;;  %v645_v14 = vmax.f32 %v551_v1, 0.0 }
 0x11f   :  { %990 = vst [vmem:[%s1625_s3 + $0xf8] sm:$0xff] %v1140_v4  ;;  %991 = vst [vmem:[%s1625_s3 + $0x100] sm:$0xff] %v1141_v5  ;;  %v444_v12 = vadd.f32 %v443_v10, %v1429_v8  ;;  %v557_v13 = vadd.f32 %v556_v11, %v1432_v9  ;;  %v644_v15 = vmax.f32 %v440_v6, 0.0  ;;  %v646_v16 = vmax.f32 %v553_v7, 0.0 }
 0x120   :  { %v445_v17 = vpop.f32.mrf.mxu1  ;;  %v558_v18 = vpop.f32.mrf.mxu0 }
 0x121   :  { %v446_v21 = vadd.f32 %v445_v17, %v1443_v19  ;;  %v559_v22 = vadd.f32 %v558_v18, %v1446_v20  ;;  %v1143_v23 = vpack.c.bf16 %v644_v15, %v643_v28  ;;  %v1144_v24 = vpack.c.bf16 %v646_v16, %v645_v14 }
 0x122   :  { %v447_v32 = vpop.f32.mrf.mxu1  ;;  %v560_v25 = vpop.f32.mrf.mxu0  ;;  %v649_v30 = vmax.f32 %v444_v12, 0.0  ;;  %v651_v26 = vmax.f32 %v557_v13, 0.0 }
 0x123   :  { %v650_v27 = vmax.f32 %v446_v21, 0.0  ;;  %v652_v29 = vmax.f32 %v559_v22, 0.0  ;;  %993 = vst [vmem:[%s1625_s3 + $0x110] sm:$0xff] %v1143_v23  ;;  %994 = vst [vmem:[%s1625_s3 + $0x118] sm:$0xff] %v1144_v24  ;;  %v448_v31 = vadd.f32 %v447_v32, %v1429_v8  ;;  %v561_v33 = vadd.f32 %v560_v25, %v1432_v9 }
 0x124   :  { %v449_v34 = vpop.f32.mrf.mxu1  ;;  %v562_v35 = vpop.f32.mrf.mxu0 }
 0x125   :  { %v1146_v36 = vpack.c.bf16 %v650_v27, %v649_v30  ;;  %v1147_v37 = vpack.c.bf16 %v652_v29, %v651_v26  ;;  %v450_v38 = vadd.f32 %v449_v34, %v1443_v19  ;;  %v563_v39 = vadd.f32 %v562_v35, %v1446_v20 }
 0x126   :  { %v453_v40 = vpop.f32.mrf.mxu1  ;;  %v566_v41 = vpop.f32.mrf.mxu0  ;;  %v655_v44 = vmax.f32 %v448_v31, 0.0  ;;  %v657_v45 = vmax.f32 %v561_v33, 0.0 }
 0x127   :  { %996 = vst [vmem:[%s1625_s3 + $0x128] sm:$0xff] %v1146_v36  ;;  %997 = vst [vmem:[%s1625_s3 + $0x130] sm:$0xff] %v1147_v37  ;;  %v454_v42 = vadd.f32 %v453_v40, %v1429_v8  ;;  %v567_v43 = vadd.f32 %v566_v41, %v1432_v9  ;;  %v656_v46 = vmax.f32 %v450_v38, 0.0  ;;  %v658_v47 = vmax.f32 %v563_v39, 0.0 }
 0x128   :  { %v455_v48 = vpop.f32.mrf.mxu1  ;;  %v568_v49 = vpop.f32.mrf.mxu0 }
 0x129   :  { %v456_v50 = vadd.f32 %v455_v48, %v1443_v19  ;;  %v569_v51 = vadd.f32 %v568_v49, %v1446_v20  ;;  %v1149_v52 = vpack.c.bf16 %v656_v46, %v655_v44  ;;  %v1150_v53 = vpack.c.bf16 %v658_v47, %v657_v45 }
 0x12a   :  { %v457_v54 = vpop.f32.mrf.mxu1  ;;  %v570_v55 = vpop.f32.mrf.mxu0  ;;  %v661_v56 = vmax.f32 %v454_v42, 0.0  ;;  %v663_v57 = vmax.f32 %v567_v43, 0.0 }
 0x12b   :  { %v662_v58 = vmax.f32 %v456_v50, 0.0  ;;  %v664_v59 = vmax.f32 %v569_v51, 0.0  ;;  %999 = vst [vmem:[%s1625_s3 + $0x140] sm:$0xff] %v1149_v52  ;;  %1000 = vst [vmem:[%s1625_s3 + $0x148] sm:$0xff] %v1150_v53  ;;  %v458_v60 = vadd.f32 %v457_v54, %v1429_v8  ;;  %v571_v61 = vadd.f32 %v570_v55, %v1432_v9 }
 0x12c   :  { %v459_v62 = vpop.f32.mrf.mxu1  ;;  %v572_v63 = vpop.f32.mrf.mxu0 }
 0x12d   :  { %v1152_v0 = vpack.c.bf16 %v662_v58, %v661_v56  ;;  %v1153_v1 = vpack.c.bf16 %v664_v59, %v663_v57  ;;  %v460_v2 = vadd.f32 %v459_v62, %v1443_v19  ;;  %v573_v3 = vadd.f32 %v572_v63, %v1446_v20 }
 0x12e   :  { %v667_v4 = vmax.f32 %v458_v60, 0.0  ;;  %v669_v8 = vmax.f32 %v571_v61, 0.0 }
 0x12f   :  { %1002 = vst [vmem:[%s1625_s3 + $0x158] sm:$0xff] %v1152_v0  ;;  %1003 = vst [vmem:[%s1625_s3 + $0x160] sm:$0xff] %v1153_v1  ;;  %v668_v5 = vmax.f32 %v460_v2, 0.0  ;;  %v670_v9 = vmax.f32 %v573_v3, 0.0 }
 0x131   :  { %v1155_v6 = vpack.c.bf16 %v668_v5, %v667_v4  ;;  %v1156_v7 = vpack.c.bf16 %v670_v9, %v669_v8 }
 0x133   :  { %1005 = vst [vmem:[%s1625_s3 + $0x170] sm:$0xff] %v1155_v6  ;;  %1006 = vst [vmem:[%s1625_s3 + $0x178] sm:$0xff] %v1156_v7 }

// kernel: deeplabv3plus_hr_forward.5
= control target key start
LH: loop header
LB: loop body
LE: loop exit
PB: predicated region body
PF: predicated region fallthrough
CT: control target
= control target key end

     0   :  { %8 = vsyncpa [#allocation3], 0  ;;  %s898_s0 = inlined_call_operand.vmem [shape: f32[2,8,8,8], index: 0, kind: input, shape index: {}]   ;;  %s899_s1 = inlined_call_operand.vmem [shape: f32[32,8], index: 1, kind: input, shape index: {}]   ;;  %s900_s2 = inlined_call_operand.vmem [shape: f32[8,32], index: 2, kind: input, shape index: {}]   ;;  %s901_s3 = inlined_call_operand.hbm [shape: f32[2,8,32,32], index: 3, kind: output, shape index: {}]  }
   0x1   :  { %10 = vsyncpa [#allocation3 + $0x1], 0  ;;  %s736_s12 = smov 0   ;;  %s738_s13 = smov 0  }
   0x2   :  { %s740_s14 = smov 0   ;;  %s742_s15 = smov 0  }
   0x3   :  { %s744_s16 = smov 0   ;;  %s746_s17 = smov 0  }
   0x4   :  { %s748_s18 = smov 0   ;;  %s750_s19 = smov 0  }
   0x5 LB: > { %s498_s20 = sadd.s32 4294967295, %s711_s19   ;;  %s499_s21 = sadd.s32 4294967294, %s711_s19   ;;  %s711_s19 = sphi %s750_s19, %s16_s19   ;;  %s707_s18 = sphi %s748_s18, %s910_s18   ;;  %s703_s17 = sphi %s746_s17, %s909_s17   ;;  %s699_s16 = sphi %s744_s16, %s908_s16   ;;  %s695_s15 = sphi %s742_s15, %s907_s15   ;;  %s691_s14 = sphi %s740_s14, %s906_s14   ;;  %s687_s13 = sphi %s738_s13, %s905_s13   ;;  %s683_s12 = sphi %s736_s12, %s904_s12  }
   0x6   : > { %s25_s22 = sadd.s32 1, %s703_s17  ;;  %s28_s23 = sadd.s32 1, %s707_s18 }
   0x7   : > { %p26_p0 = scmp.ge.s32.totalorder %s25_s22, 8  ;;  %p117_p1 = scmp.ne.s32.totalorder %s691_s14, %s687_s13 }
   0x8   : > { %p118_p2 = scmp.eq.s32.totalorder %s498_s20, 15  ;;  %p123_p5 = scmp.ne.s32.totalorder %s687_s13, %s683_s12 }
   0x9   : > { %s912_s22 = smov (%p26_p0, %s25_s22), 0  ;;  %s914_s23 = smov (!%p26_p0, %s28_s23), %s707_s18 }
   0xa   : > { %s103_s24 = ssub.s32 %s703_s17, %s912_s22  ;;  %p787_p3 = por %p118_p2, %p117_p1 }
   0xb   : > { %p30_p4 = scmp.ge.s32.totalorder %s914_s23, 2  ;;  %p124_p6 = scmp.eq.s32.totalorder %s499_s21, 15 }
   0xc   : > { %p502_p7 = scmp.ge.s32.totalorder %s711_s19, 1  ;;  %p159_p9 = scmp.lt.s32.totalorder %s711_s19, 17 }
   0xd   : > { %s916_s23 = smov (%p30_p4, %s914_s23), 0  ;;  %p796_p8 = por %p124_p6, %p123_p5 }
   0xe   : > { %s102_s27 = ssub.s32 %s707_s18, %s916_s23  ;;  %s107_s28 = sadd.s32 1, %s691_s14 }
   0xf   : > { %s104_s29 = sor.u32 %s103_s24, %s102_s27  ;;  %p160_p10 = pnand %p502_p7, %p159_p9 }
  0x10   : > { %p105_p11 = scmp.eq.s32.totalorder %s104_s29, 0  ;;  %p186_p12 = scmp.lt.s32.totalorder (!%p160_p10), %s699_s16, 1 }
  0x11   : > { %163 = sbr.rel (%p160_p10) target bundleno = 440 (0x1b8), region = 32  ;;  %p188_p13 = scmp.lt.s32.totalorder (!%p160_p10), %s695_s15, 7 }
  0x12   : > { %s805_s30 = scalar_select %p105_p11, %s691_s14, %s107_s28  }
  0x13   : > { %s516_s11 = sshll.u32 (!%p160_p10), %s699_s16, 5  ;;  %s713_s5 = smov (!%p160_p10), [#allocation2]  }
  0x16   : > { %v195_v0 = vld [vmem:[%s899_s1] sm:$0xff]  ;;  %vm199_vm0 = vcmask 64512   ;;  %s187_s6 = scalar_select %p186_p12, %s699_s16, 1  ;;  %v196_v2 = vld [vmem:[%s899_s1 + $0x8] sm:$0xff]  ;;  %v197_v3 = vld [vmem:[%s899_s1 + $0x10] sm:$0xff]  ;;  %vm395_vm1 = vcmask 261120  }
  0x17   : > { %532 = vmatprep.mubr.msk.f32.mxu0 %vm199_vm0, %v195_v0  ;;  %s189_s7 = scalar_select %p188_p13, %s695_s15, 7  ;;  %v198_v4 = vld [vmem:[%s899_s1 + $0x18] sm:$0xff]  ;;  %v297_v5 = vld [vmem:[%s900_s2] sm:$0xff] }
  0x18   : > { %s504_s8 = sshll.u32 %s187_s6, 3  ;;  %538 = vmatprep.subr.mxu1 %v297_v5  ;;  %s623_s6 = sshll.u32 %s713_s5, 4  ;;  %s624_s6 = int_to_ptr.vmem [resolvable:$false] %s623_s6 }
  0x19   : > { %s191_s9 = sadd.s32 %s504_s8, %s189_s7  ;;  %539 = vmatpush3.msra.mxu1 %v297_v5  ;;  %s183_s8 = sand.u32 1, %s687_s13  }
  0x1a   : > { %s505_s10 = sshll.u32 %s191_s9, 3  ;;  %s503_s9 = sshll.u32 %s183_s8, 5 }
  0x1b   : > { %s193_s21 = scalar_lea.vmem %s898_s0, %s505_s10  ;;  %s515_s10 = sshll.u32 %s695_s15, 2 }
  0x1c   : > { %v194_v1 = vld [vmem:[%s193_s21] sm:$0xff]  ;;  %s413_s20 = sadd.s32 %s516_s11, %s515_s10  ;;  %s185_s21 = scalar_lea.vmem [#allocation2], %s503_s9 }
  0x1d   : > { %530 = vmatprep.subr.mxu0 %v194_v1  ;;  %s416_s24 = sshll.u32 %s185_s21, 4  ;;  %s517_s27 = sshll.u32 %s413_s20, 7  ;;  %s840_s24 = int_to_ptr.vmem [resolvable:$true] %s416_s24 }
  0x1e   : > { %531 = vmatpush3.msra.mxu0 %v194_v1  ;;  %s845_s15 = scalar_lea.hbm %s901_s3, %s517_s27  ;;  %s847_s16 = scalar_lea.sflag [#allocation3], %s183_s8 }
  0x1f   : > { %533 = vmatmul.mubr.msk.f32.vlgmr.msra.gmra.mxu0 %vm199_vm0, %v196_v2  ;;  %s619_s4 = scalar_lea.vmem %s840_s24, 512  ;;  %s625_s7 = scalar_lea.vmem %s624_s6, 1024 }
  0x20   : > { %535 = vmatprep.mubr.msk.f32.mxu0 %vm199_vm0, %v197_v3  ;;  %p620_p0 = scmp.ne.s32.totalorder %s840_s24, %s619_s4  ;;  %p626_p4 = scmp.lt.s32.totalorder %s840_s24, %s624_s6 }
  0x21   : > { %p627_p5 = scmp.lt.s32.totalorder %s625_s7, %s619_s4 }
  0x22   : > { %p621_p1 = pnand %p620_p0, %p787_p3 }
  0x23   : > { %536 = vmatmul.mubr.msk.f32.gmra.mxu0 %vm199_vm0, %v198_v4  ;;  %p628_p6 = por %p627_p5, %p626_p4 }
  0x24   : > { %p622_p2 = pneg %p621_p1 }
  0x26   : > { %p629_p7 = pnand %p628_p6, %p622_p2 }
  0xdf   : > { %v534_v6 = vpop.f32.mrf.mxu0 }
  0xe1   : > { %v278_v7 = vpop.f32.mrf.mxu0 }
  0xe2   : > { %540 = vmatprep.mubr.msk.f32.mxu1 %vm199_vm0, %v278_v7 }
  0xe3   : > { %v537_v8 = vpop.f32.mrf.mxu0  ;;  %541 = vmatmul.mubr.msk.f32.vlgmr.msra.gmra.mxu1 %vm199_vm0, %v534_v6 }
  0xe5   : > { %v288_v9 = vpop.f32.mrf.mxu0 }
  0xe6   : > { %543 = vmatprep.mubr.msk.f32.mxu1 %vm199_vm0, %v288_v9 }
  0xe7   : > { %544 = vmatmul.mubr.msk.f32.gmra.mxu1 %vm199_vm0, %v537_v8 }
 0x1a3   : > { %v542_v10 = vpop.f32.mrf.mxu1 }
 0x1a4   : > { %397 = vst.msk [vmem:[%s185_s21 + $0x8] sm:$0xff] %vm395_vm1, %v542_v10 }
 0x1a5   : > { %v376_v11 = vpop.f32.mrf.mxu1 }
 0x1a6   : > { %396 = vst.msk [vmem:[%s185_s21] sm:$0xff] %vm395_vm1, %v376_v11 }
 0x1a7   : > { %v545_v12 = vpop.f32.mrf.mxu1 }
 0x1a8   : > { %399 = vst.msk [vmem:[%s185_s21 + $0x18] sm:$0xff] %vm395_vm1, %v545_v12 }
 0x1a9   : > { %v386_v13 = vpop.f32.mrf.mxu1 }
 0x1aa   : > { %398 = vst.msk [vmem:[%s185_s21 + $0x10] sm:$0xff] %vm395_vm1, %v386_v13 }
 0x1ab   : > { %632 = shalt.err (!%p629_p7)
}
 0x1ac   : > { %s633_s8 = scalar_lea.hbm %s845_s15, 512  ;;  %s637_s11 = scalar_lea.hbm %s901_s3, 8192 }
 0x1ad   : > { %p634_p9 = scmp.ne.s32.totalorder %s845_s15, %s633_s8  ;;  %p638_p12 = scmp.lt.s32.totalorder %s845_s15, %s901_s3 }
 0x1ae   : > { %p639_p13 = scmp.lt.s32.totalorder %s637_s11, %s633_s8 }
 0x1af   : > { %p635_p10 = pnand %p634_p9, %p787_p3 }
 0x1b0   : > { %p640_p0 = por %p639_p13, %p638_p12 }
 0x1b1   : > { %p636_p11 = pneg %p635_p10 }
 0x1b3   : > { %p641_p1 = pnand %p640_p0, %p636_p11 }
 0x1b5   : > { %644 = shalt.err (!%p641_p1)
}
 0x1b6   : > { %s714_s27 = smov 128   ;;  %s715_s28 = smov 8  }
 0x1b7   : > { %546 = dma.vmem_to_hbm [thread:$0]  (%p787_p3), %s840_s24, 512, %s845_s15, %s847_s16, %s714_s27, %s714_s27, %s715_s28  }
 0x1b8 PF: > { %p552_p2 = scmp.ge.s32.totalorder %s711_s19, 2  ;;  %s431_s29 = sand.u32 1, %s683_s12  }
 0x1b9   : > { %s432_s4 = scalar_lea.sflag [#allocation3], %s431_s29 }
 0x1ba   : > { %p549_p4 = pnand %p552_p2, %p796_p8 }
 0x1bc   : > { %p550_p5 = pneg %p549_p4 }
 0x1be   : > { %678 = dma.done.wait (%p550_p5), %s432_s4, 512  }
 0x1bf   : > { %680 = vsyncadd (%p550_p5), %s432_s4, 4294966784  ;;  %s16_s19 = sadd.s32 1, %s711_s19   ;;  %s904_s12 = smov %s687_s13 }
 0x1c0   : > { %p13_p6 = scmp.ge.s32.totalorder %s16_s19, 18   ;;  %s905_s13 = smov %s691_s14 }
 0x1c1   : > { %s906_s14 = smov %s805_s30  ;;  %s907_s15 = smov %s703_s17 }
 0x1c2   : > { %s908_s16 = smov %s707_s18  ;;  %s909_s17 = smov %s912_s22 }
 0x1c3   : > { %s910_s18 = smov %s916_s23  ;;  %15 = sbr.rel (!%p13_p6) target bundleno = 5 (0x5), region = 67 }
 0x1c8   :  { %437 = vsyncpa [#allocation3], 1 }
 0x1c9   :  { %439 = vsyncpa [#allocation3 + $0x1], 1 }

// kernel: deeplabv3plus_hr_forward.4
= control target key start
LH: loop header
LB: loop body
LE: loop exit
PB: predicated region body
PF: predicated region fallthrough
CT: control target
= control target key end

     0   :  { %s12078_s25 = smov 0   ;;  %s15476_s0 = inlined_call_operand.vmem [shape: bf16[2,8,8,768], index: 0, kind: input, shape index: {}]   ;;  %s15477_s1 = inlined_call_operand.vmem [shape: f32[2,1,128], index: 1, kind: input, shape index: {}]   ;;  %s15478_s2 = inlined_call_operand.vmem [shape: bf16[768,512], index: 2, kind: input, shape index: {}]   ;;  %s15479_s3 = inlined_call_operand.vmem [shape: bf16[8,768,128], index: 3, kind: input, shape index: {}]   ;;  %s15480_s4 = inlined_call_operand.vmem [shape: f32[4,128], index: 4, kind: input, shape index: {}]   ;;  %s15481_s5 = inlined_call_operand.vmem [shape: f32[4,128], index: 5, kind: input, shape index: {}]   ;;  %s15482_s6 = inlined_call_operand.vmem [shape: bf16[4,128,128], index: 6, kind: input, shape index: {}]   ;;  %s15483_s7 = inlined_call_operand.vmem [shape: f32[1,128], index: 7, kind: input, shape index: {}]   ;;  %s15484_s8 = inlined_call_operand.vmem [shape: bf16[128,128], index: 8, kind: input, shape index: {}]   ;;  %s15485_s9 = inlined_call_operand.vmem [shape: f32[1,128], index: 9, kind: input, shape index: {}]   ;;  %s15486_s10 = inlined_call_operand.vmem [shape: f32[1,128], index: 10, kind: input, shape index: {}]   ;;  %s15487_s11 = inlined_call_operand.vmem [shape: bf16[128,8], index: 11, kind: input, shape index: {}]   ;;  %s15488_s12 = inlined_call_operand.vmem [shape: f32[1,8], index: 12, kind: input, shape index: {}]   ;;  %s15489_s13 = inlined_call_operand.vmem [shape: f32[2,8,8,8], index: 13, kind: output, shape index: {}]  }
   0x1 LB: > { %s8565_s26 = sadd.s32 4294967295, %s12005_s25   ;;  %p8569_p0 = scmp.ge.s32.totalorder %s12005_s25, 1  ;;  %s12005_s25 = sphi %s12078_s25, %s23_s25  }
   0x2   : > { %p395_p1 = scmp.lt.s32.totalorder %s12005_s25, 3 }
   0x4   : > { %p396_p2 = pnand %p8569_p0, %p395_p1 }
   0x6   : > { %399 = sbr.rel (%p396_p2) target bundleno = 1475 (0x5c3), region = 72 }
   0xb   : > { %v11215_v0 = vld [vmem:[%s15478_s2 + $0xe4] ss:$16 sps:$4 sm:$0xff]   ;;  %v11219_v2 = vld [vmem:[%s15478_s2 + $0xe0] ss:$16 sps:$4 sm:$0xff]   ;;  %p442_p3 = scmp.lt.s32.totalorder %s8565_s26, 1  ;;  %vm2301_vm0 = vcmask 1042432  }
   0xc   : > { %v11217_v1 = vld [vmem:[%s15478_s2 + $0x2e4] ss:$16 sps:$4 sm:$0xff]   ;;  %1752 = vmatprep.subr.bf16.mxu0 %v11215_v0  ;;  %v11220_v3 = vld [vmem:[%s15478_s2 + $0x2e0] ss:$16 sps:$4 sm:$0xff]   ;;  %vm12987_vm1 = vmneg %vm2301_vm0  ;;  %vm3606_vm2 = vcmask 1044480   ;;  %vm5625_vm4 = vcmask 1046528  }
   0xd   : > { %1825 = vmatprep.subr.bf16.mxu1 %v11217_v1  ;;  %v11221_v4 = vld [vmem:[%s15478_s2 + $0xc4] ss:$16 sps:$4 sm:$0xff]   ;;  %1753 = vmatpush1.bf16.msra.mxu0 %v11219_v2  ;;  %v11225_v6 = vld [vmem:[%s15478_s2 + $0xc0] ss:$16 sps:$4 sm:$0xff]   ;;  %s15640_s26 = smov (!%p442_p3, %s8565_s26), 1  ;;  %vm13407_vm3 = vmneg %vm3606_vm2 }
   0xe   : > { %1826 = vmatpush1.bf16.msra.mxu1 %v11220_v3  ;;  %v11223_v5 = vld [vmem:[%s15478_s2 + $0x2c4] ss:$16 sps:$4 sm:$0xff]   ;;  %1754 = vmatprep.subr.bf16.mxu0 %v11221_v4  ;;  %v11226_v7 = vld [vmem:[%s15478_s2 + $0x2c0] ss:$16 sps:$4 sm:$0xff]   ;;  %s11205_s17 = smul.u32 192, %s15640_s26  ;;  %s10028_s14 = sshll.u32 %s15640_s26, 6 }
   0xf   : > { %1827 = vmatprep.subr.bf16.mxu1 %v11223_v5  ;;  %v11227_v8 = vld [vmem:[%s15478_s2 + $0xa4] ss:$16 sps:$4 sm:$0xff]   ;;  %v11231_v10 = vld [vmem:[%s15478_s2 + $0xa0] ss:$16 sps:$4 sm:$0xff]   ;;  %v11322_v3 = vld [vmem:[%s15478_s2 + $0xec] ss:$16 sps:$4 sm:$0xff]   ;;  %s454_s19 = scalar_lea.vmem %s15489_s13, %s10028_s14 }
  0x10   : > { %v11229_v9 = vld [vmem:[%s15478_s2 + $0x2a4] ss:$16 sps:$4 sm:$0xff]   ;;  %v11232_v11 = vld [vmem:[%s15478_s2 + $0x2a0] ss:$16 sps:$4 sm:$0xff]   ;;  %s12231_s30 = scalar_lea.vmem %s15476_s0, %s11205_s17 }
  0x11   : > { %1755 = vmatpush1.bf16.msra.mxu0 %v11225_v6  ;;  %v11233_v12 = vld [vmem:[%s15478_s2 + $0x84] ss:$16 sps:$4 sm:$0xff]   ;;  %v11237_v14 = vld [vmem:[%s15478_s2 + $0x80] ss:$16 sps:$4 sm:$0xff]  }
  0x12   : > { %1828 = vmatpush1.bf16.msra.mxu1 %v11226_v7  ;;  %1756 = vmatprep.subr.bf16.mxu0 %v11227_v8  ;;  %v11235_v13 = vld [vmem:[%s15478_s2 + $0x284] ss:$16 sps:$4 sm:$0xff]   ;;  %v11238_v15 = vld [vmem:[%s15478_s2 + $0x280] ss:$16 sps:$4 sm:$0xff]   ;;  %v11320_v7 = vld [vmem:[%s15478_s2 + $0xe8] ss:$16 sps:$4 sm:$0xff]  }
  0x13   : > { %1829 = vmatprep.subr.bf16.mxu1 %v11229_v9  ;;  %v11239_v16 = vld [vmem:[%s15478_s2 + $0x64] ss:$16 sps:$4 sm:$0xff]   ;;  %v11243_v18 = vld [vmem:[%s15478_s2 + $0x60] ss:$16 sps:$4 sm:$0xff]   ;;  %v11328_v9 = vld [vmem:[%s15478_s2 + $0xcc] ss:$16 sps:$4 sm:$0xff]  }
  0x14   : > { %v11241_v17 = vld [vmem:[%s15478_s2 + $0x264] ss:$16 sps:$4 sm:$0xff]   ;;  %v11244_v19 = vld [vmem:[%s15478_s2 + $0x260] ss:$16 sps:$4 sm:$0xff]  }
  0x15   : > { %1757 = vmatpush1.bf16.msra.mxu0 %v11231_v10  ;;  %v11245_v20 = vld [vmem:[%s15478_s2 + $0x44] ss:$16 sps:$4 sm:$0xff]   ;;  %v11249_v22 = vld [vmem:[%s15478_s2 + $0x40] ss:$16 sps:$4 sm:$0xff]  }
  0x16   : > { %1830 = vmatpush1.bf16.msra.mxu1 %v11232_v11  ;;  %1758 = vmatprep.subr.bf16.mxu0 %v11233_v12  ;;  %v11247_v21 = vld [vmem:[%s15478_s2 + $0x244] ss:$16 sps:$4 sm:$0xff]   ;;  %v11250_v23 = vld [vmem:[%s15478_s2 + $0x240] ss:$16 sps:$4 sm:$0xff]   ;;  %v11326_v11 = vld [vmem:[%s15478_s2 + $0xc8] ss:$16 sps:$4 sm:$0xff]  }
  0x17   : > { %1831 = vmatprep.subr.bf16.mxu1 %v11235_v13  ;;  %v11251_v24 = vld [vmem:[%s15478_s2 + $0x24] ss:$16 sps:$4 sm:$0xff]   ;;  %v11255_v26 = vld [vmem:[%s15478_s2 + $0x20] ss:$16 sps:$4 sm:$0xff]   ;;  %v11334_v13 = vld [vmem:[%s15478_s2 + $0xac] ss:$16 sps:$4 sm:$0xff]  }
  0x18   : > { %v11253_v25 = vld [vmem:[%s15478_s2 + $0x224] ss:$16 sps:$4 sm:$0xff]   ;;  %v11256_v27 = vld [vmem:[%s15478_s2 + $0x220] ss:$16 sps:$4 sm:$0xff]  }
  0x19   : > { %1759 = vmatpush1.bf16.msra.mxu0 %v11237_v14  ;;  %v11257_v28 = vld [vmem:[%s15478_s2 + $0x4] ss:$16 sps:$4 sm:$0xff]   ;;  %v11261_v30 = vld [vmem:[%s15478_s2] ss:$16 sps:$4 sm:$0xff]  }
  0x1a   : > { %1832 = vmatpush1.bf16.msra.mxu1 %v11238_v15  ;;  %1760 = vmatprep.subr.bf16.mxu0 %v11239_v16  ;;  %v11259_v29 = vld [vmem:[%s15478_s2 + $0x204] ss:$16 sps:$4 sm:$0xff]   ;;  %v11262_v31 = vld [vmem:[%s15478_s2 + $0x200] ss:$16 sps:$4 sm:$0xff]   ;;  %v465_v15 = vld [vmem:[%s12231_s30 + $0x48] sm:$0xff] }
  0x1b   : > { %1833 = vmatprep.subr.bf16.mxu1 %v11241_v17  ;;  %v11263_v32 = vld [vmem:[%s15478_s2 + $0x1e4] ss:$16 sps:$4 sm:$0xff]   ;;  %v11267_v34 = vld [vmem:[%s15478_s2 + $0x1e0] ss:$16 sps:$4 sm:$0xff]   ;;  %v463_v17 = vld [vmem:[%s12231_s30 + $0x38] sm:$0xff] }
  0x1c   : > { %v11265_v33 = vld [vmem:[%s15478_s2 + $0x3e4] ss:$16 sps:$4 sm:$0xff]   ;;  %v11268_v35 = vld [vmem:[%s15478_s2 + $0x3e0] ss:$16 sps:$4 sm:$0xff]  }
  0x1d   : > { %1761 = vmatpush1.bf16.msra.mxu0 %v11243_v18  ;;  %v11269_v36 = vld [vmem:[%s15478_s2 + $0x1c4] ss:$16 sps:$4 sm:$0xff]   ;;  %v11273_v38 = vld [vmem:[%s15478_s2 + $0x1c0] ss:$16 sps:$4 sm:$0xff]  }
  0x1e   : > { %1834 = vmatpush1.bf16.msra.mxu1 %v11244_v19  ;;  %1762 = vmatprep.subr.bf16.mxu0 %v11245_v20  ;;  %v11271_v37 = vld [vmem:[%s15478_s2 + $0x3c4] ss:$16 sps:$4 sm:$0xff]   ;;  %v11274_v39 = vld [vmem:[%s15478_s2 + $0x3c0] ss:$16 sps:$4 sm:$0xff]   ;;  %v11332_v20 = vld [vmem:[%s15478_s2 + $0xa8] ss:$16 sps:$4 sm:$0xff]  }
  0x1f   : > { %1835 = vmatprep.subr.bf16.mxu1 %v11247_v21  ;;  %v11275_v40 = vld [vmem:[%s15478_s2 + $0x1a4] ss:$16 sps:$4 sm:$0xff]   ;;  %v11279_v42 = vld [vmem:[%s15478_s2 + $0x1a0] ss:$16 sps:$4 sm:$0xff]  }
  0x20   : > { %v11277_v41 = vld [vmem:[%s15478_s2 + $0x3a4] ss:$16 sps:$4 sm:$0xff]   ;;  %v11280_v43 = vld [vmem:[%s15478_s2 + $0x3a0] ss:$16 sps:$4 sm:$0xff]  }
  0x21   : > { %1763 = vmatpush1.bf16.msra.mxu0 %v11249_v22  ;;  %v11281_v44 = vld [vmem:[%s15478_s2 + $0x184] ss:$16 sps:$4 sm:$0xff]   ;;  %v11285_v46 = vld [vmem:[%s15478_s2 + $0x180] ss:$16 sps:$4 sm:$0xff]  }
  0x22   : > { %1836 = vmatpush1.bf16.msra.mxu1 %v11250_v23  ;;  %1764 = vmatprep.subr.bf16.mxu0 %v11251_v24  ;;  %v11283_v45 = vld [vmem:[%s15478_s2 + $0x384] ss:$16 sps:$4 sm:$0xff]   ;;  %v11286_v47 = vld [vmem:[%s15478_s2 + $0x380] ss:$16 sps:$4 sm:$0xff]  }
  0x23   : > { %1837 = vmatprep.subr.bf16.mxu1 %v11253_v25  ;;  %v12243_v48 = vld [vmem:[%s12231_s30 + $0x4] ss:$24 sps:$4 sm:$0xff]   ;;  %v11291_v52 = vld [vmem:[%s15478_s2 + $0x160] ss:$16 sps:$4 sm:$0xff]  }
  0x24   : > { %v11287_v49 = vld [vmem:[%s15478_s2 + $0x164] ss:$16 sps:$4 sm:$0xff]   ;;  %1784 = vmatprep.mubr.bf16.mxu0 %v12243_v48  ;;  %v11292_v53 = vld [vmem:[%s15478_s2 + $0x360] ss:$16 sps:$4 sm:$0xff]   ;;  %v11340_v25 = vld [vmem:[%s15478_s2 + $0x8c] ss:$16 sps:$4 sm:$0xff]  }
  0x25   : > { %1765 = vmatpush1.bf16.msra.mxu0 %v11255_v26  ;;  %v12249_v50 = vld [vmem:[%s12231_s30 + $0xc] ss:$24 sps:$4 sm:$0xff]   ;;  %v11297_v56 = vld [vmem:[%s15478_s2 + $0x140] ss:$16 sps:$4 sm:$0xff]  }
  0x26   : > { %1838 = vmatpush1.bf16.msra.mxu1 %v11256_v27  ;;  %1766 = vmatprep.subr.bf16.mxu0 %v11257_v28  ;;  %v11289_v51 = vld [vmem:[%s15478_s2 + $0x364] ss:$16 sps:$4 sm:$0xff]   ;;  %v11298_v57 = vld [vmem:[%s15478_s2 + $0x340] ss:$16 sps:$4 sm:$0xff]   ;;  %v11338_v27 = vld [vmem:[%s15478_s2 + $0x88] ss:$16 sps:$4 sm:$0xff]  }
  0x27   : > { %1839 = vmatprep.subr.bf16.mxu1 %v11259_v29  ;;  %1857 = vmatprep.mubr.bf16.mxu1 %v12249_v50  ;;  %v11293_v54 = vld [vmem:[%s15478_s2 + $0x144] ss:$16 sps:$4 sm:$0xff]   ;;  %v11303_v60 = vld [vmem:[%s15478_s2 + $0x120] ss:$16 sps:$4 sm:$0xff]   ;;  %v11346_v29 = vld [vmem:[%s15478_s2 + $0x6c] ss:$16 sps:$4 sm:$0xff]  }
  0x28   : > { %v11295_v55 = vld [vmem:[%s15478_s2 + $0x344] ss:$16 sps:$4 sm:$0xff]   ;;  %v11304_v61 = vld [vmem:[%s15478_s2 + $0x320] ss:$16 sps:$4 sm:$0xff]  }
  0x29   : > { %1767 = vmatpush1.bf16.msra.mxu0 %v11261_v30  ;;  %v11299_v58 = vld [vmem:[%s15478_s2 + $0x124] ss:$16 sps:$4 sm:$0xff]   ;;  %v11309_v0 = vld [vmem:[%s15478_s2 + $0x100] ss:$16 sps:$4 sm:$0xff]  }
  0x2a   : > { %1840 = vmatpush1.bf16.msra.mxu1 %v11262_v31  ;;  %1768 = vmatprep.subr.bf16.mxu0 %v11263_v32  ;;  %v11301_v59 = vld [vmem:[%s15478_s2 + $0x324] ss:$16 sps:$4 sm:$0xff]   ;;  %v11310_v1 = vld [vmem:[%s15478_s2 + $0x300] ss:$16 sps:$4 sm:$0xff]   ;;  %v471_v31 = vld [vmem:[%s12231_s30 + $0x78] sm:$0xff] }
  0x2b   : > { %1841 = vmatprep.subr.bf16.mxu1 %v11265_v33  ;;  %v11305_v62 = vld [vmem:[%s15478_s2 + $0x104] ss:$16 sps:$4 sm:$0xff]   ;;  %v12305_v4 = vld [vmem:[%s12231_s30] ss:$24 sps:$4 sm:$0xff]   ;;  %v469_v32 = vld [vmem:[%s12231_s30 + $0x68] sm:$0xff] }
  0x2c   : > { %v11307_v63 = vld [vmem:[%s15478_s2 + $0x304] ss:$16 sps:$4 sm:$0xff]   ;;  %v11316_v5 = vld [vmem:[%s12231_s30 + $0x8] ss:$24 sps:$4 sm:$0xff]  }
  0x2d   : > { %1769 = vmatpush2.bf16.msra.mxu0 %v11267_v34  ;;  %v11319_v2 = vld [vmem:[%s15478_s2 + $0x4e4] ss:$16 sps:$4 sm:$0xff]   ;;  %v11317_v6 = vld [vmem:[%s15478_s2 + $0x4e0] ss:$16 sps:$4 sm:$0xff]  }
  0x2e   : > { %1842 = vmatpush2.bf16.msra.mxu1 %v11268_v35  ;;  %1770 = vmatprep.subr.bf16.mxu0 %v11269_v36  ;;  %v11325_v8 = vld [vmem:[%s15478_s2 + $0x4c4] ss:$16 sps:$4 sm:$0xff]   ;;  %v11323_v10 = vld [vmem:[%s15478_s2 + $0x4c0] ss:$16 sps:$4 sm:$0xff]  }
  0x2f   : > { %1843 = vmatprep.subr.bf16.mxu1 %v11271_v37  ;;  %v11331_v12 = vld [vmem:[%s15478_s2 + $0x4a4] ss:$16 sps:$4 sm:$0xff]   ;;  %v11329_v19 = vld [vmem:[%s15478_s2 + $0x4a0] ss:$16 sps:$4 sm:$0xff]   ;;  %v11344_v37 = vld [vmem:[%s15478_s2 + $0x68] ss:$16 sps:$4 sm:$0xff]  }
  0x30   : > { %v462_v14 = vld [vmem:[%s12231_s30 + $0x30] sm:$0xff]  ;;  %v468_v30 = vld [vmem:[%s12231_s30 + $0x60] sm:$0xff] }
  0x31   : > { %1771 = vmatpush2.bf16.msra.mxu0 %v11273_v38  ;;  %v12335_v16 = vcombine.high %v462_v14, %v465_v15  ;;  %v466_v18 = vld [vmem:[%s12231_s30 + $0x50] sm:$0xff]  ;;  %v12347_v22 = vcombine.low %v462_v14, %v465_v15  ;;  %v12376_v33 = vcombine.high %v468_v30, %v471_v31  ;;  %v472_v34 = vld [vmem:[%s12231_s30 + $0x80] sm:$0xff]  ;;  %v12388_v38 = vcombine.low %v468_v30, %v471_v31  ;;  %v11394_v14 = vld [vmem:[%s15478_s2 + $0x188] ss:$16 sps:$4 sm:$0xff]  }
  0x32   : > { %1844 = vmatpush2.bf16.msra.mxu1 %v11274_v39  ;;  %1772 = vmatprep.subr.bf16.mxu0 %v11275_v40  ;;  %v12345_v21 = vcombine.high %v463_v17, %v466_v18  ;;  %v12349_v23 = vcombine.low %v463_v17, %v466_v18  ;;  %v11337_v24 = vld [vmem:[%s15478_s2 + $0x484] ss:$16 sps:$4 sm:$0xff]   ;;  %v11335_v26 = vld [vmem:[%s15478_s2 + $0x480] ss:$16 sps:$4 sm:$0xff]   ;;  %v12379_v35 = vcombine.high %v469_v32, %v472_v34  ;;  %v11402_v17 = vld [vmem:[%s15478_s2 + $0x16c] ss:$16 sps:$4 sm:$0xff]  }
  0x33   : > { %1845 = vmatprep.subr.bf16.mxu1 %v11277_v41  ;;  %v11343_v28 = vld [vmem:[%s15478_s2 + $0x464] ss:$16 sps:$4 sm:$0xff]   ;;  %v11341_v36 = vld [vmem:[%s15478_s2 + $0x460] ss:$16 sps:$4 sm:$0xff]   ;;  %v12390_v39 = vcombine.low %v469_v32, %v472_v34  ;;  %v11352_v41 = vld [vmem:[%s15478_s2 + $0x4c] ss:$16 sps:$4 sm:$0xff]  }
  0x34   : > { %v11349_v40 = vld [vmem:[%s15478_s2 + $0x444] ss:$16 sps:$4 sm:$0xff]   ;;  %v11397_v18 = vld [vmem:[%s15478_s2 + $0x560] ss:$16 sps:$4 sm:$0xff]   ;;  %v11416_v30 = vld [vmem:[%s15478_s2 + $0x128] ss:$16 sps:$4 sm:$0xff]  }
  0x35   : > { %1773 = vmatpush2.bf16.msra.mxu0 %v11279_v42  ;;  %v11347_v42 = vld [vmem:[%s15478_s2 + $0x440] ss:$16 sps:$4 sm:$0xff]   ;;  %v11399_v15 = vld [vmem:[%s15478_s2 + $0x564] ss:$16 sps:$4 sm:$0xff]   ;;  %v11424_v32 = vld [vmem:[%s15478_s2 + $0x10c] ss:$16 sps:$4 sm:$0xff]  }
  0x36   : > { %1846 = vmatpush2.bf16.msra.mxu1 %v11280_v43  ;;  %1774 = vmatprep.subr.bf16.mxu0 %v11281_v44  ;;  %v11350_v43 = vld [vmem:[%s15478_s2 + $0x48] ss:$16 sps:$4 sm:$0xff]   ;;  %v474_v44 = vld [vmem:[%s12231_s30 + $0x90] sm:$0xff] }
  0x37   : > { %1847 = vmatprep.subr.bf16.mxu1 %v11283_v45  ;;  %v477_v45 = vld [vmem:[%s12231_s30 + $0xa8] sm:$0xff]  ;;  %v11421_v31 = vld [vmem:[%s15478_s2 + $0x504] ss:$16 sps:$4 sm:$0xff]   ;;  %v11419_v34 = vld [vmem:[%s15478_s2 + $0x500] ss:$16 sps:$4 sm:$0xff]  }
  0x39   : > { %1775 = vmatpush2.bf16.msra.mxu0 %v11285_v46  ;;  %v475_v46 = vld [vmem:[%s12231_s30 + $0x98] sm:$0xff] }
  0x3a   : > { %1848 = vmatpush2.bf16.msra.mxu1 %v11286_v47  ;;  %1776 = vmatprep.subr.bf16.mxu0 %v11287_v49  ;;  %v478_v47 = vld [vmem:[%s12231_s30 + $0xb0] sm:$0xff] }
  0x3b   : > { %1849 = vmatprep.subr.bf16.mxu1 %v11289_v51  ;;  %v11355_v49 = vld [vmem:[%s15478_s2 + $0x424] ss:$16 sps:$4 sm:$0xff]   ;;  %v12414_v51 = vcombine.high %v474_v44, %v477_v45 }
  0x3d   : > { %1777 = vmatpush2.bf16.msra.mxu0 %v11291_v52  ;;  %v12416_v52 = vcombine.high %v475_v46, %v478_v47 }
  0x3e   : > { %1850 = vmatpush2.bf16.msra.mxu1 %v11292_v53  ;;  %1778 = vmatprep.subr.bf16.mxu0 %v11293_v54  ;;  %v11358_v53 = vld [vmem:[%s15478_s2 + $0x2c] ss:$16 sps:$4 sm:$0xff]   ;;  %v11353_v54 = vld [vmem:[%s15478_s2 + $0x420] ss:$16 sps:$4 sm:$0xff]  }
  0x3f   : > { %1851 = vmatprep.subr.bf16.mxu1 %v11295_v55  ;;  %v11356_v55 = vld [vmem:[%s15478_s2 + $0x28] ss:$16 sps:$4 sm:$0xff]  }
  0x41   : > { %1779 = vmatpush2.bf16.msra.mxu0 %v11297_v56  ;;  %v12429_v56 = vcombine.low %v474_v44, %v477_v45  ;;  %v11428_v44 = vld [vmem:[%s15478_s2 + $0x2e8] ss:$16 sps:$4 sm:$0xff]  }
  0x42   : > { %1852 = vmatpush2.bf16.msra.mxu1 %v11298_v57  ;;  %1780 = vmatprep.subr.bf16.mxu0 %v11299_v58  ;;  %v12431_v57 = vcombine.low %v475_v46, %v478_v47  ;;  %v11361_v58 = vld [vmem:[%s15478_s2 + $0x404] ss:$16 sps:$4 sm:$0xff]   ;;  %v11431_v45 = vld [vmem:[%s15478_s2 + $0x4e8] ss:$16 sps:$4 sm:$0xff]   ;;  %v11436_v46 = vld [vmem:[%s15478_s2 + $0x2cc] ss:$16 sps:$4 sm:$0xff]  }
  0x43   : > { %1853 = vmatprep.subr.bf16.mxu1 %v11301_v59  ;;  %v11364_v59 = vld [vmem:[%s15478_s2 + $0xc] ss:$16 sps:$4 sm:$0xff]  }
  0x44   : > { %15525 = vst [vmem:[#allocation2_spill] sm:$0xff] %v12431_v57  ;;  %v11439_v47 = vld [vmem:[%s15478_s2 + $0x4cc] ss:$16 sps:$4 sm:$0xff]  }
  0x45   : > { %1781 = vmatpush2.bf16.msra.mxu0 %v11303_v60  ;;  %v11359_v60 = vld [vmem:[%s15478_s2 + $0x400] ss:$16 sps:$4 sm:$0xff]  }
  0x46   : > { %1854 = vmatpush2.bf16.msra.mxu1 %v11304_v61  ;;  %1782 = vmatprep.subr.bf16.mxu0 %v11305_v62  ;;  %v11362_v61 = vld [vmem:[%s15478_s2 + $0x8] ss:$16 sps:$4 sm:$0xff]   ;;  %v11367_v62 = vld [vmem:[%s15478_s2 + $0x5e4] ss:$16 sps:$4 sm:$0xff]  }
  0x47   : > { %1855 = vmatprep.subr.bf16.mxu1 %v11307_v63  ;;  %v12451_v63 = vld [vmem:[%s12231_s30 + $0x14] ss:$24 sps:$4 sm:$0xff]  }
  0x49   : > { %1783 = vmatpush2.bf16.msra.mxu0 %v11309_v0  ;;  %v11370_v0 = vld [vmem:[%s15478_s2 + $0x1ec] ss:$16 sps:$4 sm:$0xff]  }
  0x4a   : > { %1856 = vmatpush2.bf16.msra.mxu1 %v11310_v1  ;;  %1898 = vmatprep.subr.bf16.mxu0 %v11319_v2  ;;  %v11365_v1 = vld [vmem:[%s15478_s2 + $0x5e0] ss:$16 sps:$4 sm:$0xff]   ;;  %v11368_v2 = vld [vmem:[%s15478_s2 + $0x1e8] ss:$16 sps:$4 sm:$0xff]  }
  0x4b   : > { %1971 = vmatprep.subr.bf16.mxu1 %v11322_v3  ;;  %v11377_v3 = vld [vmem:[%s15478_s2 + $0x5c4] ss:$16 sps:$4 sm:$0xff]  }
  0x4c   : > { %1785 = vmatmul.mubr.bf16.vlgmr.msra.gmra.mxu0 %v12305_v4 }
  0x4d   : > { %1858 = vmatmul.mubr.bf16.vlgmr.msra.gmra.mxu1 %v11316_v5  ;;  %1899 = vmatpush1.bf16.msra.mxu0 %v11317_v6  ;;  %v11375_v5 = vld [vmem:[%s15478_s2 + $0x5c0] ss:$16 sps:$4 sm:$0xff]   ;;  %v11378_v6 = vld [vmem:[%s15478_s2 + $0x1c8] ss:$16 sps:$4 sm:$0xff]  }
  0x4e   : > { %1972 = vmatpush1.bf16.msra.mxu1 %v11320_v7  ;;  %1900 = vmatprep.subr.bf16.mxu0 %v11325_v8  ;;  %v11383_v7 = vld [vmem:[%s15478_s2 + $0x5a4] ss:$16 sps:$4 sm:$0xff]   ;;  %v11386_v8 = vld [vmem:[%s15478_s2 + $0x1ac] ss:$16 sps:$4 sm:$0xff]  }
  0x4f   : > { %1973 = vmatprep.subr.bf16.mxu1 %v11328_v9  ;;  %1794 = vmatprep.mubr.bf16.mxu0 %v12335_v16  ;;  %v11381_v9 = vld [vmem:[%s15478_s2 + $0x5a0] ss:$16 sps:$4 sm:$0xff]  }
  0x50   : > { %1867 = vmatprep.mubr.bf16.mxu1 %v12345_v21 }
  0x51   : > { %1901 = vmatpush1.bf16.msra.mxu0 %v11323_v10  ;;  %v11384_v10 = vld [vmem:[%s15478_s2 + $0x1a8] ss:$16 sps:$4 sm:$0xff]  }
  0x52   : > { %1974 = vmatpush1.bf16.msra.mxu1 %v11326_v11  ;;  %1902 = vmatprep.subr.bf16.mxu0 %v11331_v12  ;;  %v11393_v11 = vld [vmem:[%s15478_s2 + $0x584] ss:$16 sps:$4 sm:$0xff]   ;;  %v11396_v12 = vld [vmem:[%s15478_s2 + $0x18c] ss:$16 sps:$4 sm:$0xff]  }
  0x53   : > { %1975 = vmatprep.subr.bf16.mxu1 %v11334_v13  ;;  %v11391_v13 = vld [vmem:[%s15478_s2 + $0x580] ss:$16 sps:$4 sm:$0xff]  }
  0x54   : > { %1795 = vmatmul.mubr.bf16.gmra.mxu0 %v12347_v22 }
  0x55   : > { %1868 = vmatmul.mubr.bf16.gmra.mxu1 %v12349_v23  ;;  %1903 = vmatpush1.bf16.msra.mxu0 %v11329_v19  ;;  %v11400_v19 = vld [vmem:[%s15478_s2 + $0x168] ss:$16 sps:$4 sm:$0xff]  }
  0x56   : > { %1976 = vmatpush1.bf16.msra.mxu1 %v11332_v20  ;;  %1904 = vmatprep.subr.bf16.mxu0 %v11337_v24  ;;  %v11409_v20 = vld [vmem:[%s15478_s2 + $0x544] ss:$16 sps:$4 sm:$0xff]   ;;  %v11412_v24 = vld [vmem:[%s15478_s2 + $0x14c] ss:$16 sps:$4 sm:$0xff]  }
  0x57   : > { %1977 = vmatprep.subr.bf16.mxu1 %v11340_v25  ;;  %1804 = vmatprep.mubr.bf16.mxu0 %v12376_v33  ;;  %v11407_v25 = vld [vmem:[%s15478_s2 + $0x540] ss:$16 sps:$4 sm:$0xff]  }
  0x58   : > { %1877 = vmatprep.mubr.bf16.mxu1 %v12379_v35 }
  0x59   : > { %1905 = vmatpush1.bf16.msra.mxu0 %v11335_v26  ;;  %v11410_v26 = vld [vmem:[%s15478_s2 + $0x148] ss:$16 sps:$4 sm:$0xff]  }
  0x5a   : > { %1978 = vmatpush1.bf16.msra.mxu1 %v11338_v27  ;;  %1906 = vmatprep.subr.bf16.mxu0 %v11343_v28  ;;  %v11415_v27 = vld [vmem:[%s15478_s2 + $0x524] ss:$16 sps:$4 sm:$0xff]   ;;  %v11418_v28 = vld [vmem:[%s15478_s2 + $0x12c] ss:$16 sps:$4 sm:$0xff]  }
  0x5b   : > { %1979 = vmatprep.subr.bf16.mxu1 %v11346_v29  ;;  %v11413_v29 = vld [vmem:[%s15478_s2 + $0x520] ss:$16 sps:$4 sm:$0xff]  }
  0x5c   : > { %1805 = vmatmul.mubr.bf16.gmra.mxu0 %v12388_v38 }
  0x5d   : > { %1878 = vmatmul.mubr.bf16.gmra.mxu1 %v12390_v39  ;;  %1907 = vmatpush1.bf16.msra.mxu0 %v11341_v36  ;;  %v11422_v36 = vld [vmem:[%s15478_s2 + $0x108] ss:$16 sps:$4 sm:$0xff]  }
  0x5e   : > { %1980 = vmatpush1.bf16.msra.mxu1 %v11344_v37  ;;  %1908 = vmatprep.subr.bf16.mxu0 %v11349_v40  ;;  %v12549_v37 = vld [vmem:[%s12231_s30 + $0x10] ss:$24 sps:$4 sm:$0xff]   ;;  %v11430_v40 = vld [vmem:[%s15478_s2 + $0x2ec] ss:$16 sps:$4 sm:$0xff]  }
  0x5f   : > { %1981 = vmatprep.subr.bf16.mxu1 %v11352_v41  ;;  %1814 = vmatprep.mubr.bf16.mxu0 %v12414_v51  ;;  %v11433_v41 = vld [vmem:[%s15478_s2 + $0x4ec] ss:$16 sps:$4 sm:$0xff]  }
  0x60   : > { %1887 = vmatprep.mubr.bf16.mxu1 %v12416_v52 }
  0x61   : > { %1909 = vmatpush1.bf16.msra.mxu0 %v11347_v42  ;;  %v464_v42 = vld [vmem:[%s12231_s30 + $0x40] sm:$0xff] }
  0x62   : > { %1982 = vmatpush1.bf16.msra.mxu1 %v11350_v43  ;;  %1910 = vmatprep.subr.bf16.mxu0 %v11355_v49  ;;  %v467_v43 = vld [vmem:[%s12231_s30 + $0x58] sm:$0xff] }
  0x63   : > { %1983 = vmatprep.subr.bf16.mxu1 %v11358_v53  ;;  %v12571_v49 = vcombine.high %v464_v42, %v467_v43  ;;  %v11434_v53 = vld [vmem:[%s15478_s2 + $0x2c8] ss:$16 sps:$4 sm:$0xff]  }
  0x64   : > { %1815 = vmatmul.mubr.bf16.gmra.mxu0 %v12429_v56 }
  0x65   : > { %1888 = vmatmul.mubr.bf16.gmra.mxu1 %v12431_v57  ;;  %1911 = vmatpush1.bf16.msra.mxu0 %v11353_v54  ;;  %v11437_v54 = vld [vmem:[%s15478_s2 + $0x4c8] ss:$16 sps:$4 sm:$0xff]  }
  0x66   : > { %1984 = vmatpush1.bf16.msra.mxu1 %v11356_v55  ;;  %1912 = vmatprep.subr.bf16.mxu0 %v11361_v58  ;;  %v11444_v55 = vld [vmem:[%s15478_s2 + $0x2ac] ss:$16 sps:$4 sm:$0xff]   ;;  %v470_v58 = vld [vmem:[%s12231_s30 + $0x70] sm:$0xff] }
  0x67   : > { %1985 = vmatprep.subr.bf16.mxu1 %v11364_v59  ;;  %1930 = vmatprep.mubr.bf16.mxu0 %v12451_v63  ;;  %v12590_v59 = vcombine.low %v464_v42, %v467_v43  ;;  %v11499_v42 = vld [vmem:[%s15478_s2 + $0x5ac] ss:$16 sps:$4 sm:$0xff]   ;;  %v11494_v43 = vld [vmem:[%s15478_s2 + $0x3a8] ss:$16 sps:$4 sm:$0xff]  }
  0x68   : > { %2003 = vmatprep.mubr.bf16.mxu1 %v12243_v48  ;;  %v11380_v48 = vld [vmem:[%s15478_s2 + $0x1cc] ss:$16 sps:$4 sm:$0xff]  }
  0x69   : > { %1913 = vmatpush1.bf16.msra.mxu0 %v11359_v60  ;;  %15526 = vst [vmem:[#allocation3_spill] sm:$0xff] %v12590_v59  ;;  %v473_v60 = vld [vmem:[%s12231_s30 + $0x88] sm:$0xff] }
  0x6a   : > { %1986 = vmatpush1.bf16.msra.mxu1 %v11362_v61  ;;  %1914 = vmatprep.subr.bf16.mxu0 %v11367_v62  ;;  %v11442_v61 = vld [vmem:[%s15478_s2 + $0x2a8] ss:$16 sps:$4 sm:$0xff]  }
  0x6b   : > { %1987 = vmatprep.subr.bf16.mxu1 %v11370_v0  ;;  %v11445_v62 = vld [vmem:[%s15478_s2 + $0x4a8] ss:$16 sps:$4 sm:$0xff]   ;;  %v11450_v0 = vld [vmem:[%s15478_s2 + $0x28c] ss:$16 sps:$4 sm:$0xff]  }
  0x6d   : > { %1915 = vmatpush2.bf16.msra.mxu0 %v11365_v1  ;;  %v11453_v1 = vld [vmem:[%s15478_s2 + $0x48c] ss:$16 sps:$4 sm:$0xff]  }
  0x6e   : > { %1988 = vmatpush2.bf16.msra.mxu1 %v11368_v2  ;;  %1916 = vmatprep.subr.bf16.mxu0 %v11377_v3  ;;  %v11448_v2 = vld [vmem:[%s15478_s2 + $0x288] ss:$16 sps:$4 sm:$0xff]   ;;  %v12608_v3 = vcombine.high %v470_v58, %v473_v60 }
  0x6f   : > { %1989 = vmatprep.subr.bf16.mxu1 %v11380_v48  ;;  %v11451_v48 = vld [vmem:[%s15478_s2 + $0x488] ss:$16 sps:$4 sm:$0xff]  }
  0x71   : > { %1917 = vmatpush2.bf16.msra.mxu0 %v11375_v5  ;;  %v11458_v5 = vld [vmem:[%s15478_s2 + $0x26c] ss:$16 sps:$4 sm:$0xff]  }
  0x72   : > { %1990 = vmatpush2.bf16.msra.mxu1 %v11378_v6  ;;  %1918 = vmatprep.subr.bf16.mxu0 %v11383_v7  ;;  %v11461_v6 = vld [vmem:[%s15478_s2 + $0x46c] ss:$16 sps:$4 sm:$0xff]   ;;  %v11456_v7 = vld [vmem:[%s15478_s2 + $0x268] ss:$16 sps:$4 sm:$0xff]  }
  0x73   : > { %1991 = vmatprep.subr.bf16.mxu1 %v11386_v8  ;;  %v11459_v8 = vld [vmem:[%s15478_s2 + $0x468] ss:$16 sps:$4 sm:$0xff]  }
  0x75   : > { %1919 = vmatpush2.bf16.msra.mxu0 %v11381_v9  ;;  %v476_v9 = vld [vmem:[%s12231_s30 + $0xa0] sm:$0xff] }
  0x76   : > { %1992 = vmatpush2.bf16.msra.mxu1 %v11384_v10  ;;  %1920 = vmatprep.subr.bf16.mxu0 %v11393_v11  ;;  %v12630_v10 = vcombine.low %v470_v58, %v473_v60  ;;  %v479_v11 = vld [vmem:[%s12231_s30 + $0xb8] sm:$0xff] }
  0x77   : > { %1993 = vmatprep.subr.bf16.mxu1 %v11396_v12  ;;  %v11464_v12 = vld [vmem:[%s15478_s2 + $0x24c] ss:$16 sps:$4 sm:$0xff]   ;;  %v11509_v58 = vld [vmem:[%s15478_s2 + $0x568] ss:$16 sps:$4 sm:$0xff]  }
  0x78   : > { %v11514_v60 = vld [vmem:[%s15478_s2 + $0x34c] ss:$16 sps:$4 sm:$0xff]  }
  0x79   : > { %1921 = vmatpush2.bf16.msra.mxu0 %v11391_v13  ;;  %v11467_v13 = vld [vmem:[%s15478_s2 + $0x44c] ss:$16 sps:$4 sm:$0xff]  }
  0x7a   : > { %1994 = vmatpush2.bf16.msra.mxu1 %v11394_v14  ;;  %1922 = vmatprep.subr.bf16.mxu0 %v11399_v15  ;;  %v11462_v14 = vld [vmem:[%s15478_s2 + $0x248] ss:$16 sps:$4 sm:$0xff]   ;;  %v12642_v15 = vcombine.high %v476_v9, %v479_v11 }
  0x7b   : > { %1995 = vmatprep.subr.bf16.mxu1 %v11402_v17  ;;  %v11465_v17 = vld [vmem:[%s15478_s2 + $0x448] ss:$16 sps:$4 sm:$0xff]  }
  0x7c   : > { %15527 = vst [vmem:[#allocation4_spill] sm:$0xff] %v12642_v15 }
  0x7d   : > { %1923 = vmatpush2.bf16.msra.mxu0 %v11397_v18  ;;  %v11472_v18 = vld [vmem:[%s15478_s2 + $0x22c] ss:$16 sps:$4 sm:$0xff]  }
  0x7e   : > { %1996 = vmatpush2.bf16.msra.mxu1 %v11400_v19  ;;  %1924 = vmatprep.subr.bf16.mxu0 %v11409_v20  ;;  %v11475_v19 = vld [vmem:[%s15478_s2 + $0x42c] ss:$16 sps:$4 sm:$0xff]   ;;  %v11470_v20 = vld [vmem:[%s15478_s2 + $0x228] ss:$16 sps:$4 sm:$0xff]  }
  0x7f   : > { %1997 = vmatprep.subr.bf16.mxu1 %v11412_v24  ;;  %v12660_v24 = vcombine.low %v476_v9, %v479_v11  ;;  %v11527_v9 = vld [vmem:[%s15478_s2 + $0x508] ss:$16 sps:$4 sm:$0xff]  }
  0x80   : > { %v11530_v11 = vld [vmem:[%s15479_s3 + $0x78] sm:$0xff]  }
  0x81   : > { %1925 = vmatpush2.bf16.msra.mxu0 %v11407_v25  ;;  %15528 = vst [vmem:[#allocation5_spill] sm:$0xff] %v12660_v24  ;;  %v11473_v25 = vld [vmem:[%s15478_s2 + $0x428] ss:$16 sps:$4 sm:$0xff]  }
  0x82   : > { %1998 = vmatpush2.bf16.msra.mxu1 %v11410_v26  ;;  %1926 = vmatprep.subr.bf16.mxu0 %v11415_v27  ;;  %v11478_v26 = vld [vmem:[%s15478_s2 + $0x20c] ss:$16 sps:$4 sm:$0xff]  }
  0x83   : > { %1999 = vmatprep.subr.bf16.mxu1 %v11418_v28  ;;  %v11481_v27 = vld [vmem:[%s15478_s2 + $0x40c] ss:$16 sps:$4 sm:$0xff]   ;;  %v11476_v28 = vld [vmem:[%s15478_s2 + $0x208] ss:$16 sps:$4 sm:$0xff]  }
  0x85   : > { %1927 = vmatpush2.bf16.msra.mxu0 %v11413_v29  ;;  %v11479_v29 = vld [vmem:[%s15478_s2 + $0x408] ss:$16 sps:$4 sm:$0xff]  }
  0x86   : > { %2000 = vmatpush2.bf16.msra.mxu1 %v11416_v30  ;;  %1928 = vmatprep.subr.bf16.mxu0 %v11421_v31  ;;  %v11484_v30 = vld [vmem:[%s15478_s2 + $0x3ec] ss:$16 sps:$4 sm:$0xff]  }
  0x87   : > { %2001 = vmatprep.subr.bf16.mxu1 %v11424_v32  ;;  %v11487_v31 = vld [vmem:[%s15478_s2 + $0x5ec] ss:$16 sps:$4 sm:$0xff]   ;;  %v11482_v32 = vld [vmem:[%s15478_s2 + $0x3e8] ss:$16 sps:$4 sm:$0xff]  }
  0x89   : > { %1929 = vmatpush2.bf16.msra.mxu0 %v11419_v34  ;;  %v11485_v34 = vld [vmem:[%s15478_s2 + $0x5e8] ss:$16 sps:$4 sm:$0xff]  }
  0x8a   : > { %2002 = vmatpush2.bf16.msra.mxu1 %v11422_v36  ;;  %2044 = vmatprep.subr.bf16.mxu0 %v11430_v40  ;;  %v11490_v36 = vld [vmem:[%s15478_s2 + $0x3cc] ss:$16 sps:$4 sm:$0xff]  }
  0x8b   : > { %2117 = vmatprep.subr.bf16.mxu1 %v11433_v41  ;;  %v11493_v40 = vld [vmem:[%s15478_s2 + $0x5cc] ss:$16 sps:$4 sm:$0xff]  }
  0x8c   : > { %1931 = vmatmul.mubr.bf16.vlgmr.msra.gmra.mxu0 %v12549_v37  ;;  %v11496_v41 = vld [vmem:[%s15478_s2 + $0x3ac] ss:$16 sps:$4 sm:$0xff]  }
  0x8d   : > { %2004 = vmatmul.mubr.bf16.vlgmr.msra.gmra.mxu1 %v12305_v4  ;;  %2045 = vmatpush1.bf16.msra.mxu0 %v11428_v44  ;;  %v11447_v4 = vld [vmem:[%s15478_s2 + $0x4ac] ss:$16 sps:$4 sm:$0xff]   ;;  %v11497_v44 = vld [vmem:[%s15478_s2 + $0x5a8] ss:$16 sps:$4 sm:$0xff]  }
  0x8e   : > { %2118 = vmatpush1.bf16.msra.mxu1 %v11431_v45  ;;  %2046 = vmatprep.subr.bf16.mxu0 %v11436_v46  ;;  %v11502_v45 = vld [vmem:[%s15478_s2 + $0x38c] ss:$16 sps:$4 sm:$0xff]  }
  0x8f   : > { %2119 = vmatprep.subr.bf16.mxu1 %v11439_v47  ;;  %1940 = vmatprep.mubr.bf16.mxu0 %v12571_v49  ;;  %v11505_v46 = vld [vmem:[%s15478_s2 + $0x58c] ss:$16 sps:$4 sm:$0xff]   ;;  %v11500_v47 = vld [vmem:[%s15478_s2 + $0x388] ss:$16 sps:$4 sm:$0xff]  }
  0x90   : > { %2013 = vmatprep.mubr.bf16.mxu1 %v12335_v16 }
  0x91   : > { %2047 = vmatpush1.bf16.msra.mxu0 %v11434_v53  ;;  %v11503_v53 = vld [vmem:[%s15478_s2 + $0x588] ss:$16 sps:$4 sm:$0xff]  }
  0x92   : > { %2120 = vmatpush1.bf16.msra.mxu1 %v11437_v54  ;;  %2048 = vmatprep.subr.bf16.mxu0 %v11444_v55  ;;  %v11508_v54 = vld [vmem:[%s15478_s2 + $0x36c] ss:$16 sps:$4 sm:$0xff]  }
  0x93   : > { %2121 = vmatprep.subr.bf16.mxu1 %v11447_v4  ;;  %v11511_v55 = vld [vmem:[%s15478_s2 + $0x56c] ss:$16 sps:$4 sm:$0xff]   ;;  %v11506_v4 = vld [vmem:[%s15478_s2 + $0x368] ss:$16 sps:$4 sm:$0xff]  }
  0x94   : > { %1941 = vmatmul.mubr.bf16.gmra.mxu0 %v12590_v59 }
  0x95   : > { %2014 = vmatmul.mubr.bf16.gmra.mxu1 %v12347_v22  ;;  %2049 = vmatpush1.bf16.msra.mxu0 %v11442_v61  ;;  %v11517_v61 = vld [vmem:[%s15478_s2 + $0x54c] ss:$16 sps:$4 sm:$0xff]  }
  0x96   : > { %2122 = vmatpush1.bf16.msra.mxu1 %v11445_v62  ;;  %2050 = vmatprep.subr.bf16.mxu0 %v11450_v0  ;;  %v11512_v62 = vld [vmem:[%s15478_s2 + $0x348] ss:$16 sps:$4 sm:$0xff]  }
  0x97   : > { %2123 = vmatprep.subr.bf16.mxu1 %v11453_v1  ;;  %1950 = vmatprep.mubr.bf16.mxu0 %v12608_v3  ;;  %v11515_v0 = vld [vmem:[%s15478_s2 + $0x548] ss:$16 sps:$4 sm:$0xff]   ;;  %v11520_v1 = vld [vmem:[%s15478_s2 + $0x32c] ss:$16 sps:$4 sm:$0xff]  }
  0x98   : > { %2023 = vmatprep.mubr.bf16.mxu1 %v12376_v33 }
  0x99   : > { %2051 = vmatpush1.bf16.msra.mxu0 %v11448_v2  ;;  %v11523_v2 = vld [vmem:[%s15478_s2 + $0x52c] ss:$16 sps:$4 sm:$0xff]  }
  0x9a   : > { %2124 = vmatpush1.bf16.msra.mxu1 %v11451_v48  ;;  %2052 = vmatprep.subr.bf16.mxu0 %v11458_v5  ;;  %v11518_v48 = vld [vmem:[%s15478_s2 + $0x328] ss:$16 sps:$4 sm:$0xff]  }
  0x9b   : > { %2125 = vmatprep.subr.bf16.mxu1 %v11461_v6  ;;  %v11521_v5 = vld [vmem:[%s15478_s2 + $0x528] ss:$16 sps:$4 sm:$0xff]   ;;  %v11526_v6 = vld [vmem:[%s15478_s2 + $0x30c] ss:$16 sps:$4 sm:$0xff]  }
  0x9c   : > { %1951 = vmatmul.mubr.bf16.gmra.mxu0 %v12630_v10 }
  0x9d   : > { %2024 = vmatmul.mubr.bf16.gmra.mxu1 %v12388_v38  ;;  %2053 = vmatpush1.bf16.msra.mxu0 %v11456_v7  ;;  %v11529_v7 = vld [vmem:[%s15478_s2 + $0x50c] ss:$16 sps:$4 sm:$0xff]  }
  0x9e   : > { %2126 = vmatpush1.bf16.msra.mxu1 %v11459_v8  ;;  %2054 = vmatprep.subr.bf16.mxu0 %v11464_v12  ;;  %v11524_v8 = vld [vmem:[%s15478_s2 + $0x308] ss:$16 sps:$4 sm:$0xff]  }
  0x9f   : > { %2127 = vmatprep.subr.bf16.mxu1 %v11467_v13  ;;  %1960 = vmatprep.mubr.bf16.mxu0 %v12642_v15  ;;  %v11531_v12 = vld [vmem:[%s15479_s3 + $0xf8] sm:$0xff]  }
  0xa0   : > { %2033 = vmatprep.mubr.bf16.mxu1 %v12414_v51  ;;  %v11532_v13 = vld [vmem:[%s15479_s3 + $0x38] sm:$0xff]  }
  0xa1   : > { %2055 = vmatpush1.bf16.msra.mxu0 %v11462_v14  ;;  %v11533_v14 = vld [vmem:[%s15479_s3 + $0xb8] sm:$0xff]  }
  0xa2   : > { %2128 = vmatpush1.bf16.msra.mxu1 %v11465_v17  ;;  %2056 = vmatprep.subr.bf16.mxu0 %v11472_v18  ;;  %v11534_v17 = vld [vmem:[%s15479_s3 + $0x70] sm:$0xff]  }
  0xa3   : > { %2129 = vmatprep.subr.bf16.mxu1 %v11475_v19  ;;  %v11535_v18 = vld [vmem:[%s15479_s3 + $0xf0] sm:$0xff]  }
  0xa4   : > { %1961 = vmatmul.mubr.bf16.gmra.mxu0 %v12660_v24  ;;  %v11536_v19 = vld [vmem:[%s15479_s3 + $0x30] sm:$0xff]  }
  0xa5   : > { %2034 = vmatmul.mubr.bf16.gmra.mxu1 %v12429_v56  ;;  %2057 = vmatpush1.bf16.msra.mxu0 %v11470_v20  ;;  %v12799_v20 = vld [vmem:[%s12231_s30 + $0x8] ss:$24 sps:$4 sm:$0xff]  }
  0xa6   : > { %2130 = vmatpush1.bf16.msra.mxu1 %v11473_v25  ;;  %2058 = vmatprep.subr.bf16.mxu0 %v11478_v26  ;;  %v11537_v25 = vld [vmem:[%s15479_s3 + $0xb0] sm:$0xff]   ;;  %v11538_v26 = vld [vmem:[%s15479_s3 + $0x68] sm:$0xff]  }
  0xa7   : > { %2131 = vmatprep.subr.bf16.mxu1 %v11481_v27  ;;  %2076 = vmatprep.mubr.bf16.mxu0 %v12249_v50  ;;  %v11488_v50 = vld [vmem:[%s15478_s2 + $0x3c8] ss:$16 sps:$4 sm:$0xff]  }
  0xa8   : > { %2149 = vmatprep.mubr.bf16.mxu1 %v12451_v63  ;;  %v11491_v63 = vld [vmem:[%s15478_s2 + $0x5c8] ss:$16 sps:$4 sm:$0xff]  }
  0xa9   : > { %2059 = vmatpush1.bf16.msra.mxu0 %v11476_v28  ;;  %v11539_v27 = vld [vmem:[%s15479_s3 + $0xe8] sm:$0xff]  }
  0xaa   : > { %2132 = vmatpush1.bf16.msra.mxu1 %v11479_v29  ;;  %2060 = vmatprep.subr.bf16.mxu0 %v11484_v30  ;;  %v11541_v28 = vld [vmem:[%s15479_s3 + $0xa8] sm:$0xff]   ;;  %v11542_v29 = vld [vmem:[%s15479_s3 + $0x60] sm:$0xff]  }
  0xab   : > { %2133 = vmatprep.subr.bf16.mxu1 %v11487_v31  ;;  %v11543_v30 = vld [vmem:[%s15479_s3 + $0xe0] sm:$0xff]  }
  0xac   : > { %v11544_v31 = vld [vmem:[%s15479_s3 + $0x20] sm:$0xff]  }
  0xad   : > { %2061 = vmatpush2.bf16.msra.mxu0 %v11482_v32  ;;  %v11545_v32 = vld [vmem:[%s15479_s3 + $0xa0] sm:$0xff]  }
  0xae   : > { %2134 = vmatpush2.bf16.msra.mxu1 %v11485_v34  ;;  %2062 = vmatprep.subr.bf16.mxu0 %v11490_v36  ;;  %v11546_v34 = vld [vmem:[%s15479_s3 + $0x58] sm:$0xff]  }
  0xaf   : > { %2135 = vmatprep.subr.bf16.mxu1 %v11493_v40  ;;  %v11547_v36 = vld [vmem:[%s15479_s3 + $0xd8] sm:$0xff]  }
  0xb0   : > { %v11548_v40 = vld [vmem:[%s15479_s3 + $0x18] sm:$0xff]  }
  0xb1   : > { %2063 = vmatpush2.bf16.msra.mxu0 %v11488_v50  ;;  %v11549_v50 = vld [vmem:[%s15479_s3 + $0x98] sm:$0xff]  }
  0xb2   : > { %2136 = vmatpush2.bf16.msra.mxu1 %v11491_v63  ;;  %2064 = vmatprep.subr.bf16.mxu0 %v11496_v41  ;;  %v11550_v63 = vld [vmem:[%s15479_s3 + $0x50] sm:$0xff]  }
  0xb3   : > { %2137 = vmatprep.subr.bf16.mxu1 %v11499_v42  ;;  %v11551_v41 = vld [vmem:[%s15479_s3 + $0xd0] sm:$0xff]  }
  0xb4   : > { %v11552_v42 = vld [vmem:[%s15479_s3 + $0x10] sm:$0xff]  }
  0xb5   : > { %2065 = vmatpush2.bf16.msra.mxu0 %v11494_v43  ;;  %v11553_v43 = vld [vmem:[%s15479_s3 + $0x90] sm:$0xff]  }
  0xb6   : > { %2138 = vmatpush2.bf16.msra.mxu1 %v11497_v44  ;;  %2066 = vmatprep.subr.bf16.mxu0 %v11502_v45  ;;  %v11554_v44 = vld [vmem:[%s15479_s3 + $0x48] sm:$0xff]  }
  0xb7   : > { %2139 = vmatprep.subr.bf16.mxu1 %v11505_v46  ;;  %v11555_v45 = vld [vmem:[%s15479_s3 + $0xc8] sm:$0xff]  }
  0xb8   : > { %v11556_v46 = vld [vmem:[%s15479_s3 + $0x8] sm:$0xff]  }
  0xb9   : > { %2067 = vmatpush2.bf16.msra.mxu0 %v11500_v47  ;;  %v11557_v47 = vld [vmem:[%s15479_s3 + $0x88] sm:$0xff]  }
  0xba   : > { %2140 = vmatpush2.bf16.msra.mxu1 %v11503_v53  ;;  %2068 = vmatprep.subr.bf16.mxu0 %v11508_v54  ;;  %v11558_v53 = vld [vmem:[%s15479_s3 + $0x40] sm:$0xff]  }
  0xbb   : > { %2141 = vmatprep.subr.bf16.mxu1 %v11511_v55  ;;  %v11559_v54 = vld [vmem:[%s15479_s3 + $0xc0] sm:$0xff]  }
  0xbc   : > { %v11560_v55 = vld [vmem:[%s15479_s3] sm:$0xff]  }
  0xbd   : > { %2069 = vmatpush2.bf16.msra.mxu0 %v11506_v4  ;;  %v11561_v4 = vld [vmem:[%s15479_s3 + $0x80] sm:$0xff]  }
  0xbe   : > { %2142 = vmatpush2.bf16.msra.mxu1 %v11509_v58  ;;  %2070 = vmatprep.subr.bf16.mxu0 %v11514_v60  ;;  %v11562_v58 = vld [vmem:[%s15479_s3 + $0x178] sm:$0xff]  }
  0xbf   : > { %2143 = vmatprep.subr.bf16.mxu1 %v11517_v61  ;;  %v11563_v60 = vld [vmem:[%s15479_s3 + $0x1f8] sm:$0xff]   ;;  %v15490_v61 = vmov 0  }
  0xc1   : > { %2071 = vmatpush2.bf16.msra.mxu0 %v11512_v62  ;;  %v11564_v62 = vld [vmem:[%s15479_s3 + $0x138] sm:$0xff]  }
  0xc2   : > { %2144 = vmatpush2.bf16.msra.mxu1 %v11515_v0  ;;  %2072 = vmatprep.subr.bf16.mxu0 %v11520_v1  ;;  %v11565_v0 = vld [vmem:[%s15479_s3 + $0x1b8] sm:$0xff]   ;;  %v11566_v1 = vld [vmem:[%s15479_s3 + $0x170] sm:$0xff]  }
  0xc3   : > { %2145 = vmatprep.subr.bf16.mxu1 %v11523_v2  ;;  %v11567_v2 = vld [vmem:[%s15479_s3 + $0x1f0] sm:$0xff]  }
  0xc5   : > { %2073 = vmatpush2.bf16.msra.mxu0 %v11518_v48  ;;  %v11568_v48 = vld [vmem:[%s15479_s3 + $0x130] sm:$0xff]  }
  0xc6   : > { %2146 = vmatpush2.bf16.msra.mxu1 %v11521_v5  ;;  %2074 = vmatprep.subr.bf16.mxu0 %v11526_v6  ;;  %v11569_v5 = vld [vmem:[%s15479_s3 + $0x1b0] sm:$0xff]   ;;  %v11570_v6 = vld [vmem:[%s15479_s3 + $0x168] sm:$0xff]  }
  0xc7   : > { %2147 = vmatprep.subr.bf16.mxu1 %v11529_v7  ;;  %v11571_v7 = vld [vmem:[%s15479_s3 + $0x1e8] sm:$0xff]  }
  0xc9   : > { %2075 = vmatpush2.bf16.msra.mxu0 %v11524_v8  ;;  %v11572_v8 = vld [vmem:[%s15479_s3 + $0x128] sm:$0xff]  }
  0xca   : > { %2148 = vmatpush2.bf16.msra.mxu1 %v11527_v9  ;;  %10029 = vmatprep.subr.bf16.mxu0 %v11530_v11  ;;  %v11573_v9 = vld [vmem:[%s15479_s3 + $0x1a8] sm:$0xff]   ;;  %v11574_v11 = vld [vmem:[%s15479_s3 + $0x160] sm:$0xff]  }
  0xcb   : > { %10069 = vmatprep.subr.bf16.mxu1 %v11531_v12  ;;  %v11575_v12 = vld [vmem:[%s15479_s3 + $0x1e0] sm:$0xff]  }
  0xcc   : > { %2077 = vmatmul.mubr.bf16.vlgmr.msra.gmra.mxu0 %v12799_v20 }
  0xcd   : > { %2150 = vmatmul.mubr.bf16.vlgmr.msra.gmra.mxu1 %v12549_v37  ;;  %10030 = vmatpush3.bf16.msra.mxu0 %v11532_v13  ;;  %v11540_v37 = vld [vmem:[%s15479_s3 + $0x28] sm:$0xff]   ;;  %v11576_v13 = vld [vmem:[%s15479_s3 + $0x120] sm:$0xff]  }
  0xce   : > { %10070 = vmatpush3.bf16.msra.mxu1 %v11533_v14  ;;  %10031 = vmatprep.subr.bf16.mxu0 %v11534_v17  ;;  %v11577_v14 = vld [vmem:[%s15479_s3 + $0x1a0] sm:$0xff]   ;;  %v11578_v17 = vld [vmem:[%s15479_s3 + $0x158] sm:$0xff]  }
  0xcf   : > { %10071 = vmatprep.subr.bf16.mxu1 %v11535_v18  ;;  %2086 = vmatprep.mubr.bf16.mxu0 %v12345_v21  ;;  %v11579_v18 = vld [vmem:[%s15479_s3 + $0x1d8] sm:$0xff]  }
  0xd0   : > { %2159 = vmatprep.mubr.bf16.mxu1 %v12571_v49 }
  0xd1   : > { %10032 = vmatpush3.bf16.msra.mxu0 %v11536_v19  ;;  %v11580_v19 = vld [vmem:[%s15479_s3 + $0x118] sm:$0xff]  }
  0xd2   : > { %10072 = vmatpush3.bf16.msra.mxu1 %v11537_v25  ;;  %10033 = vmatprep.subr.bf16.mxu0 %v11538_v26  ;;  %v11581_v25 = vld [vmem:[%s15479_s3 + $0x198] sm:$0xff]   ;;  %v11582_v26 = vld [vmem:[%s15479_s3 + $0x150] sm:$0xff]  }
  0xd3   : > { %10073 = vmatprep.subr.bf16.mxu1 %v11539_v27  ;;  %v11583_v27 = vld [vmem:[%s15479_s3 + $0x1d0] sm:$0xff]  }
  0xd4   : > { %2087 = vmatmul.mubr.bf16.gmra.mxu0 %v12349_v23 }
  0xd5   : > { %2160 = vmatmul.mubr.bf16.gmra.mxu1 %v12590_v59  ;;  %10034 = vmatpush3.bf16.msra.mxu0 %v11540_v37  ;;  %v12967_v37 = vld [vmem:[%s12231_s30 + $0x4] ss:$24 sps:$4 sm:$0xff]  }
  0xd6   : > { %10074 = vmatpush3.bf16.msra.mxu1 %v11541_v28  ;;  %10035 = vmatprep.subr.bf16.mxu0 %v11542_v29  ;;  %v12970_v28 = vrot.slane %v12967_v37, 5  ;;  %v11584_v29 = vld [vmem:[%s15479_s3 + $0x110] sm:$0xff]  }
  0xd7   : > { %10075 = vmatprep.subr.bf16.mxu1 %v11543_v30  ;;  %2096 = vmatprep.mubr.bf16.mxu0 %v12379_v35  ;;  %v11585_v30 = vld [vmem:[%s15479_s3 + $0x190] sm:$0xff]  }
  0xd8   : > { %2169 = vmatprep.mubr.bf16.mxu1 %v12608_v3 }
  0xd9   : > { %10036 = vmatpush3.bf16.msra.mxu0 %v11544_v31  ;;  %v12979_v31 = vld [vmem:[%s12231_s30 + $0xc] ss:$24 sps:$4 sm:$0xff]  }
  0xda   : > { %10076 = vmatpush3.bf16.msra.mxu1 %v11545_v32  ;;  %10037 = vmatprep.subr.bf16.mxu0 %v11546_v34  ;;  %v12982_v32 = vrot.slane %v12979_v31, 5  ;;  %v13744_v34 = vld [vmem:[%s15480_s4 + $0x2] ss:$0 sm:$0xff] }
  0xdb   : > { %10077 = vmatprep.subr.bf16.mxu1 %v11547_v36  ;;  %v11586_v36 = vld [vmem:[%s15479_s3 + $0x148] sm:$0xff]  }
  0xdc   : > { %2097 = vmatmul.mubr.bf16.gmra.mxu0 %v12390_v39 }
  0xdd   : > { %2170 = vmatmul.mubr.bf16.gmra.mxu1 %v12630_v10  ;;  %10038 = vmatpush3.bf16.msra.mxu0 %v11548_v40  ;;  %v11587_v40 = vld [vmem:[%s15479_s3 + $0x1c8] sm:$0xff]  }
  0xde   : > { %10078 = vmatpush3.bf16.msra.mxu1 %v11549_v50  ;;  %10039 = vmatprep.subr.bf16.mxu0 %v11550_v63  ;;  %v13004_v50 = vld [vmem:[%s12231_s30] ss:$24 sps:$4 sm:$0xff]  }
  0xdf   : > { %10079 = vmatprep.subr.bf16.mxu1 %v11551_v41  ;;  %2106 = vmatprep.mubr.bf16.mxu0 %v12416_v52  ;;  %v13007_v63 = vrot.slane %v13004_v50, 5  ;;  %v11588_v41 = vld [vmem:[%s15479_s3 + $0x108] sm:$0xff]  }
  0xe0   : > { %2179 = vmatprep.mubr.bf16.mxu1 %v12642_v15 }
  0xe1   : > { %10040 = vmatpush3.bf16.msra.mxu0 %v11552_v42  ;;  %v13013_v42 = vrot.slane %v12799_v20, 5  ;;  %v11592_v20 = vld [vmem:[%s15479_s3 + $0x100] sm:$0xff]  }
  0xe2   : > { %10080 = vmatpush3.bf16.msra.mxu1 %v11553_v43  ;;  %10041 = vmatprep.subr.bf16.mxu0 %v11554_v44  ;;  %v11589_v43 = vld [vmem:[%s15479_s3 + $0x188] sm:$0xff]   ;;  %v11590_v44 = vld [vmem:[%s15479_s3 + $0x140] sm:$0xff]  }
  0xe3   : > { %10081 = vmatprep.subr.bf16.mxu1 %v11555_v45  ;;  %v11591_v45 = vld [vmem:[%s15479_s3 + $0x1c0] sm:$0xff]  }
  0xe4   : > { %2107 = vmatmul.mubr.bf16.gmra.mxu0 %v12431_v57 }
  0xe5   : > { %2180 = vmatmul.mubr.bf16.gmra.mxu1 %v12660_v24  ;;  %10042 = vmatpush3.bf16.msra.mxu0 %v11556_v46  ;;  %v11593_v46 = vld [vmem:[%s15479_s3 + $0x180] sm:$0xff]  }
  0xe6   : > { %10082 = vmatpush3.bf16.msra.mxu1 %v11557_v47  ;;  %10043 = vmatprep.subr.bf16.mxu0 %v11558_v53  ;;  %v11594_v47 = vld [vmem:[%s15479_s3 + $0x278] sm:$0xff]  }
  0xe7   : > { %10083 = vmatprep.subr.bf16.mxu1 %v11559_v54  ;;  %2737 = vmatprep.mubr.bf16.mxu0 %v15490_v61  ;;  %v11595_v53 = vld [vmem:[%s15479_s3 + $0x2f8] sm:$0xff]  }
  0xe8   : > { %2802 = vmatprep.mubr.bf16.mxu1 %v15490_v61  ;;  %v11596_v54 = vld [vmem:[%s15479_s3 + $0x238] sm:$0xff]  }
  0xe9   : > { %10044 = vmatpush3.bf16.msra.mxu0 %v11560_v55  ;;  %v11597_v55 = vld [vmem:[%s15479_s3 + $0x2b8] sm:$0xff]  }
  0xea   : > { %10084 = vmatpush3.bf16.msra.mxu1 %v11561_v4  ;;  %10109 = vmatprep.subr.bf16.mxu0 %v11562_v58  ;;  %v11598_v4 = vld [vmem:[%s15479_s3 + $0x270] sm:$0xff]  }
  0xeb   : > { %10149 = vmatprep.subr.bf16.mxu1 %v11563_v60  ;;  %v11599_v58 = vld [vmem:[%s15479_s3 + $0x2f0] sm:$0xff]  }
  0xec   : > { %2738 = vmatmul.mubr.bf16.vlgmr.msra.gmra.mxu0 %v15490_v61  ;;  %v11600_v60 = vld [vmem:[%s15479_s3 + $0x230] sm:$0xff]  }
  0xed   : > { %2803 = vmatmul.mubr.bf16.vlgmr.msra.gmra.mxu1 %v15490_v61  ;;  %10110 = vmatpush3.bf16.msra.mxu0 %v11564_v62 }
  0xee   : > { %10150 = vmatpush3.bf16.msra.mxu1 %v11565_v0  ;;  %10111 = vmatprep.subr.bf16.mxu0 %v11566_v1  ;;  %v11601_v1 = vld [vmem:[%s15479_s3 + $0x2b0] sm:$0xff]  }
  0xef   : > { %10151 = vmatprep.subr.bf16.mxu1 %v11567_v2  ;;  %2745 = vmatprep.mubr.bf16.mxu0 %v15490_v61 }
  0xf0   : > { %2810 = vmatprep.mubr.bf16.mxu1 %v15490_v61 }
  0xf1   : > { %10112 = vmatpush3.bf16.msra.mxu0 %v11568_v48  ;;  %v11602_v48 = vld [vmem:[%s15479_s3 + $0x268] sm:$0xff]  }
  0xf2   : > { %10152 = vmatpush3.bf16.msra.mxu1 %v11569_v5  ;;  %10113 = vmatprep.subr.bf16.mxu0 %v11570_v6 }
  0xf3   : > { %10153 = vmatprep.subr.bf16.mxu1 %v11571_v7  ;;  %v11603_v7 = vld [vmem:[%s15479_s3 + $0x2e8] sm:$0xff]  }
  0xf4   : > { %2746 = vmatmul.mubr.bf16.gmra.mxu0 %v15490_v61 }
  0xf5   : > { %2811 = vmatmul.mubr.bf16.gmra.mxu1 %v15490_v61  ;;  %10114 = vmatpush3.bf16.msra.mxu0 %v11572_v8 }
  0xf6   : > { %10154 = vmatpush3.bf16.msra.mxu1 %v11573_v9  ;;  %10115 = vmatprep.subr.bf16.mxu0 %v11574_v11  ;;  %v11604_v9 = vld [vmem:[%s15479_s3 + $0x228] sm:$0xff]  }
  0xf7   : > { %10155 = vmatprep.subr.bf16.mxu1 %v11575_v12  ;;  %2753 = vmatprep.mubr.bf16.mxu0 %v15490_v61 }
  0xf8   : > { %2818 = vmatprep.mubr.bf16.mxu1 %v15490_v61 }
  0xf9   : > { %10116 = vmatpush3.bf16.msra.mxu0 %v11576_v13  ;;  %v11605_v13 = vld [vmem:[%s15479_s3 + $0x2a8] sm:$0xff]  }
  0xfa   : > { %10156 = vmatpush3.bf16.msra.mxu1 %v11577_v14  ;;  %10117 = vmatprep.subr.bf16.mxu0 %v11578_v17  ;;  %v11606_v17 = vld [vmem:[%s15479_s3 + $0x260] sm:$0xff]  }
  0xfb   : > { %10157 = vmatprep.subr.bf16.mxu1 %v11579_v18 }
  0xfc   : > { %2754 = vmatmul.mubr.bf16.gmra.mxu0 %v15490_v61 }
  0xfd   : > { %2819 = vmatmul.mubr.bf16.gmra.mxu1 %v15490_v61  ;;  %10118 = vmatpush3.bf16.msra.mxu0 %v11580_v19 }
  0xfe   : > { %10158 = vmatpush3.bf16.msra.mxu1 %v11581_v25  ;;  %10119 = vmatprep.subr.bf16.mxu0 %v11582_v26  ;;  %v11607_v25 = vld [vmem:[%s15479_s3 + $0x2e0] sm:$0xff]  }
  0xff   : > { %10159 = vmatprep.subr.bf16.mxu1 %v11583_v27  ;;  %8838 = vmatprep.mubr.msk.bf16.mxu0 %vm12987_vm1, %v12970_v28  ;;  %v11608_v26 = vld [vmem:[%s15479_s3 + $0x220] sm:$0xff]  }
 0x100   : > { %8842 = vmatprep.mubr.msk.bf16.mxu1 %vm12987_vm1, %v12982_v32  ;;  %v11609_v27 = vld [vmem:[%s15479_s3 + $0x2a0] sm:$0xff]  }
 0x101   : > { %10120 = vmatpush3.bf16.msra.mxu0 %v11584_v29 }
 0x102   : > { %10160 = vmatpush3.bf16.msra.mxu1 %v11585_v30  ;;  %10121 = vmatprep.subr.bf16.mxu0 %v11586_v36  ;;  %v11610_v36 = vld [vmem:[%s15479_s3 + $0x258] sm:$0xff]  }
 0x103   : > { %10161 = vmatprep.subr.bf16.mxu1 %v11587_v40 }
 0x104   : > { %8840 = vmatmul.mubr.msk.bf16.gmra.mxu0 %vm12987_vm1, %v13007_v63 }
 0x105   : > { %8844 = vmatmul.mubr.msk.bf16.gmra.mxu1 %vm12987_vm1, %v13013_v42  ;;  %10122 = vmatpush3.bf16.msra.mxu0 %v11588_v41  ;;  %v11611_v41 = vld [vmem:[%s15479_s3 + $0x2d8] sm:$0xff]  }
 0x106   : > { %10162 = vmatpush3.bf16.msra.mxu1 %v11589_v43  ;;  %10123 = vmatprep.subr.bf16.mxu0 %v11590_v44 }
 0x107   : > { %10163 = vmatprep.subr.bf16.mxu1 %v11591_v45  ;;  %2867 = vmatprep.mubr.bf16.mxu0 %v15490_v61  ;;  %v11612_v45 = vld [vmem:[%s15479_s3 + $0x218] sm:$0xff]  }
 0x108   : > { %3381 = vmatprep.mubr.bf16.mxu1 %v15490_v61 }
 0x109   : > { %10124 = vmatpush3.bf16.msra.mxu0 %v11592_v20 }
 0x10a   : > { %10164 = vmatpush3.bf16.msra.mxu1 %v11593_v46  ;;  %10189 = vmatprep.subr.bf16.mxu0 %v11594_v47  ;;  %v11613_v46 = vld [vmem:[%s15479_s3 + $0x298] sm:$0xff]  }
 0x10b   : > { %10229 = vmatprep.subr.bf16.mxu1 %v11595_v53 }
 0x10c   : > { %v1786_v62 = vpop.f32.mrf.mxu0  ;;  %2868 = vmatmul.mubr.bf16.vlgmr.msra.gmra.mxu0 %v15490_v61 }
 0x10d   : > { %v1859_v0 = vpop.f32.mrf.mxu1  ;;  %3382 = vmatmul.mubr.bf16.vlgmr.msra.gmra.mxu1 %v15490_v61  ;;  %10190 = vmatpush3.bf16.msra.mxu0 %v11596_v54  ;;  %v11614_v54 = vld [vmem:[%s15479_s3 + $0x250] sm:$0xff]  }
 0x10e   : > { %v13064_v2 = vadd.f32 %v1859_v0, %v1786_v62  ;;  %10230 = vmatpush3.bf16.msra.mxu1 %v11597_v55  ;;  %v1788_v5 = vpop.f32.mrf.mxu0  ;;  %10191 = vmatprep.subr.bf16.mxu0 %v11598_v4  ;;  %v11615_v4 = vld [vmem:[%s15479_s3 + $0x2d0] sm:$0xff]  }
 0x10f   : > { %v1861_v6 = vpop.f32.mrf.mxu1  ;;  %10231 = vmatprep.subr.bf16.mxu1 %v11599_v58  ;;  %2875 = vmatprep.mubr.bf16.mxu0 %v15490_v61  ;;  %v11616_v62 = vld [vmem:[%s15479_s3 + $0x210] sm:$0xff]  }
 0x110   : > { %v13072_v8 = vadd.f32 %v1861_v6, %v1788_v5  ;;  %3389 = vmatprep.mubr.bf16.mxu1 %v15490_v61  ;;  %v1790_v11 = vpop.f32.mrf.mxu0  ;;  %v13136_v0 = vld [vmem:[%s12231_s30 + $0x14] ss:$24 sps:$4 sm:$0xff]  }
 0x111   : > { %v1863_v12 = vpop.f32.mrf.mxu1  ;;  %10192 = vmatpush3.bf16.msra.mxu0 %v11600_v60 }
 0x112   : > { %v13082_v14 = vadd.f32 %v1863_v12, %v1790_v11  ;;  %10232 = vmatpush3.bf16.msra.mxu1 %v11601_v1  ;;  %v13087_v18 = vpop.f32.mrf.mxu0  ;;  %10193 = vmatprep.subr.bf16.mxu0 %v11602_v48  ;;  %v13139_v1 = vrot.slane %v13136_v0, 5  ;;  %v11617_v48 = vld [vmem:[%s15479_s3 + $0x290] sm:$0xff]   ;;  %v11619_v11 = vld [vmem:[%s15479_s3 + $0x2c8] sm:$0xff]  }
 0x113   : > { %15531 = vst [vmem:[#allocation6_spill] sm:$0xff] %v13087_v18  ;;  %v13089_v19 = vpop.f32.mrf.mxu1  ;;  %10233 = vmatprep.subr.bf16.mxu1 %v11603_v7  ;;  %v11618_v7 = vld [vmem:[%s15479_s3 + $0x248] sm:$0xff]   ;;  %v11674_v18 = vld [vmem:[%s15479_s3 + $0x458] sm:$0xff]  }
 0x114   : > { %15532 = vst [vmem:[#allocation7_spill] sm:$0xff] %v13089_v19  ;;  %2876 = vmatmul.mubr.bf16.gmra.mxu0 %v15490_v61  ;;  %v1796_v29 = vpop.f32.mrf.mxu0 }
 0x115   : > { %3390 = vmatmul.mubr.bf16.gmra.mxu1 %v15490_v61  ;;  %v1869_v30 = vpop.f32.mrf.mxu1  ;;  %10194 = vmatpush3.bf16.msra.mxu0 %v11604_v9 }
 0x116   : > { %10234 = vmatpush3.bf16.msra.mxu1 %v11605_v13  ;;  %v13105_v40 = vadd.f32 %v1869_v30, %v1796_v29  ;;  %10195 = vmatprep.subr.bf16.mxu0 %v11606_v17  ;;  %v1798_v43 = vpop.f32.mrf.mxu0  ;;  %v11620_v17 = vld [vmem:[%s15479_s3 + $0x208] sm:$0xff]  }
 0x117   : > { %10235 = vmatprep.subr.bf16.mxu1 %v11607_v25  ;;  %v1871_v44 = vpop.f32.mrf.mxu1  ;;  %2883 = vmatprep.mubr.bf16.mxu0 %v15490_v61  ;;  %v11621_v29 = vld [vmem:[%s15479_s3 + $0x288] sm:$0xff]  }
 0x118   : > { %3397 = vmatprep.mubr.bf16.mxu1 %v15490_v61  ;;  %v13115_v20 = vadd.f32 %v1871_v44, %v1798_v43  ;;  %v1800_v47 = vpop.f32.mrf.mxu0  ;;  %v11623_v44 = vld [vmem:[%s15479_s3 + $0x2c0] sm:$0xff]  }
 0x119   : > { %v1873_v53 = vpop.f32.mrf.mxu1  ;;  %10196 = vmatpush3.bf16.msra.mxu0 %v11608_v26  ;;  %v13164_v26 = vld [vmem:[%s12231_s30 + $0x10] ss:$24 sps:$4 sm:$0xff]  }
 0x11a   : > { %10236 = vmatpush3.bf16.msra.mxu1 %v11609_v27  ;;  %v13123_v55 = vadd.f32 %v1873_v53, %v1800_v47  ;;  %10197 = vmatprep.subr.bf16.mxu0 %v11610_v36  ;;  %v13128_v58 = vpop.f32.mrf.mxu0  ;;  %v13167_v27 = vrot.slane %v13164_v26, 5  ;;  %v11624_v47 = vld [vmem:[%s15479_s3 + $0x200] sm:$0xff]  }
 0x11b   : > { %10237 = vmatprep.subr.bf16.mxu1 %v11611_v41  ;;  %15533 = vst [vmem:[#allocation8_spill] sm:$0xff] %v13128_v58  ;;  %v13130_v60 = vpop.f32.mrf.mxu1  ;;  %v11622_v41 = vld [vmem:[%s15479_s3 + $0x240] sm:$0xff]  }
 0x11c   : > { %15534 = vst [vmem:[#allocation9_spill] sm:$0xff] %v13130_v60  ;;  %2884 = vmatmul.mubr.bf16.gmra.mxu0 %v15490_v61  ;;  %v1806_v5 = vpop.f32.mrf.mxu0  ;;  %v11625_v53 = vld [vmem:[%s15479_s3 + $0x280] sm:$0xff]  }
 0x11d   : > { %3398 = vmatmul.mubr.bf16.gmra.mxu1 %v15490_v61  ;;  %v1879_v6 = vpop.f32.mrf.mxu1  ;;  %10198 = vmatpush3.bf16.msra.mxu0 %v11612_v45  ;;  %v11672_v60 = vld [vmem:[%s15479_s3 + $0x420] sm:$0xff]  }
 0x11e   : > { %10238 = vmatpush3.bf16.msra.mxu1 %v11613_v46  ;;  %v13149_v9 = vadd.f32 %v1879_v6, %v1806_v5  ;;  %10199 = vmatprep.subr.bf16.mxu0 %v11614_v54  ;;  %v1808_v12 = vpop.f32.mrf.mxu0  ;;  %v11627_v5 = vld [vmem:[%s15479_s3 + $0x3f8] sm:$0xff]  }
 0x11f   : > { %10239 = vmatprep.subr.bf16.mxu1 %v11615_v4  ;;  %v1881_v13 = vpop.f32.mrf.mxu1  ;;  %8846 = vmatprep.mubr.msk.bf16.mxu0 %vm12987_vm1, %v13139_v1 }
 0x120   : > { %3405 = vmatprep.mubr.bf16.mxu1 %v12967_v37  ;;  %v13161_v25 = vadd.f32 %v1881_v13, %v1808_v12  ;;  %v1810_v30 = vpop.f32.mrf.mxu0  ;;  %v11629_v13 = vld [vmem:[%s15479_s3 + $0x3b8] sm:$0xff]  }
 0x121   : > { %v1883_v36 = vpop.f32.mrf.mxu1  ;;  %10200 = vmatpush3.bf16.msra.mxu0 %v11616_v62  ;;  %v11626_v62 = vld [vmem:[%s15479_s3 + $0x378] sm:$0xff]  }
 0x122   : > { %10240 = vmatpush3.bf16.msra.mxu1 %v11617_v48  ;;  %v13175_v43 = vadd.f32 %v1883_v36, %v1810_v30  ;;  %10201 = vmatprep.subr.bf16.mxu0 %v11618_v7  ;;  %v13180_v45 = vpop.f32.mrf.mxu0  ;;  %v11630_v30 = vld [vmem:[%s15479_s3 + $0x370] sm:$0xff]  }
 0x123   : > { %10241 = vmatprep.subr.bf16.mxu1 %v11619_v11  ;;  %15535 = vst [vmem:[#allocation10_spill] sm:$0xff] %v13180_v45  ;;  %v13182_v46 = vpop.f32.mrf.mxu1  ;;  %v11628_v11 = vld [vmem:[%s15479_s3 + $0x338] sm:$0xff]  }
 0x124   : > { %15536 = vst [vmem:[#allocation11_spill] sm:$0xff] %v13182_v46  ;;  %8848 = vmatmul.mubr.msk.bf16.gmra.mxu0 %vm12987_vm1, %v13167_v27  ;;  %v1816_v54 = vpop.f32.mrf.mxu0 }
 0x125   : > { %3406 = vmatmul.mubr.bf16.gmra.mxu1 %v13004_v50  ;;  %v1889_v4 = vpop.f32.mrf.mxu1  ;;  %10202 = vmatpush3.bf16.msra.mxu0 %v11620_v17 }
 0x126   : > { %10242 = vmatpush3.bf16.msra.mxu1 %v11621_v29  ;;  %v13197_v48 = vadd.f32 %v1889_v4, %v1816_v54  ;;  %10203 = vmatprep.subr.bf16.mxu0 %v11622_v41  ;;  %v1818_v6 = vpop.f32.mrf.mxu0  ;;  %v11631_v41 = vld [vmem:[%s15479_s3 + $0x3f0] sm:$0xff]   ;;  %v11635_v54 = vld [vmem:[%s15479_s3 + $0x3e8] sm:$0xff]  }
 0x127   : > { %10243 = vmatprep.subr.bf16.mxu1 %v11623_v44  ;;  %v1891_v7 = vpop.f32.mrf.mxu1  ;;  %3446 = vmatprep.mubr.bf16.mxu0 %v15490_v61  ;;  %v11632_v44 = vld [vmem:[%s15479_s3 + $0x330] sm:$0xff]   ;;  %v11636_v4 = vld [vmem:[%s15479_s3 + $0x328] sm:$0xff]  }
 0x128   : > { %3511 = vmatprep.mubr.bf16.mxu1 %v15490_v61  ;;  %v13207_v12 = vadd.f32 %v1891_v7, %v1818_v6  ;;  %v1820_v17 = vpop.f32.mrf.mxu0  ;;  %v11639_v6 = vld [vmem:[%s15479_s3 + $0x3e0] sm:$0xff]  }
 0x129   : > { %v1893_v29 = vpop.f32.mrf.mxu1  ;;  %10204 = vmatpush3.bf16.msra.mxu0 %v11624_v47  ;;  %v11633_v47 = vld [vmem:[%s15479_s3 + $0x3b0] sm:$0xff]   ;;  %v11640_v7 = vld [vmem:[%s15479_s3 + $0x320] sm:$0xff]  }
 0x12a   : > { %10244 = vmatpush3.bf16.msra.mxu1 %v11625_v53  ;;  %v13215_v36 = vadd.f32 %v1893_v29, %v1820_v17  ;;  %10269 = vmatprep.subr.bf16.mxu0 %v11626_v62  ;;  %v11634_v53 = vld [vmem:[%s15479_s3 + $0x368] sm:$0xff]   ;;  %v11643_v17 = vld [vmem:[%s15479_s3 + $0x3d8] sm:$0xff]  }
 0x12b   : > { %10309 = vmatprep.subr.bf16.mxu1 %v11627_v5  ;;  %v11637_v62 = vld [vmem:[%s15479_s3 + $0x3a8] sm:$0xff]   ;;  %v11638_v5 = vld [vmem:[%s15479_s3 + $0x360] sm:$0xff]   ;;  %v11644_v29 = vld [vmem:[%s15479_s3 + $0x318] sm:$0xff]  }
 0x12c   : > { %3447 = vmatmul.mubr.bf16.vlgmr.msra.gmra.mxu0 %v15490_v61 }
 0x12d   : > { %3512 = vmatmul.mubr.bf16.vlgmr.msra.gmra.mxu1 %v15490_v61  ;;  %10270 = vmatpush3.bf16.msra.mxu0 %v11628_v11  ;;  %v11641_v11 = vld [vmem:[%s15479_s3 + $0x3a0] sm:$0xff]  }
 0x12e   : > { %10310 = vmatpush3.bf16.msra.mxu1 %v11629_v13  ;;  %10271 = vmatprep.subr.bf16.mxu0 %v11630_v30  ;;  %v11642_v13 = vld [vmem:[%s15479_s3 + $0x358] sm:$0xff]  }
 0x12f   : > { %10311 = vmatprep.subr.bf16.mxu1 %v11631_v41  ;;  %3454 = vmatprep.mubr.bf16.mxu0 %v15490_v61  ;;  %v11645_v30 = vld [vmem:[%s15479_s3 + $0x398] sm:$0xff]   ;;  %v11646_v41 = vld [vmem:[%s15479_s3 + $0x350] sm:$0xff]  }
 0x130   : > { %3519 = vmatprep.mubr.bf16.mxu1 %v15490_v61 }
 0x131   : > { %10272 = vmatpush3.bf16.msra.mxu0 %v11632_v44  ;;  %v11647_v44 = vld [vmem:[%s15479_s3 + $0x3d0] sm:$0xff]  }
 0x132   : > { %10312 = vmatpush3.bf16.msra.mxu1 %v11633_v47  ;;  %10273 = vmatprep.subr.bf16.mxu0 %v11634_v53  ;;  %v11648_v47 = vld [vmem:[%s15479_s3 + $0x310] sm:$0xff]  }
 0x133   : > { %10313 = vmatprep.subr.bf16.mxu1 %v11635_v54  ;;  %v11649_v53 = vld [vmem:[%s15479_s3 + $0x390] sm:$0xff]   ;;  %v11650_v54 = vld [vmem:[%s15479_s3 + $0x348] sm:$0xff]  }
 0x134   : > { %3455 = vmatmul.mubr.bf16.gmra.mxu0 %v15490_v61 }
 0x135   : > { %3520 = vmatmul.mubr.bf16.gmra.mxu1 %v15490_v61  ;;  %10274 = vmatpush3.bf16.msra.mxu0 %v11636_v4  ;;  %v11651_v4 = vld [vmem:[%s15479_s3 + $0x3c8] sm:$0xff]  }
 0x136   : > { %10314 = vmatpush3.bf16.msra.mxu1 %v11637_v62  ;;  %10275 = vmatprep.subr.bf16.mxu0 %v11638_v5  ;;  %v11652_v62 = vld [vmem:[%s15479_s3 + $0x308] sm:$0xff]  }
 0x137   : > { %10315 = vmatprep.subr.bf16.mxu1 %v11639_v6  ;;  %3462 = vmatprep.mubr.bf16.mxu0 %v15490_v61  ;;  %v11653_v5 = vld [vmem:[%s15479_s3 + $0x388] sm:$0xff]   ;;  %v11654_v6 = vld [vmem:[%s15479_s3 + $0x340] sm:$0xff]  }
 0x138   : > { %3527 = vmatprep.mubr.bf16.mxu1 %v15490_v61 }
 0x139   : > { %10276 = vmatpush3.bf16.msra.mxu0 %v11640_v7  ;;  %v11655_v7 = vld [vmem:[%s15479_s3 + $0x3c0] sm:$0xff]  }
 0x13a   : > { %10316 = vmatpush3.bf16.msra.mxu1 %v11641_v11  ;;  %10277 = vmatprep.subr.bf16.mxu0 %v11642_v13  ;;  %v11656_v11 = vld [vmem:[%s15479_s3 + $0x300] sm:$0xff]  }
 0x13b   : > { %10317 = vmatprep.subr.bf16.mxu1 %v11643_v17  ;;  %v13308_v13 = vld [vmem:[%s12231_s30 + $0x8] ss:$24 sps:$4 sm:$0xff]  }
 0x13c   : > { %3463 = vmatmul.mubr.bf16.gmra.mxu0 %v15490_v61  ;;  %v11657_v17 = vld [vmem:[%s15479_s3 + $0x380] sm:$0xff]   ;;  %v13418_v19 = vrot.slane %v13308_v13, 3 }
 0x13d   : > { %3528 = vmatmul.mubr.bf16.gmra.mxu1 %v15490_v61  ;;  %10278 = vmatpush3.bf16.msra.mxu0 %v11644_v29  ;;  %v11658_v29 = vld [vmem:[%s15479_s3 + $0x478] sm:$0xff]  }
 0x13e   : > { %10318 = vmatpush3.bf16.msra.mxu1 %v11645_v30  ;;  %10279 = vmatprep.subr.bf16.mxu0 %v11646_v41  ;;  %v11659_v30 = vld [vmem:[%s15479_s3 + $0x4f8] sm:$0xff]  }
 0x13f   : > { %10319 = vmatprep.subr.bf16.mxu1 %v11647_v44  ;;  %3470 = vmatprep.mubr.bf16.mxu0 %v12979_v31  ;;  %v11660_v41 = vld [vmem:[%s15479_s3 + $0x438] sm:$0xff]  }
 0x140   : > { %3535 = vmatprep.mubr.bf16.mxu1 %v13136_v0  ;;  %v11661_v44 = vld [vmem:[%s15479_s3 + $0x4b8] sm:$0xff]  }
 0x141   : > { %10280 = vmatpush3.bf16.msra.mxu0 %v11648_v47  ;;  %v11662_v47 = vld [vmem:[%s15479_s3 + $0x470] sm:$0xff]  }
 0x142   : > { %10320 = vmatpush3.bf16.msra.mxu1 %v11649_v53  ;;  %10281 = vmatprep.subr.bf16.mxu0 %v11650_v54  ;;  %v13332_v53 = vpop.f32.mrf.mxu0  ;;  %v13337_v54 = vld [vmem:[%s15480_s4] ss:$0 sm:$0xff] }
 0x143   : > { %10321 = vmatprep.subr.bf16.mxu1 %v11651_v4  ;;  %15537 = vst [vmem:[#allocation12_spill] sm:$0xff] %v13332_v53  ;;  %v11663_v4 = vld [vmem:[%s15479_s3 + $0x4f0] sm:$0xff]  }
 0x144   : > { %3471 = vmatmul.mubr.bf16.gmra.mxu0 %v13308_v13  ;;  %v11987_v53 = vld [vmem:[%s12231_s30 + $0x30] sm:$0xff] }
 0x145   : > { %3536 = vmatmul.mubr.bf16.gmra.mxu1 %v13164_v26  ;;  %10282 = vmatpush3.bf16.msra.mxu0 %v11652_v62  ;;  %v11664_v62 = vld [vmem:[%s15479_s3 + $0x430] sm:$0xff]   ;;  %v8994_v46 = vcombine.high %v11987_v53, %v11987_v53 }
 0x146   : > { %10322 = vmatpush3.bf16.msra.mxu1 %v11653_v5  ;;  %10283 = vmatprep.subr.bf16.mxu0 %v11654_v6  ;;  %v11665_v6 = vld [vmem:[%s15479_s3 + $0x4b0] sm:$0xff]  }
 0x147   : > { %10323 = vmatprep.subr.bf16.mxu1 %v11655_v7  ;;  %4067 = vmatprep.mubr.bf16.mxu0 %v15490_v61  ;;  %v3615_v57 = vrot.slane %v8994_v46, 3  ;;  %v11676_v46 = vld [vmem:[%s15479_s3 + $0x418] sm:$0xff]  }
 0x148   : > { %4132 = vmatprep.mubr.bf16.mxu1 %v15490_v61 }
 0x149   : > { %10284 = vmatpush3.bf16.msra.mxu0 %v11656_v11  ;;  %v11666_v11 = vld [vmem:[%s15479_s3 + $0x468] sm:$0xff]  }
 0x14a   : > { %10324 = vmatpush3.bf16.msra.mxu1 %v11657_v17  ;;  %10349 = vmatprep.subr.bf16.mxu0 %v11658_v29  ;;  %v13354_v17 = vpop.f32.mrf.mxu1  ;;  %v13359_v29 = vld [vmem:[%s15481_s5] ss:$0 sm:$0xff] }
 0x14b   : > { %10389 = vmatprep.subr.bf16.mxu1 %v11659_v30  ;;  %15538 = vst [vmem:[#allocation13_spill] sm:$0xff] %v13354_v17  ;;  %v11669_v17 = vld [vmem:[%s15479_s3 + $0x4a8] sm:$0xff]  }
 0x14c   : > { %v1932_v5 = vpop.f32.mrf.mxu0  ;;  %4068 = vmatmul.mubr.bf16.vlgmr.msra.gmra.mxu0 %v15490_v61 }
 0x14d   : > { %4133 = vmatmul.mubr.bf16.vlgmr.msra.gmra.mxu1 %v15490_v61  ;;  %v1933_v7 = vadd.f32 %v1932_v5, %v13064_v2  ;;  %10350 = vmatpush3.bf16.msra.mxu0 %v11660_v41  ;;  %v11667_v2 = vld [vmem:[%s15479_s3 + $0x4e8] sm:$0xff]  }
 0x14e   : > { %10390 = vmatpush3.bf16.msra.mxu1 %v11661_v44  ;;  %v1934_v30 = vpop.f32.mrf.mxu0  ;;  %10351 = vmatprep.subr.bf16.mxu0 %v11662_v47  ;;  %v11668_v5 = vld [vmem:[%s15479_s3 + $0x428] sm:$0xff]   ;;  %v13373_v47 = vpop.f32.mrf.mxu1 }
 0x14f   : > { %10391 = vmatprep.subr.bf16.mxu1 %v11663_v4  ;;  %v7462_v41 = vmul.f32 %v13337_v54, %v1933_v7  ;;  %v13366_v44 = vadd.f32 %v1934_v30, %v13072_v8  ;;  %4075 = vmatprep.mubr.bf16.mxu0 %v15490_v61  ;;  %v11670_v8 = vld [vmem:[%s15479_s3 + $0x460] sm:$0xff]  }
 0x150   : > { %4140 = vmatprep.mubr.bf16.mxu1 %v15490_v61  ;;  %v1936_v4 = vpop.f32.mrf.mxu0  ;;  %v11671_v61 = vld [vmem:[%s15479_s3 + $0x4e0] sm:$0xff]   ;;  %v13396_v45 = vpop.f32.mrf.mxu1 }
 0x151   : > { %15539 = vst [vmem:[#allocation14_spill] sm:$0xff] %v13366_v44  ;;  %v1937_v7 = vadd.f32 %v1936_v4, %v13082_v14  ;;  %10352 = vmatpush3.bf16.msra.mxu0 %v11664_v62  ;;  %v7474_v14 = vadd.f32 %v13359_v29, %v7462_v41  ;;  %v13394_v4 = vrot.slane %v12979_v31, 3  ;;  %v11673_v41 = vld [vmem:[%s15479_s3 + $0x4a0] sm:$0xff]   ;;  %v13412_v31 = vrot.slane %v13004_v50, 3  ;;  %v11675_v50 = vld [vmem:[%s15479_s3 + $0x4d8] sm:$0xff]  }
 0x152   : > { %10392 = vmatpush3.bf16.msra.mxu1 %v11665_v6  ;;  %v13382_v30 = vpop.f32.mrf.mxu0  ;;  %10353 = vmatprep.subr.bf16.mxu0 %v11666_v11  ;;  %v13391_v6 = vrot.slane %v12967_v37, 3  ;;  %v11720_v37 = vld [vmem:[%s15479_s3 + $0x548] sm:$0xff]  }
 0x153   : > { %15540 = vst [vmem:[#allocation15_spill] sm:$0xff] %v13382_v30  ;;  %10393 = vmatprep.subr.bf16.mxu1 %v11667_v2  ;;  %v7463_v62 = vmul.f32 %v13337_v54, %v1937_v7  ;;  %v15541_v2 = vmov 0   ;;  %v11988_v7 = vld [vmem:[%s12231_s30 + $0x38] sm:$0xff] }
 0x154   : > { %v1942_v11 = vpop.f32.mrf.mxu0  ;;  %4076 = vmatmul.mubr.bf16.gmra.mxu0 %v15541_v2  ;;  %v8996_v58 = vcombine.high %v11988_v7, %v11988_v7 }
 0x155   : > { %4141 = vmatmul.mubr.bf16.gmra.mxu1 %v15541_v2  ;;  %v7475_v30 = vadd.f32 %v13359_v29, %v7463_v62  ;;  %v1943_v44 = vadd.f32 %v1942_v11, %v13105_v40  ;;  %10354 = vmatpush3.bf16.msra.mxu0 %v11668_v5  ;;  %v7482_v62 = vmax.f32 %v7474_v14, 0.0 }
 0x156   : > { %10394 = vmatpush3.bf16.msra.mxu1 %v11669_v17  ;;  %v1944_v24 = vpop.f32.mrf.mxu0  ;;  %10355 = vmatprep.subr.bf16.mxu0 %v11670_v8  ;;  %v3619_v5 = vrot.slane %v8996_v58, 3  ;;  %v11678_v8 = vld [vmem:[%s15479_s3 + $0x450] sm:$0xff]  }
 0x157   : > { %10395 = vmatprep.subr.bf16.mxu1 %v11671_v61  ;;  %v7483_v15 = vmax.f32 %v7475_v30, 0.0  ;;  %v7464_v40 = vmul.f32 %v13337_v54, %v1943_v44  ;;  %v13428_v17 = vadd.f32 %v1944_v24, %v13115_v20  ;;  %9144 = vmatprep.mubr.msk.bf16.mxu0 %vm13407_vm3, %v13391_v6  ;;  %v13436_v61 = vpop.f32.mrf.mxu1  ;;  %v8993_v44 = vcombine.low %v11987_v53, %v11987_v53  ;;  %v11677_v20 = vld [vmem:[%s15479_s3 + $0x498] sm:$0xff]   ;;  %v11680_v53 = vld [vmem:[%s15479_s3 + $0x410] sm:$0xff]  }
 0x158   : > { %9148 = vmatprep.mubr.msk.bf16.mxu1 %vm13407_vm3, %v13394_v4  ;;  %v1946_v13 = vpop.f32.mrf.mxu0  ;;  %v8995_v30 = vcombine.low %v11988_v7, %v11988_v7  ;;  %v3616_v7 = vsel %vm3606_vm2, %v13391_v6, %v3615_v57  ;;  %v11687_v57 = vld [vmem:[%s15479_s3 + $0x4c8] sm:$0xff]  }
 0x159   : > { %15544 = vst [vmem:[#allocation16_spill] sm:$0xff] %v13428_v17  ;;  %v1947_v24 = vadd.f32 %v1946_v13, %v13123_v55  ;;  %10356 = vmatpush3.bf16.msra.mxu0 %v11672_v60  ;;  %v13448_v14 = vpack.c.bf16 %v7483_v15, %v7482_v62  ;;  %v11679_v55 = vld [vmem:[%s15479_s3 + $0x4d0] sm:$0xff]   ;;  %v7476_v58 = vadd.f32 %v13359_v29, %v7464_v40  ;;  %v3613_v62 = vrot.slane %v8993_v44, 3 }
 0x15a   : > { %10396 = vmatpush3.bf16.msra.mxu1 %v11673_v41  ;;  %v13450_v11 = vpop.f32.mrf.mxu0  ;;  %10357 = vmatprep.subr.bf16.mxu0 %v11674_v18  ;;  %v13460_v41 = vpop.f32.mrf.mxu1  ;;  %v11681_v18 = vld [vmem:[%s15479_s3 + $0x490] sm:$0xff]  }
 0x15b   : > { %15545 = vst [vmem:[#allocation17_spill] sm:$0xff] %v13448_v14  ;;  %15546 = vst [vmem:[#allocation18_spill] sm:$0xff] %v13450_v11  ;;  %10397 = vmatprep.subr.bf16.mxu1 %v11675_v50  ;;  %v7465_v60 = vmul.f32 %v13337_v54, %v1947_v24  ;;  %v3620_v50 = vsel %vm3606_vm2, %v13394_v4, %v3619_v5  ;;  %v3617_v24 = vrot.slane %v8995_v30, 3  ;;  %v11686_v14 = vld [vmem:[%s15479_s3 + $0x448] sm:$0xff]   ;;  %v7484_v44 = vmax.f32 %v7476_v58, 0.0 }
 0x15c   : > { %v1952_v15 = vpop.f32.mrf.mxu0  ;;  %9146 = vmatmul.mubr.msk.bf16.gmra.mxu0 %vm13407_vm3, %v13412_v31  ;;  %v13483_v5 = vpop.f32.mrf.mxu1  ;;  %v11689_v30 = vld [vmem:[%s15479_s3 + $0x488] sm:$0xff]  }
 0x15d   : > { %9150 = vmatmul.mubr.msk.bf16.gmra.mxu1 %vm13407_vm3, %v13418_v19  ;;  %v7477_v40 = vadd.f32 %v13359_v29, %v7465_v60  ;;  %v1953_v13 = vadd.f32 %v1952_v15, %v13149_v9  ;;  %10358 = vmatpush3.bf16.msra.mxu0 %v11676_v46  ;;  %v11688_v46 = vld [vmem:[%s15479_s3 + $0x408] sm:$0xff]  }
 0x15e   : > { %10398 = vmatpush3.bf16.msra.mxu1 %v11677_v20  ;;  %v1954_v11 = vpop.f32.mrf.mxu0  ;;  %10359 = vmatprep.subr.bf16.mxu0 %v11678_v8  ;;  %v3614_v8 = vsel %vm3606_vm2, %v13412_v31, %v3613_v62 }
 0x15f   : > { %10399 = vmatprep.subr.bf16.mxu1 %v11679_v55  ;;  %v7485_v60 = vmax.f32 %v7477_v40, 0.0  ;;  %v13486_v9 = vadd.f32 %v1954_v11, %v13161_v25  ;;  %4091 = vmatprep.mubr.bf16.mxu0 %v3616_v7  ;;  %v3618_v25 = vsel %vm3606_vm2, %v13418_v19, %v3617_v24  ;;  %v11690_v11 = vld [vmem:[%s15479_s3 + $0x440] sm:$0xff]   ;;  %v7466_v15 = vmul.f32 %v13337_v54, %v1953_v13  ;;  %v11694_v24 = vld [vmem:[%s15479_s3 + $0x578] sm:$0xff]  }
 0x160   : > { %4156 = vmatprep.mubr.bf16.mxu1 %v3620_v50  ;;  %v1956_v20 = vpop.f32.mrf.mxu0  ;;  %v11691_v50 = vld [vmem:[%s15479_s3 + $0x4c0] sm:$0xff]  }
 0x161   : > { %15547 = vst [vmem:[#allocation19_spill] sm:$0xff] %v13486_v9  ;;  %v13496_v55 = vpack.c.bf16 %v7485_v60, %v7484_v44  ;;  %v1957_v58 = vadd.f32 %v1956_v20, %v13175_v43  ;;  %10360 = vmatpush3.bf16.msra.mxu0 %v11680_v53  ;;  %v13510_v43 = vpop.f32.mrf.mxu1  ;;  %v11695_v60 = vld [vmem:[%s15479_s3 + $0x5f8] sm:$0xff]  }
 0x162   : > { %10400 = vmatpush3.bf16.msra.mxu1 %v11681_v18  ;;  %v13505_v7 = vpop.f32.mrf.mxu0  ;;  %10361 = vmatprep.subr.bf16.mxu0 %v11686_v14  ;;  %v11692_v18 = vld [vmem:[%s15479_s3 + $0x400] sm:$0xff]  }
 0x163   : > { %15548 = vst [vmem:[#allocation20_spill] sm:$0xff] %v13496_v55  ;;  %15549 = vst [vmem:[#allocation21_spill] sm:$0xff] %v13505_v7  ;;  %10401 = vmatprep.subr.bf16.mxu1 %v11687_v57  ;;  %v7467_v53 = vmul.f32 %v13337_v54, %v1957_v58  ;;  %v11693_v14 = vld [vmem:[%s15479_s3 + $0x480] sm:$0xff]   ;;  %v7478_v57 = vadd.f32 %v13359_v29, %v7466_v15  ;;  %v13528_v20 = vpop.f32.mrf.mxu1  ;;  %v11698_v15 = vld [vmem:[%s15479_s3 + $0x570] sm:$0xff]   ;;  %v4325_v7 = vrot.slane %v12416_v52, 5 }
 0x164   : > { %v1962_v62 = vpop.f32.mrf.mxu0  ;;  %4092 = vmatmul.mubr.bf16.gmra.mxu0 %v3614_v8 }
 0x165   : > { %4157 = vmatmul.mubr.bf16.gmra.mxu1 %v3618_v25  ;;  %v7479_v40 = vadd.f32 %v13359_v29, %v7467_v53  ;;  %v1963_v13 = vadd.f32 %v1962_v62, %v13197_v48  ;;  %10362 = vmatpush3.bf16.msra.mxu0 %v11688_v46  ;;  %v11696_v46 = vld [vmem:[%s15479_s3 + $0x538] sm:$0xff]   ;;  %v11699_v53 = vld [vmem:[%s15479_s3 + $0x5f0] sm:$0xff]   ;;  %v13552_v62 = vpop.f32.mrf.mxu1 }
 0x166   : > { %10402 = vmatpush3.bf16.msra.mxu1 %v11689_v30  ;;  %v1964_v44 = vpop.f32.mrf.mxu0  ;;  %10363 = vmatprep.subr.bf16.mxu0 %v11690_v11  ;;  %v4297_v30 = vrot.slane %v12335_v16, 5  ;;  %v11697_v11 = vld [vmem:[%s15479_s3 + $0x5b8] sm:$0xff]  }
 0x167   : > { %10403 = vmatprep.subr.bf16.mxu1 %v11691_v50  ;;  %v7468_v8 = vmul.f32 %v13337_v54, %v1963_v13  ;;  %v13532_v48 = vadd.f32 %v1964_v44, %v13207_v12  ;;  %4197 = vmatprep.mubr.bf16.mxu0 %v15541_v2  ;;  %v7487_v58 = vmax.f32 %v7479_v40, 0.0  ;;  %v7486_v50 = vmax.f32 %v7478_v57, 0.0  ;;  %v11702_v44 = vld [vmem:[%s15479_s3 + $0x568] sm:$0xff]  }
 0x168   : > { %9300 = vmatprep.mubr.msk.bf16.mxu1 %vm12987_vm1, %v12970_v28  ;;  %v1966_v25 = vpop.f32.mrf.mxu0  ;;  %v4295_v57 = vrot.slane %v12347_v22, 5 }
 0x169   : > { %15550 = vst [vmem:[#allocation22_spill] sm:$0xff] %v13532_v48  ;;  %v1967_v12 = vadd.f32 %v1966_v25, %v13215_v36  ;;  %10364 = vmatpush3.bf16.msra.mxu0 %v11692_v18  ;;  %v7480_v40 = vadd.f32 %v13359_v29, %v7468_v8  ;;  %v11700_v36 = vld [vmem:[%s15479_s3 + $0x530] sm:$0xff]   ;;  %v13578_v8 = vpop.f32.mrf.mxu1  ;;  %v4309_v25 = vrot.slane %v12376_v33, 5  ;;  %v11744_v48 = vld [vmem:[%s15479_s3 + $0x658] sm:$0xff]  }
 0x16a   : > { %10404 = vmatpush3.bf16.msra.mxu1 %v11693_v14  ;;  %10429 = vmatprep.subr.bf16.mxu0 %v11694_v24  ;;  %v11701_v18 = vld [vmem:[%s15479_s3 + $0x5b0] sm:$0xff]   ;;  %v4298_v14 = vsel %vm2301_vm0, %v12970_v28, %v4297_v30  ;;  %v13568_v24 = vpack.c.bf16 %v7487_v58, %v7486_v50  ;;  %v11707_v50 = vld [vmem:[%s15479_s3 + $0x5e0] sm:$0xff]  }
 0x16b   : > { %10469 = vmatprep.subr.bf16.mxu1 %v11695_v60  ;;  %v7469_v13 = vmul.f32 %v13337_v54, %v1967_v12  ;;  %v11703_v60 = vld [vmem:[%s15479_s3 + $0x5e8] sm:$0xff]   ;;  %v7488_v28 = vmax.f32 %v7480_v40, 0.0  ;;  %v4296_v12 = vsel %vm2301_vm0, %v13007_v63, %v4295_v57  ;;  %v11708_v40 = vld [vmem:[%s15479_s3 + $0x520] sm:$0xff]  }
 0x16c   : > { %4198 = vmatmul.mubr.bf16.vlgmr.msra.gmra.mxu0 %v15541_v2  ;;  %15551 = vst [vmem:[#allocation23_spill] sm:$0xff] %v13568_v24  ;;  %v15501_v24 = vrot.slane %v12590_v59, 5 }
 0x16d   : > { %9302 = vmatmul.mubr.msk.bf16.vlgmr.msra.gmra.mxu1 %vm12987_vm1, %v13007_v63  ;;  %v7481_v54 = vadd.f32 %v13359_v29, %v7469_v13  ;;  %10430 = vmatpush3.bf16.msra.mxu0 %v11696_v46  ;;  %v11704_v29 = vld [vmem:[%s15479_s3 + $0x528] sm:$0xff]   ;;  %v13604_v13 = vrot.slane %v13136_v0, 3  ;;  %v11989_v63 = vld [vmem:[%s12231_s30 + $0x40] sm:$0xff]  ;;  %v11710_v0 = vld [vmem:[%s15479_s3 + $0x558] sm:$0xff]  }
 0x16e   : > { %10470 = vmatpush3.bf16.msra.mxu1 %v11697_v11  ;;  %10431 = vmatprep.subr.bf16.mxu0 %v11698_v15  ;;  %v11705_v46 = vld [vmem:[%s15479_s3 + $0x5a8] sm:$0xff]   ;;  %v11706_v15 = vld [vmem:[%s15479_s3 + $0x560] sm:$0xff]  }
 0x16f   : > { %10471 = vmatprep.subr.bf16.mxu1 %v11699_v53  ;;  %v7489_v58 = vmax.f32 %v7481_v54, 0.0  ;;  %4205 = vmatprep.mubr.bf16.mxu0 %v15541_v2  ;;  %v13598_v53 = vpop.f32.mrf.mxu1  ;;  %15553 = vst [vmem:[#allocation25_spill] sm:$0xff] %v13604_v13  ;;  %v4307_v54 = vrot.slane %v12388_v38, 5 }
 0x170   : > { %4774 = vmatprep.mubr.bf16.mxu1 %v4298_v14  ;;  %v4310_v14 = vsel %vm2301_vm0, %v4297_v30, %v4309_v25  ;;  %v11712_v30 = vld [vmem:[%s15479_s3 + $0x518] sm:$0xff]  }
 0x171   : > { %v13588_v11 = vpack.c.bf16 %v7489_v58, %v7488_v28  ;;  %10432 = vmatpush3.bf16.msra.mxu0 %v11700_v36  ;;  %v8998_v36 = vcombine.high %v11989_v63, %v11989_v63  ;;  %v13622_v28 = vpop.f32.mrf.mxu1 }
 0x172   : > { %10472 = vmatpush3.bf16.msra.mxu1 %v11701_v18  ;;  %10433 = vmatprep.subr.bf16.mxu0 %v11702_v44  ;;  %v11709_v18 = vld [vmem:[%s15479_s3 + $0x5a0] sm:$0xff]   ;;  %v13617_v44 = vrot.slane %v13164_v26, 3  ;;  %v11713_v26 = vld [vmem:[%s15479_s3 + $0x598] sm:$0xff]  }
 0x173   : > { %15552 = vst [vmem:[#allocation24_spill] sm:$0xff] %v13588_v11  ;;  %10473 = vmatprep.subr.bf16.mxu1 %v11703_v60  ;;  %v11711_v60 = vld [vmem:[%s15479_s3 + $0x5d8] sm:$0xff]   ;;  %v3623_v58 = vrot.slane %v8998_v36, 3  ;;  %v11715_v36 = vld [vmem:[%s15479_s3 + $0x5d0] sm:$0xff]  }
 0x174   : > { %4206 = vmatmul.mubr.bf16.gmra.mxu0 %v15541_v2  ;;  %15554 = vst [vmem:[#allocation26_spill] sm:$0xff] %v13617_v44 }
 0x175   : > { %4775 = vmatmul.mubr.bf16.gmra.mxu1 %v4296_v12  ;;  %10434 = vmatpush3.bf16.msra.mxu0 %v11704_v29  ;;  %v4321_v29 = vrot.slane %v12414_v51, 5  ;;  %v4308_v12 = vsel %vm2301_vm0, %v4295_v57, %v4307_v54  ;;  %v11717_v57 = vld [vmem:[%s15479_s3 + $0x590] sm:$0xff]  }
 0x176   : > { %10474 = vmatpush3.bf16.msra.mxu1 %v11705_v46  ;;  %10435 = vmatprep.subr.bf16.mxu0 %v11706_v15  ;;  %v8997_v46 = vcombine.low %v11989_v63, %v11989_v63  ;;  %v11714_v15 = vld [vmem:[%s15479_s3 + $0x550] sm:$0xff]  }
 0x177   : > { %10475 = vmatprep.subr.bf16.mxu1 %v11707_v50  ;;  %9152 = vmatprep.mubr.msk.bf16.mxu0 %vm13407_vm3, %v13604_v13  ;;  %v13638_v50 = vpop.f32.mrf.mxu1  ;;  %v11716_v63 = vld [vmem:[%s15479_s3 + $0x510] sm:$0xff]  }
 0x178   : > { %4782 = vmatprep.mubr.bf16.mxu1 %v4310_v14  ;;  %v3621_v14 = vrot.slane %v8997_v46, 3 }
 0x179   : > { %10436 = vmatpush3.bf16.msra.mxu0 %v11708_v40  ;;  %v3624_v40 = vsel %vm3606_vm2, %v13604_v13, %v3623_v58 }
 0x17a   : > { %10476 = vmatpush3.bf16.msra.mxu1 %v11709_v18  ;;  %10437 = vmatprep.subr.bf16.mxu0 %v11710_v0  ;;  %v4322_v18 = vsel %vm2301_vm0, %v4309_v25, %v4321_v29  ;;  %v4319_v0 = vrot.slane %v12429_v56, 5  ;;  %v11722_v25 = vld [vmem:[%s15479_s3 + $0x508] sm:$0xff]   ;;  %v3622_v58 = vsel %vm3606_vm2, %v13617_v44, %v3621_v14  ;;  %v11724_v29 = vld [vmem:[%s15479_s3 + $0x540] sm:$0xff]   ;;  %v15498_v14 = vrot.slane %v12345_v21, 5 }
 0x17b   : > { %10477 = vmatprep.subr.bf16.mxu1 %v11711_v60  ;;  %v13659_v60 = vpop.f32.mrf.mxu1 }
 0x17c   : > { %9154 = vmatmul.mubr.msk.bf16.gmra.mxu0 %vm13407_vm3, %v13617_v44 }
 0x17d   : > { %4783 = vmatmul.mubr.bf16.gmra.mxu1 %v4308_v12  ;;  %10438 = vmatpush3.bf16.msra.mxu0 %v11712_v30  ;;  %v11721_v12 = vld [vmem:[%s15479_s3 + $0x5c8] sm:$0xff]   ;;  %v13676_v46 = vpop.f32.mrf.mxu1 }
 0x17e   : > { %10478 = vmatpush3.bf16.msra.mxu1 %v11713_v26  ;;  %10439 = vmatprep.subr.bf16.mxu0 %v11714_v15  ;;  %v11723_v30 = vld [vmem:[%s15479_s3 + $0x588] sm:$0xff]   ;;  %v4320_v26 = vsel %vm2301_vm0, %v4307_v54, %v4319_v0  ;;  %v11725_v15 = vld [vmem:[%s15479_s3 + $0x5c0] sm:$0xff]   ;;  %v11731_v0 = vld [vmem:[%s15479_s3 + $0x6b8] sm:$0xff]  }
 0x17f   : > { %10479 = vmatprep.subr.bf16.mxu1 %v11715_v36  ;;  %4221 = vmatprep.mubr.bf16.mxu0 %v3624_v40  ;;  %v11726_v36 = vld [vmem:[%s15479_s3 + $0x500] sm:$0xff]   ;;  %v11729_v40 = vld [vmem:[%s15479_s3 + $0x6f8] sm:$0xff]  }
 0x180   : > { %4790 = vmatprep.mubr.bf16.mxu1 %v4322_v18  ;;  %v11727_v54 = vld [vmem:[%s15479_s3 + $0x580] sm:$0xff]   ;;  %v11730_v18 = vld [vmem:[%s15479_s3 + $0x638] sm:$0xff]  }
 0x181   : > { %10440 = vmatpush3.bf16.msra.mxu0 %v11716_v63  ;;  %v11728_v63 = vld [vmem:[%s15479_s3 + $0x678] sm:$0xff]  }
 0x182   : > { %10480 = vmatpush3.bf16.msra.mxu1 %v11717_v57  ;;  %10441 = vmatprep.subr.bf16.mxu0 %v11720_v37  ;;  %v13690_v57 = vpop.f32.mrf.mxu1  ;;  %v15499_v37 = vrot.slane %v12571_v49, 5 }
 0x183   : > { %10481 = vmatprep.subr.bf16.mxu1 %v11721_v12  ;;  %v11732_v12 = vld [vmem:[%s15479_s3 + $0x670] sm:$0xff]  }
 0x184   : > { %4222 = vmatmul.mubr.bf16.gmra.mxu0 %v3622_v58  ;;  %v11733_v58 = vld [vmem:[%s15479_s3 + $0x6f0] sm:$0xff]  }
 0x185   : > { %4791 = vmatmul.mubr.bf16.gmra.mxu1 %v4320_v26  ;;  %10442 = vmatpush3.bf16.msra.mxu0 %v11722_v25  ;;  %v13712_v25 = vpop.f32.mrf.mxu0  ;;  %v11734_v26 = vld [vmem:[%s15479_s3 + $0x630] sm:$0xff]  }
 0x186   : > { %10482 = vmatpush3.bf16.msra.mxu1 %v11723_v30  ;;  %10443 = vmatprep.subr.bf16.mxu0 %v11724_v29  ;;  %15555 = vst [vmem:[#allocation27_spill] sm:$0xff] %v13712_v25  ;;  %v13714_v30 = vpop.f32.mrf.mxu1 }
 0x187   : > { %10483 = vmatprep.subr.bf16.mxu1 %v11725_v15  ;;  %9304 = vmatprep.mubr.msk.bf16.mxu0 %vm12987_vm1, %v12982_v32 }
 0x188   : > { %9308 = vmatprep.mubr.msk.bf16.mxu1 %vm12987_vm1, %v13139_v1 }
 0x189   : > { %10444 = vmatpush3.bf16.msra.mxu0 %v11726_v36  ;;  %v11735_v36 = vld [vmem:[%s15479_s3 + $0x6b0] sm:$0xff]  }
 0x18a   : > { %10484 = vmatpush3.bf16.msra.mxu1 %v11727_v54  ;;  %10509 = vmatprep.subr.bf16.mxu0 %v11728_v63  ;;  %v4302_v54 = vsel %vm2301_vm0, %v12982_v32, %v15498_v14  ;;  %v4306_v63 = vsel %vm2301_vm0, %v13139_v1, %v15499_v37  ;;  %v11736_v32 = vld [vmem:[%s15479_s3 + $0x668] sm:$0xff]  }
 0x18b   : > { %10549 = vmatprep.subr.bf16.mxu1 %v11729_v40  ;;  %v15500_v40 = vrot.slane %v12349_v23, 5  ;;  %v11737_v1 = vld [vmem:[%s15479_s3 + $0x6e8] sm:$0xff]  }
 0x18c   : > { %v2078_v29 = vpop.f32.mrf.mxu0  ;;  %9306 = vmatmul.mubr.msk.bf16.vlgmr.msra.gmra.mxu0 %vm12987_vm1, %v13013_v42 }
 0x18d   : > { %v2151_v15 = vpop.f32.mrf.mxu1  ;;  %9310 = vmatmul.mubr.msk.bf16.vlgmr.msra.gmra.mxu1 %vm12987_vm1, %v13167_v27  ;;  %v2079_v11 = vadd.f32 %v2078_v29, %v13373_v47  ;;  %10510 = vmatpush3.bf16.msra.mxu0 %v11730_v18  ;;  %v13757_v18 = vld [vmem:[%s15480_s4 + $0x3] ss:$0 sm:$0xff] }
 0x18e   : > { %10550 = vmatpush3.bf16.msra.mxu1 %v11731_v0  ;;  %v2080_v14 = vpop.f32.mrf.mxu0  ;;  %10511 = vmatprep.subr.bf16.mxu0 %v11732_v12  ;;  %v11738_v0 = vld [vmem:[%s15479_s3 + $0x628] sm:$0xff]  }
 0x18f   : > { %v2153_v55 = vpop.f32.mrf.mxu1  ;;  %10551 = vmatprep.subr.bf16.mxu1 %v11733_v58  ;;  %v2152_v47 = vadd.f32 %v2151_v15, %v2079_v11  ;;  %v2081_v29 = vadd.f32 %v2080_v14, %v13396_v45  ;;  %4839 = vmatprep.mubr.bf16.mxu0 %v4302_v54  ;;  %v4300_v45 = vsel %vm2301_vm0, %v13013_v42, %v15500_v40  ;;  %v11739_v11 = vld [vmem:[%s15479_s3 + $0x6a8] sm:$0xff]   ;;  %v13774_v15 = vld [vmem:[%s15481_s5 + $0x2] ss:$0 sm:$0xff] }
 0x190   : > { %4904 = vmatprep.mubr.bf16.mxu1 %v4306_v63  ;;  %v2082_v58 = vpop.f32.mrf.mxu0  ;;  %v4304_v42 = vsel %vm2301_vm0, %v13167_v27, %v15501_v24  ;;  %v11740_v40 = vld [vmem:[%s15479_s3 + $0x660] sm:$0xff]   ;;  %v15556_v24 = vrot.slane %v12379_v35, 5 }
 0x191   : > { %v2155_v37 = vpop.f32.mrf.mxu1  ;;  %v2154_v54 = vadd.f32 %v2153_v55, %v2081_v29  ;;  %v2083_v63 = vadd.f32 %v2082_v58, %v13436_v61  ;;  %10512 = vmatpush3.bf16.msra.mxu0 %v11734_v26  ;;  %v7538_v14 = vmul.f32 %v13744_v34, %v2152_v47  ;;  %v11741_v61 = vld [vmem:[%s15479_s3 + $0x6e0] sm:$0xff]  }
 0x192   : > { %10552 = vmatpush3.bf16.msra.mxu1 %v11735_v36  ;;  %v2084_v12 = vpop.f32.mrf.mxu0  ;;  %10513 = vmatprep.subr.bf16.mxu0 %v11736_v32  ;;  %v13792_v27 = vld [vmem:[%s15481_s5 + $0x3] ss:$0 sm:$0xff] }
 0x193   : > { %v2157_v25 = vpop.f32.mrf.mxu1  ;;  %10553 = vmatprep.subr.bf16.mxu1 %v11737_v1  ;;  %v2156_v26 = vadd.f32 %v2155_v37, %v2083_v63  ;;  %v2085_v36 = vadd.f32 %v2084_v12, %v13460_v41  ;;  %v11742_v47 = vld [vmem:[%s15479_s3 + $0x620] sm:$0xff]   ;;  %v7576_v32 = vmul.f32 %v13757_v18, %v2154_v54  ;;  %v15557_v37 = vrot.slane %v12345_v21, 5 }
 0x194   : > { %v2088_v1 = vpop.f32.mrf.mxu0  ;;  %4840 = vmatmul.mubr.bf16.gmra.mxu0 %v4300_v45  ;;  %v11743_v58 = vld [vmem:[%s15479_s3 + $0x6a0] sm:$0xff]   ;;  %v15558_v12 = vrot.slane %v12608_v3, 5  ;;  %v15559_v63 = vrot.slane %v12571_v49, 5 }
 0x195   : > { %v2161_v29 = vpop.f32.mrf.mxu1  ;;  %4905 = vmatmul.mubr.bf16.gmra.mxu1 %v4304_v42  ;;  %v4314_v41 = vsel %vm2301_vm0, %v15557_v37, %v15556_v24  ;;  %v7539_v45 = vmul.f32 %v13744_v34, %v2156_v26  ;;  %v2158_v42 = vadd.f32 %v2157_v25, %v2085_v36  ;;  %10514 = vmatpush3.bf16.msra.mxu0 %v11738_v0  ;;  %v15561_v25 = vrot.slane %v12349_v23, 5  ;;  %v15562_v26 = vld [vmem:[#allocation4_spill] sm:$0xff] }
 0x196   : > { %v4318_v54 = vsel %vm2301_vm0, %v15559_v63, %v15558_v12  ;;  %10554 = vmatpush3.bf16.msra.mxu1 %v11739_v11  ;;  %v7550_v24 = vadd.f32 %v13774_v15, %v7538_v14  ;;  %v2089_v37 = vadd.f32 %v2088_v1, %v13483_v5  ;;  %v2090_v9 = vpop.f32.mrf.mxu0  ;;  %10515 = vmatprep.subr.bf16.mxu0 %v11740_v40  ;;  %v15560_v12 = vrot.slane %v12390_v39, 5  ;;  %v11745_v11 = vld [vmem:[%s15479_s3 + $0x6d8] sm:$0xff]  }
 0x197   : > { %v2163_v17 = vpop.f32.mrf.mxu1  ;;  %10555 = vmatprep.subr.bf16.mxu1 %v11741_v61  ;;  %v4329_v36 = vrot.slane %v15562_v26, 5  ;;  %v7551_v14 = vadd.f32 %v13774_v15, %v7539_v45  ;;  %v7577_v5 = vmul.f32 %v13757_v18, %v2158_v42  ;;  %v2091_v1 = vadd.f32 %v2090_v9, %v13510_v43  ;;  %4847 = vmatprep.mubr.bf16.mxu0 %v4314_v41  ;;  %v11746_v40 = vld [vmem:[%s15479_s3 + $0x618] sm:$0xff]   ;;  %v15563_v61 = vld [vmem:[#allocation2_spill] sm:$0xff] }
 0x198   : > { %v4312_v0 = vsel %vm2301_vm0, %v15561_v25, %v15560_v12  ;;  %4912 = vmatprep.mubr.bf16.mxu1 %v4318_v54  ;;  %v4323_v63 = vrot.slane %v15563_v61, 5  ;;  %v7588_v12 = vadd.f32 %v13792_v27, %v7576_v32  ;;  %v2162_v25 = vadd.f32 %v2161_v29, %v2089_v37  ;;  %v2092_v55 = vpop.f32.mrf.mxu0  ;;  %v11747_v9 = vld [vmem:[%s15479_s3 + $0x698] sm:$0xff]   ;;  %v11748_v29 = vld [vmem:[%s15479_s3 + $0x650] sm:$0xff]  }
 0x199   : > { %v2165_v2 = vpop.f32.mrf.mxu1  ;;  %v15564_v26 = vrot.slane %v12630_v10, 5  ;;  %v15565_v45 = vrot.slane %v12590_v59, 5  ;;  %v15566_v43 = vld [vmem:[#allocation5_spill] sm:$0xff]  ;;  %v7559_v54 = vmax.f32 %v7551_v14, 0.0  ;;  %v7589_v44 = vadd.f32 %v13792_v27, %v7577_v5  ;;  %10516 = vmatpush3.bf16.msra.mxu0 %v11742_v47  ;;  %v11749_v14 = vld [vmem:[%s15479_s3 + $0x6d0] sm:$0xff]  }
 0x19a   : > { %v4327_v41 = vrot.slane %v15566_v43, 5  ;;  %v2164_v13 = vadd.f32 %v2163_v17, %v2091_v1  ;;  %v2093_v32 = vadd.f32 %v2092_v55, %v13528_v20  ;;  %10556 = vmatpush3.bf16.msra.mxu1 %v11743_v58  ;;  %v7558_v37 = vmax.f32 %v7550_v24, 0.0  ;;  %10517 = vmatprep.subr.bf16.mxu0 %v11744_v48  ;;  %v11750_v47 = vld [vmem:[%s15479_s3 + $0x610] sm:$0xff]  }
 0x19b   : > { %v4316_v42 = vsel %vm2301_vm0, %v15565_v45, %v15564_v26  ;;  %v7540_v26 = vmul.f32 %v13744_v34, %v2162_v25  ;;  %v2094_v45 = vpop.f32.mrf.mxu0  ;;  %v2167_v59 = vpop.f32.mrf.mxu1  ;;  %10557 = vmatprep.subr.bf16.mxu1 %v11745_v11  ;;  %v7597_v58 = vmax.f32 %v7589_v44, 0.0  ;;  %v7596_v24 = vmax.f32 %v7588_v12, 0.0  ;;  %v11751_v48 = vld [vmem:[%s15479_s3 + $0x690] sm:$0xff]  }
 0x19c   : > { %v7578_v17 = vmul.f32 %v13757_v18, %v2164_v13  ;;  %v2166_v20 = vadd.f32 %v2165_v2, %v2093_v32  ;;  %v2095_v55 = vadd.f32 %v2094_v45, %v13552_v62  ;;  %4848 = vmatmul.mubr.bf16.gmra.mxu0 %v4312_v0  ;;  %v15567_v11 = vrot.slane %v12379_v35, 5  ;;  %v11752_v32 = vld [vmem:[%s15479_s3 + $0x648] sm:$0xff]  }
 0x19d   : > { %v2098_v5 = vpop.f32.mrf.mxu0  ;;  %v2171_v1 = vpop.f32.mrf.mxu1  ;;  %4913 = vmatmul.mubr.bf16.gmra.mxu1 %v4316_v42  ;;  %v15568_v62 = vrot.slane %v12608_v3, 5  ;;  %v13869_v25 = vpack.c.bf16 %v7559_v54, %v7558_v37  ;;  %v7552_v44 = vadd.f32 %v13774_v15, %v7540_v26  ;;  %10518 = vmatpush3.bf16.msra.mxu0 %v11746_v40  ;;  %v4947_v54 = vrot.slane %v12335_v16, 3 }
 0x19e   : > { %v4326_v2 = vsel %vm2301_vm0, %v15567_v11, %v4325_v7  ;;  %v7541_v12 = vmul.f32 %v13744_v34, %v2166_v20  ;;  %v2168_v0 = vadd.f32 %v2167_v59, %v2095_v55  ;;  %v2099_v42 = vadd.f32 %v2098_v5, %v13578_v8  ;;  %10558 = vmatpush3.bf16.msra.mxu1 %v11747_v9  ;;  %v11754_v9 = vld [vmem:[%s15479_s3 + $0x608] sm:$0xff]   ;;  %v11756_v5 = vld [vmem:[%s15479_s3 + $0x640] sm:$0xff]  }
 0x19f   : > { %v4330_v13 = vsel %vm2301_vm0, %v15568_v62, %v4329_v36  ;;  %15569 = vst [vmem:[#allocation2_spill] sm:$0xff] %v13869_v25  ;;  %v7590_v7 = vadd.f32 %v13792_v27, %v7578_v17  ;;  %v2100_v45 = vpop.f32.mrf.mxu0  ;;  %v2173_v11 = vpop.f32.mrf.mxu1  ;;  %10519 = vmatprep.subr.bf16.mxu0 %v11748_v29  ;;  %v11753_v36 = vld [vmem:[%s15479_s3 + $0x6c8] sm:$0xff]   ;;  %v13882_v59 = vpack.c.bf16 %v7597_v58, %v7596_v24  ;;  %v15571_v20 = vrot.slane %v12390_v39, 5  ;;  %v15599_v25 = vld [vmem:[#allocation9_spill] sm:$0xff] }
 0x1a0   : > { %v7553_v8 = vadd.f32 %v13774_v15, %v7541_v12  ;;  %v7579_v40 = vmul.f32 %v13757_v18, %v2168_v0  ;;  %v2172_v37 = vadd.f32 %v2171_v1, %v2099_v42  ;;  %10559 = vmatprep.subr.bf16.mxu1 %v11749_v14  ;;  %4855 = vmatprep.mubr.bf16.mxu0 %v4326_v2  ;;  %v15572_v58 = vrot.slane %v12630_v10, 5  ;;  %v11755_v14 = vld [vmem:[%s15479_s3 + $0x688] sm:$0xff]   ;;  %v11757_v42 = vld [vmem:[%s15479_s3 + $0x6c0] sm:$0xff]  }
 0x1a1   : > { %15570 = vst [vmem:[#allocation5_spill] sm:$0xff] %v13882_v59  ;;  %v2101_v29 = vadd.f32 %v2100_v45, %v13598_v53  ;;  %v2102_v26 = vpop.f32.mrf.mxu0  ;;  %v2175_v17 = vpop.f32.mrf.mxu1  ;;  %4920 = vmatprep.mubr.bf16.mxu1 %v4330_v13  ;;  %v4324_v55 = vsel %vm2301_vm0, %v15571_v20, %v4323_v63  ;;  %v4951_v53 = vrot.slane %v12345_v21, 3  ;;  %v7560_v1 = vmax.f32 %v7552_v44, 0.0  ;;  %10520 = vmatpush3.bf16.msra.mxu0 %v11750_v47 }
 0x1a2   : > { %v4328_v24 = vsel %vm2301_vm0, %v15572_v58, %v4327_v41  ;;  %v7561_v2 = vmax.f32 %v7553_v8, 0.0  ;;  %v7591_v62 = vadd.f32 %v13792_v27, %v7579_v40  ;;  %v2103_v63 = vadd.f32 %v2102_v26, %v13622_v28  ;;  %10560 = vmatpush3.bf16.msra.mxu1 %v11751_v48  ;;  %10521 = vmatprep.subr.bf16.mxu0 %v11752_v32  ;;  %v11758_v48 = vld [vmem:[%s15479_s3 + $0x600] sm:$0xff]  }
 0x1a3   : > { %v7542_v13 = vmul.f32 %v13744_v34, %v2172_v37  ;;  %v2174_v41 = vadd.f32 %v2173_v11, %v2101_v29  ;;  %v2104_v12 = vpop.f32.mrf.mxu0  ;;  %v2177_v0 = vpop.f32.mrf.mxu1  ;;  %v4948_v44 = vsel %vm3606_vm2, %v13391_v6, %v4947_v54  ;;  %v7598_v45 = vmax.f32 %v7590_v7, 0.0  ;;  %10561 = vmatprep.subr.bf16.mxu1 %v11753_v36  ;;  %v11759_v6 = vld [vmem:[%s15479_s3 + $0x680] sm:$0xff]  }
 0x1a4   : > { %v13913_v8 = vpack.c.bf16 %v7561_v2, %v7560_v1  ;;  %v7599_v28 = vmax.f32 %v7591_v62, 0.0  ;;  %v2176_v47 = vadd.f32 %v2175_v17, %v2103_v63  ;;  %v2105_v11 = vadd.f32 %v2104_v12, %v13638_v50  ;;  %4856 = vmatmul.mubr.bf16.gmra.mxu0 %v4324_v55  ;;  %v11760_v17 = vld [vmem:[%s15479_s3 + $0x778] sm:$0xff]  }
 0x1a5   : > { %v7580_v32 = vmul.f32 %v13757_v18, %v2174_v41  ;;  %v2108_v40 = vpop.f32.mrf.mxu0  ;;  %v2181_v37 = vpop.f32.mrf.mxu1  ;;  %4921 = vmatmul.mubr.bf16.gmra.mxu1 %v4328_v24  ;;  %v4952_v7 = vsel %vm3606_vm2, %v13394_v4, %v4951_v53  ;;  %v4945_v36 = vrot.slane %v12347_v22, 3  ;;  %10522 = vmatpush3.bf16.msra.mxu0 %v11754_v9  ;;  %v7554_v20 = vadd.f32 %v13774_v15, %v7542_v13  ;;  %v11761_v1 = vld [vmem:[%s15479_s3 + $0x7f8] sm:$0xff]  }
 0x1a6   : > { %15573 = vst [vmem:[#allocation28_spill] sm:$0xff] %v13913_v8  ;;  %v13928_v29 = vpack.c.bf16 %v7599_v28, %v7598_v45  ;;  %v7543_v26 = vmul.f32 %v13744_v34, %v2176_v47  ;;  %v2109_v50 = vadd.f32 %v2108_v40, %v13659_v60  ;;  %5434 = vmatprep.mubr.bf16.mxu0 %v4948_v44  ;;  %v4949_v24 = vrot.slane %v12349_v23, 3  ;;  %v11764_v47 = vld [vmem:[%s15479_s3 + $0x770] sm:$0xff]  }
 0x1a7   : > { %v2178_v55 = vadd.f32 %v2177_v0, %v2105_v11  ;;  %10562 = vmatpush3.bf16.msra.mxu1 %v11755_v14  ;;  %v2110_v58 = vpop.f32.mrf.mxu0  ;;  %v2183_v4 = vpop.f32.mrf.mxu1  ;;  %10523 = vmatprep.subr.bf16.mxu0 %v11756_v5  ;;  %v11762_v14 = vld [vmem:[%s15479_s3 + $0x738] sm:$0xff]   ;;  %v4959_v62 = vrot.slane %v12376_v33, 3  ;;  %v7592_v5 = vadd.f32 %v13792_v27, %v7580_v32  ;;  %v4946_v12 = vsel %vm3606_vm2, %v13412_v31, %v4945_v36  ;;  %v11818_v8 = vld [vmem:[%s15479_s3 + $0x810] sm:$0xff]  }
 0x1a8   : > { %15574 = vst [vmem:[#allocation29_spill] sm:$0xff] %v13928_v29  ;;  %v7555_v60 = vadd.f32 %v13774_v15, %v7543_v26  ;;  %v2182_v9 = vadd.f32 %v2181_v37, %v2109_v50  ;;  %v2111_v2 = vadd.f32 %v2110_v58, %v13676_v46  ;;  %10563 = vmatprep.subr.bf16.mxu1 %v11757_v42  ;;  %v11763_v46 = vld [vmem:[%s15479_s3 + $0x7b8] sm:$0xff]   ;;  %v4963_v0 = vrot.slane %v12379_v35, 3 }
 0x1a9   : > { %5499 = vmatprep.mubr.bf16.mxu1 %v4952_v7  ;;  %v7581_v63 = vmul.f32 %v13757_v18, %v2178_v55  ;;  %v2112_v13 = vpop.f32.mrf.mxu0  ;;  %v2185_v41 = vpop.f32.mrf.mxu1  ;;  %10524 = vmatpush3.bf16.msra.mxu0 %v11758_v48  ;;  %v7562_v32 = vmax.f32 %v7554_v20, 0.0  ;;  %v4950_v37 = vsel %vm3606_vm2, %v13418_v19, %v4949_v24  ;;  %v4960_v19 = vsel %vm3606_vm2, %v4947_v54, %v4959_v62  ;;  %v11767_v55 = vld [vmem:[%s15479_s3 + $0x7b0] sm:$0xff]   ;;  %v11990_v33 = vld [vmem:[%s12231_s30 + $0x78] sm:$0xff] }
 0x1aa   : > { %v7563_v42 = vmax.f32 %v7555_v60, 0.0  ;;  %v7544_v44 = vmul.f32 %v13744_v34, %v2182_v9  ;;  %v2184_v45 = vadd.f32 %v2183_v4, %v2111_v2  ;;  %v2113_v28 = vadd.f32 %v2112_v13, %v13690_v57  ;;  %10589 = vmatprep.subr.bf16.mxu0 %v11760_v17  ;;  %v11765_v57 = vld [vmem:[%s15479_s3 + $0x7f0] sm:$0xff]   ;;  %v11768_v9 = vld [vmem:[%s15479_s3 + $0x768] sm:$0xff]  }
 0x1ab   : > { %v7593_v31 = vadd.f32 %v13792_v27, %v7581_v63  ;;  %10564 = vmatpush3.bf16.msra.mxu1 %v11759_v6  ;;  %v2114_v11 = vpop.f32.mrf.mxu0  ;;  %v2187_v40 = vpop.f32.mrf.mxu1  ;;  %v11766_v6 = vld [vmem:[%s15479_s3 + $0x730] sm:$0xff]   ;;  %v7600_v50 = vmax.f32 %v7592_v5, 0.0  ;;  %v4957_v60 = vrot.slane %v12388_v38, 3  ;;  %v4961_v5 = vrot.slane %v12390_v39, 3 }
 0x1ac   : > { %v7582_v48 = vmul.f32 %v13757_v18, %v2184_v45  ;;  %v2186_v7 = vadd.f32 %v2185_v41, %v2113_v28  ;;  %v2115_v26 = vadd.f32 %v2114_v11, %v13714_v30  ;;  %10629 = vmatprep.subr.bf16.mxu1 %v11761_v1  ;;  %5435 = vmatmul.mubr.bf16.vlgmr.msra.gmra.mxu0 %v4946_v12  ;;  %v11770_v12 = vld [vmem:[%s15479_s3 + $0x728] sm:$0xff]   ;;  %v14017_v28 = vrot.slane %v12416_v52, 3  ;;  %v11781_v38 = vld [vmem:[%s15479_s3 + $0x7d0] sm:$0xff]  }
 0x1ad   : > { %v10045_v17 = vpop.f32.mrf.mxu0  ;;  %v10085_v20 = vpop.f32.mrf.mxu1  ;;  %v4964_v30 = vsel %vm3606_vm2, %v4951_v53, %v4963_v0  ;;  %v7601_v58 = vmax.f32 %v7593_v31, 0.0  ;;  %v13987_v4 = vpack.c.bf16 %v7563_v42, %v7562_v32  ;;  %v7556_v16 = vadd.f32 %v13774_v15, %v7544_v44  ;;  %10590 = vmatpush3.bf16.msra.mxu0 %v11762_v14  ;;  %5442 = vmatprep.mubr.bf16.mxu0 %v4960_v19  ;;  %v11774_v19 = vld [vmem:[%s15479_s3 + $0x720] sm:$0xff]  }
 0x1ae   : > { %v7545_v54 = vmul.f32 %v13744_v34, %v2186_v7  ;;  %v2188_v1 = vadd.f32 %v2187_v40, %v2115_v26  ;;  %5500 = vmatmul.mubr.bf16.vlgmr.msra.gmra.mxu1 %v4950_v37  ;;  %v7594_v21 = vadd.f32 %v13792_v27, %v7582_v48  ;;  %10591 = vmatprep.subr.bf16.mxu0 %v11764_v47  ;;  %v11769_v34 = vld [vmem:[%s15479_s3 + $0x7e8] sm:$0xff]  }
 0x1af   : > { %15575 = vst [vmem:[#allocation30_spill] sm:$0xff] %v13987_v4  ;;  %10630 = vmatpush3.bf16.msra.mxu1 %v11763_v46  ;;  %v10046_v53 = vpop.f32.mrf.mxu0  ;;  %v10086_v2 = vpop.f32.mrf.mxu1  ;;  %v14000_v63 = vpack.c.bf16 %v7601_v58, %v7600_v50  ;;  %v14008_v46 = vrot.slane %v12414_v51, 3  ;;  %5507 = vmatprep.mubr.bf16.mxu1 %v4964_v30  ;;  %15577 = vst [vmem:[#allocation32_spill] sm:$0xff] %v14017_v28  ;;  %v7564_v47 = vmax.f32 %v7556_v16, 0.0  ;;  %v14054_v30 = vrot.slane %v12429_v56, 3  ;;  %v11776_v58 = vld [vmem:[%s15479_s3 + $0x758] sm:$0xff]  }
 0x1b0   : > { %v7557_v14 = vadd.f32 %v13774_v15, %v7545_v54  ;;  %v7583_v13 = vmul.f32 %v13757_v18, %v2188_v1  ;;  %v10047_v41 = vadd.f32 %v10046_v53, %v10045_v17  ;;  %10631 = vmatprep.subr.bf16.mxu1 %v11765_v57  ;;  %v10087_v42 = vadd.f32 %v10086_v2, %v10085_v20  ;;  %v11771_v15 = vld [vmem:[%s15479_s3 + $0x7a8] sm:$0xff]   ;;  %v11772_v18 = vld [vmem:[%s15479_s3 + $0x760] sm:$0xff]   ;;  %v11991_v16 = vld [vmem:[%s12231_s30 + $0x90] sm:$0xff] }
 0x1b1   : > { %15576 = vst [vmem:[#allocation31_spill] sm:$0xff] %v14000_v63  ;;  %v10048_v44 = vpop.f32.mrf.mxu0  ;;  %v10088_v45 = vpop.f32.mrf.mxu1  ;;  %10592 = vmatpush3.bf16.msra.mxu0 %v11766_v6  ;;  %v4958_v11 = vsel %vm3606_vm2, %v4945_v36, %v4957_v60  ;;  %v7602_v40 = vmax.f32 %v7594_v21, 0.0  ;;  %v4962_v7 = vsel %vm3606_vm2, %v4949_v24, %v4961_v5  ;;  %v11775_v24 = vld [vmem:[%s15479_s3 + $0x7a0] sm:$0xff]   ;;  %v4972_v17 = vsel %vm3606_vm2, %v4959_v62, %v14008_v46  ;;  %v11992_v21 = vld [vmem:[%s12231_s30 + $0xa8] sm:$0xff]  ;;  %v15600_v63 = vld [vmem:[#allocation16_spill] sm:$0xff] }
 0x1b2   : > { %v7565_v32 = vmax.f32 %v7557_v14, 0.0  ;;  %v7595_v31 = vadd.f32 %v13792_v27, %v7583_v13  ;;  %v14025_v37 = vadd.f32 %v10087_v42, %v10047_v41  ;;  %10593 = vmatprep.subr.bf16.mxu0 %v11768_v9  ;;  %v11773_v27 = vld [vmem:[%s15479_s3 + $0x7e0] sm:$0xff]   ;;  %v4976_v20 = vsel %vm3606_vm2, %v4963_v0, %v14017_v28  ;;  %v11777_v9 = vld [vmem:[%s15479_s3 + $0x7d8] sm:$0xff]  }
 0x1b3   : > { %10632 = vmatpush3.bf16.msra.mxu1 %v11767_v55  ;;  %v10049_v57 = vpop.f32.mrf.mxu0  ;;  %v10089_v48 = vpop.f32.mrf.mxu1  ;;  %v9462_v62 = vcombine.high %v11990_v33, %v11991_v16  ;;  %v14064_v1 = vrot.slane %v15563_v61, 3  ;;  %v9468_v53 = vcombine.high %v11992_v21, %v11992_v21  ;;  %v11778_v14 = vld [vmem:[%s15479_s3 + $0x718] sm:$0xff]   ;;  %v4955_v42 = vrot.slane %v12571_v49, 3  ;;  %v11805_v49 = vld [vmem:[%s15479_s3 + $0x8e8] sm:$0xff]  }
 0x1b4   : > { %v14035_v22 = vpack.c.bf16 %v7565_v32, %v7564_v47  ;;  %v7603_v36 = vmax.f32 %v7595_v31, 0.0  ;;  %v10050_v26 = vadd.f32 %v10049_v57, %v10048_v44  ;;  %v10090_v6 = vadd.f32 %v10089_v48, %v10088_v45  ;;  %10633 = vmatprep.subr.bf16.mxu1 %v11769_v34  ;;  %5443 = vmatmul.mubr.bf16.gmra.mxu0 %v4958_v11 }
 0x1b5   : > { %v10051_v23 = vpop.f32.mrf.mxu0  ;;  %v10091_v50 = vpop.f32.mrf.mxu1  ;;  %10594 = vmatpush3.bf16.msra.mxu0 %v11770_v12  ;;  %15580 = vst [vmem:[#allocation35_spill] sm:$0xff] %v14064_v1  ;;  %5450 = vmatprep.mubr.bf16.mxu0 %v4972_v17  ;;  %v11779_v12 = vld [vmem:[%s15479_s3 + $0x798] sm:$0xff]   ;;  %v2190_v44 = vlaneseq  ;;  %v14086_v47 = vrot.slane %v9462_v62, 1  ;;  %v9461_v32 = vcombine.low %v11990_v33, %v11991_v16  ;;  %v9467_v57 = vcombine.low %v11992_v21, %v11992_v21 }
 0x1b6   : > { %15578 = vst [vmem:[#allocation33_spill] sm:$0xff] %v14035_v22  ;;  %v14051_v55 = vadd.f32 %v10090_v6, %v10050_v26  ;;  %5508 = vmatmul.mubr.bf16.gmra.mxu1 %v4962_v7  ;;  %v14061_v54 = vpack.c.bf16 %v7603_v36, %v7602_v40  ;;  %10595 = vmatprep.subr.bf16.mxu0 %v11772_v18  ;;  %v11780_v18 = vld [vmem:[%s15479_s3 + $0x750] sm:$0xff]   ;;  %v15581_v36 = vld [vmem:[#allocation3_spill] sm:$0xff] }
 0x1b7   : > { %10634 = vmatpush3.bf16.msra.mxu1 %v11771_v15  ;;  %v10052_v35 = vpop.f32.mrf.mxu0  ;;  %v10092_v0 = vpop.f32.mrf.mxu1  ;;  %5515 = vmatprep.mubr.bf16.mxu1 %v4976_v20  ;;  %v4970_v15 = vsel %vm3606_vm2, %v4957_v60, %v14054_v30  ;;  %v4974_v40 = vsel %vm3606_vm2, %v4961_v5, %v14064_v1  ;;  %v14095_v60 = vrot.slane %v9468_v53, 1  ;;  %v4953_v39 = vrot.slane %v15581_v36, 3  ;;  %v11783_v6 = vld [vmem:[%s15479_s3 + $0x790] sm:$0xff]   ;;  %v11787_v53 = vld [vmem:[%s15479_s3 + $0x788] sm:$0xff]  }
 0x1b8   : > { %15579 = vst [vmem:[#allocation34_spill] sm:$0xff] %v14061_v54  ;;  %v10053_v2 = vadd.f32 %v10052_v35, %v10051_v23  ;;  %v10093_v34 = vadd.f32 %v10092_v0, %v10091_v50  ;;  %10635 = vmatprep.subr.bf16.mxu1 %v11773_v27  ;;  %v11782_v27 = vld [vmem:[%s15479_s3 + $0x710] sm:$0xff]   ;;  %v11784_v50 = vld [vmem:[%s15479_s3 + $0x748] sm:$0xff]   ;;  %v14116_v33 = vrot.slane %v9467_v57, 1  ;;  %v11791_v57 = vld [vmem:[%s15479_s3 + $0x780] sm:$0xff]  }
 0x1b9   : > { %v10054_v13 = vpop.f32.mrf.mxu0  ;;  %v10094_v41 = vpop.f32.mrf.mxu1  ;;  %10596 = vmatpush3.bf16.msra.mxu0 %v11774_v19  ;;  %v14104_v19 = vshrl.u32 %v2190_v44, 7  ;;  %v11786_v35 = vld [vmem:[%s15479_s3 + $0x708] sm:$0xff]   ;;  %v11789_v44 = vld [vmem:[%s15479_s3 + $0x7c0] sm:$0xff]  }
 0x1ba   : > { %v14077_v45 = vadd.f32 %v10093_v34, %v10053_v2  ;;  %10597 = vmatprep.subr.bf16.mxu0 %v11776_v58  ;;  %v11785_v58 = vld [vmem:[%s15479_s3 + $0x7c8] sm:$0xff]  }
 0x1bb   : > { %10636 = vmatpush3.bf16.msra.mxu1 %v11775_v24  ;;  %v10055_v31 = vpop.f32.mrf.mxu0  ;;  %v10095_v11 = vpop.f32.mrf.mxu1  ;;  %v14111_v24 = vrot.slane %v9461_v32, 1  ;;  %v14124_v0 = vadd.s32 8, %v14104_v19  ;;  %v15510_v2 = vand.u32 7, %v14104_v19 }
 0x1bc   : > { %v10056_v48 = vadd.f32 %v10055_v31, %v10054_v13  ;;  %v10096_v7 = vadd.f32 %v10095_v11, %v10094_v41  ;;  %10637 = vmatprep.subr.bf16.mxu1 %v11777_v9  ;;  %5451 = vmatmul.mubr.bf16.gmra.mxu0 %v4970_v15  ;;  %v14138_v13 = vadd.s32 16, %v14104_v19  ;;  %v15512_v15 = vrot.slane %v12608_v3, 3  ;;  %v11790_v31 = vld [vmem:[%s15479_s3 + $0x700] sm:$0xff]  }
 0x1bd   : > { %v10057_v26 = vpop.f32.mrf.mxu0  ;;  %v10097_v5 = vpop.f32.mrf.mxu1  ;;  %10598 = vmatpush3.bf16.msra.mxu0 %v11778_v14  ;;  %9455 = vmatprep.mubr.msk.bf16.mxu0 %vm3606_vm2, %v14008_v46  ;;  %v11788_v14 = vld [vmem:[%s15479_s3 + $0x740] sm:$0xff]   ;;  %v15509_v11 = vand.u32 7, %v14124_v0 }
 0x1be   : > { %v14106_v23 = vadd.f32 %v10096_v7, %v10056_v48  ;;  %5516 = vmatmul.mubr.bf16.gmra.mxu1 %v4974_v40  ;;  %10599 = vmatprep.subr.bf16.mxu0 %v11780_v18  ;;  %v15582_v48 = vld [vmem:[#allocation25_spill] sm:$0xff] }
 0x1bf   : > { %10638 = vmatpush3.bf16.msra.mxu1 %v11779_v12  ;;  %v10058_v17 = vpop.f32.mrf.mxu0  ;;  %v10098_v20 = vpop.f32.mrf.mxu1  ;;  %9457 = vmatprep.mubr.msk.bf16.mxu1 %vm3606_vm2, %v14017_v28  ;;  %v4956_v7 = vsel %vm3606_vm2, %v15582_v48, %v4955_v42 }
 0x1c0   : > { %v10059_v16 = vadd.f32 %v10058_v17, %v10057_v26  ;;  %v10099_v62 = vadd.f32 %v10098_v20, %v10097_v5  ;;  %10639 = vmatprep.subr.bf16.mxu1 %v11781_v38  ;;  %v5631_v5 = vsel %vm5625_vm4, %v14086_v47, %v14095_v60  ;;  %v11798_v47 = vld [vmem:[%s15479_s3 + $0x838] sm:$0xff]  }
 0x1c1   : > { %v10060_v9 = vpop.f32.mrf.mxu0  ;;  %v10100_v21 = vpop.f32.mrf.mxu1  ;;  %10600 = vmatpush3.bf16.msra.mxu0 %v11782_v27  ;;  %v14159_v27 = vadd.s32 4294967290, %v15510_v2 }
 0x1c2   : > { %v14132_v34 = vadd.f32 %v10099_v62, %v10059_v16  ;;  %10601 = vmatprep.subr.bf16.mxu0 %v11784_v50  ;;  %v15507_v50 = vand.u32 7, %v14138_v13  ;;  %v14176_v16 = vadd.s32 24, %v14104_v19 }
 0x1c3   : > { %10640 = vmatpush3.bf16.msra.mxu1 %v11783_v6  ;;  %v10061_v41 = vpop.f32.mrf.mxu0  ;;  %v10101_v12 = vpop.f32.mrf.mxu1  ;;  %15583 = vst [vmem:[#allocation3_spill] sm:$0xff] %v14159_v27  ;;  %v11796_v6 = vld [vmem:[%s15479_s3 + $0x878] sm:$0xff]   ;;  %vm2908_vm5 = vcmp.ge.s32.totalorder %v14159_v27, 0 }
 0x1c4   : > { %v10062_v18 = vadd.f32 %v10061_v41, %v10060_v9  ;;  %v10102_v32 = vadd.f32 %v10101_v12, %v10100_v21  ;;  %10641 = vmatprep.subr.bf16.mxu1 %v11785_v58  ;;  %9456 = vmatmul.mubr.msk.bf16.gmra.mxu0 %vm3606_vm2, %v14054_v30  ;;  %v11797_v58 = vld [vmem:[%s15479_s3 + $0x8f8] sm:$0xff]   ;;  %v14183_v9 = vadd.s32 4294967290, %v15509_v11  ;;  %v15511_v41 = vrot.slane %v12630_v10, 3  ;;  %v15589_v11 = vld [vmem:[#allocation6_spill] sm:$0xff] }
 0x1c5   : > { %v10063_v40 = vpop.f32.mrf.mxu0  ;;  %v10103_v38 = vpop.f32.mrf.mxu1  ;;  %10602 = vmatpush3.bf16.msra.mxu0 %v11786_v35  ;;  %5564 = vmatprep.mubr.bf16.mxu0 %v4956_v7  ;;  %v11801_v7 = vld [vmem:[%s15479_s3 + $0x8f0] sm:$0xff]  }
 0x1c6   : > { %v14161_v26 = vadd.f32 %v10102_v32, %v10062_v18  ;;  %9458 = vmatmul.mubr.msk.bf16.gmra.mxu1 %vm3606_vm2, %v14064_v1  ;;  %10603 = vmatprep.subr.bf16.mxu0 %v11788_v14  ;;  %15584 = vst [vmem:[#allocation25_spill] sm:$0xff] %v14183_v9  ;;  %v11799_v14 = vld [vmem:[%s15479_s3 + $0x8b8] sm:$0xff]   ;;  %v11800_v32 = vld [vmem:[%s15479_s3 + $0x870] sm:$0xff]   ;;  %vm2909_vm6 = vcmp.ge.s32.totalorder %v14183_v9, 0 }
 0x1c7   : > { %10642 = vmatpush3.bf16.msra.mxu1 %v11787_v53  ;;  %v10064_v17 = vpop.f32.mrf.mxu0  ;;  %v10104_v20 = vpop.f32.mrf.mxu1  ;;  %6085 = vmatprep.mubr.bf16.mxu1 %v5631_v5  ;;  %v15508_v5 = vand.u32 7, %v14176_v16 }
 0x1c8   : > { %v10065_v62 = vadd.f32 %v10064_v17, %v10063_v40  ;;  %v10105_v35 = vadd.f32 %v10104_v20, %v10103_v38  ;;  %10643 = vmatprep.subr.bf16.mxu1 %v11789_v44  ;;  %v15585_v44 = vld [vmem:[#allocation26_spill] sm:$0xff]  ;;  %v14201_v40 = vadd.s32 4294967290, %v15507_v50 }
 0x1c9   : > { %v10066_v21 = vpop.f32.mrf.mxu0  ;;  %v10106_v53 = vpop.f32.mrf.mxu1  ;;  %10604 = vmatpush3.bf16.msra.mxu0 %v11790_v31  ;;  %v4954_v18 = vsel %vm3606_vm2, %v15585_v44, %v4953_v39  ;;  %v5628_v31 = vsel %vm5625_vm4, %v14111_v24, %v14116_v33  ;;  %v11803_v24 = vld [vmem:[%s15479_s3 + $0x8b0] sm:$0xff]  }
 0x1ca   : > { %v14190_v12 = vadd.f32 %v10105_v35, %v10065_v62  ;;  %15586 = vst [vmem:[#allocation26_spill] sm:$0xff] %v14201_v40  ;;  %10669 = vmatprep.subr.bf16.mxu0 %v11796_v6  ;;  %v15587_v62 = vld [vmem:[#allocation4_spill] sm:$0xff]  ;;  %v4968_v6 = vsel %vm3606_vm2, %v4955_v42, %v15512_v15  ;;  %v14241_v42 = vadd.s32 4294967290, %v15508_v5  ;;  %vm2910_vm7 = vcmp.ge.s32.totalorder %v14201_v40, 0 }
 0x1cb   : > { %10644 = vmatpush3.bf16.msra.mxu1 %v11791_v57  ;;  %v10067_v38 = vpop.f32.mrf.mxu0  ;;  %v10107_v48 = vpop.f32.mrf.mxu1  ;;  %v11802_v57 = vld [vmem:[%s15479_s3 + $0x830] sm:$0xff]   ;;  %v14214_v35 = vrot.slane %v15587_v62, 3 }
 0x1cc   : > { %v10068_v17 = vadd.f32 %v10067_v38, %v10066_v21  ;;  %v10108_v20 = vadd.f32 %v10107_v48, %v10106_v53  ;;  %10709 = vmatprep.subr.bf16.mxu1 %v11797_v58  ;;  %5565 = vmatmul.mubr.bf16.vlgmr.msra.gmra.mxu0 %v4954_v18  ;;  %v14226_v58 = vadd.s32 32, %v14104_v19  ;;  %v11804_v53 = vld [vmem:[%s15479_s3 + $0x868] sm:$0xff]   ;;  %v14234_v18 = vadd.s32 40, %v14104_v19  ;;  %15588 = vst [vmem:[#allocation4_spill] sm:$0xff] %v14241_v42 }
 0x1cd   : > { %v10125_v44 = vpop.f32.mrf.mxu0  ;;  %v10165_v50 = vpop.f32.mrf.mxu1  ;;  %10670 = vmatpush3.bf16.msra.mxu0 %v11798_v47  ;;  %5572 = vmatprep.mubr.bf16.mxu0 %v4968_v6  ;;  %v4966_v6 = vsel %vm3606_vm2, %v4953_v39, %v15511_v41  ;;  %v15591_v41 = vld [vmem:[#allocation14_spill] sm:$0xff]  ;;  %vm2911_vm8 = vcmp.ge.s32.totalorder %v14241_v42, 0 }
 0x1ce   : > { %v14228_v21 = vadd.f32 %v10108_v20, %v10068_v17  ;;  %6086 = vmatmul.mubr.bf16.vlgmr.msra.gmra.mxu1 %v5628_v31  ;;  %10671 = vmatprep.subr.bf16.mxu0 %v11800_v32  ;;  %v14249_v17 = vrot.slane %v15566_v43, 3 }
 0x1cf   : > { %10710 = vmatpush3.bf16.msra.mxu1 %v11799_v14  ;;  %v10126_v38 = vpop.f32.mrf.mxu0  ;;  %v10166_v48 = vpop.f32.mrf.mxu1  ;;  %v11806_v14 = vld [vmem:[%s15479_s3 + $0x828] sm:$0xff]   ;;  %9617 = vmatprep.mubr.msk.bf16.mxu1 %vm2301_vm0, %v14095_v60  ;;  %v11808_v60 = vld [vmem:[%s15479_s3 + $0x860] sm:$0xff]  }
 0x1d0   : > { %v10127_v47 = vadd.f32 %v10126_v38, %v10125_v44  ;;  %v14243_v31 = vadd.f32 %v10166_v48, %v10165_v50  ;;  %10711 = vmatprep.subr.bf16.mxu1 %v11801_v7  ;;  %v11807_v44 = vld [vmem:[%s15479_s3 + $0x8a8] sm:$0xff]  }
 0x1d1   : > { %v10128_v32 = vpop.f32.mrf.mxu0  ;;  %v10168_v20 = vpop.f32.mrf.mxu1  ;;  %10672 = vmatpush3.bf16.msra.mxu0 %v11802_v57  ;;  %v14272_v57 = vadd.s32 48, %v14104_v19 }
 0x1d2   : > { %v2870_v7 = vadd.f32 %v10127_v47, %v14025_v37  ;;  %10673 = vmatprep.subr.bf16.mxu0 %v11804_v53  ;;  %v11809_v37 = vld [vmem:[%s15479_s3 + $0x8e0] sm:$0xff]   ;;  %v15590_v53 = vld [vmem:[#allocation7_spill] sm:$0xff] }
 0x1d3   : > { %10712 = vmatpush3.bf16.msra.mxu1 %v11803_v24  ;;  %v10129_v48 = vpop.f32.mrf.mxu0  ;;  %v10169_v5 = vpop.f32.mrf.mxu1  ;;  %v11810_v24 = vld [vmem:[%s15479_s3 + $0x820] sm:$0xff]   ;;  %v1866_v2 = vadd.f32 %v15590_v53, %v15589_v11 }
 0x1d4   : > { %v2948_v36 = vsel %vm2908_vm5, %v2870_v7, 0.0  ;;  %v10130_v39 = vadd.f32 %v10129_v48, %v10128_v32  ;;  %v14276_v47 = vadd.f32 %v10169_v5, %v10168_v20  ;;  %10713 = vmatprep.subr.bf16.mxu1 %v11805_v49  ;;  %5573 = vmatmul.mubr.bf16.gmra.mxu0 %v4966_v6  ;;  %v11811_v32 = vld [vmem:[%s15479_s3 + $0x8a0] sm:$0xff]   ;;  %v15592_v5 = vrot.slane %v12608_v3, 3  ;;  %v11812_v7 = vld [vmem:[%s15479_s3 + $0x858] sm:$0xff]   ;;  %v15595_v3 = vld [vmem:[#allocation15_spill] sm:$0xff] }
 0x1d5   : > { %v14284_v38 = vadd.f32 %v2948_v36, %v15591_v41  ;;  %v10131_v50 = vpop.f32.mrf.mxu0  ;;  %v10171_v15 = vpop.f32.mrf.mxu1  ;;  %v15593_v20 = vand.u32 7, %v14226_v58  ;;  %10674 = vmatpush3.bf16.msra.mxu0 %v11806_v14  ;;  %v15594_v6 = vand.u32 7, %v14234_v18  ;;  %v1939_v36 = vadd.f32 %v15595_v3, %v1866_v2  ;;  %v11814_v2 = vld [vmem:[%s15479_s3 + $0x818] sm:$0xff]  }
 0x1d6   : > { %v4980_v49 = vsel %vm3606_vm2, %v15592_v5, %v14214_v35  ;;  %v2873_v41 = vadd.f32 %v10130_v39, %v14051_v55  ;;  %9618 = vmatmul.mubr.msk.bf16.gmra.mxu1 %vm2301_vm0, %v14116_v33  ;;  %10675 = vmatprep.subr.bf16.mxu0 %v11808_v60  ;;  %v11813_v55 = vld [vmem:[%s15479_s3 + $0x8d8] sm:$0xff]   ;;  %v15513_v33 = vand.u32 7, %v14272_v57  ;;  %v15596_v3 = vmov 0  }
 0x1d7   : > { %v14296_v11 = vadd.s32 4294967290, %v15593_v20  ;;  %v14306_v48 = vadd.s32 4294967290, %v15594_v6  ;;  %10714 = vmatpush3.bf16.msra.mxu1 %v11807_v44  ;;  %v10132_v53 = vpop.f32.mrf.mxu0  ;;  %v10172_v5 = vpop.f32.mrf.mxu1  ;;  %5580 = vmatprep.mubr.bf16.mxu0 %v4980_v49  ;;  %v15597_v49 = vrot.slane %v12630_v10, 3  ;;  %v11817_v10 = vld [vmem:[%s15479_s3 + $0x8d0] sm:$0xff]  }
 0x1d8   : > { %v2949_v14 = vsel %vm2909_vm6, %v2873_v41, 0.0  ;;  %v10133_v39 = vadd.f32 %v10132_v53, %v10131_v50  ;;  %v14315_v20 = vadd.f32 %v10172_v5, %v10171_v15  ;;  %10715 = vmatprep.subr.bf16.mxu1 %v11809_v37  ;;  %6101 = vmatprep.mubr.bf16.mxu1 %v15596_v3  ;;  %v11815_v50 = vld [vmem:[%s15479_s3 + $0x898] sm:$0xff]   ;;  %v14327_v15 = vadd.s32 56, %v14104_v19  ;;  %v14339_v53 = vld [vmem:[%s12231_s30 + $0x80] sm:$0xff] }
 0x1d9   : > { %v14320_v44 = vadd.f32 %v2949_v14, %v1939_v36  ;;  %v10134_v60 = vpop.f32.mrf.mxu0  ;;  %v10174_v6 = vpop.f32.mrf.mxu1  ;;  %10676 = vmatpush3.bf16.msra.mxu0 %v11810_v24  ;;  %v4978_v41 = vsel %vm3606_vm2, %v15597_v49, %v14249_v17  ;;  %vm2912_vm9 = vcmp.ge.s32.totalorder %v14296_v11, 0  ;;  %v11816_v36 = vld [vmem:[%s15479_s3 + $0x850] sm:$0xff]   ;;  %v14342_v5 = vld [vmem:[%s12231_s30 + $0x98] sm:$0xff]  ;;  %vm2913_vm10 = vcmp.ge.s32.totalorder %v14306_v48, 0 }
 0x1da   : > { %v2878_v37 = vadd.f32 %v10133_v39, %v14077_v45  ;;  %v9464_v14 = vcombine.high %v14339_v53, %v14342_v5  ;;  %10677 = vmatprep.subr.bf16.mxu0 %v11812_v7  ;;  %v14351_v39 = vadd.s32 4294967290, %v15513_v33  ;;  %v14354_v49 = vld [vmem:[%s12231_s30 + $0xb0] sm:$0xff] }
 0x1db   : > { %10716 = vmatpush3.bf16.msra.mxu1 %v11811_v32  ;;  %v10135_v45 = vpop.f32.mrf.mxu0  ;;  %v10175_v24 = vpop.f32.mrf.mxu1  ;;  %v9470_v22 = vcombine.high %v14354_v49, %v14354_v49  ;;  %v15598_v33 = vld [vmem:[#allocation8_spill] sm:$0xff] }
 0x1dc   : > { %v2950_v32 = vsel %vm2910_vm7, %v2878_v37, 0.0  ;;  %v10136_v4 = vadd.f32 %v10135_v45, %v10134_v60  ;;  %v14360_v7 = vadd.f32 %v10175_v24, %v10174_v6  ;;  %10717 = vmatprep.subr.bf16.mxu1 %v11813_v55  ;;  %v1876_v54 = vadd.f32 %v15599_v25, %v15598_v33  ;;  %5581 = vmatmul.mubr.bf16.gmra.mxu0 %v4978_v41  ;;  %v11819_v60 = vld [vmem:[%s15479_s3 + $0x890] sm:$0xff]   ;;  %v11996_v6 = vld [vmem:[%s12231_s30 + $0x88] sm:$0xff]  ;;  %v11997_v37 = vld [vmem:[%s12231_s30 + $0xa0] sm:$0xff] }
 0x1dd   : > { %v14368_v29 = vadd.f32 %v2950_v32, %v15600_v63  ;;  %v10137_v59 = vpop.f32.mrf.mxu0  ;;  %v10177_v9 = vpop.f32.mrf.mxu1  ;;  %v9466_v45 = vcombine.high %v11996_v6, %v11997_v37  ;;  %10678 = vmatpush3.bf16.msra.mxu0 %v11814_v2  ;;  %v11820_v63 = vld [vmem:[%s15479_s3 + $0x848] sm:$0xff]   ;;  %v5635_v33 = vrot.slane %v9464_v14, 1  ;;  %v11998_v41 = vld [vmem:[%s12231_s30 + $0xb8] sm:$0xff]  ;;  %v15601_v32 = vld [vmem:[#allocation18_spill] sm:$0xff]  ;;  %v9463_v2 = vcombine.low %v14339_v53, %v14342_v5  ;;  %9459 = vmatprep.mubr.msk.bf16.mxu0 %vm3606_vm2, %v14214_v35  ;;  %s449_s30 = scalar_lea.vmem %s15477_s1, %s15640_s26 }
 0x1de   : > { %v2881_v25 = vadd.f32 %v10136_v4, %v14106_v23  ;;  %6102 = vmatmul.mubr.bf16.gmra.mxu1 %v15596_v3  ;;  %v9472_v24 = vcombine.high %v11998_v41, %v11998_v41  ;;  %v1949_v40 = vadd.f32 %v15601_v32, %v1876_v54  ;;  %10679 = vmatprep.subr.bf16.mxu0 %v11816_v36  ;;  %v11821_v4 = vld [vmem:[%s15479_s3 + $0x8c8] sm:$0xff]   ;;  %v14387_v23 = vrot.slane %v9470_v22, 1 }
 0x1df   : > { %10718 = vmatpush3.bf16.msra.mxu1 %v11815_v50  ;;  %v10138_v27 = vpop.f32.mrf.mxu0  ;;  %v10178_v55 = vpop.f32.mrf.mxu1  ;;  %v11822_v54 = vld [vmem:[%s15479_s3 + $0x808] sm:$0xff]   ;;  %6109 = vmatprep.mubr.bf16.mxu1 %v15596_v3  ;;  %vm2914_vm11 = vcmp.ge.s32.totalorder %v14351_v39, 0  ;;  %v5632_v32 = vrot.slane %v9463_v2, 1 }
 0x1e0   : > { %v2951_v14 = vsel %vm2911_vm8, %v2881_v25, 0.0  ;;  %v10139_v1 = vadd.f32 %v10138_v27, %v10137_v59  ;;  %v14393_v28 = vadd.f32 %v10178_v55, %v10177_v9  ;;  %10719 = vmatprep.subr.bf16.mxu1 %v11817_v10  ;;  %v11823_v59 = vld [vmem:[%s15479_s3 + $0x888] sm:$0xff]   ;;  %v5641_v27 = vrot.slane %v9466_v45, 1  ;;  %v11825_v45 = vld [vmem:[%s15479_s3 + $0x8c0] sm:$0xff]  }
 0x1e1   : > { %v14400_v50 = vadd.f32 %v2951_v14, %v1949_v40  ;;  %v10140_v22 = vpop.f32.mrf.mxu0  ;;  %v10180_v36 = vpop.f32.mrf.mxu1  ;;  %v9469_v9 = vcombine.low %v14354_v49, %v14354_v49  ;;  %10680 = vmatpush3.bf16.msra.mxu0 %v11818_v8  ;;  %v11824_v40 = vld [vmem:[%s15479_s3 + $0x840] sm:$0xff]   ;;  %v14413_v5 = vrot.slane %v9472_v24, 1  ;;  %v9465_v10 = vcombine.low %v11996_v6, %v11997_v37  ;;  %v15603_v37 = vld [vmem:[#allocation11_spill] sm:$0xff] }
 0x1e2   : > { %v2886_v53 = vadd.f32 %v10139_v1, %v14132_v34  ;;  %10681 = vmatprep.subr.bf16.mxu0 %v11820_v63  ;;  %v9471_v49 = vcombine.low %v11998_v41, %v11998_v41  ;;  %v15602_v6 = vld [vmem:[#allocation10_spill] sm:$0xff]  ;;  %v15604_v24 = vld [vmem:[#allocation19_spill] sm:$0xff] }
 0x1e3   : > { %10720 = vmatpush3.bf16.msra.mxu1 %v11819_v60  ;;  %v10141_v55 = vpop.f32.mrf.mxu0  ;;  %v10181_v25 = vpop.f32.mrf.mxu1  ;;  %v11826_v60 = vld [vmem:[%s15479_s3 + $0x800] sm:$0xff]   ;;  %v1886_v63 = vadd.f32 %v15603_v37, %v15602_v6 }
 0x1e4   : > { %v2952_v8 = vsel %vm2912_vm9, %v2886_v53, 0.0  ;;  %v10142_v1 = vadd.f32 %v10141_v55, %v10140_v22  ;;  %v14420_v34 = vadd.f32 %v10181_v25, %v10180_v36  ;;  %10721 = vmatprep.subr.bf16.mxu1 %v11821_v4  ;;  %9460 = vmatmul.mubr.msk.bf16.gmra.mxu0 %vm3606_vm2, %v14249_v17  ;;  %v11827_v41 = vld [vmem:[%s15479_s3 + $0x880] sm:$0xff]   ;;  %v5637_v4 = vsel %vm5625_vm4, %v5635_v33, %v14387_v23  ;;  %v11836_v25 = vld [vmem:[%s15479_s3 + $0x978] sm:$0xff]  }
 0x1e5   : > { %v14428_v14 = vadd.f32 %v2952_v8, %v15604_v24  ;;  %v10143_v42 = vpop.f32.mrf.mxu0  ;;  %v10183_v2 = vpop.f32.mrf.mxu1  ;;  %v14437_v22 = vrot.slane %v9469_v9, 1  ;;  %10682 = vmatpush3.bf16.msra.mxu0 %v11822_v54  ;;  %v5643_v53 = vsel %vm5625_vm4, %v5641_v27, %v14413_v5  ;;  %v5638_v55 = vrot.slane %v9465_v10, 1  ;;  %v15605_v8 = vld [vmem:[#allocation21_spill] sm:$0xff]  ;;  %6150 = vmatprep.mubr.bf16.mxu0 %v5637_v4  ;;  %v11840_v4 = vld [vmem:[%s15479_s3 + $0x970] sm:$0xff]  }
 0x1e6   : > { %v2889_v36 = vadd.f32 %v10142_v1, %v14161_v26  ;;  %6110 = vmatmul.mubr.bf16.gmra.mxu1 %v15596_v3  ;;  %v1959_v6 = vadd.f32 %v15605_v8, %v1886_v63  ;;  %10683 = vmatprep.subr.bf16.mxu0 %v11824_v40  ;;  %v14447_v9 = vrot.slane %v9471_v49, 1  ;;  %v11837_v26 = vld [vmem:[%s15479_s3 + $0x9f8] sm:$0xff]   ;;  %v15606_v63 = vand.u32 7, %v14327_v15 }
 0x1e7   : > { %10722 = vmatpush3.bf16.msra.mxu1 %v11823_v59  ;;  %v10144_v37 = vpop.f32.mrf.mxu0  ;;  %v10184_v33 = vpop.f32.mrf.mxu1  ;;  %v11838_v59 = vld [vmem:[%s15479_s3 + $0x938] sm:$0xff]   ;;  %6215 = vmatprep.mubr.bf16.mxu1 %v5643_v53 }
 0x1e8   : > { %v2953_v54 = vsel %vm2913_vm10, %v2889_v36, 0.0  ;;  %v10145_v27 = vadd.f32 %v10144_v37, %v10143_v42  ;;  %v14454_v10 = vadd.f32 %v10184_v33, %v10183_v2  ;;  %10723 = vmatprep.subr.bf16.mxu1 %v11825_v45  ;;  %v14463_v24 = vadd.s32 4294967290, %v15606_v63  ;;  %v11839_v42 = vld [vmem:[%s15479_s3 + $0x9b8] sm:$0xff]   ;;  %v15607_v37 = vld [vmem:[#allocation12_spill] sm:$0xff] }
 0x1e9   : > { %v14459_v1 = vadd.f32 %v2953_v54, %v1959_v6  ;;  %v10146_v40 = vpop.f32.mrf.mxu0  ;;  %v10186_v49 = vpop.f32.mrf.mxu1  ;;  %10684 = vmatpush3.bf16.msra.mxu0 %v11826_v60  ;;  %v5634_v2 = vsel %vm5625_vm4, %v5632_v32, %v14437_v22  ;;  %v5640_v53 = vsel %vm5625_vm4, %v5638_v55, %v14447_v9  ;;  %v11841_v6 = vld [vmem:[%s15479_s3 + $0x9f0] sm:$0xff]   ;;  %v15608_v33 = vld [vmem:[#allocation13_spill] sm:$0xff]  ;;  %v15609_v55 = vld [vmem:[#allocation22_spill] sm:$0xff] }
 0x1ea   : > { %v2894_v45 = vadd.f32 %v10145_v27, %v14190_v12  ;;  %10749 = vmatprep.subr.bf16.mxu0 %v11836_v25  ;;  %v1896_v54 = vadd.f32 %v15608_v33, %v15607_v37  ;;  %vm2915_vm12 = vcmp.ge.s32.totalorder %v14463_v24, 0  ;;  %v11847_v33 = vld [vmem:[%s15479_s3 + $0x9a8] sm:$0xff]  }
 0x1eb   : > { %10724 = vmatpush3.bf16.msra.mxu1 %v11827_v41  ;;  %v10147_v36 = vpop.f32.mrf.mxu0  ;;  %v10187_v8 = vpop.f32.mrf.mxu1  ;;  %v11842_v41 = vld [vmem:[%s15479_s3 + $0x930] sm:$0xff]  }
 0x1ec   : > { %v2954_v12 = vsel %vm2914_vm11, %v2894_v45, 0.0  ;;  %v10148_v60 = vadd.f32 %v10147_v36, %v10146_v40  ;;  %v14481_v32 = vadd.f32 %v10187_v8, %v10186_v49  ;;  %10789 = vmatprep.subr.bf16.mxu1 %v11837_v26  ;;  %6151 = vmatmul.mubr.bf16.vlgmr.msra.gmra.mxu0 %v5634_v2  ;;  %v11843_v40 = vld [vmem:[%s15479_s3 + $0x9b0] sm:$0xff]   ;;  %v11844_v49 = vld [vmem:[%s15479_s3 + $0x968] sm:$0xff]  }
 0x1ed   : > { %v14489_v25 = vadd.f32 %v2954_v12, %v15609_v55  ;;  %v10205_v27 = vpop.f32.mrf.mxu0  ;;  %v10245_v63 = vpop.f32.mrf.mxu1  ;;  %10750 = vmatpush3.bf16.msra.mxu0 %v11838_v59  ;;  %v15610_v45 = vld [vmem:[#allocation27_spill] sm:$0xff]  ;;  %9619 = vmatprep.mubr.msk.bf16.mxu0 %vm2301_vm0, %v14387_v23  ;;  %v11848_v23 = vld [vmem:[%s15479_s3 + $0x960] sm:$0xff]  }
 0x1ee   : > { %v2897_v26 = vadd.f32 %v10148_v60, %v14228_v21  ;;  %6216 = vmatmul.mubr.bf16.vlgmr.msra.gmra.mxu1 %v5640_v53  ;;  %v1969_v36 = vadd.f32 %v15610_v45, %v1896_v54  ;;  %10751 = vmatprep.subr.bf16.mxu0 %v11840_v4  ;;  %v11845_v2 = vld [vmem:[%s15479_s3 + $0x9e8] sm:$0xff]  }
 0x1ef   : > { %10790 = vmatpush3.bf16.msra.mxu1 %v11839_v42  ;;  %v10206_v8 = vpop.f32.mrf.mxu0  ;;  %v10246_v12 = vpop.f32.mrf.mxu1  ;;  %v11846_v59 = vld [vmem:[%s15479_s3 + $0x928] sm:$0xff]   ;;  %9621 = vmatprep.mubr.msk.bf16.mxu1 %vm2301_vm0, %v14413_v5 }
 0x1f0   : > { %v2955_v37 = vsel %vm2915_vm12, %v2897_v26, 0.0  ;;  %v10207_v21 = vadd.f32 %v10206_v8, %v10205_v27  ;;  %v10247_v53 = vadd.f32 %v10246_v12, %v10245_v63  ;;  %10791 = vmatprep.subr.bf16.mxu1 %v11841_v6  ;;  %v11849_v27 = vld [vmem:[%s15479_s3 + $0x9e0] sm:$0xff]   ;;  %v11852_v8 = vld [vmem:[%s15479_s3 + $0x958] sm:$0xff]  }
 0x1f1   : > { %v14510_v42 = vadd.f32 %v2955_v37, %v1969_v36  ;;  %v10208_v4 = vpop.f32.mrf.mxu0  ;;  %v10248_v60 = vpop.f32.mrf.mxu1  ;;  %10752 = vmatpush3.bf16.msra.mxu0 %v11842_v41 }
 0x1f2   : > { %v3449_v6 = vadd.f32 %v10207_v21, %v14243_v31  ;;  %10753 = vmatprep.subr.bf16.mxu0 %v11844_v49  ;;  %v11850_v31 = vld [vmem:[%s15479_s3 + $0x920] sm:$0xff]  }
 0x1f3   : > { %10792 = vmatpush3.bf16.msra.mxu1 %v11843_v40  ;;  %v10209_v54 = vpop.f32.mrf.mxu0  ;;  %v10249_v55 = vpop.f32.mrf.mxu1  ;;  %v11851_v40 = vld [vmem:[%s15479_s3 + $0x9a0] sm:$0xff]  }
 0x1f4   : > { %v3514_v5 = vadd.f32 %v10247_v53, %v3449_v6  ;;  %v10210_v63 = vadd.f32 %v10209_v54, %v10208_v4  ;;  %v10250_v26 = vadd.f32 %v10249_v55, %v10248_v60  ;;  %10793 = vmatprep.subr.bf16.mxu1 %v11845_v2  ;;  %9620 = vmatmul.mubr.msk.bf16.gmra.mxu0 %vm2301_vm0, %v14437_v22  ;;  %v11853_v2 = vld [vmem:[%s15479_s3 + $0x9d8] sm:$0xff]   ;;  %v11857_v54 = vld [vmem:[%s15479_s3 + $0x9d0] sm:$0xff]  }
 0x1f5   : > { %v10211_v41 = vpop.f32.mrf.mxu0  ;;  %v10251_v45 = vpop.f32.mrf.mxu1  ;;  %10754 = vmatpush3.bf16.msra.mxu0 %v11846_v59  ;;  %6166 = vmatprep.mubr.bf16.mxu0 %v15596_v3  ;;  %v11855_v59 = vld [vmem:[%s15479_s3 + $0x998] sm:$0xff]  }
 0x1f6   : > { %v14533_v49 = vadd.f32 %v3514_v5, %v14284_v38  ;;  %v3452_v36 = vadd.f32 %v10210_v63, %v14276_v47  ;;  %9622 = vmatmul.mubr.msk.bf16.gmra.mxu1 %vm2301_vm0, %v14447_v9  ;;  %10755 = vmatprep.subr.bf16.mxu0 %v11848_v23  ;;  %v11854_v47 = vld [vmem:[%s15479_s3 + $0x918] sm:$0xff]  }
 0x1f7   : > { %10794 = vmatpush3.bf16.msra.mxu1 %v11847_v33  ;;  %v10212_v12 = vpop.f32.mrf.mxu0  ;;  %v10252_v22 = vpop.f32.mrf.mxu1  ;;  %6231 = vmatprep.mubr.bf16.mxu1 %v15596_v3  ;;  %v11856_v33 = vld [vmem:[%s15479_s3 + $0x950] sm:$0xff]  }
 0x1f8   : > { %v3517_v38 = vadd.f32 %v10250_v26, %v3452_v36  ;;  %v10213_v37 = vadd.f32 %v10212_v12, %v10211_v41  ;;  %v10253_v21 = vadd.f32 %v10252_v22, %v10251_v45  ;;  %10795 = vmatprep.subr.bf16.mxu1 %v11849_v27  ;;  %v11859_v26 = vld [vmem:[%s15479_s3 + $0x990] sm:$0xff]   ;;  %v11860_v45 = vld [vmem:[%s15479_s3 + $0x948] sm:$0xff]  }
 0x1f9   : > { %v10214_v9 = vpop.f32.mrf.mxu0  ;;  %v10254_v53 = vpop.f32.mrf.mxu1  ;;  %10756 = vmatpush3.bf16.msra.mxu0 %v11850_v31 }
 0x1fa   : > { %v14553_v4 = vadd.f32 %v3517_v38, %v14320_v44  ;;  %v3457_v60 = vadd.f32 %v10213_v37, %v14315_v20  ;;  %10757 = vmatprep.subr.bf16.mxu0 %v11852_v8  ;;  %v11858_v20 = vld [vmem:[%s15479_s3 + $0x910] sm:$0xff]   ;;  %v11861_v8 = vld [vmem:[%s15479_s3 + $0x9c8] sm:$0xff]  }
 0x1fb   : > { %10796 = vmatpush3.bf16.msra.mxu1 %v11851_v40  ;;  %v10215_v6 = vpop.f32.mrf.mxu0  ;;  %v10255_v23 = vpop.f32.mrf.mxu1  ;;  %v11863_v37 = vld [vmem:[%s15479_s3 + $0x988] sm:$0xff]  }
 0x1fc   : > { %v3522_v55 = vadd.f32 %v10253_v21, %v3457_v60  ;;  %v10216_v27 = vadd.f32 %v10215_v6, %v10214_v9  ;;  %v10256_v5 = vadd.f32 %v10255_v23, %v10254_v53  ;;  %10797 = vmatprep.subr.bf16.mxu1 %v11853_v2  ;;  %6167 = vmatmul.mubr.bf16.gmra.mxu0 %v15596_v3  ;;  %v11864_v9 = vld [vmem:[%s15479_s3 + $0x940] sm:$0xff]  }
 0x1fd   : > { %v10217_v44 = vpop.f32.mrf.mxu0  ;;  %v10257_v63 = vpop.f32.mrf.mxu1  ;;  %10758 = vmatpush3.bf16.msra.mxu0 %v11854_v47  ;;  %6174 = vmatprep.mubr.bf16.mxu0 %v15596_v3  ;;  %v11865_v60 = vld [vmem:[%s15479_s3 + $0x9c0] sm:$0xff]  }
 0x1fe   : > { %v14570_v31 = vadd.f32 %v3522_v55, %v14368_v29  ;;  %v3460_v41 = vadd.f32 %v10216_v27, %v14360_v7  ;;  %6232 = vmatmul.mubr.bf16.gmra.mxu1 %v15596_v3  ;;  %10759 = vmatprep.subr.bf16.mxu0 %v11856_v33  ;;  %v11862_v7 = vld [vmem:[%s15479_s3 + $0x908] sm:$0xff]   ;;  %v11867_v55 = vld [vmem:[%s15479_s3 + $0x980] sm:$0xff]  }
 0x1ff   : > { %10798 = vmatpush3.bf16.msra.mxu1 %v11855_v59  ;;  %v10218_v40 = vpop.f32.mrf.mxu0  ;;  %v10258_v36 = vpop.f32.mrf.mxu1  ;;  %6239 = vmatprep.mubr.bf16.mxu1 %v15596_v3 }
 0x200   : > { %v3525_v12 = vadd.f32 %v10256_v5, %v3460_v41  ;;  %v10219_v29 = vadd.f32 %v10218_v40, %v10217_v44  ;;  %v10259_v22 = vadd.f32 %v10258_v36, %v10257_v63  ;;  %10799 = vmatprep.subr.bf16.mxu1 %v11857_v54 }
 0x201   : > { %v10220_v2 = vpop.f32.mrf.mxu0  ;;  %v10260_v38 = vpop.f32.mrf.mxu1  ;;  %10760 = vmatpush3.bf16.msra.mxu0 %v11858_v20  ;;  %v11868_v20 = vld [vmem:[%s15479_s3 + $0xa78] sm:$0xff]  }
 0x202   : > { %v14589_v21 = vadd.f32 %v3525_v12, %v14400_v50  ;;  %v3465_v47 = vadd.f32 %v10219_v29, %v14393_v28  ;;  %10761 = vmatprep.subr.bf16.mxu0 %v11860_v45  ;;  %v11866_v28 = vld [vmem:[%s15479_s3 + $0x900] sm:$0xff]  }
 0x203   : > { %10800 = vmatpush3.bf16.msra.mxu1 %v11859_v26  ;;  %v10221_v53 = vpop.f32.mrf.mxu0  ;;  %v10261_v59 = vpop.f32.mrf.mxu1  ;;  %v11869_v26 = vld [vmem:[%s15479_s3 + $0xaf8] sm:$0xff]  }
 0x204   : > { %v3530_v33 = vadd.f32 %v10259_v22, %v3465_v47  ;;  %v10222_v6 = vadd.f32 %v10221_v53, %v10220_v2  ;;  %v10262_v23 = vadd.f32 %v10261_v59, %v10260_v38  ;;  %10801 = vmatprep.subr.bf16.mxu1 %v11861_v8  ;;  %6175 = vmatmul.mubr.bf16.gmra.mxu0 %v15596_v3  ;;  %v11871_v8 = vld [vmem:[%s15479_s3 + $0xab8] sm:$0xff]  }
 0x205   : > { %v10223_v50 = vpop.f32.mrf.mxu0  ;;  %v10263_v54 = vpop.f32.mrf.mxu1  ;;  %10762 = vmatpush3.bf16.msra.mxu0 %v11862_v7  ;;  %6681 = vmatprep.mubr.bf16.mxu0 %v12414_v51  ;;  %v11872_v51 = vld [vmem:[%s15479_s3 + $0xa70] sm:$0xff]  }
 0x206   : > { %v14606_v27 = vadd.f32 %v3530_v33, %v14428_v14  ;;  %v3468_v5 = vadd.f32 %v10222_v6, %v14420_v34  ;;  %6240 = vmatmul.mubr.bf16.gmra.mxu1 %v15596_v3  ;;  %10763 = vmatprep.subr.bf16.mxu0 %v11864_v9  ;;  %v11870_v34 = vld [vmem:[%s15479_s3 + $0xa38] sm:$0xff]   ;;  %v11875_v9 = vld [vmem:[%s15479_s3 + $0xab0] sm:$0xff]  }
 0x207   : > { %10802 = vmatpush3.bf16.msra.mxu1 %v11863_v37  ;;  %v10224_v44 = vpop.f32.mrf.mxu0  ;;  %v10264_v63 = vpop.f32.mrf.mxu1  ;;  %6746 = vmatprep.mubr.bf16.mxu1 %v12416_v52  ;;  %v11873_v52 = vld [vmem:[%s15479_s3 + $0xaf0] sm:$0xff]  }
 0x208   : > { %v3533_v41 = vadd.f32 %v10262_v23, %v3468_v5  ;;  %v10225_v14 = vadd.f32 %v10224_v44, %v10223_v50  ;;  %v10265_v45 = vadd.f32 %v10264_v63, %v10263_v54  ;;  %10803 = vmatprep.subr.bf16.mxu1 %v11865_v60  ;;  %v11876_v60 = vld [vmem:[%s15479_s3 + $0xa68] sm:$0xff]  }
 0x209   : > { %v10226_v40 = vpop.f32.mrf.mxu0  ;;  %v10266_v36 = vpop.f32.mrf.mxu1  ;;  %10764 = vmatpush3.bf16.msra.mxu0 %v11866_v28  ;;  %v11879_v54 = vld [vmem:[%s15479_s3 + $0xaa8] sm:$0xff]  }
 0x20a   : > { %v14625_v12 = vadd.f32 %v3533_v41, %v14459_v1  ;;  %v3473_v29 = vadd.f32 %v10225_v14, %v14454_v10  ;;  %10829 = vmatprep.subr.bf16.mxu0 %v11868_v20  ;;  %v11874_v10 = vld [vmem:[%s15479_s3 + $0xa30] sm:$0xff]   ;;  %v11880_v20 = vld [vmem:[%s15479_s3 + $0xa60] sm:$0xff]  }
 0x20b   : > { %10804 = vmatpush3.bf16.msra.mxu1 %v11867_v55  ;;  %v10227_v22 = vpop.f32.mrf.mxu0  ;;  %v10267_v7 = vpop.f32.mrf.mxu1 }
 0x20c   : > { %v3538_v2 = vadd.f32 %v10265_v45, %v3473_v29  ;;  %v10228_v38 = vadd.f32 %v10227_v22, %v10226_v40  ;;  %v10268_v37 = vadd.f32 %v10267_v7, %v10266_v36  ;;  %10869 = vmatprep.subr.bf16.mxu1 %v11869_v26  ;;  %6682 = vmatmul.mubr.bf16.vlgmr.msra.gmra.mxu0 %v12429_v56  ;;  %v11877_v56 = vld [vmem:[%s15479_s3 + $0xae8] sm:$0xff]   ;;  %v11881_v26 = vld [vmem:[%s15479_s3 + $0xae0] sm:$0xff]   ;;  %v11885_v22 = vld [vmem:[%s15479_s3 + $0xad8] sm:$0xff]  }
 0x20d   : > { %v10285_v1 = vpop.f32.mrf.mxu0  ;;  %v10325_v47 = vpop.f32.mrf.mxu1  ;;  %10830 = vmatpush3.bf16.msra.mxu0 %v11870_v34  ;;  %6689 = vmatprep.mubr.bf16.mxu0 %v15596_v3  ;;  %v11883_v40 = vld [vmem:[%s15479_s3 + $0xaa0] sm:$0xff]  }
 0x20e   : > { %v14642_v53 = vadd.f32 %v3538_v2, %v14489_v25  ;;  %v3476_v59 = vadd.f32 %v10228_v38, %v14481_v32  ;;  %6747 = vmatmul.mubr.bf16.vlgmr.msra.gmra.mxu1 %v15563_v61  ;;  %10831 = vmatprep.subr.bf16.mxu0 %v11872_v51  ;;  %v11878_v61 = vld [vmem:[%s15479_s3 + $0xa28] sm:$0xff]   ;;  %v11886_v2 = vld [vmem:[%s15479_s3 + $0xa18] sm:$0xff]  }
 0x20f   : > { %10870 = vmatpush3.bf16.msra.mxu1 %v11871_v8  ;;  %v10286_v33 = vpop.f32.mrf.mxu0  ;;  %v10326_v6 = vpop.f32.mrf.mxu1  ;;  %6754 = vmatprep.mubr.bf16.mxu1 %v15596_v3  ;;  %v11884_v8 = vld [vmem:[%s15479_s3 + $0xa58] sm:$0xff]  }
 0x210   : > { %v3541_v23 = vadd.f32 %v10268_v37, %v3476_v59  ;;  %v10287_v25 = vadd.f32 %v10286_v33, %v10285_v1  ;;  %v10327_v28 = vadd.f32 %v10326_v6, %v10325_v47  ;;  %10871 = vmatprep.subr.bf16.mxu1 %v11873_v52  ;;  %v11888_v47 = vld [vmem:[%s15479_s3 + $0xa50] sm:$0xff]  }
 0x211   : > { %v10288_v32 = vpop.f32.mrf.mxu0  ;;  %v10328_v50 = vpop.f32.mrf.mxu1  ;;  %10832 = vmatpush3.bf16.msra.mxu0 %v11874_v10  ;;  %v11887_v10 = vld [vmem:[%s15479_s3 + $0xa98] sm:$0xff]  }
 0x212   : > { %v14661_v55 = vadd.f32 %v3541_v23, %v14510_v42  ;;  %v14663_v5 = vadd.f32 %v10327_v28, %v10287_v25  ;;  %10833 = vmatprep.subr.bf16.mxu0 %v11876_v60  ;;  %v11882_v42 = vld [vmem:[%s15479_s3 + $0xa20] sm:$0xff]   ;;  %v11889_v60 = vld [vmem:[%s15479_s3 + $0xad0] sm:$0xff]  }
 0x213   : > { %10872 = vmatpush3.bf16.msra.mxu1 %v11875_v9  ;;  %v10289_v44 = vpop.f32.mrf.mxu0  ;;  %v10329_v63 = vpop.f32.mrf.mxu1  ;;  %v11891_v28 = vld [vmem:[%s15479_s3 + $0xa90] sm:$0xff]  }
 0x214   : > { %v10290_v41 = vadd.f32 %v10289_v44, %v10288_v32  ;;  %v10330_v14 = vadd.f32 %v10329_v63, %v10328_v50  ;;  %10873 = vmatprep.subr.bf16.mxu1 %v11877_v56  ;;  %6690 = vmatmul.mubr.bf16.gmra.mxu0 %v15596_v3  ;;  %v11890_v56 = vld [vmem:[%s15479_s3 + $0xa10] sm:$0xff]   ;;  %v11892_v32 = vld [vmem:[%s15479_s3 + $0xa48] sm:$0xff]  }
 0x215   : > { %v10291_v45 = vpop.f32.mrf.mxu0  ;;  %v10331_v34 = vpop.f32.mrf.mxu1  ;;  %10834 = vmatpush3.bf16.msra.mxu0 %v11878_v61  ;;  %6697 = vmatprep.mubr.bf16.mxu0 %v15596_v3 }
 0x216   : > { %v14678_v36 = vadd.f32 %v10330_v14, %v10290_v41  ;;  %6755 = vmatmul.mubr.bf16.gmra.mxu1 %v15596_v3  ;;  %10835 = vmatprep.subr.bf16.mxu0 %v11880_v20  ;;  %v11893_v20 = vld [vmem:[%s15479_s3 + $0xac8] sm:$0xff]  }
 0x217   : > { %10874 = vmatpush3.bf16.msra.mxu1 %v11879_v54  ;;  %v10292_v29 = vpop.f32.mrf.mxu0  ;;  %v10332_v51 = vpop.f32.mrf.mxu1  ;;  %6762 = vmatprep.mubr.bf16.mxu1 %v15596_v3 }
 0x218   : > { %v10293_v7 = vadd.f32 %v10292_v29, %v10291_v45  ;;  %v10333_v52 = vadd.f32 %v10332_v51, %v10331_v34  ;;  %10875 = vmatprep.subr.bf16.mxu1 %v11881_v26  ;;  %v11894_v26 = vld [vmem:[%s15479_s3 + $0xa08] sm:$0xff]   ;;  %v11896_v34 = vld [vmem:[%s15479_s3 + $0xa40] sm:$0xff]   ;;  %v15611_v51 = vand.u32 7, %v14104_v19 }
 0x219   : > { %v10294_v38 = vpop.f32.mrf.mxu0  ;;  %v10334_v37 = vpop.f32.mrf.mxu1  ;;  %10836 = vmatpush3.bf16.msra.mxu0 %v11882_v42  ;;  %v11895_v42 = vld [vmem:[%s15479_s3 + $0xa88] sm:$0xff]   ;;  %v11897_v29 = vld [vmem:[%s15479_s3 + $0xac0] sm:$0xff]  }
 0x21a   : > { %v14695_v1 = vadd.f32 %v10333_v52, %v10293_v7  ;;  %10837 = vmatprep.subr.bf16.mxu0 %v11884_v8  ;;  %v11899_v19 = vld [vmem:[%s15479_s3 + $0xa80] sm:$0xff]  }
 0x21b   : > { %10876 = vmatpush3.bf16.msra.mxu1 %v11883_v40  ;;  %v10295_v9 = vpop.f32.mrf.mxu0  ;;  %v10335_v59 = vpop.f32.mrf.mxu1 }
 0x21c   : > { %v10296_v33 = vadd.f32 %v10295_v9, %v10294_v38  ;;  %v10336_v6 = vadd.f32 %v10335_v59, %v10334_v37  ;;  %10877 = vmatprep.subr.bf16.mxu1 %v11885_v22  ;;  %6698 = vmatmul.mubr.bf16.gmra.mxu0 %v15596_v3  ;;  %v14737_v22 = vadd.s32 6, %v15611_v51  ;;  %v15612_v38 = vand.u32 7, %v14124_v0  ;;  %v11900_v9 = vld [vmem:[%s15479_s3 + $0xb78] sm:$0xff]  }
 0x21d   : > { %v10297_v23 = vpop.f32.mrf.mxu0  ;;  %v10337_v25 = vpop.f32.mrf.mxu1  ;;  %10838 = vmatpush3.bf16.msra.mxu0 %v11886_v2  ;;  %6705 = vmatprep.mubr.bf16.mxu0 %v15596_v3  ;;  %v11898_v2 = vld [vmem:[%s15479_s3 + $0xa00] sm:$0xff]   ;;  %v15613_v59 = vand.u32 7, %v14138_v13  ;;  %v11901_v0 = vld [vmem:[%s15479_s3 + $0xbf8] sm:$0xff]  }
 0x21e   : > { %v14710_v61 = vadd.f32 %v10336_v6, %v10296_v33  ;;  %6763 = vmatmul.mubr.bf16.gmra.mxu1 %v15596_v3  ;;  %10839 = vmatprep.subr.bf16.mxu0 %v11888_v47  ;;  %v14744_v37 = vadd.s32 6, %v15612_v38  ;;  %v15614_v6 = vand.u32 7, %v14176_v16  ;;  %v11903_v16 = vld [vmem:[%s15479_s3 + $0xbb8] sm:$0xff]   ;;  %vm4246_vm13 = vcmp.lt.s32.totalorder %v14737_v22, 8  ;;  %v11910_v38 = vld [vmem:[%s15479_s3 + $0xb28] sm:$0xff]  }
 0x21f   : > { %10878 = vmatpush3.bf16.msra.mxu1 %v11887_v10  ;;  %v10298_v50 = vpop.f32.mrf.mxu0  ;;  %v10338_v54 = vpop.f32.mrf.mxu1  ;;  %6770 = vmatprep.mubr.bf16.mxu1 %v15596_v3 }
 0x220   : > { %v10299_v44 = vadd.f32 %v10298_v50, %v10297_v23  ;;  %v10339_v63 = vadd.f32 %v10338_v54, %v10337_v25  ;;  %10879 = vmatprep.subr.bf16.mxu1 %v11889_v60  ;;  %v14755_v60 = vadd.s32 6, %v15613_v59  ;;  %vm4247_vm14 = vcmp.lt.s32.totalorder %v14744_v37, 8  ;;  %v11913_v59 = vld [vmem:[%s15479_s3 + $0xbe0] sm:$0xff]  }
 0x221   : > { %v10300_v41 = vpop.f32.mrf.mxu0  ;;  %v10340_v14 = vpop.f32.mrf.mxu1  ;;  %10840 = vmatpush3.bf16.msra.mxu0 %v11890_v56  ;;  %v14765_v56 = vadd.s32 6, %v15614_v6 }
 0x222   : > { %v14727_v45 = vadd.f32 %v10339_v63, %v10299_v44  ;;  %10841 = vmatprep.subr.bf16.mxu0 %v11892_v32  ;;  %v11902_v32 = vld [vmem:[%s15479_s3 + $0xb38] sm:$0xff]   ;;  %v11905_v44 = vld [vmem:[%s15479_s3 + $0xbf0] sm:$0xff]   ;;  %vm4248_vm15 = vcmp.lt.s32.totalorder %v14755_v60, 8 }
 0x223   : > { %10880 = vmatpush3.bf16.msra.mxu1 %v11891_v28  ;;  %v10301_v40 = vpop.f32.mrf.mxu0  ;;  %v10341_v8 = vpop.f32.mrf.mxu1  ;;  %vm4249_vm0 = vcmp.lt.s32.totalorder %v14765_v56, 8 }
 0x224   : > { %v10302_v7 = vadd.f32 %v10301_v40, %v10300_v41  ;;  %v10342_v52 = vadd.f32 %v10341_v8, %v10340_v14  ;;  %10881 = vmatprep.subr.bf16.mxu1 %v11893_v20  ;;  %6706 = vmatmul.mubr.bf16.gmra.mxu0 %v15596_v3  ;;  %v11904_v20 = vld [vmem:[%s15479_s3 + $0xb70] sm:$0xff]   ;;  %v11908_v8 = vld [vmem:[%s15479_s3 + $0xb68] sm:$0xff]  }
 0x225   : > { %v10303_v10 = vpop.f32.mrf.mxu0  ;;  %v10343_v47 = vpop.f32.mrf.mxu1  ;;  %10842 = vmatpush3.bf16.msra.mxu0 %v11894_v26  ;;  %6811 = vmatprep.mubr.bf16.mxu0 %v15587_v62  ;;  %v11906_v14 = vld [vmem:[%s15479_s3 + $0xb30] sm:$0xff]  }
 0x226   : > { %v14757_v33 = vadd.f32 %v10342_v52, %v10302_v7  ;;  %6771 = vmatmul.mubr.bf16.gmra.mxu1 %v15596_v3  ;;  %10843 = vmatprep.subr.bf16.mxu0 %v11896_v34  ;;  %v11907_v40 = vld [vmem:[%s15479_s3 + $0xbb0] sm:$0xff]  }
 0x227   : > { %10882 = vmatpush3.bf16.msra.mxu1 %v11895_v42  ;;  %v10304_v23 = vpop.f32.mrf.mxu0  ;;  %v10344_v25 = vpop.f32.mrf.mxu1  ;;  %9911 = vmatprep.mubr.msk.bf16.mxu1 %vm3606_vm2, %v14008_v46 }
 0x228   : > { %v10305_v13 = vadd.f32 %v10304_v23, %v10303_v10  ;;  %v10345_v28 = vadd.f32 %v10344_v25, %v10343_v47  ;;  %10883 = vmatprep.subr.bf16.mxu1 %v11897_v29  ;;  %v11911_v47 = vld [vmem:[%s15479_s3 + $0xba8] sm:$0xff]  }
 0x229   : > { %v10306_v50 = vpop.f32.mrf.mxu0  ;;  %v10346_v54 = vpop.f32.mrf.mxu1  ;;  %10844 = vmatpush3.bf16.msra.mxu0 %v11898_v2 }
 0x22a   : > { %v14780_v62 = vadd.f32 %v10345_v28, %v10305_v13  ;;  %10909 = vmatprep.subr.bf16.mxu0 %v11900_v9 }
 0x22b   : > { %10884 = vmatpush3.bf16.msra.mxu1 %v11899_v19  ;;  %v10307_v63 = vpop.f32.mrf.mxu0  ;;  %v10347_v46 = vpop.f32.mrf.mxu1  ;;  %v11912_v19 = vld [vmem:[%s15479_s3 + $0xb60] sm:$0xff]  }
 0x22c   : > { %v10308_v26 = vadd.f32 %v10307_v63, %v10306_v50  ;;  %v10348_v41 = vadd.f32 %v10347_v46, %v10346_v54  ;;  %10949 = vmatprep.subr.bf16.mxu1 %v11901_v0  ;;  %6812 = vmatmul.mubr.bf16.vlgmr.msra.gmra.mxu0 %v15566_v43  ;;  %v11909_v43 = vld [vmem:[%s15479_s3 + $0xbe8] sm:$0xff]   ;;  %v11915_v54 = vld [vmem:[%s15479_s3 + $0xba0] sm:$0xff]  }
 0x22d   : > { %v10365_v42 = vpop.f32.mrf.mxu0  ;;  %v10405_v34 = vpop.f32.mrf.mxu1  ;;  %10910 = vmatpush3.bf16.msra.mxu0 %v11902_v32  ;;  %6819 = vmatprep.mubr.bf16.mxu0 %v15596_v3 }
 0x22e   : > { %v14796_v29 = vadd.f32 %v10348_v41, %v10308_v26  ;;  %9912 = vmatmul.mubr.msk.bf16.vlgmr.msra.gmra.mxu1 %vm3606_vm2, %v14054_v30  ;;  %10911 = vmatprep.subr.bf16.mxu0 %v11904_v20 }
 0x22f   : > { %10950 = vmatpush3.bf16.msra.mxu1 %v11903_v16  ;;  %v10366_v51 = vpop.f32.mrf.mxu0  ;;  %v10406_v7 = vpop.f32.mrf.mxu1  ;;  %7285 = vmatprep.mubr.bf16.mxu1 %v15596_v3  ;;  %v11916_v16 = vld [vmem:[%s15479_s3 + $0xb58] sm:$0xff]  }
 0x230   : > { %v10367_v52 = vadd.f32 %v10366_v51, %v10365_v42  ;;  %v14803_v2 = vadd.f32 %v10406_v7, %v10405_v34  ;;  %10951 = vmatprep.subr.bf16.mxu1 %v11905_v44 }
 0x231   : > { %v10368_v30 = vpop.f32.mrf.mxu0  ;;  %v10408_v10 = vpop.f32.mrf.mxu1  ;;  %10912 = vmatpush3.bf16.msra.mxu0 %v11906_v14 }
 0x232   : > { %v4200_v9 = vadd.f32 %v10367_v52, %v14663_v5  ;;  %10913 = vmatprep.subr.bf16.mxu0 %v11908_v8  ;;  %v11914_v5 = vld [vmem:[%s15479_s3 + $0xb20] sm:$0xff]   ;;  %v11920_v8 = vld [vmem:[%s15479_s3 + $0xb50] sm:$0xff]  }
 0x233   : > { %10952 = vmatpush3.bf16.msra.mxu1 %v11907_v40  ;;  %v10369_v0 = vpop.f32.mrf.mxu0  ;;  %v10409_v6 = vpop.f32.mrf.mxu1  ;;  %v11919_v40 = vld [vmem:[%s15479_s3 + $0xb98] sm:$0xff]  }
 0x234   : > { %v4278_v23 = vsel %vm4246_vm13, %v4200_v9, 0.0  ;;  %v10370_v25 = vadd.f32 %v10369_v0, %v10368_v30  ;;  %v14823_v13 = vadd.f32 %v10409_v6, %v10408_v10  ;;  %10953 = vmatprep.subr.bf16.mxu1 %v11909_v43  ;;  %6820 = vmatmul.mubr.bf16.gmra.mxu0 %v15596_v3  ;;  %v11921_v30 = vld [vmem:[%s15479_s3 + $0xbd0] sm:$0xff]  }
 0x235   : > { %v14829_v28 = vadd.f32 %v4278_v23, %v14533_v49  ;;  %v10371_v32 = vpop.f32.mrf.mxu0  ;;  %v10411_v50 = vpop.f32.mrf.mxu1  ;;  %10914 = vmatpush3.bf16.msra.mxu0 %v11910_v38  ;;  %v11917_v49 = vld [vmem:[%s15479_s3 + $0xbd8] sm:$0xff]   ;;  %6827 = vmatprep.mubr.bf16.mxu0 %v15596_v3  ;;  %v11923_v23 = vld [vmem:[%s15479_s3 + $0xb90] sm:$0xff]  }
 0x236   : > { %v4203_v20 = vadd.f32 %v10370_v25, %v14678_v36  ;;  %7286 = vmatmul.mubr.bf16.gmra.mxu1 %v15596_v3  ;;  %10915 = vmatprep.subr.bf16.mxu0 %v11912_v19  ;;  %v11918_v36 = vld [vmem:[%s15479_s3 + $0xb18] sm:$0xff]   ;;  %v15615_v19 = vand.u32 7, %v14226_v58  ;;  %v11924_v58 = vld [vmem:[%s15479_s3 + $0xb48] sm:$0xff]  }
 0x237   : > { %10954 = vmatpush3.bf16.msra.mxu1 %v11911_v47  ;;  %v10372_v44 = vpop.f32.mrf.mxu0  ;;  %v10412_v63 = vpop.f32.mrf.mxu1  ;;  %7293 = vmatprep.mubr.bf16.mxu1 %v15596_v3 }
 0x238   : > { %v4279_v46 = vsel %vm4247_vm14, %v4203_v20, 0.0  ;;  %v10373_v26 = vadd.f32 %v10372_v44, %v10371_v32  ;;  %v14845_v41 = vadd.f32 %v10412_v63, %v10411_v50  ;;  %10955 = vmatprep.subr.bf16.mxu1 %v11913_v59  ;;  %v14876_v9 = vadd.s32 6, %v15615_v19  ;;  %v11925_v32 = vld [vmem:[%s15479_s3 + $0xbc8] sm:$0xff]   ;;  %v15618_v19 = vld [vmem:[#allocation32_spill] sm:$0xff] }
 0x239   : > { %v14852_v14 = vadd.f32 %v4279_v46, %v14553_v4  ;;  %v10374_v42 = vpop.f32.mrf.mxu0  ;;  %v10414_v34 = vpop.f32.mrf.mxu1  ;;  %10916 = vmatpush3.bf16.msra.mxu0 %v11914_v5  ;;  %v15616_v20 = vand.u32 7, %v14234_v18  ;;  %v11926_v63 = vld [vmem:[%s15479_s3 + $0xb08] sm:$0xff]   ;;  %v11928_v18 = vld [vmem:[%s15479_s3 + $0xb40] sm:$0xff]  }
 0x23a   : > { %v4208_v43 = vadd.f32 %v10373_v26, %v14695_v1  ;;  %10917 = vmatprep.subr.bf16.mxu0 %v11916_v16  ;;  %vm4250_vm1 = vcmp.lt.s32.totalorder %v14876_v9, 8  ;;  %v11927_v26 = vld [vmem:[%s15479_s3 + $0xb88] sm:$0xff]  }
 0x23b   : > { %10956 = vmatpush3.bf16.msra.mxu1 %v11915_v54  ;;  %v10375_v51 = vpop.f32.mrf.mxu0  ;;  %v10415_v7 = vpop.f32.mrf.mxu1 }
 0x23c   : > { %v4280_v4 = vsel %vm4248_vm15, %v4208_v43, 0.0  ;;  %v10376_v52 = vadd.f32 %v10375_v51, %v10374_v42  ;;  %v14864_v38 = vadd.f32 %v10415_v7, %v10414_v34  ;;  %10957 = vmatprep.subr.bf16.mxu1 %v11917_v49  ;;  %6828 = vmatmul.mubr.bf16.gmra.mxu0 %v15596_v3  ;;  %v14903_v49 = vadd.s32 6, %v15616_v20  ;;  %v11929_v34 = vld [vmem:[%s15479_s3 + $0xbc0] sm:$0xff]  }
 0x23d   : > { %v14870_v10 = vadd.f32 %v4280_v4, %v14570_v31  ;;  %v10377_v1 = vpop.f32.mrf.mxu0  ;;  %v10417_v47 = vpop.f32.mrf.mxu1  ;;  %10918 = vmatpush3.bf16.msra.mxu0 %v11918_v36  ;;  %v11922_v31 = vld [vmem:[%s15479_s3 + $0xb10] sm:$0xff]   ;;  %6835 = vmatprep.mubr.bf16.mxu0 %v15596_v3  ;;  %v15617_v51 = vand.u32 7, %v14272_v57 }
 0x23e   : > { %v4211_v59 = vadd.f32 %v10376_v52, %v14710_v61  ;;  %7294 = vmatmul.mubr.bf16.gmra.mxu1 %v15596_v3  ;;  %10919 = vmatprep.subr.bf16.mxu0 %v11920_v8  ;;  %vm15524_vm3 = vcmp.lt.s32.totalorder %v14903_v49, 8 }
 0x23f   : > { %10958 = vmatpush3.bf16.msra.mxu1 %v11919_v40  ;;  %v10378_v0 = vpop.f32.mrf.mxu0  ;;  %v10418_v6 = vpop.f32.mrf.mxu1  ;;  %7301 = vmatprep.mubr.bf16.mxu1 %v15596_v3  ;;  %v14930_v7 = vadd.s32 6, %v15617_v51 }
 0x240   : > { %v4281_v61 = vsel %vm4249_vm0, %v4211_v59, 0.0  ;;  %v10379_v25 = vadd.f32 %v10378_v0, %v10377_v1  ;;  %v14891_v5 = vadd.f32 %v10418_v6, %v10417_v47  ;;  %10959 = vmatprep.subr.bf16.mxu1 %v11921_v30  ;;  %v11931_v1 = vld [vmem:[%s15479_s3 + $0xb80] sm:$0xff]   ;;  %v11932_v59 = vld [vmem:[%s15482_s6 + $0x38] sm:$0xff]  }
 0x241   : > { %v14898_v50 = vadd.f32 %v4281_v61, %v14589_v21  ;;  %v10380_v54 = vpop.f32.mrf.mxu0  ;;  %v10420_v16 = vpop.f32.mrf.mxu1  ;;  %10920 = vmatpush3.bf16.msra.mxu0 %v11922_v31  ;;  %vm4252_vm4 = vcmp.lt.s32.totalorder %v14930_v7, 8 }
 0x242   : > { %v4216_v44 = vadd.f32 %v10379_v25, %v14727_v45  ;;  %10921 = vmatprep.subr.bf16.mxu0 %v11924_v58 }
 0x243   : > { %10960 = vmatpush3.bf16.msra.mxu1 %v11923_v23  ;;  %v10381_v21 = vpop.f32.mrf.mxu0  ;;  %v10421_v46 = vpop.f32.mrf.mxu1  ;;  %v15619_v23 = vand.u32 7, %v14327_v15  ;;  %v11933_v15 = vld [vmem:[%s15482_s6 + $0x30] sm:$0xff]  }
 0x244   : > { %v4282_v45 = vsel %vm4250_vm1, %v4216_v44, 0.0  ;;  %v10382_v36 = vadd.f32 %v10381_v21, %v10380_v54  ;;  %v14918_v42 = vadd.f32 %v10421_v46, %v10420_v16  ;;  %10961 = vmatprep.subr.bf16.mxu1 %v11925_v32  ;;  %6836 = vmatmul.mubr.bf16.gmra.mxu0 %v15596_v3  ;;  %v15620_v44 = vld [vmem:[#allocation35_spill] sm:$0xff] }
 0x245   : > { %v14924_v40 = vadd.f32 %v4282_v45, %v14606_v27  ;;  %v10383_v8 = vpop.f32.mrf.mxu0  ;;  %v10423_v43 = vpop.f32.mrf.mxu1  ;;  %10922 = vmatpush3.bf16.msra.mxu0 %v11926_v63  ;;  %v11930_v27 = vld [vmem:[%s15479_s3 + $0xb00] sm:$0xff]   ;;  %9913 = vmatprep.mubr.msk.bf16.mxu0 %vm3606_vm2, %v15618_v19  ;;  %v14955_v58 = vadd.s32 6, %v15619_v23 }
 0x246   : > { %v4219_v4 = vadd.f32 %v10382_v36, %v14757_v33  ;;  %7302 = vmatmul.mubr.bf16.gmra.mxu1 %v15596_v3  ;;  %10923 = vmatprep.subr.bf16.mxu0 %v11928_v18 }
 0x247   : > { %10962 = vmatpush3.bf16.msra.mxu1 %v11927_v26  ;;  %v10384_v52 = vpop.f32.mrf.mxu0  ;;  %v10424_v30 = vpop.f32.mrf.mxu1  ;;  %9915 = vmatprep.mubr.msk.bf16.mxu1 %vm3606_vm2, %v14214_v35 }
 0x248   : > { %v4283_v57 = vsel %vm15524_vm3, %v4219_v4, 0.0  ;;  %v10385_v47 = vadd.f32 %v10384_v52, %v10383_v8  ;;  %v14942_v33 = vadd.f32 %v10424_v30, %v10423_v43  ;;  %10963 = vmatprep.subr.bf16.mxu1 %v11929_v34  ;;  %vm4253_vm3 = vcmp.lt.s32.totalorder %v14955_v58, 8  ;;  %v11935_v52 = vld [vmem:[%s15482_s6 + $0x20] sm:$0xff]   ;;  %v11960_v58 = vld [vmem:[%s15482_s6 + $0x98] sm:$0xff]  }
 0x249   : > { %v14950_v31 = vadd.f32 %v4283_v57, %v14625_v12  ;;  %v10386_v0 = vpop.f32.mrf.mxu0  ;;  %v10426_v6 = vpop.f32.mrf.mxu1  ;;  %10924 = vmatpush3.bf16.msra.mxu0 %v11930_v27 }
 0x24a   : > { %v4224_v61 = vadd.f32 %v10385_v47, %v14780_v62 }
 0x24b   : > { %10964 = vmatpush3.bf16.msra.mxu1 %v11931_v1  ;;  %v10387_v25 = vpop.f32.mrf.mxu0  ;;  %v10427_v32 = vpop.f32.mrf.mxu1 }
 0x24c   : > { %v4284_v12 = vsel %vm4252_vm4, %v4224_v61, 0.0  ;;  %v10388_v54 = vadd.f32 %v10387_v25, %v10386_v0  ;;  %v14962_v16 = vadd.f32 %v10427_v32, %v10426_v6  ;;  %11085 = vmatprep.subr.bf16.mxu1 %v11932_v59  ;;  %9914 = vmatmul.mubr.msk.bf16.vlgmr.msra.gmra.mxu0 %vm3606_vm2, %v15620_v44 }
 0x24d   : > { %v14968_v20 = vadd.f32 %v4284_v12, %v14642_v53  ;;  %v10445_v35 = vpop.f32.mrf.mxu0  ;;  %v10485_v62 = vpop.f32.mrf.mxu1  ;;  %7350 = vmatprep.mubr.bf16.mxu0 %v15596_v3 }
 0x24e   : > { %v4227_v63 = vadd.f32 %v10388_v54, %v14796_v29  ;;  %9916 = vmatmul.mubr.msk.bf16.vlgmr.msra.gmra.mxu1 %vm3606_vm2, %v14249_v17  ;;  %v11934_v29 = vld [vmem:[%s15482_s6 + $0x28] sm:$0xff]   ;;  %vm15633_vm2 = vcmp.lt.s32.totalorder %v14903_v49, 8 }
 0x24f   : > { %11086 = vmatpush3.bf16.msra.mxu1 %v11932_v59  ;;  %v10446_v21 = vpop.f32.mrf.mxu0  ;;  %v10486_v46 = vpop.f32.mrf.mxu1  ;;  %7415 = vmatprep.mubr.bf16.mxu1 %v15596_v3 }
 0x250   : > { %v4285_v53 = vsel %vm4253_vm3, %v4227_v63, 0.0  ;;  %v10447_v26 = vadd.f32 %v10446_v21, %v10445_v35  ;;  %v10487_v18 = vadd.f32 %v10486_v46, %v10485_v62  ;;  %11087 = vmatprep.subr.bf16.mxu1 %v11933_v15  ;;  %v11937_v21 = vld [vmem:[%s15482_s6 + $0x10] sm:$0xff]  }
 0x251   : > { %v14984_v45 = vadd.f32 %v4285_v53, %v14661_v55  ;;  %v10448_v17 = vpop.f32.mrf.mxu0  ;;  %v10488_v36 = vpop.f32.mrf.mxu1 }
 0x252   : > { %v4834_v34 = vadd.f32 %v10447_v26, %v14803_v2 }
 0x253   : > { %11088 = vmatpush3.bf16.msra.mxu1 %v11933_v15  ;;  %v10449_v8 = vpop.f32.mrf.mxu0  ;;  %v10489_v43 = vpop.f32.mrf.mxu1 }
 0x254   : > { %v4899_v51 = vadd.f32 %v10487_v18, %v4834_v34  ;;  %v10450_v4 = vadd.f32 %v10449_v8, %v10448_v17  ;;  %v10490_v27 = vadd.f32 %v10489_v43, %v10488_v36  ;;  %11089 = vmatprep.subr.bf16.mxu1 %v11934_v29  ;;  %7351 = vmatmul.mubr.bf16.gmra.mxu0 %v15596_v3 }
 0x255   : > { %v10451_v30 = vpop.f32.mrf.mxu0  ;;  %v10491_v1 = vpop.f32.mrf.mxu1  ;;  %7358 = vmatprep.mubr.bf16.mxu0 %v15596_v3 }
 0x256   : > { %v4929_v57 = vsel %vm2908_vm5, %v4899_v51, 0.0  ;;  %v4837_v2 = vadd.f32 %v10450_v4, %v14823_v13  ;;  %7416 = vmatmul.mubr.bf16.gmra.mxu1 %v15596_v3  ;;  %v11936_v13 = vld [vmem:[%s15482_s6 + $0x18] sm:$0xff]  }
 0x257   : > { %v14997_v47 = vadd.f32 %v4929_v57, %v14829_v28  ;;  %11090 = vmatpush3.bf16.msra.mxu1 %v11934_v29  ;;  %v10452_v19 = vpop.f32.mrf.mxu0  ;;  %v10492_v59 = vpop.f32.mrf.mxu1  ;;  %7423 = vmatprep.mubr.bf16.mxu1 %v15596_v3 }
 0x258   : > { %v4902_v0 = vadd.f32 %v10490_v27, %v4837_v2  ;;  %v10453_v6 = vadd.f32 %v10452_v19, %v10451_v30  ;;  %v10493_v23 = vadd.f32 %v10492_v59, %v10491_v1  ;;  %11091 = vmatprep.subr.bf16.mxu1 %v11935_v52  ;;  %v11939_v59 = vld [vmem:[%s15482_s6] sm:$0xff]  }
 0x259   : > { %v10454_v61 = vpop.f32.mrf.mxu0  ;;  %v10494_v25 = vpop.f32.mrf.mxu1 }
 0x25a   : > { %v4930_v12 = vsel %vm2909_vm6, %v4902_v0, 0.0  ;;  %v4842_v28 = vadd.f32 %v10453_v6, %v14845_v41 }
 0x25b   : > { %v15007_v54 = vadd.f32 %v4930_v12, %v14852_v14  ;;  %11092 = vmatpush3.bf16.msra.mxu1 %v11935_v52  ;;  %v10455_v15 = vpop.f32.mrf.mxu0  ;;  %v10495_v35 = vpop.f32.mrf.mxu1 }
 0x25c   : > { %v4907_v62 = vadd.f32 %v10493_v23, %v4842_v28  ;;  %v10456_v44 = vadd.f32 %v10455_v15, %v10454_v61  ;;  %v10496_v63 = vadd.f32 %v10495_v35, %v10494_v25  ;;  %11093 = vmatprep.subr.bf16.mxu1 %v11936_v13  ;;  %7359 = vmatmul.mubr.bf16.gmra.mxu0 %v15596_v3  ;;  %v11940_v35 = vld [vmem:[%s15482_s6 + $0xf8] sm:$0xff]  }
 0x25d   : > { %v10457_v46 = vpop.f32.mrf.mxu0  ;;  %v10497_v53 = vpop.f32.mrf.mxu1  ;;  %7366 = vmatprep.mubr.bf16.mxu0 %v15596_v3 }
 0x25e   : > { %v4931_v41 = vsel %vm2910_vm7, %v4907_v62, 0.0  ;;  %v4845_v14 = vadd.f32 %v10456_v44, %v14864_v38  ;;  %7424 = vmatmul.mubr.bf16.gmra.mxu1 %v15596_v3  ;;  %v11938_v38 = vld [vmem:[%s15482_s6 + $0x8] sm:$0xff]  }
 0x25f   : > { %v15019_v18 = vadd.f32 %v4931_v41, %v14870_v10  ;;  %11094 = vmatpush3.bf16.msra.mxu1 %v11936_v13  ;;  %v10458_v29 = vpop.f32.mrf.mxu0  ;;  %v10498_v17 = vpop.f32.mrf.mxu1  ;;  %7431 = vmatprep.mubr.bf16.mxu1 %v15596_v3  ;;  %v15625_v13 = vld [vmem:[#allocation17_spill] sm:$0xff] }
 0x260   : > { %v4910_v36 = vadd.f32 %v10496_v63, %v4845_v14  ;;  %v10459_v34 = vadd.f32 %v10458_v29, %v10457_v46  ;;  %v10499_v8 = vadd.f32 %v10498_v17, %v10497_v53  ;;  %11095 = vmatprep.subr.bf16.mxu1 %v11937_v21  ;;  %v11941_v14 = vld [vmem:[%s15482_s6 + $0xf0] sm:$0xff]  }
 0x261   : > { %v10460_v43 = vpop.f32.mrf.mxu0  ;;  %v10500_v51 = vpop.f32.mrf.mxu1 }
 0x262   : > { %v4932_v27 = vsel %vm2911_vm8, %v4910_v36, 0.0  ;;  %v4850_v10 = vadd.f32 %v10459_v34, %v14891_v5 }
 0x263   : > { %v15029_v52 = vadd.f32 %v4932_v27, %v14898_v50  ;;  %11096 = vmatpush3.bf16.msra.mxu1 %v11937_v21  ;;  %v10461_v30 = vpop.f32.mrf.mxu0  ;;  %v10501_v1 = vpop.f32.mrf.mxu1 }
 0x264   : > { %v4915_v57 = vadd.f32 %v10499_v8, %v4850_v10  ;;  %v10462_v2 = vadd.f32 %v10461_v30, %v10460_v43  ;;  %v10502_v19 = vadd.f32 %v10501_v1, %v10500_v51  ;;  %11097 = vmatprep.subr.bf16.mxu1 %v11938_v38  ;;  %7367 = vmatmul.mubr.bf16.gmra.mxu0 %v15596_v3  ;;  %v15627_v8 = vld [vmem:[#allocation23_spill] sm:$0xff] }
 0x265   : > { %v10463_v0 = vpop.f32.mrf.mxu0  ;;  %v10503_v6 = vpop.f32.mrf.mxu1  ;;  %v11942_v10 = vld [vmem:[%s15482_s6 + $0xe8] sm:$0xff]  }
 0x266   : > { %v4933_v5 = vsel %vm2912_vm9, %v4915_v57, 0.0  ;;  %v4853_v50 = vadd.f32 %v10462_v2, %v14918_v42  ;;  %7432 = vmatmul.mubr.bf16.gmra.mxu1 %v15596_v3 }
 0x267   : > { %v15040_v23 = vadd.f32 %v4933_v5, %v14924_v40  ;;  %11098 = vmatpush3.bf16.msra.mxu1 %v11938_v38  ;;  %11101 = vmatprep.mubr.bf16.mxu1 %v15625_v13  ;;  %v10464_v61 = vpop.f32.mrf.mxu0  ;;  %v10504_v25 = vpop.f32.mrf.mxu1 }
 0x268   : > { %v4918_v12 = vadd.f32 %v10502_v19, %v4853_v50  ;;  %v10465_v28 = vadd.f32 %v10464_v61, %v10463_v0  ;;  %v10505_v15 = vadd.f32 %v10504_v25, %v10503_v6  ;;  %11099 = vmatprep.subr.bf16.mxu1 %v11939_v59  ;;  %v11943_v6 = vld [vmem:[%s15482_s6 + $0xe0] sm:$0xff]   ;;  %v15628_v61 = vld [vmem:[#allocation24_spill] sm:$0xff] }
 0x269   : > { %v10466_v62 = vpop.f32.mrf.mxu0  ;;  %v10506_v42 = vpop.f32.mrf.mxu1 }
 0x26a   : > { %v4934_v3 = vsel %vm2913_vm10, %v4918_v12, 0.0  ;;  %v4858_v40 = vadd.f32 %v10465_v28, %v14942_v33 }
 0x26b   : > { %v15050_v44 = vadd.f32 %v4934_v3, %v14950_v31  ;;  %11100 = vmatpush3.bf16.msra.mxu1 %v11939_v59  ;;  %v10467_v63 = vpop.f32.mrf.mxu0  ;;  %v10507_v21 = vpop.f32.mrf.mxu1  ;;  %v15626_v31 = vld [vmem:[#allocation20_spill] sm:$0xff] }
 0x26c   : > { %v4923_v46 = vadd.f32 %v10505_v15, %v4858_v40  ;;  %v10468_v53 = vadd.f32 %v10467_v63, %v10466_v62  ;;  %v10508_v41 = vadd.f32 %v10507_v21, %v10506_v42  ;;  %11133 = vmatprep.subr.bf16.mxu1 %v11940_v35 }
 0x26d   : > { %v10525_v29 = vpop.f32.mrf.mxu0 }
 0x26e   : > { %v4935_v17 = vsel %vm2914_vm11, %v4923_v46, 0.0  ;;  %v4861_v33 = vadd.f32 %v10468_v53, %v14962_v16  ;;  %v10565_v36 = vpop.f32.mrf.mxu1  ;;  %11102 = vmatmul.mubr.bf16.vlgmr.msra.gmra.mxu1 %v15626_v31  ;;  %v11945_v53 = vld [vmem:[%s15482_s6 + $0xd0] sm:$0xff]  }
 0x26f   : > { %v15060_v34 = vadd.f32 %v4935_v17, %v14968_v20  ;;  %11105 = vmatprep.mubr.bf16.mxu1 %v15627_v8  ;;  %11134 = vmatpush3.bf16.msra.mxu1 %v11940_v35  ;;  %v10526_v38 = vpop.f32.mrf.mxu0  ;;  %v11944_v35 = vld [vmem:[%s15482_s6 + $0xd8] sm:$0xff]   ;;  %v11946_v8 = vld [vmem:[%s15482_s6 + $0xc8] sm:$0xff]  }
 0x270   : > { %v4926_v43 = vadd.f32 %v10508_v41, %v4861_v33  ;;  %v10527_v51 = vadd.f32 %v10526_v38, %v10525_v29  ;;  %v10566_v27 = vpop.f32.mrf.mxu1  ;;  %11135 = vmatprep.subr.bf16.mxu1 %v11941_v14 }
 0x271   : > { %v10567_v30 = vadd.f32 %v10566_v27, %v10565_v36  ;;  %v10528_v16 = vpop.f32.mrf.mxu0 }
 0x272   : > { %v4936_v1 = vsel %vm2915_vm12, %v4926_v43, 0.0  ;;  %v10568_v57 = vpop.f32.mrf.mxu1 }
 0x273   : > { %v15069_v20 = vadd.f32 %v4936_v1, %v14984_v45  ;;  %v15071_v2 = vadd.f32 %v10567_v30, %v10527_v51  ;;  %11136 = vmatpush3.bf16.msra.mxu1 %v11941_v14  ;;  %v10529_v19 = vpop.f32.mrf.mxu0  ;;  %v15629_v45 = vld [vmem:[#allocation5_spill] sm:$0xff]  ;;  %v11947_v1 = vld [vmem:[%s15482_s6 + $0xc0] sm:$0xff]  }
 0x274   : > { %v10530_v59 = vadd.f32 %v10529_v19, %v10528_v16  ;;  %v10569_v0 = vpop.f32.mrf.mxu1  ;;  %11137 = vmatprep.subr.bf16.mxu1 %v11942_v10 }
 0x275   : > { %v10570_v5 = vadd.f32 %v10569_v0, %v10568_v57  ;;  %v10531_v50 = vpop.f32.mrf.mxu0 }
 0x276   : > { %v10571_v13 = vpop.f32.mrf.mxu1  ;;  %11106 = vmatmul.mubr.bf16.gmra.mxu1 %v15628_v61 }
 0x277   : > { %v15077_v25 = vadd.f32 %v10570_v5, %v10530_v59  ;;  %11138 = vmatpush3.bf16.msra.mxu1 %v11942_v10  ;;  %11149 = vmatprep.mubr.bf16.mxu1 %v15629_v45  ;;  %v10532_v12 = vpop.f32.mrf.mxu0 }
 0x278   : > { %v10533_v28 = vadd.f32 %v10532_v12, %v10531_v50  ;;  %v10572_v15 = vpop.f32.mrf.mxu1  ;;  %11139 = vmatprep.subr.bf16.mxu1 %v11943_v6 }
 0x279   : > { %v10573_v62 = vadd.f32 %v10572_v15, %v10571_v13  ;;  %v10534_v42 = vpop.f32.mrf.mxu0 }
 0x27a   : > { %v10574_v3 = vpop.f32.mrf.mxu1 }
 0x27b   : > { %v15083_v40 = vadd.f32 %v10573_v62, %v10533_v28  ;;  %11140 = vmatpush3.bf16.msra.mxu1 %v11943_v6  ;;  %v10535_v63 = vpop.f32.mrf.mxu0 }
 0x27c   : > { %v10536_v21 = vadd.f32 %v10535_v63, %v10534_v42  ;;  %v10575_v46 = vpop.f32.mrf.mxu1  ;;  %11141 = vmatprep.subr.bf16.mxu1 %v11944_v35 }
 0x27d   : > { %v10576_v41 = vadd.f32 %v10575_v46, %v10574_v3  ;;  %v10537_v14 = vpop.f32.mrf.mxu0  ;;  %v11948_v3 = vld [vmem:[%s15482_s6 + $0x78] sm:$0xff]  }
 0x27e   : > { %v10577_v29 = vpop.f32.mrf.mxu1  ;;  %11061 = vmatprep.subr.bf16.mxu0 %v11948_v3 }
 0x27f   : > { %v15088_v17 = vadd.f32 %v10576_v41, %v10536_v21  ;;  %11142 = vmatpush3.bf16.msra.mxu1 %v11944_v35  ;;  %v10538_v33 = vpop.f32.mrf.mxu0  ;;  %v15630_v21 = vld [vmem:[#allocation29_spill] sm:$0xff]  ;;  %11062 = vmatpush3.bf16.msra.mxu0 %v11948_v3 }
 0x280   : > { %v10539_v36 = vadd.f32 %v10538_v33, %v10537_v14  ;;  %v10578_v31 = vpop.f32.mrf.mxu1  ;;  %11143 = vmatprep.subr.bf16.mxu1 %v11945_v53 }
 0x281   : > { %v10579_v38 = vadd.f32 %v10578_v31, %v10577_v29  ;;  %v10540_v43 = vpop.f32.mrf.mxu0  ;;  %v11949_v31 = vld [vmem:[%s15482_s6 + $0x70] sm:$0xff]  }
 0x282   : > { %v10580_v51 = vpop.f32.mrf.mxu1  ;;  %11063 = vmatprep.subr.bf16.mxu0 %v11949_v31 }
 0x283   : > { %v15093_v27 = vadd.f32 %v10579_v38, %v10539_v36  ;;  %11144 = vmatpush3.bf16.msra.mxu1 %v11945_v53  ;;  %v10541_v10 = vpop.f32.mrf.mxu0  ;;  %v15631_v53 = vld [vmem:[#allocation31_spill] sm:$0xff]  ;;  %11064 = vmatpush3.bf16.msra.mxu0 %v11949_v31 }
 0x284   : > { %v10542_v30 = vadd.f32 %v10541_v10, %v10540_v43  ;;  %v10581_v16 = vpop.f32.mrf.mxu1  ;;  %11145 = vmatprep.subr.bf16.mxu1 %v11946_v8 }
 0x285   : > { %v10582_v57 = vadd.f32 %v10581_v16, %v10580_v51  ;;  %v10543_v19 = vpop.f32.mrf.mxu0 }
 0x286   : > { %v10583_v59 = vpop.f32.mrf.mxu1 }
 0x287   : > { %v15098_v0 = vadd.f32 %v10582_v57, %v10542_v30  ;;  %11146 = vmatpush3.bf16.msra.mxu1 %v11946_v8  ;;  %v10544_v6 = vpop.f32.mrf.mxu0 }
 0x288   : > { %v10545_v5 = vadd.f32 %v10544_v6, %v10543_v19  ;;  %v10584_v50 = vpop.f32.mrf.mxu1  ;;  %11147 = vmatprep.subr.bf16.mxu1 %v11947_v1  ;;  %v11950_v19 = vld [vmem:[%s15482_s6 + $0x68] sm:$0xff]   ;;  %v15632_v6 = vld [vmem:[#allocation34_spill] sm:$0xff] }
 0x289   : > { %v10585_v13 = vadd.f32 %v10584_v50, %v10583_v59  ;;  %v10546_v61 = vpop.f32.mrf.mxu0  ;;  %11065 = vmatprep.subr.bf16.mxu0 %v11950_v19 }
 0x28a   : > { %v10586_v45 = vpop.f32.mrf.mxu1  ;;  %11066 = vmatpush3.bf16.msra.mxu0 %v11950_v19 }
 0x28b   : > { %v15100_v12 = vadd.f32 %v10585_v13, %v10545_v5  ;;  %11148 = vmatpush3.bf16.msra.mxu1 %v11947_v1  ;;  %v10547_v28 = vpop.f32.mrf.mxu0 }
 0x28c   : > { %v10548_v15 = vadd.f32 %v10547_v28, %v10546_v61  ;;  %v10587_v35 = vpop.f32.mrf.mxu1 }
 0x28d   : > { %v10588_v62 = vadd.f32 %v10587_v35, %v10586_v45  ;;  %v10605_v42 = vpop.f32.mrf.mxu0 }
 0x28e   : > { %v10645_v63 = vpop.f32.mrf.mxu1  ;;  %11150 = vmatmul.mubr.bf16.vlgmr.msra.gmra.mxu1 %v15630_v21 }
 0x28f   : > { %v15106_v46 = vadd.f32 %v10588_v62, %v10548_v15  ;;  %11153 = vmatprep.mubr.bf16.mxu1 %v15631_v53  ;;  %v10606_v41 = vpop.f32.mrf.mxu0 }
 0x290   : > { %v10607_v14 = vadd.f32 %v10606_v41, %v10605_v42  ;;  %v10646_v29 = vpop.f32.mrf.mxu1  ;;  %v11952_v41 = vld [vmem:[%s15482_s6 + $0x58] sm:$0xff]  }
 0x291   : > { %v15109_v33 = vadd.f32 %v10646_v29, %v10645_v63  ;;  %v10608_v36 = vpop.f32.mrf.mxu0 }
 0x292   : > { %v5567_v8 = vadd.f32 %v10607_v14, %v15071_v2  ;;  %v10648_v38 = vpop.f32.mrf.mxu1 }
 0x293   : > { %v10609_v43 = vpop.f32.mrf.mxu0 }
 0x294   : > { %v5597_v51 = vsel %vm4246_vm13, %v5567_v8, 0.0  ;;  %v10610_v10 = vadd.f32 %v10609_v43, %v10608_v36  ;;  %v10649_v30 = vpop.f32.mrf.mxu1 }
 0x295   : > { %v15118_v16 = vadd.f32 %v5597_v51, %v14997_v47  ;;  %v15120_v1 = vadd.f32 %v10649_v30, %v10648_v38  ;;  %v10611_v57 = vpop.f32.mrf.mxu0  ;;  %v11953_v51 = vld [vmem:[%s15482_s6 + $0x50] sm:$0xff]  }
 0x296   : > { %v5570_v2 = vadd.f32 %v10610_v10, %v15077_v25  ;;  %v10651_v59 = vpop.f32.mrf.mxu1  ;;  %11154 = vmatmul.mubr.bf16.gmra.mxu1 %v15632_v6  ;;  %v11951_v25 = vld [vmem:[%s15482_s6 + $0x60] sm:$0xff]  }
 0x297   : > { %v10612_v5 = vpop.f32.mrf.mxu0  ;;  %11067 = vmatprep.subr.bf16.mxu0 %v11951_v25 }
 0x298   : > { %v5598_v50 = vsel %vm4247_vm14, %v5570_v2, 0.0  ;;  %v10613_v13 = vadd.f32 %v10612_v5, %v10611_v57  ;;  %v10652_v47 = vpop.f32.mrf.mxu1  ;;  %11068 = vmatpush3.bf16.msra.mxu0 %v11951_v25  ;;  %v11954_v5 = vld [vmem:[%s15482_s6 + $0x48] sm:$0xff]  }
 0x299   : > { %v15130_v61 = vadd.f32 %v5598_v50, %v15007_v54  ;;  %v15132_v45 = vadd.f32 %v10652_v47, %v10651_v59  ;;  %v10614_v28 = vpop.f32.mrf.mxu0  ;;  %11069 = vmatprep.subr.bf16.mxu0 %v11952_v41 }
 0x29a   : > { %v5575_v15 = vadd.f32 %v10613_v13, %v15083_v40  ;;  %v10654_v35 = vpop.f32.mrf.mxu1 }
 0x29b   : > { %v10615_v62 = vpop.f32.mrf.mxu0 }
 0x29c   : > { %v5599_v42 = vsel %vm4248_vm15, %v5575_v15, 0.0  ;;  %v10616_v3 = vadd.f32 %v10615_v62, %v10614_v28  ;;  %v10655_v63 = vpop.f32.mrf.mxu1  ;;  %11070 = vmatpush3.bf16.msra.mxu0 %v11952_v41  ;;  %v11955_v62 = vld [vmem:[%s15482_s6 + $0x40] sm:$0xff]  }
 0x29d   : > { %v15141_v54 = vadd.f32 %v5599_v42, %v15019_v18  ;;  %v15143_v21 = vadd.f32 %v10655_v63, %v10654_v35  ;;  %v10617_v53 = vpop.f32.mrf.mxu0  ;;  %11071 = vmatprep.subr.bf16.mxu0 %v11953_v51 }
 0x29e   : > { %v5578_v40 = vadd.f32 %v10616_v3, %v15088_v17  ;;  %v10657_v14 = vpop.f32.mrf.mxu1 }
 0x29f   : > { %v10618_v29 = vpop.f32.mrf.mxu0 }
 0x2a0   : > { %v5600_v36 = vsel %vm4249_vm0, %v5578_v40, 0.0  ;;  %v10619_v31 = vadd.f32 %v10618_v29, %v10617_v53  ;;  %v10658_v8 = vpop.f32.mrf.mxu1  ;;  %11072 = vmatpush3.bf16.msra.mxu0 %v11953_v51  ;;  %v15192_v29 = vld [vmem:[%s15482_s6 + $0xb8] sm:$0xff]  }
 0x2a1   : > { %v15152_v18 = vadd.f32 %v5600_v36, %v15029_v52  ;;  %v15154_v38 = vadd.f32 %v10658_v8, %v10657_v14  ;;  %v10620_v43 = vpop.f32.mrf.mxu0  ;;  %11073 = vmatprep.subr.bf16.mxu0 %v11954_v5 }
 0x2a2   : > { %v5583_v17 = vadd.f32 %v10619_v31, %v15093_v27  ;;  %v10660_v10 = vpop.f32.mrf.mxu1 }
 0x2a3   : > { %v10621_v30 = vpop.f32.mrf.mxu0 }
 0x2a4   : > { %v5601_v57 = vsel %vm4250_vm1, %v5583_v17, 0.0  ;;  %v10622_v19 = vadd.f32 %v10621_v30, %v10620_v43  ;;  %v10661_v2 = vpop.f32.mrf.mxu1  ;;  %11074 = vmatpush3.bf16.msra.mxu0 %v11954_v5 }
 0x2a5   : > { %v15163_v52 = vadd.f32 %v5601_v57, %v15040_v23  ;;  %v15165_v59 = vadd.f32 %v10661_v2, %v10660_v10  ;;  %v10623_v6 = vpop.f32.mrf.mxu0  ;;  %11075 = vmatprep.subr.bf16.mxu0 %v11955_v62 }
 0x2a6   : > { %v5586_v27 = vadd.f32 %v10622_v19, %v15098_v0  ;;  %v10663_v50 = vpop.f32.mrf.mxu1 }
 0x2a7   : > { %v10624_v13 = vpop.f32.mrf.mxu0 }
 0x2a8   : > { %v5602_v47 = vsel %vm15633_vm2, %v5586_v27, 0.0  ;;  %v10625_v28 = vadd.f32 %v10624_v13, %v10623_v6  ;;  %v10664_v25 = vpop.f32.mrf.mxu1  ;;  %11076 = vmatpush3.bf16.msra.mxu0 %v11955_v62 }
 0x2a9   : > { %v15174_v23 = vadd.f32 %v5602_v47, %v15050_v44  ;;  %v15176_v15 = vadd.f32 %v10664_v25, %v10663_v50  ;;  %v10626_v35 = vpop.f32.mrf.mxu0  ;;  %11109 = vmatprep.subr.bf16.mxu0 %v15192_v29 }
 0x2aa   : > { %v5591_v0 = vadd.f32 %v10625_v28, %v15100_v12  ;;  %v10666_v42 = vpop.f32.mrf.mxu1 }
 0x2ab   : > { %v10627_v3 = vpop.f32.mrf.mxu0 }
 0x2ac   : > { %v5603_v63 = vsel %vm4252_vm4, %v5591_v0, 0.0  ;;  %v10628_v53 = vadd.f32 %v10627_v3, %v10626_v35  ;;  %v10667_v41 = vpop.f32.mrf.mxu1 }
 0x2ad   : > { %v15185_v44 = vadd.f32 %v5603_v63, %v15060_v34  ;;  %v15187_v40 = vadd.f32 %v10667_v41, %v10666_v42  ;;  %v10685_v14 = vpop.f32.mrf.mxu0 }
 0x2ae   : > { %v5594_v12 = vadd.f32 %v10628_v53, %v15106_v46  ;;  %v10725_v36 = vpop.f32.mrf.mxu1 }
 0x2af   : > { %v10686_v31 = vpop.f32.mrf.mxu0 }
 0x2b0   : > { %v5604_v8 = vsel %vm4253_vm3, %v5594_v12, 0.0  ;;  %v10687_v43 = vadd.f32 %v10686_v31, %v10685_v14  ;;  %v10726_v34 = vpop.f32.mrf.mxu1 }
 0x2b1   : > { %v15199_v51 = vadd.f32 %v5604_v8, %v15069_v20  ;;  %v10727_v17 = vadd.f32 %v10726_v34, %v10725_v36  ;;  %v10688_v10 = vpop.f32.mrf.mxu0 }
 0x2b2   : > { %v6153_v30 = vadd.f32 %v10687_v43, %v15109_v33  ;;  %v10728_v57 = vpop.f32.mrf.mxu1 }
 0x2b3   : > { %v10689_v19 = vpop.f32.mrf.mxu0 }
 0x2b4   : > { %v6218_v2 = vadd.f32 %v10727_v17, %v6153_v30  ;;  %v10690_v46 = vadd.f32 %v10689_v19, %v10688_v10  ;;  %v10729_v6 = vpop.f32.mrf.mxu1 }
 0x2b5   : > { %v10730_v5 = vadd.f32 %v10729_v6, %v10728_v57  ;;  %v10691_v27 = vpop.f32.mrf.mxu0 }
 0x2b6   : > { %v6248_v50 = vsel %vm2908_vm5, %v6218_v2, 0.0  ;;  %v6156_v13 = vadd.f32 %v10690_v46, %v15120_v1  ;;  %v10731_v47 = vpop.f32.mrf.mxu1  ;;  %vm15634_vm5 = vmmov %vm15633_vm2 }
 0x2b7   : > { %v15206_v20 = vadd.f32 %v6248_v50, %v15118_v16  ;;  %v10692_v28 = vpop.f32.mrf.mxu0 }
 0x2b8   : > { %v6221_v25 = vadd.f32 %v10730_v5, %v6156_v13  ;;  %v10693_v35 = vadd.f32 %v10692_v28, %v10691_v27  ;;  %v10732_v33 = vpop.f32.mrf.mxu1 }
 0x2b9   : > { %v10733_v62 = vadd.f32 %v10732_v33, %v10731_v47  ;;  %v10694_v0 = vpop.f32.mrf.mxu0 }
 0x2ba   : > { %v6249_v42 = vsel %vm2909_vm6, %v6221_v25, 0.0  ;;  %v6161_v3 = vadd.f32 %v10693_v35, %v15132_v45  ;;  %v10734_v63 = vpop.f32.mrf.mxu1  ;;  %vm8492_vm6 = vcmask 64512  }
 0x2bb   : > { %v15212_v55 = vadd.f32 %v6249_v42, %v15130_v61  ;;  %v10695_v1 = vpop.f32.mrf.mxu0 }
 0x2bc   : > { %v6226_v53 = vadd.f32 %v10733_v62, %v6161_v3  ;;  %v10696_v41 = vadd.f32 %v10695_v1, %v10694_v0  ;;  %v10735_v16 = vpop.f32.mrf.mxu1 }
 0x2bd   : > { %v10736_v14 = vadd.f32 %v10735_v16, %v10734_v63  ;;  %v10697_v12 = vpop.f32.mrf.mxu0 }
 0x2be   : > { %v6250_v36 = vsel %vm2910_vm7, %v6226_v53, 0.0  ;;  %v6164_v31 = vadd.f32 %v10696_v41, %v15143_v21  ;;  %v10737_v8 = vpop.f32.mrf.mxu1 }
 0x2bf   : > { %v15218_v32 = vadd.f32 %v6250_v36, %v15141_v54  ;;  %v10698_v45 = vpop.f32.mrf.mxu0 }
 0x2c0   : > { %v6229_v43 = vadd.f32 %v10736_v14, %v6164_v31  ;;  %v10699_v34 = vadd.f32 %v10698_v45, %v10697_v12  ;;  %v10738_v61 = vpop.f32.mrf.mxu1 }
 0x2c1   : > { %v10739_v17 = vadd.f32 %v10738_v61, %v10737_v8  ;;  %v10700_v10 = vpop.f32.mrf.mxu0 }
 0x2c2   : > { %v6251_v30 = vsel %vm2911_vm8, %v6229_v43, 0.0  ;;  %v6169_v57 = vadd.f32 %v10699_v34, %v15154_v38  ;;  %v10740_v19 = vpop.f32.mrf.mxu1 }
 0x2c3   : > { %v15224_v26 = vadd.f32 %v6251_v30, %v15152_v18  ;;  %v10701_v21 = vpop.f32.mrf.mxu0 }
 0x2c4   : > { %v6234_v2 = vadd.f32 %v10739_v17, %v6169_v57  ;;  %v10702_v46 = vadd.f32 %v10701_v21, %v10700_v10  ;;  %v10741_v54 = vpop.f32.mrf.mxu1 }
 0x2c5   : > { %v10742_v6 = vadd.f32 %v10741_v54, %v10740_v19  ;;  %v10703_v5 = vpop.f32.mrf.mxu0 }
 0x2c6   : > { %v6252_v27 = vsel %vm2912_vm9, %v6234_v2, 0.0  ;;  %v6172_v50 = vadd.f32 %v10702_v46, %v15165_v59  ;;  %v10743_v13 = vpop.f32.mrf.mxu1 }
 0x2c7   : > { %v15230_v4 = vadd.f32 %v6252_v27, %v15163_v52  ;;  %v10704_v38 = vpop.f32.mrf.mxu0 }
 0x2c8   : > { %v6237_v47 = vadd.f32 %v10742_v6, %v6172_v50  ;;  %v10705_v28 = vadd.f32 %v10704_v38, %v10703_v5  ;;  %v10744_v18 = vpop.f32.mrf.mxu1 }
 0x2c9   : > { %v10745_v25 = vadd.f32 %v10744_v18, %v10743_v13  ;;  %v10706_v35 = vpop.f32.mrf.mxu0 }
 0x2ca   : > { %v6253_v33 = vsel %vm2913_vm10, %v6237_v47, 0.0  ;;  %v6177_v62 = vadd.f32 %v10705_v28, %v15176_v15  ;;  %v10746_v0 = vpop.f32.mrf.mxu1 }
 0x2cb   : > { %v15236_v11 = vadd.f32 %v6253_v33, %v15174_v23  ;;  %v10707_v59 = vpop.f32.mrf.mxu0 }
 0x2cc   : > { %v6242_v42 = vadd.f32 %v10745_v25, %v6177_v62  ;;  %v10708_v3 = vadd.f32 %v10707_v59, %v10706_v35  ;;  %v10747_v52 = vpop.f32.mrf.mxu1 }
 0x2cd   : > { %v10748_v63 = vadd.f32 %v10747_v52, %v10746_v0  ;;  %v10765_v1 = vpop.f32.mrf.mxu0 }
 0x2ce   : > { %v6254_v53 = vsel %vm2914_vm11, %v6242_v42, 0.0  ;;  %v6180_v41 = vadd.f32 %v10708_v3, %v15187_v40  ;;  %v10805_v16 = vpop.f32.mrf.mxu1 }
 0x2cf   : > { %v15242_v48 = vadd.f32 %v6254_v53, %v15185_v44  ;;  %v10766_v15 = vpop.f32.mrf.mxu0 }
 0x2d0   : > { %v6245_v14 = vadd.f32 %v10748_v63, %v6180_v41  ;;  %v10767_v12 = vadd.f32 %v10766_v15, %v10765_v1  ;;  %v10806_v23 = vpop.f32.mrf.mxu1 }
 0x2d1   : > { %v10807_v36 = vadd.f32 %v10806_v23, %v10805_v16  ;;  %v10768_v31 = vpop.f32.mrf.mxu0 }
 0x2d2   : > { %v6255_v8 = vsel %vm2915_vm12, %v6245_v14, 0.0  ;;  %v10808_v45 = vpop.f32.mrf.mxu1 }
 0x2d3   : > { %v15247_v43 = vadd.f32 %v6255_v8, %v15199_v51  ;;  %v6749_v39 = vadd.f32 %v10807_v36, %v10767_v12  ;;  %v10769_v34 = vpop.f32.mrf.mxu0 }
 0x2d4   : > { %v10809_v40 = vpop.f32.mrf.mxu1  ;;  %v10770_v15 = vadd.f32 %v10769_v34, %v10768_v31 }
 0x2d5   : > { %v10771_v61 = vpop.f32.mrf.mxu0  ;;  %v10810_v14 = vadd.f32 %v10809_v40, %v10808_v45 }
 0x2d6   : > { %v10811_v17 = vpop.f32.mrf.mxu1 }
 0x2d7   : > { %v10772_v44 = vpop.f32.mrf.mxu0 }
 0x2d8   : > { %v10773_v10 = vadd.f32 %v10772_v44, %v10771_v61  ;;  %v10812_v30 = vpop.f32.mrf.mxu1  ;;  %v6752_v44 = vadd.f32 %v10810_v14, %v10770_v15 }
 0x2d9   : > { %v10813_v57 = vadd.f32 %v10812_v30, %v10811_v17  ;;  %v10774_v19 = vpop.f32.mrf.mxu0 }
 0x2da   : > { %v10814_v21 = vpop.f32.mrf.mxu1 }
 0x2db   : > { %v6757_v2 = vadd.f32 %v10813_v57, %v10773_v10  ;;  %v10775_v46 = vpop.f32.mrf.mxu0 }
 0x2dc   : > { %v10815_v54 = vpop.f32.mrf.mxu1  ;;  %v10776_v45 = vadd.f32 %v10775_v46, %v10774_v19 }
 0x2dd   : > { %v10777_v24 = vpop.f32.mrf.mxu0  ;;  %v10816_v34 = vadd.f32 %v10815_v54, %v10814_v21 }
 0x2de   : > { %v10817_v6 = vpop.f32.mrf.mxu1 }
 0x2df   : > { %v10778_v5 = vpop.f32.mrf.mxu0 }
 0x2e0   : > { %v10779_v27 = vadd.f32 %v10778_v5, %v10777_v24  ;;  %v10818_v51 = vpop.f32.mrf.mxu1 }
 0x2e1   : > { %v10819_v50 = vadd.f32 %v10818_v51, %v10817_v6  ;;  %v10780_v13 = vpop.f32.mrf.mxu0 }
 0x2e2   : > { %v10820_v38 = vpop.f32.mrf.mxu1 }
 0x2e3   : > { %v6765_v47 = vadd.f32 %v10819_v50, %v10779_v27  ;;  %v10781_v28 = vpop.f32.mrf.mxu0 }
 0x2e4   : > { %v10821_v18 = vpop.f32.mrf.mxu1  ;;  %v10782_v54 = vadd.f32 %v10781_v28, %v10780_v13 }
 0x2e5   : > { %v10783_v25 = vpop.f32.mrf.mxu0 }
 0x2e6   : > { %v10823_v35 = vpop.f32.mrf.mxu1 }
 0x2e7   : > { %v10784_v33 = vpop.f32.mrf.mxu0 }
 0x2e8   : > { %v10785_v62 = vadd.f32 %v10784_v33, %v10783_v25  ;;  %v10824_v0 = vpop.f32.mrf.mxu1 }
 0x2e9   : > { %v10825_v59 = vadd.f32 %v10824_v0, %v10823_v35  ;;  %v10786_v42 = vpop.f32.mrf.mxu0  ;;  %v6760_v35 = vadd.f32 %v10816_v34, %v10776_v45 }
 0x2ea   : > { %v10826_v3 = vpop.f32.mrf.mxu1 }
 0x2eb   : > { %v6773_v52 = vadd.f32 %v10825_v59, %v10785_v62  ;;  %v10787_v63 = vpop.f32.mrf.mxu0  ;;  %v10822_v59 = vadd.f32 %v10821_v18, %v10820_v38 }
 0x2ec   : > { %v10827_v1 = vpop.f32.mrf.mxu1  ;;  %v10788_v18 = vadd.f32 %v10787_v63, %v10786_v42 }
 0x2ed   : > { %v10845_v53 = vpop.f32.mrf.mxu0 }
 0x2ee   : > { %v15249_v41 = vpop.f32.mrf.mxu1 }
 0x2ef   : > { %v10846_v16 = vpop.f32.mrf.mxu0 }
 0x2f0   : > { %v10847_v12 = vadd.f32 %v10846_v16, %v10845_v53  ;;  %v15251_v23 = vpop.f32.mrf.mxu1 }
 0x2f1   : > { %v10848_v36 = vpop.f32.mrf.mxu0 }
 0x2f2   : > { %v6814_v8 = vadd.f32 %v10847_v12, %v6749_v39  ;;  %v15253_v61 = vpop.f32.mrf.mxu1 }
 0x2f3   : > { %v10849_v17 = vpop.f32.mrf.mxu0 }
 0x2f4   : > { %v15256_v10 = vadd.f32 %v6814_v8, %v15206_v20  ;;  %v10850_v30 = vadd.f32 %v10849_v17, %v10848_v36  ;;  %v15258_v57 = vpop.f32.mrf.mxu1  ;;  %v6768_v36 = vadd.f32 %v10822_v59, %v10782_v54 }
 0x2f5   : > { %v10851_v24 = vpop.f32.mrf.mxu0  ;;  %v10890_v59 = vadd.f32 %v15258_v57, %v15253_v61 }
 0x2f6   : > { %v6817_v6 = vadd.f32 %v10850_v30, %v6752_v44  ;;  %v15260_v5 = vpop.f32.mrf.mxu1  ;;  %v10828_v30 = vadd.f32 %v10827_v1, %v10826_v3  ;;  %v10887_v1 = vadd.f32 %v15251_v23, %v15249_v41 }
 0x2f7   : > { %v10852_v31 = vpop.f32.mrf.mxu0 }
 0x2f8   : > { %v15263_v40 = vadd.f32 %v6817_v6, %v15212_v55  ;;  %v10853_v39 = vadd.f32 %v10852_v31, %v10851_v24  ;;  %v15265_v27 = vpop.f32.mrf.mxu1 }
 0x2f9   : > { %v10854_v51 = vpop.f32.mrf.mxu0  ;;  %v10893_v61 = vadd.f32 %v15265_v27, %v15260_v5 }
 0x2fa   : > { %v6822_v50 = vadd.f32 %v10853_v39, %v6757_v2  ;;  %v15267_v20 = vpop.f32.mrf.mxu1  ;;  %v6776_v39 = vadd.f32 %v10828_v30, %v10788_v18 }
 0x2fb   : > { %v10855_v25 = vpop.f32.mrf.mxu0 }
 0x2fc   : > { %v15270_v33 = vadd.f32 %v6822_v50, %v15218_v32  ;;  %v10856_v62 = vadd.f32 %v10855_v25, %v10854_v51  ;;  %v15272_v0 = vpop.f32.mrf.mxu1 }
 0x2fd   : > { %v10857_v19 = vpop.f32.mrf.mxu0  ;;  %v10896_v27 = vadd.f32 %v15272_v0, %v15267_v20 }
 0x2fe   : > { %v6825_v21 = vadd.f32 %v10856_v62, %v6760_v35  ;;  %v15274_v46 = vpop.f32.mrf.mxu1 }
 0x2ff   : > { %v10858_v55 = vpop.f32.mrf.mxu0 }
 0x300   : > { %v15277_v53 = vadd.f32 %v6825_v21, %v15224_v26  ;;  %v10859_v2 = vadd.f32 %v10858_v55, %v10857_v19  ;;  %v15279_v16 = vpop.f32.mrf.mxu1 }
 0x301   : > { %v10860_v15 = vpop.f32.mrf.mxu0  ;;  %v10899_v20 = vadd.f32 %v15279_v16, %v15274_v46 }
 0x302   : > { %v6830_v14 = vadd.f32 %v10859_v2, %v6765_v47  ;;  %v15281_v32 = vpop.f32.mrf.mxu1 }
 0x303   : > { %v10861_v12 = vpop.f32.mrf.mxu0 }
 0x304   : > { %v15284_v8 = vadd.f32 %v6830_v14, %v15230_v4  ;;  %v10862_v17 = vadd.f32 %v10861_v12, %v10860_v15  ;;  %v15286_v44 = vpop.f32.mrf.mxu1 }
 0x305   : > { %v10863_v13 = vpop.f32.mrf.mxu0  ;;  %v10902_v46 = vadd.f32 %v15286_v44, %v15281_v32 }
 0x306   : > { %v6833_v38 = vadd.f32 %v10862_v17, %v6768_v36  ;;  %v15288_v28 = vpop.f32.mrf.mxu1 }
 0x307   : > { %v10864_v26 = vpop.f32.mrf.mxu0 }
 0x308   : > { %v15291_v24 = vadd.f32 %v6833_v38, %v15236_v11  ;;  %v10865_v47 = vadd.f32 %v10864_v26, %v10863_v13  ;;  %v15293_v6 = vpop.f32.mrf.mxu1 }
 0x309   : > { %v10866_v31 = vpop.f32.mrf.mxu0  ;;  %v10905_v44 = vadd.f32 %v15293_v6, %v15288_v28  ;;  %v11957_v28 = vld [vmem:[%s15482_s6 + $0xb0] sm:$0xff]  }
 0x30a   : > { %v6838_v45 = vadd.f32 %v10865_v47, %v6773_v52  ;;  %v15295_v4 = vpop.f32.mrf.mxu1 }
 0x30b   : > { %v10867_v34 = vpop.f32.mrf.mxu0 }
 0x30c   : > { %v15298_v51 = vadd.f32 %v6838_v45, %v15242_v48  ;;  %v10868_v50 = vadd.f32 %v10867_v34, %v10866_v31  ;;  %v15300_v25 = vpop.f32.mrf.mxu1  ;;  %v15325_v34 = vld [vmem:[%s15481_s5 + $0x1] ss:$0 sm:$0xff] }
 0x30d   : > { %v10925_v42 = vpop.f32.mrf.mxu0  ;;  %v10908_v6 = vadd.f32 %v15300_v25, %v15295_v4  ;;  %v11958_v4 = vld [vmem:[%s15482_s6 + $0xa8] sm:$0xff]  }
 0x30e   : > { %v6841_v3 = vadd.f32 %v10868_v50, %v6776_v39  ;;  %v10965_v63 = vpop.f32.mrf.mxu1 }
 0x30f   : > { %v10926_v11 = vpop.f32.mrf.mxu0 }
 0x310   : > { %v15305_v35 = vadd.f32 %v6841_v3, %v15247_v43  ;;  %v10927_v52 = vadd.f32 %v10926_v11, %v10925_v42  ;;  %v10966_v62 = vpop.f32.mrf.mxu1  ;;  %v15314_v43 = vld [vmem:[%s15480_s4 + $0x1] ss:$0 sm:$0xff] }
 0x311   : > { %v10928_v19 = vpop.f32.mrf.mxu0  ;;  %v10967_v55 = vadd.f32 %v10966_v62, %v10965_v63 }
 0x312   : > { %v7345_v21 = vadd.f32 %v10927_v52, %v10887_v1  ;;  %v10968_v48 = vpop.f32.mrf.mxu1 }
 0x313   : > { %v10929_v54 = vpop.f32.mrf.mxu0 }
 0x314   : > { %v7410_v2 = vadd.f32 %v10967_v55, %v7345_v21  ;;  %v10930_v15 = vadd.f32 %v10929_v54, %v10928_v19  ;;  %v10969_v14 = vpop.f32.mrf.mxu1 }
 0x315   : > { %v10931_v12 = vpop.f32.mrf.mxu0  ;;  %v10970_v36 = vadd.f32 %v10969_v14, %v10968_v48 }
 0x316   : > { %v7440_v41 = vsel %vm4246_vm13, %v7410_v2, 0.0  ;;  %v7348_v23 = vadd.f32 %v10930_v15, %v10890_v59  ;;  %v10971_v17 = vpop.f32.mrf.mxu1 }
 0x317   : > { %v7448_v13 = vadd.f32 %v7440_v41, %v15256_v10  ;;  %v10932_v38 = vpop.f32.mrf.mxu0 }
 0x318   : > { %v7413_v57 = vadd.f32 %v10970_v36, %v7348_v23  ;;  %v10933_v26 = vadd.f32 %v10932_v38, %v10931_v12  ;;  %v10972_v18 = vpop.f32.mrf.mxu1 }
 0x319   : > { %v7500_v22 = vmul.f32 %v15314_v43, %v7448_v13  ;;  %v10934_v30 = vpop.f32.mrf.mxu0  ;;  %v10973_v45 = vadd.f32 %v10972_v18, %v10971_v17 }
 0x31a   : > { %v7441_v47 = vsel %vm4247_vm14, %v7413_v57, 0.0  ;;  %v7353_v31 = vadd.f32 %v10933_v26, %v10893_v61  ;;  %v10974_v10 = vpop.f32.mrf.mxu1 }
 0x31b   : > { %v7449_v39 = vadd.f32 %v7441_v47, %v15263_v40  ;;  %v10935_v5 = vpop.f32.mrf.mxu0  ;;  %v7512_v11 = vadd.f32 %v15325_v34, %v7500_v22 }
 0x31c   : > { %v7418_v50 = vadd.f32 %v10973_v45, %v7353_v31  ;;  %v10936_v42 = vadd.f32 %v10935_v5, %v10934_v30  ;;  %v10975_v3 = vpop.f32.mrf.mxu1 }
 0x31d   : > { %v7501_v37 = vmul.f32 %v15314_v43, %v7449_v39  ;;  %v10937_v63 = vpop.f32.mrf.mxu0  ;;  %v10976_v62 = vadd.f32 %v10975_v3, %v10974_v10  ;;  %v7520_v60 = vmax.f32 %v7512_v11, 0.0 }
 0x31e   : > { %v7442_v1 = vsel %vm4248_vm15, %v7418_v50, 0.0  ;;  %v7356_v52 = vadd.f32 %v10936_v42, %v10896_v27  ;;  %v10977_v19 = vpop.f32.mrf.mxu1 }
 0x31f   : > { %v7450_v40 = vadd.f32 %v7442_v1, %v15270_v33  ;;  %v10938_v21 = vpop.f32.mrf.mxu0  ;;  %v7513_v55 = vadd.f32 %v15325_v34, %v7501_v37 }
 0x320   : > { %v7421_v0 = vadd.f32 %v10976_v62, %v7356_v52  ;;  %v10939_v48 = vadd.f32 %v10938_v21, %v10937_v63  ;;  %v10978_v54 = vpop.f32.mrf.mxu1 }
 0x321   : > { %v7502_v59 = vmul.f32 %v15314_v43, %v7450_v40  ;;  %v10979_v2 = vadd.f32 %v10978_v54, %v10977_v19  ;;  %v10940_v15 = vpop.f32.mrf.mxu0  ;;  %v7521_v14 = vmax.f32 %v7513_v55, 0.0 }
 0x322   : > { %v7443_v12 = vsel %vm4249_vm0, %v7421_v0, 0.0  ;;  %v7361_v41 = vadd.f32 %v10939_v48, %v10899_v20  ;;  %v10980_v33 = vpop.f32.mrf.mxu1 }
 0x323   : > { %v7451_v23 = vadd.f32 %v7443_v12, %v15277_v53  ;;  %v10941_v36 = vpop.f32.mrf.mxu0  ;;  %v7528_v17 = vpack.c.bf16 %v7521_v14, %v7520_v60  ;;  %v7514_v61 = vadd.f32 %v15325_v34, %v7502_v59  ;;  %v11959_v59 = vld [vmem:[%s15482_s6 + $0xa0] sm:$0xff]  }
 0x324   : > { %v7426_v16 = vadd.f32 %v10979_v2, %v7361_v41  ;;  %v10942_v13 = vadd.f32 %v10941_v36, %v10940_v15  ;;  %v10981_v38 = vpop.f32.mrf.mxu1  ;;  %v11961_v41 = vld [vmem:[%s15482_s6 + $0x90] sm:$0xff]   ;;  %v15637_v36 = vld [vmem:[#allocation30_spill] sm:$0xff] }
 0x325   : > { %v7503_v57 = vmul.f32 %v15314_v43, %v7451_v23  ;;  %v10982_v26 = vadd.f32 %v10981_v38, %v10980_v33  ;;  %v10943_v18 = vpop.f32.mrf.mxu0  ;;  %11077 = vmatprep.mubr.bf16.mxu0 %v7528_v17  ;;  %v7522_v39 = vmax.f32 %v7514_v61, 0.0  ;;  %v11963_v33 = vld [vmem:[%s15482_s6 + $0x80] sm:$0xff]   ;;  %v15636_v23 = vld [vmem:[#allocation28_spill] sm:$0xff]  ;;  %v15638_v17 = vld [vmem:[#allocation33_spill] sm:$0xff] }
 0x326   : > { %v7444_v56 = vsel %vm4250_vm1, %v7426_v16, 0.0  ;;  %v7364_v22 = vadd.f32 %v10942_v13, %v10902_v46  ;;  %v10983_v53 = vpop.f32.mrf.mxu1  ;;  %v11964_v46 = vld [vmem:[%s15484_s8 + $0x38] sm:$0xff]   ;;  %v11965_v16 = vld [vmem:[%s15484_s8 + $0x30] sm:$0xff]   ;;  %v11966_v13 = vld [vmem:[%s15484_s8 + $0x28] sm:$0xff]  }
 0x327   : > { %v7515_v30 = vadd.f32 %v15325_v34, %v7503_v57  ;;  %v7452_v47 = vadd.f32 %v7444_v56, %v15284_v8  ;;  %v10944_v32 = vpop.f32.mrf.mxu0  ;;  %v11967_v38 = vld [vmem:[%s15484_s8 + $0x20] sm:$0xff]   ;;  %v11968_v61 = vld [vmem:[%s15484_s8 + $0x18] sm:$0xff]   ;;  %v11969_v57 = vld [vmem:[%s15484_s8 + $0x10] sm:$0xff]  }
 0x328   : > { %v7429_v31 = vadd.f32 %v10982_v26, %v7364_v22  ;;  %v10945_v45 = vadd.f32 %v10944_v32, %v10943_v18  ;;  %v10984_v10 = vpop.f32.mrf.mxu1  ;;  %v11970_v26 = vld [vmem:[%s15484_s8 + $0x8] sm:$0xff]   ;;  %v11971_v18 = vld [vmem:[%s15484_s8] sm:$0xff]   ;;  %v11972_v56 = vld [vmem:[%s15487_s11 + $0x38] sm:$0xff]  }
 0x329   : > { %v7523_v5 = vmax.f32 %v7515_v30, 0.0  ;;  %v7504_v27 = vmul.f32 %v15314_v43, %v7452_v47  ;;  %v10985_v50 = vadd.f32 %v10984_v10, %v10983_v53  ;;  %v10946_v9 = vpop.f32.mrf.mxu0  ;;  %v11973_v22 = vld [vmem:[%s15487_s11 + $0x30] sm:$0xff]   ;;  %11181 = vmatprep.subr.bf16.mxu1 %v11972_v56  ;;  %v11974_v53 = vld [vmem:[%s15487_s11 + $0x28] sm:$0xff]   ;;  %v11975_v30 = vld [vmem:[%s15487_s11 + $0x20] sm:$0xff]  }
 0x32a   : > { %v7445_v42 = vsel %vm15634_vm5, %v7429_v31, 0.0  ;;  %v7369_v3 = vadd.f32 %v10945_v45, %v10905_v44  ;;  %v10986_v37 = vpop.f32.mrf.mxu1  ;;  %11182 = vmatpush3.bf16.msra.mxu1 %v11972_v56 }
 0x32b   : > { %v7529_v63 = vpack.c.bf16 %v7523_v5, %v7522_v39  ;;  %v7453_v8 = vadd.f32 %v7445_v42, %v15291_v24  ;;  %v10947_v11 = vpop.f32.mrf.mxu0  ;;  %v7516_v40 = vadd.f32 %v15325_v34, %v7504_v27  ;;  %11183 = vmatprep.subr.bf16.mxu1 %v11973_v22 }
 0x32c   : > { %v7434_v1 = vadd.f32 %v10985_v50, %v7369_v3  ;;  %v10948_v52 = vadd.f32 %v10947_v11, %v10946_v9  ;;  %v10987_v62 = vpop.f32.mrf.mxu1 }
 0x32d   : > { %v7505_v19 = vmul.f32 %v15314_v43, %v7453_v8  ;;  %v10988_v49 = vadd.f32 %v10987_v62, %v10986_v37  ;;  %11078 = vmatmul.mubr.bf16.vlgmr.msra.gmra.mxu0 %v7529_v63  ;;  %v7524_v48 = vmax.f32 %v7516_v40, 0.0 }
 0x32e   : > { %v7446_v24 = vsel %vm4252_vm4, %v7434_v1, 0.0  ;;  %v7372_v21 = vadd.f32 %v10948_v52, %v10908_v6  ;;  %11110 = vmatpush3.bf16.msra.mxu0 %v15192_v29  ;;  %11184 = vmatpush3.bf16.msra.mxu1 %v11973_v22  ;;  %v11103_v47 = vpop.f32.mrf.mxu1 }
 0x32f   : > { %v7454_v55 = vadd.f32 %v7446_v24, %v15298_v51  ;;  %11111 = vmatprep.subr.bf16.mxu0 %v11957_v28  ;;  %v7517_v25 = vadd.f32 %v15325_v34, %v7505_v19  ;;  %11185 = vmatprep.subr.bf16.mxu1 %v11974_v53 }
 0x330   : > { %v7437_v20 = vadd.f32 %v10988_v49, %v7372_v21  ;;  %v7836_v32 = vpop.f32.mrf.mxu1 }
 0x331   : > { %v7506_v0 = vmul.f32 %v15314_v43, %v7454_v55  ;;  %v7525_v54 = vmax.f32 %v7517_v25, 0.0 }
 0x332   : > { %v7447_v7 = vsel %vm4253_vm3, %v7437_v20, 0.0  ;;  %11112 = vmatpush3.bf16.msra.mxu0 %v11957_v28  ;;  %11186 = vmatpush3.bf16.msra.mxu1 %v11974_v53  ;;  %v11104_v44 = vpop.f32.mrf.mxu1 }
 0x333   : > { %v7455_v29 = vadd.f32 %v7447_v7, %v15305_v35  ;;  %11113 = vmatprep.subr.bf16.mxu0 %v11958_v4  ;;  %v7530_v51 = vpack.c.bf16 %v7525_v54, %v7524_v48  ;;  %v7518_v2 = vadd.f32 %v15325_v34, %v7506_v0  ;;  %11187 = vmatprep.subr.bf16.mxu1 %v11975_v30  ;;  %v10005_v54 = vld [vmem:[%s15483_s7] ss:$0 sm:$0xff] }
 0x334   : > { %v7839_v31 = vpop.f32.mrf.mxu1 }
 0x335   : > { %v7507_v15 = vmul.f32 %v15314_v43, %v7455_v29  ;;  %11081 = vmatprep.mubr.bf16.mxu0 %v7530_v51  ;;  %v7526_v35 = vmax.f32 %v7518_v2, 0.0  ;;  %v15635_v43 = vld [vmem:[#allocation2_spill] sm:$0xff] }
 0x336   : > { %11114 = vmatpush3.bf16.msra.mxu0 %v11958_v4  ;;  %11188 = vmatpush3.bf16.msra.mxu1 %v11975_v30  ;;  %v11107_v10 = vpop.f32.mrf.mxu1 }
 0x337   : > { %v7519_v60 = vadd.f32 %v15325_v34, %v7507_v15  ;;  %11115 = vmatprep.subr.bf16.mxu0 %v11959_v59  ;;  %v11962_v34 = vld [vmem:[%s15482_s6 + $0x88] sm:$0xff]  }
 0x338   : > { %v7852_v5 = vpop.f32.mrf.mxu1 }
 0x339   : > { %v7527_v14 = vmax.f32 %v7519_v60, 0.0 }
 0x33a   : > { %11116 = vmatpush3.bf16.msra.mxu0 %v11959_v59  ;;  %v11108_v50 = vpop.f32.mrf.mxu1 }
 0x33b   : > { %11117 = vmatprep.subr.bf16.mxu0 %v11960_v58  ;;  %v7531_v12 = vpack.c.bf16 %v7527_v14, %v7526_v35 }
 0x33c   : > { %v7855_v3 = vpop.f32.mrf.mxu1 }
 0x33d   : > { %11082 = vmatmul.mubr.bf16.gmra.mxu0 %v7531_v12 }
 0x33e   : > { %11118 = vmatpush3.bf16.msra.mxu0 %v11960_v58  ;;  %11125 = vmatprep.mubr.bf16.mxu0 %v15635_v43  ;;  %v10006_v43 = vld [vmem:[%s449_s30] ss:$0 sm:$0xff] }
 0x33f   : > { %11119 = vmatprep.subr.bf16.mxu0 %v11961_v41 }
 0x342   : > { %11120 = vmatpush3.bf16.msra.mxu0 %v11961_v41 }
 0x343   : > { %11121 = vmatprep.subr.bf16.mxu0 %v11962_v34 }
 0x346   : > { %11122 = vmatpush3.bf16.msra.mxu0 %v11962_v34 }
 0x347   : > { %11123 = vmatprep.subr.bf16.mxu0 %v11963_v33 }
 0x34a   : > { %11124 = vmatpush3.bf16.msra.mxu0 %v11963_v33 }
 0x34b   : > { %11157 = vmatprep.subr.bf16.mxu0 %v11964_v46 }
 0x34d   : > { %11126 = vmatmul.mubr.bf16.vlgmr.msra.gmra.mxu0 %v15636_v23 }
 0x34e   : > { %11129 = vmatprep.mubr.bf16.mxu0 %v15637_v36  ;;  %11158 = vmatpush3.bf16.msra.mxu0 %v11964_v46  ;;  %v11151_v37 = vpop.f32.mrf.mxu1 }
 0x34f   : > { %11159 = vmatprep.subr.bf16.mxu0 %v11965_v16 }
 0x350   : > { %v8104_v8 = vpop.f32.mrf.mxu1 }
 0x352   : > { %11160 = vmatpush3.bf16.msra.mxu0 %v11965_v16  ;;  %v11152_v28 = vpop.f32.mrf.mxu1 }
 0x353   : > { %11161 = vmatprep.subr.bf16.mxu0 %v11966_v13 }
 0x354   : > { %v8107_v62 = vpop.f32.mrf.mxu1 }
 0x355   : > { %11130 = vmatmul.mubr.bf16.gmra.mxu0 %v15638_v17 }
 0x356   : > { %11162 = vmatpush3.bf16.msra.mxu0 %v11966_v13  ;;  %v11155_v4 = vpop.f32.mrf.mxu1 }
 0x357   : > { %11163 = vmatprep.subr.bf16.mxu0 %v11967_v38 }
 0x358   : > { %v8120_v58 = vpop.f32.mrf.mxu1 }
 0x35a   : > { %11164 = vmatpush3.bf16.msra.mxu0 %v11967_v38  ;;  %v11156_v13 = vpop.f32.mrf.mxu1 }
 0x35b   : > { %11165 = vmatprep.subr.bf16.mxu0 %v11968_v61 }
 0x35e   : > { %11166 = vmatpush3.bf16.msra.mxu0 %v11968_v61 }
 0x35f   : > { %11167 = vmatprep.subr.bf16.mxu0 %v11969_v57 }
 0x362   : > { %11168 = vmatpush3.bf16.msra.mxu0 %v11969_v57 }
 0x363   : > { %11169 = vmatprep.subr.bf16.mxu0 %v11970_v26 }
 0x366   : > { %11170 = vmatpush3.bf16.msra.mxu0 %v11970_v26 }
 0x367   : > { %11171 = vmatprep.subr.bf16.mxu0 %v11971_v18 }
 0x36a   : > { %11172 = vmatpush3.bf16.msra.mxu0 %v11971_v18 }
 0x3ed   : > { %v11079_v45 = vpop.f32.mrf.mxu0 }
 0x3ee   : > { %v7845_v1 = vadd.f32 %v11103_v47, %v11079_v45  ;;  %v8123_v45 = vpop.f32.mrf.mxu1 }
 0x3ef   : > { %v7723_v39 = vpop.f32.mrf.mxu0 }
 0x3f0   : > { %v7837_v19 = vadd.f32 %v7836_v32, %v7723_v39 }
 0x3f1   : > { %v11080_v27 = vpop.f32.mrf.mxu0 }
 0x3f2   : > { %v7848_v24 = vadd.f32 %v11104_v44, %v11080_v27 }
 0x3f3   : > { %v7726_v9 = vpop.f32.mrf.mxu0 }
 0x3f4   : > { %v7840_v25 = vadd.f32 %v7839_v31, %v7726_v9 }
 0x3fd   : > { %v11083_v42 = vpop.f32.mrf.mxu0 }
 0x3fe   : > { %v7861_v29 = vadd.f32 %v11107_v10, %v11083_v42 }
 0x3ff   : > { %v7739_v63 = vpop.f32.mrf.mxu0 }
 0x400   : > { %v7853_v2 = vadd.f32 %v7852_v5, %v7739_v63 }
 0x401   : > { %v11084_v11 = vpop.f32.mrf.mxu0 }
 0x402   : > { %v7864_v33 = vadd.f32 %v11108_v50, %v11084_v11 }
 0x403   : > { %v7742_v6 = vpop.f32.mrf.mxu0 }
 0x404   : > { %v7856_v18 = vadd.f32 %v7855_v3, %v7742_v6 }
 0x40d   : > { %v11127_v52 = vpop.f32.mrf.mxu0 }
 0x40e   : > { %v7999_v49 = vadd.f32 %v11127_v52, %v7845_v1 }
 0x40f   : > { %v7966_v40 = vpop.f32.mrf.mxu0 }
 0x410   : > { %v7997_v21 = vadd.f32 %v7966_v40, %v7837_v19  ;;  %v8137_v20 = vadd.f32 %v11151_v37, %v7999_v49  ;;  %v11976_v19 = vld [vmem:[%s15487_s11 + $0x18] sm:$0xff]   ;;  %v11977_v49 = vld [vmem:[%s15487_s11 + $0x10] sm:$0xff]   ;;  %v11978_v40 = vld [vmem:[%s15487_s11 + $0x8] sm:$0xff]  }
 0x411   : > { %v11128_v55 = vpop.f32.mrf.mxu0  ;;  %11189 = vmatprep.subr.bf16.mxu1 %v11976_v19 }
 0x412   : > { %v8135_v0 = vadd.f32 %v8104_v8, %v7997_v21  ;;  %v8000_v48 = vadd.f32 %v11128_v55, %v7848_v24  ;;  %v8152_v35 = vmul.f32 %v10005_v54, %v8137_v20  ;;  %11190 = vmatpush3.bf16.msra.mxu1 %v11976_v19  ;;  %v11979_v24 = vld [vmem:[%s15487_s11] sm:$0xff]  }
 0x413   : > { %v7969_v7 = vpop.f32.mrf.mxu0  ;;  %11191 = vmatprep.subr.bf16.mxu1 %v11977_v49  ;;  %v10015_v55 = vld [vmem:[%s15485_s9] ss:$0 sm:$0xff] }
 0x414   : > { %v8138_v51 = vadd.f32 %v11152_v28, %v8000_v48  ;;  %v7998_v59 = vadd.f32 %v7969_v7, %v7840_v25  ;;  %v8150_v15 = vmul.f32 %v10005_v54, %v8135_v0  ;;  %v8167_v38 = vadd.f32 %v10006_v43, %v8152_v35  ;;  %v10016_v48 = vld [vmem:[%s15486_s10] ss:$0 sm:$0xff] }
 0x415   : > { %v11131_v60 = vpop.f32.mrf.mxu0 }
 0x416   : > { %v8153_v14 = vmul.f32 %v10005_v54, %v8138_v51  ;;  %v8136_v12 = vadd.f32 %v8107_v62, %v7998_v59  ;;  %v8003_v41 = vadd.f32 %v11131_v60, %v7861_v29  ;;  %v8165_v16 = vadd.f32 %v10006_v43, %v8150_v15  ;;  %11192 = vmatpush3.bf16.msra.mxu1 %v11977_v49 }
 0x417   : > { %v7982_v34 = vpop.f32.mrf.mxu0  ;;  %v8175_v10 = vmax.f32 %v8167_v38, 0.0  ;;  %11193 = vmatprep.subr.bf16.mxu1 %v11978_v40 }
 0x418   : > { %v8168_v23 = vadd.f32 %v10006_v43, %v8153_v14  ;;  %v8151_v36 = vmul.f32 %v10005_v54, %v8136_v12  ;;  %v8001_v17 = vadd.f32 %v7982_v34, %v7853_v2  ;;  %v8141_v61 = vadd.f32 %v11155_v4, %v8003_v41 }
 0x419   : > { %v11132_v46 = vpop.f32.mrf.mxu0  ;;  %v8173_v44 = vmax.f32 %v8165_v16, 0.0 }
 0x41a   : > { %v8139_v57 = vadd.f32 %v8120_v58, %v8001_v17  ;;  %v8004_v26 = vadd.f32 %v11132_v46, %v7864_v33  ;;  %v8166_v22 = vadd.f32 %v10006_v43, %v8151_v36  ;;  %v8176_v53 = vmax.f32 %v8168_v23, 0.0  ;;  %11194 = vmatpush3.bf16.msra.mxu1 %v11978_v40 }
 0x41b   : > { %v7985_v56 = vpop.f32.mrf.mxu0  ;;  %v8156_v39 = vmul.f32 %v10005_v54, %v8141_v61  ;;  %11195 = vmatprep.subr.bf16.mxu1 %v11979_v24 }
 0x41c   : > { %v8142_v30 = vadd.f32 %v11156_v13, %v8004_v26  ;;  %v8154_v47 = vmul.f32 %v10005_v54, %v8139_v57  ;;  %v8002_v32 = vadd.f32 %v7985_v56, %v7856_v18  ;;  %v8174_v31 = vmax.f32 %v8166_v22, 0.0 }
 0x41d   : > { %v8182_v9 = vpack.c.bf16 %v8176_v53, %v8175_v10  ;;  %v8171_v3 = vadd.f32 %v10006_v43, %v8156_v39 }
 0x41e   : > { %v8157_v5 = vmul.f32 %v10005_v54, %v8142_v30  ;;  %v8140_v27 = vadd.f32 %v8123_v45, %v8002_v32  ;;  %v8181_v50 = vpack.c.bf16 %v8174_v31, %v8173_v44  ;;  %v8169_v63 = vadd.f32 %v10006_v43, %v8154_v47  ;;  %11196 = vmatpush3.bf16.msra.mxu1 %v11979_v24  ;;  %v10017_v47 = vld [vmem:[%s15488_s12] ss:$0 sm:$0xff] }
 0x41f   : > { %v8179_v1 = vmax.f32 %v8171_v3, 0.0 }
 0x420   : > { %v8172_v42 = vadd.f32 %v10006_v43, %v8157_v5  ;;  %v8155_v37 = vmul.f32 %v10005_v54, %v8140_v27  ;;  %11173 = vmatprep.mubr.bf16.mxu0 %v8181_v50  ;;  %v8177_v28 = vmax.f32 %v8169_v63, 0.0 }
 0x421   : > { %11174 = vmatmul.mubr.bf16.vlgmr.msra.gmra.mxu0 %v8182_v9 }
 0x422   : > { %v8170_v8 = vadd.f32 %v10006_v43, %v8155_v37  ;;  %v8180_v11 = vmax.f32 %v8172_v42, 0.0 }
 0x424   : > { %v8178_v6 = vmax.f32 %v8170_v8, 0.0  ;;  %v8184_v62 = vpack.c.bf16 %v8180_v11, %v8179_v1 }
 0x426   : > { %v8183_v52 = vpack.c.bf16 %v8178_v6, %v8177_v28 }
 0x428   : > { %11177 = vmatprep.mubr.bf16.mxu0 %v8183_v52 }
 0x429   : > { %11178 = vmatmul.mubr.bf16.gmra.mxu0 %v8184_v62 }
 0x4e1   : > { %v11175_v21 = vpop.f32.mrf.mxu0 }
 0x4e2   : > { %v8323_v20 = vmul.f32 %v11175_v21, %v10015_v55 }
 0x4e3   : > { %v8283_v4 = vpop.f32.mrf.mxu0 }
 0x4e4   : > { %v8321_v25 = vmul.f32 %v10015_v55, %v8283_v4  ;;  %v8338_v2 = vadd.f32 %v10016_v48, %v8323_v20 }
 0x4e5   : > { %v11176_v0 = vpop.f32.mrf.mxu0 }
 0x4e6   : > { %v8324_v54 = vmul.f32 %v11176_v0, %v10015_v55  ;;  %v8336_v29 = vadd.f32 %v10016_v48, %v8321_v25  ;;  %v8346_v43 = vmax.f32 %v8338_v2, 0.0 }
 0x4e7   : > { %v8286_v7 = vpop.f32.mrf.mxu0 }
 0x4e8   : > { %v8339_v51 = vadd.f32 %v10016_v48, %v8324_v54  ;;  %v8322_v59 = vmul.f32 %v10015_v55, %v8286_v7  ;;  %v8344_v14 = vmax.f32 %v8336_v29, 0.0 }
 0x4e9   : > { %v11179_v15 = vpop.f32.mrf.mxu0 }
 0x4ea   : > { %v8337_v60 = vadd.f32 %v10016_v48, %v8322_v59  ;;  %v8347_v58 = vmax.f32 %v8339_v51, 0.0  ;;  %v8327_v34 = vmul.f32 %v11179_v15, %v10015_v55 }
 0x4eb   : > { %v8299_v35 = vpop.f32.mrf.mxu0 }
 0x4ec   : > { %v8345_v12 = vmax.f32 %v8337_v60, 0.0  ;;  %v8325_v41 = vmul.f32 %v10015_v55, %v8299_v35  ;;  %v8353_v17 = vpack.c.bf16 %v8347_v58, %v8346_v43  ;;  %v8342_v61 = vadd.f32 %v10016_v48, %v8327_v34 }
 0x4ed   : > { %v11180_v33 = vpop.f32.mrf.mxu0 }
 0x4ee   : > { %v8328_v23 = vmul.f32 %v11180_v33, %v10015_v55  ;;  %v8352_v36 = vpack.c.bf16 %v8345_v12, %v8344_v14  ;;  %v8340_v16 = vadd.f32 %v10016_v48, %v8325_v41  ;;  %v8350_v22 = vmax.f32 %v8342_v61, 0.0 }
 0x4ef   : > { %v8302_v46 = vpop.f32.mrf.mxu0 }
 0x4f0   : > { %v8343_v13 = vadd.f32 %v10016_v48, %v8328_v23  ;;  %v8326_v38 = vmul.f32 %v10015_v55, %v8302_v46  ;;  %11197 = vmatprep.mubr.bf16.mxu1 %v8352_v36  ;;  %v8348_v18 = vmax.f32 %v8340_v16, 0.0 }
 0x4f1   : > { %11198 = vmatmul.mubr.bf16.vlgmr.msra.gmra.mxu1 %v8353_v17 }
 0x4f2   : > { %v8341_v57 = vadd.f32 %v10016_v48, %v8326_v38  ;;  %v8351_v26 = vmax.f32 %v8343_v13, 0.0 }
 0x4f4   : > { %v8349_v56 = vmax.f32 %v8341_v57, 0.0  ;;  %v8355_v30 = vpack.c.bf16 %v8351_v26, %v8350_v22 }
 0x4f6   : > { %v8354_v53 = vpack.c.bf16 %v8349_v56, %v8348_v18 }
 0x4f8   : > { %11201 = vmatprep.mubr.bf16.mxu1 %v8354_v53 }
 0x4f9   : > { %11202 = vmatmul.mubr.bf16.gmra.mxu1 %v8355_v30 }
 0x5b1   : > { %v11199_v32 = vpop.f32.mrf.mxu1 }
 0x5b2   : > { %v8470_v44 = vadd.f32 %v11199_v32, %v10017_v47 }
 0x5b3   : > { %v8461_v31 = vpop.f32.mrf.mxu1 }
 0x5b4   : > { %8495 = vst.msk [vmem:[%s454_s19 + $0x10] sm:$0xff] %vm8492_vm6, %v8470_v44  ;;  %v8462_v45 = vadd.f32 %v10017_v47, %v8461_v31 }
 0x5b5   : > { %v11200_v10 = vpop.f32.mrf.mxu1 }
 0x5b6   : > { %8493 = vst.msk [vmem:[%s454_s19] sm:$0xff] %vm8492_vm6, %v8462_v45  ;;  %v8473_v39 = vadd.f32 %v11200_v10, %v10017_v47 }
 0x5b7   : > { %v8464_v5 = vpop.f32.mrf.mxu1 }
 0x5b8   : > { %8496 = vst.msk [vmem:[%s454_s19 + $0x18] sm:$0xff] %vm8492_vm6, %v8473_v39  ;;  %v8465_v27 = vadd.f32 %v10017_v47, %v8464_v5 }
 0x5b9   : > { %v11203_v50 = vpop.f32.mrf.mxu1 }
 0x5ba   : > { %8494 = vst.msk [vmem:[%s454_s19 + $0x8] sm:$0xff] %vm8492_vm6, %v8465_v27  ;;  %v8486_v9 = vadd.f32 %v11203_v50, %v10017_v47 }
 0x5bb   : > { %v8477_v42 = vpop.f32.mrf.mxu1 }
 0x5bc   : > { %8499 = vst.msk [vmem:[%s454_s19 + $0x30] sm:$0xff] %vm8492_vm6, %v8486_v9  ;;  %v8478_v37 = vadd.f32 %v10017_v47, %v8477_v42 }
 0x5bd   : > { %v11204_v63 = vpop.f32.mrf.mxu1 }
 0x5be   : > { %8497 = vst.msk [vmem:[%s454_s19 + $0x20] sm:$0xff] %vm8492_vm6, %v8478_v37  ;;  %v8489_v3 = vadd.f32 %v11204_v63, %v10017_v47 }
 0x5bf   : > { %v8480_v8 = vpop.f32.mrf.mxu1 }
 0x5c0   : > { %8500 = vst.msk [vmem:[%s454_s19 + $0x38] sm:$0xff] %vm8492_vm6, %v8489_v3  ;;  %v8481_v11 = vadd.f32 %v10017_v47, %v8480_v8 }
 0x5c2   : > { %8498 = vst.msk [vmem:[%s454_s19 + $0x28] sm:$0xff] %vm8492_vm6, %v8481_v11 }
 0x5c3 PF: > { %s23_s25 = sadd.s32 1, %s12005_s25  }
 0x5c4   : > { %p20_p4 = scmp.ge.s32.totalorder %s23_s25, 4  }
 0x5c6   :  { %22 = sbr.rel (!%p20_p4) target bundleno = 1 (0x1), region = 115 }

</bundles_post_ra>
